<compile_context>
chip_gen: v7x
topology: tpu7x:2x2x1
jax: 0.10.0
libtpu: 0.0.40
codegen_flags: <defaults>
</compile_context>

<pallas_src>
import math
import jax
import jax.numpy as jnp
from jax.experimental import pallas as pl
from jax.experimental.pallas import tpu as pltpu

# log(float32(1e-45)) — exactly what torch's (mask + 1e-45).log() produces for mask == 0.
LOG_TINY = float(math.log(1.401298464324817e-45))
MIN_VAL = -10000000.0


def pointer_net_kernel(x_ref, mask_ref, dirsel_ref,
                       wx_ref, whh_ref, b_enc_ref,
                       wdec_ref, b_dec_ref, w1_ref, w2_ref, vt_ref,
                       logs_ref, amax_ref,
                       gx_scr, enc_scr, et_scr):
    """Fused PointerNet forward for one batch tile.

    x_ref:    (TB, T, Din) bf16 input features
    mask_ref: (TB, 1, T)   f32, 1.0 where t < length[b]
    logs_ref: (TB, T, T)   log pointer scores (step-major in dim 1)
    amax_ref: (TB, 1, T)   int32 masked argmax per decode step
    gx_scr:   (TB, T, 8H)  VMEM: per-time input-gate pre-activations, both dirs
    enc_scr:  (TB, T, H)   VMEM: fwd outputs, later the summed encoder outputs
    et_scr:   (TB, T, H)   VMEM: bwd outputs, later enc @ W1
    """
    TB, T, Din = x_ref.shape
    H = w1_ref.shape[0]
    H2 = 2 * H
    G8 = 8 * H

    mask = mask_ref[:, 0, :]                                   # (TB, T) f32 0/1

    # Hoisted constants (JAX does not CSE broadcasts inside unrolled loops).
    fwd_cols = dirsel_ref[...] > 0.0                           # (1, 8H) fwd gate columns
    fwd_half = fwd_cols[:, :H2]                                # (1, 2H) fwd state lanes
    col = jax.lax.broadcasted_iota(jnp.int32, (TB, T), 1)
    vt_row = vt_ref[...].reshape(1, 1, H)                      # (1, 1, H) f32
    b_dec = b_dec_ref[...]                                     # (1, 4H) f32

    # ---- fused embedding + input-gate projections: the embedding is folded into
    #      wx in the wrapper, so ONE MXU matmul covers all T steps of both
    #      encoder directions ----
    x = x_ref[...].reshape(TB * T, Din)                        # bf16
    gx = jnp.dot(x, wx_ref[...], preferred_element_type=jnp.float32) + b_enc_ref[...]
    gx_scr[...] = gx.reshape(TB, T, G8)                        # keep in VMEM, read per step

    whh = whh_ref[...]                                         # (2H, 8H) bf16 block-diagonal

    # ---- bidirectional encoder: both directions interleaved in one T-step loop
    #      (gate column layout: [i_f,i_b, f_f,f_b, o_f,o_b, g_f,g_b], H each) ----
    h = jnp.zeros((TB, H2), jnp.float32)                       # [h_fwd | h_bwd]
    c = jnp.zeros((TB, H2), jnp.float32)
    for t in range(T):
        tb = T - 1 - t
        gx_t = jnp.where(fwd_cols, gx_scr[:, t, :], gx_scr[:, tb, :])            # (TB, 8H)
        gates = gx_t + jnp.dot(h.astype(jnp.bfloat16), whh,
                               preferred_element_type=jnp.float32)
        s = jax.nn.sigmoid(gates[:, :3 * H2])                  # full-width i|f|o
        i = s[:, :H2]
        f = s[:, H2:2 * H2]
        o = s[:, 2 * H2:3 * H2]
        g = jnp.tanh(gates[:, 3 * H2:])
        c_new = f * c + i * g
        h_new = o * jnp.tanh(c_new)
        # pack_padded semantics: freeze state / zero outputs past each length.
        v = jnp.where(fwd_half, mask[:, t:t + 1], mask[:, tb:tb + 1])            # (TB, 2H)
        h = jnp.where(v > 0, h_new, h)
        c = jnp.where(v > 0, c_new, c)
        out = jnp.where(v > 0, h_new, 0.0)
        enc_scr[:, t, :] = out[:, :H]                          # fwd output at time t
        et_scr[:, tb, :] = out[:, H:]                          # bwd output at time T-1-t

    # decoder init = final forward-direction state (h_n.view(L, 2, B, H)[-1, 0])
    h_d = h[:, :H]
    c_d = c[:, :H]

    # summed bidirectional encoder outputs + step-invariant W1 transform
    enc = enc_scr[...] + et_scr[...]                           # (TB, T, H)
    enc_scr[...] = enc
    et_scr[...] = jnp.dot(enc.reshape(TB * T, H).astype(jnp.bfloat16), w1_ref[...],
                          preferred_element_type=jnp.float32).reshape(TB, T, H)

    # ---- pointer decoder ----
    w_dec = wdec_ref[...]                                      # (2H, 4H) bf16 [wih_d; whh_d]
    w2 = w2_ref[...]                                           # (H, H) bf16
    dec_in = jnp.zeros((TB, H), jnp.float32)
    amax_acc = jnp.zeros((TB, T), jnp.int32)

    for step in range(T):
        # fused LSTMCell: [dec_in | h] @ [[wih]; [whh]] in one MXU push
        hx = jnp.concatenate([dec_in, h_d], axis=-1).astype(jnp.bfloat16)        # (TB, 2H)
        gates = jnp.dot(hx, w_dec, preferred_element_type=jnp.float32) + b_dec   # (TB, 4H)
        s = jax.nn.sigmoid(gates[:, :3 * H])                   # full-width i|f|o
        i = s[:, :H]
        f = s[:, H:2 * H]
        o = s[:, 2 * H:3 * H]
        g = jnp.tanh(gates[:, 3 * H:])
        c_d = f * c_d + i * g
        h_d = o * jnp.tanh(c_d)

        # additive attention; vt "matvec" done as VPU multiply + lane reduction
        dec_t = jnp.dot(h_d.astype(jnp.bfloat16), w2,
                        preferred_element_type=jnp.float32)                       # (TB, H)
        u = jnp.sum(jnp.tanh(et_scr[...] + dec_t[:, None, :]) * vt_row, axis=-1)  # (TB, T)

        # masked log-softmax: vector + (mask + 1e-45).log()
        sub_mask = mask * mask[:, step:step + 1]               # mask_tensor[:, step, :]
        logits = u + jnp.where(sub_mask > 0, 0.0, LOG_TINY)
        m = jnp.max(logits, axis=-1, keepdims=True)
        lse = jnp.log(jnp.sum(jnp.exp(logits - m), axis=-1, keepdims=True))
        log_score = logits - m - lse
        logs_ref[:, step, :] = log_score                       # final layout, static index

        # masked argmax (first index of the max; torch tie-breaking is impl-defined)
        replaced = jnp.where(sub_mask == 0.0, MIN_VAL, log_score)
        mx = jnp.max(replaced, axis=-1, keepdims=True)
        amax = jnp.min(jnp.where(replaced == mx, col, T), axis=-1, keepdims=True)  # (TB,1)
        amax_acc = jnp.where(col == step, amax, amax_acc)

        # decoder_input = encoder_outputs[b, amax[b], :]  (one-hot select on VPU/XLU)
        onehot = (col == amax).astype(jnp.float32)             # (TB, T)
        dec_in = jnp.sum(onehot[:, :, None] * enc_scr[...], axis=1)               # (TB, H)

    amax_ref[:, 0, :] = amax_acc                               # single lane-dense store


# ------------------------- wrapper-side weight prep -------------------------

def _split_gates(w, H):
    return [w[..., k * H:(k + 1) * H] for k in range(4)]       # i, f, g, o


def _interleave_enc(w_f, w_b, H):
    """[i,f,g,o] per direction -> [i_f,i_b, f_f,f_b, o_f,o_b, g_f,g_b]."""
    gf = _split_gates(w_f, H)
    gb = _split_gates(w_b, H)
    cols = []
    for k in (0, 1, 3, 2):                                     # i, f, o, g
        cols += [gf[k], gb[k]]
    return jnp.concatenate(cols, axis=-1)


def _blockdiag_whh(whh_f, whh_b, H):
    """Block-diagonal recurrent weight so [h_f | h_b] @ W does both directions."""
    z = jnp.zeros((H, H), whh_f.dtype)
    gf = _split_gates(whh_f, H)
    gb = _split_gates(whh_b, H)
    top, bot = [], []
    for k in (0, 1, 3, 2):                                     # i, f, o, g
        top += [gf[k], z]
        bot += [z, gb[k]]
    return jnp.concatenate([jnp.concatenate(top, axis=1),
                            jnp.concatenate(bot, axis=1)], axis=0)   # (2H, 8H)


def _perm_dec(w, H):
    g = _split_gates(w, H)
    return jnp.concatenate([g[0], g[1], g[3], g[2]], axis=-1)  # i, f, o, g


def init_params(key, input_dim, embedding_dim, hidden_size):
    H = hidden_size
    ks = jax.random.split(key, 13)

    def u(k, shape, fan):
        s = 1.0 / math.sqrt(fan)
        return jax.random.uniform(k, shape, jnp.float32, -s, s)

    return dict(
        w_emb=u(ks[0], (input_dim, embedding_dim), input_dim),
        # encoder bi-LSTM (b_* = b_ih + b_hh folded together), gate order [i,f,g,o]
        wih_f=u(ks[1], (embedding_dim, 4 * H), H),
        whh_f=u(ks[2], (H, 4 * H), H),
        b_f=u(ks[3], (1, 4 * H), H),
        wih_b=u(ks[4], (embedding_dim, 4 * H), H),
        whh_b=u(ks[5], (H, 4 * H), H),
        b_b=u(ks[6], (1, 4 * H), H),
        # decoder LSTMCell
        wih_d=u(ks[7], (H, 4 * H), H),
        whh_d=u(ks[8], (H, 4 * H), H),
        b_d=u(ks[9], (1, 4 * H), H),
        # attention (Linear layers have no bias in the PyTorch module)
        w1=u(ks[10], (H, H), H),
        w2=u(ks[11], (H, H), H),
        vt=u(ks[12], (H, 1), H),
    )


def _full_spec(arr):
    n = arr.ndim
    return pl.BlockSpec(arr.shape, lambda b, _n=n: (0,) * _n)


def _pick_batch_tile(B, T, H, input_dim):
    # Per-batch-row VMEM footprint (bytes) of the in-kernel working set:
    # gx scratch (T*8H) + enc/W1 scratches (2*T*H) + logs block (T*T, x2 buffers)
    # + bf16 x block + a few (8H)-wide temporaries.
    row_bytes = 4 * T * (8 * H + 2 * H + 2 * T) + 2 * T * input_dim + 64 * H
    cap = int(max(8, min(256, (16 * 2 ** 20) // max(row_bytes, 1))))
    if B <= 16:
        return B
    # Keep >= 2 grid steps so the "parallel" batch axis can shard across the two
    # TensorCores of a v7x chip (a no-op on v5e/v6e); cap the tile by VMEM budget.
    return int(min(cap, pl.cdiv(B, 2)))


def pointer_net_forward(input_seq, input_lengths, params, hidden_size):
    B, T, Din = input_seq.shape
    H = hidden_size

    # length mask (B, T): 1.0 where t < input_lengths[b]
    len_mask = (jnp.arange(T, dtype=input_lengths.dtype)[None, :]
                < input_lengths[:, None]).astype(jnp.float32)

    # ---- one-time weight fusions (tiny) ----
    # Fold the embedding into the interleaved input-gate weights: emb is only
    # consumed by them, so gx = x @ (w_emb @ wih_fb) is mathematically identical.
    wih_fb = _interleave_enc(params["wih_f"], params["wih_b"], H)          # (E, 8H)
    w_x = (params["w_emb"] @ wih_fb).astype(jnp.bfloat16)                  # (Din, 8H)
    whh_cat = _blockdiag_whh(params["whh_f"], params["whh_b"], H).astype(jnp.bfloat16)
    b_enc = _interleave_enc(params["b_f"], params["b_b"], H)               # (1, 8H) f32
    dir_sel = jnp.tile(jnp.concatenate([jnp.ones((1, H), jnp.float32),
                                        jnp.zeros((1, H), jnp.float32)], axis=1),
                       (1, 4))                                             # (1, 8H)
    # Decoder LSTMCell: stack input/recurrent weights so each step is one matmul.
    w_dec = jnp.concatenate([_perm_dec(params["wih_d"], H),
                             _perm_dec(params["whh_d"], H)],
                            axis=0).astype(jnp.bfloat16)                   # (2H, 4H)
    b_dec = _perm_dec(params["b_d"], H)                                    # (1, 4H) f32
    w1 = params["w1"].astype(jnp.bfloat16)
    w2 = params["w2"].astype(jnp.bfloat16)
    vt_row = params["vt"].T                                                # (1, H) f32

    # ---- batch tiling (pad B so every tile is fully specified) ----
    TB = _pick_batch_tile(B, T, H, Din)
    Bp = pl.cdiv(B, TB) * TB
    x_in = input_seq.astype(jnp.bfloat16)
    mask_in = len_mask[:, None, :]
    if Bp != B:
        x_in = jnp.pad(x_in, ((0, Bp - B), (0, 0), (0, 0)))
        mask_in = jnp.pad(mask_in, ((0, Bp - B), (0, 0), (0, 0)))
    grid = (Bp // TB,)

    # VMEM budget from the actual per-tile working set (scratches + double-buffered
    # blocks + weights), with headroom; capped below v7x's 64 MiB physical VMEM.
    tile_bytes = (4 * TB * T * (8 * H + 2 * H)
                  + 2 * (4 * TB * T * T + 2 * TB * T * Din + 4 * TB * T))
    weight_bytes = 2 * (Din + 2 * H) * 8 * H + 2 * 2 * H * 4 * H + 4 * H * H + 64 * H
    vmem_limit = int(min(64 * 2 ** 20, max(24 * 2 ** 20, 4 * (tile_bytes + weight_bytes))))

    logs, amax3 = pl.pallas_call(
        pointer_net_kernel,
        out_shape=(jax.ShapeDtypeStruct((Bp, T, T), jnp.float32),
                   jax.ShapeDtypeStruct((Bp, 1, T), jnp.int32)),
        grid_spec=pltpu.PrefetchScalarGridSpec(
            num_scalar_prefetch=0,
            grid=grid,
            in_specs=[
                pl.BlockSpec((TB, T, Din), lambda b: (b, 0, 0)),
                pl.BlockSpec((TB, 1, T), lambda b: (b, 0, 0)),
                _full_spec(dir_sel),
                _full_spec(w_x),
                _full_spec(whh_cat),
                _full_spec(b_enc),
                _full_spec(w_dec),
                _full_spec(b_dec),
                _full_spec(w1),
                _full_spec(w2),
                _full_spec(vt_row),
            ],
            out_specs=(pl.BlockSpec((TB, T, T), lambda b: (b, 0, 0)),
                       pl.BlockSpec((TB, 1, T), lambda b: (b, 0, 0))),
            scratch_shapes=[pltpu.VMEM((TB, T, 8 * H), jnp.float32),
                            pltpu.VMEM((TB, T, H), jnp.float32),
                            pltpu.VMEM((TB, T, H), jnp.float32)],
        ),
        compiler_params=pltpu.CompilerParams(
            dimension_semantics=("parallel",),
            vmem_limit_bytes=vmem_limit),
    )(x_in, mask_in, dir_sel, w_x, whh_cat, b_enc, w_dec, b_dec, w1, w2, vt_row)

    pointer_log_scores = logs[:B]                          # (B, T, T) — final layout
    pointer_argmaxs = amax3[:B, 0, :]                      # (B, T)
    mask_bool = len_mask > 0
    mask_tensor = mask_bool[:, None, :] & mask_bool[:, :, None]  # (B, T, T) bool
    return pointer_log_scores, pointer_argmaxs, mask_tensor


if __name__ == "__main__":
    B, T = 2, 8
    input_dim, embedding_dim, hidden_size = 4, 16, 32

    key = jax.random.PRNGKey(0)
    k_in, k_param = jax.random.split(key)

    input_seq = jax.random.normal(k_in, (B, T, input_dim), jnp.float32)
    # pack_padded_sequence requires lengths sorted in descending order
    input_lengths = jnp.array([8, 5], dtype=jnp.int32)
    params = init_params(k_param, input_dim, embedding_dim, hidden_size)

    logs, argmaxs, mask = pointer_net_forward(input_seq, input_lengths, params, hidden_size)
    jax.block_until_ready((logs, argmaxs, mask))

    assert logs.shape == (B, T, T)
    assert argmaxs.shape == (B, T)
    assert mask.shape == (B, T, T)
    assert bool(jnp.all(jnp.isfinite(logs)))
    assert bool(jnp.all((argmaxs >= 0) & (argmaxs < T)))
    # each decode step emits a valid log-softmax (rows exponentiate to 1)
    assert bool(jnp.all(jnp.abs(jnp.sum(jnp.exp(logs), axis=-1) - 1.0) < 1e-3))
    print("KERNEL_OK")
</pallas_src>

<mosaic_0001>
module attributes {stable_mosaic.version = 11 : i64} {
  func.func @pointer_net_kernel(%arg0: i32, %arg1: memref<2x8x4xbf16, #tpu.memory_space<vmem>>, %arg2: memref<2x1x8xf32, #tpu.memory_space<vmem>>, %arg3: memref<1x256xf32, #tpu.memory_space<vmem>>, %arg4: memref<4x256xbf16, #tpu.memory_space<vmem>>, %arg5: memref<64x256xbf16, #tpu.memory_space<vmem>>, %arg6: memref<1x256xf32, #tpu.memory_space<vmem>>, %arg7: memref<64x128xbf16, #tpu.memory_space<vmem>>, %arg8: memref<1x128xf32, #tpu.memory_space<vmem>>, %arg9: memref<32x32xbf16, #tpu.memory_space<vmem>>, %arg10: memref<32x32xbf16, #tpu.memory_space<vmem>>, %arg11: memref<1x32xf32, #tpu.memory_space<vmem>>, %arg12: memref<2x8x8xf32, #tpu.memory_space<vmem>>, %arg13: memref<2x1x8xi32, #tpu.memory_space<vmem>>, %arg14: memref<2x8x256xf32, #tpu.memory_space<vmem>>, %arg15: memref<2x8x32xf32, #tpu.memory_space<vmem>>, %arg16: memref<2x8x32xf32, #tpu.memory_space<vmem>>) attributes {dimension_semantics = [#tpu.dimension_semantics<parallel>], iteration_bounds = array<i64: 1>, scalar_prefetch = 0 : i64, scratch_operands = 3 : i64, tpu.core_type = #tpu.core_type<tc>, window_params = [{transform_indices = @transform_0, window_bounds = array<i64: 2, 8, 4>}, {transform_indices = @transform_1, window_bounds = array<i64: 2, 1, 8>}, {pipeline_mode = #tpu.pipeline_mode<synchronous>, transform_indices = @transform_2, window_bounds = array<i64: 1, 256>}, {pipeline_mode = #tpu.pipeline_mode<synchronous>, transform_indices = @transform_3, window_bounds = array<i64: 4, 256>}, {pipeline_mode = #tpu.pipeline_mode<synchronous>, transform_indices = @transform_4, window_bounds = array<i64: 64, 256>}, {pipeline_mode = #tpu.pipeline_mode<synchronous>, transform_indices = @transform_5, window_bounds = array<i64: 1, 256>}, {pipeline_mode = #tpu.pipeline_mode<synchronous>, transform_indices = @transform_6, window_bounds = array<i64: 64, 128>}, {pipeline_mode = #tpu.pipeline_mode<synchronous>, transform_indices = @transform_7, window_bounds = array<i64: 1, 128>}, {pipeline_mode = #tpu.pipeline_mode<synchronous>, transform_indices = @transform_8, window_bounds = array<i64: 32, 32>}, {pipeline_mode = #tpu.pipeline_mode<synchronous>, transform_indices = @transform_9, window_bounds = array<i64: 32, 32>}, {pipeline_mode = #tpu.pipeline_mode<synchronous>, transform_indices = @transform_10, window_bounds = array<i64: 1, 32>}, {transform_indices = @transform_11, window_bounds = array<i64: 2, 8, 8>}, {transform_indices = @transform_12, window_bounds = array<i64: 2, 1, 8>}]} {
    %c0 = arith.constant 0 : index
    %c0_0 = arith.constant 0 : index
    %c0_1 = arith.constant 0 : index
    %0 = vector.load %arg2[%c0, %c0_0, %c0_1] : memref<2x1x8xf32, #tpu.memory_space<vmem>>, vector<2x1x8xf32>
    %1 = vector.shape_cast %0 : vector<2x1x8xf32> to vector<2x8xf32>
    %c0_2 = arith.constant 0 : index
    %c0_3 = arith.constant 0 : index
    %2 = vector.load %arg3[%c0_2, %c0_3] : memref<1x256xf32, #tpu.memory_space<vmem>>, vector<1x256xf32>
    %cst = arith.constant 0.000000e+00 : f32
    %3 = vector.broadcast %cst : f32 to vector<1x256xf32>
    %4 = arith.cmpf ogt, %2, %3 : vector<1x256xf32>
    %5 = vector.extract_strided_slice %4 {offsets = [0, 0], sizes = [1, 64], strides = [1, 1]} : vector<1x256xi1> to vector<1x64xi1>
    %6 = tpu.iota {dimensions = array<i32: 1>} : vector<2x8xi32>
    %c0_4 = arith.constant 0 : index
    %c0_5 = arith.constant 0 : index
    %7 = vector.load %arg11[%c0_4, %c0_5] : memref<1x32xf32, #tpu.memory_space<vmem>>, vector<1x32xf32>
    %8 = vector.shape_cast %7 : vector<1x32xf32> to vector<1x1x32xf32>
    %c0_6 = arith.constant 0 : index
    %c0_7 = arith.constant 0 : index
    %9 = vector.load %arg8[%c0_6, %c0_7] : memref<1x128xf32, #tpu.memory_space<vmem>>, vector<1x128xf32>
    %c0_8 = arith.constant 0 : index
    %c0_9 = arith.constant 0 : index
    %c0_10 = arith.constant 0 : index
    %10 = vector.load %arg1[%c0_8, %c0_9, %c0_10] : memref<2x8x4xbf16, #tpu.memory_space<vmem>>, vector<2x8x4xbf16>
    %11 = vector.shape_cast %10 : vector<2x8x4xbf16> to vector<16x4xbf16>
    %c0_11 = arith.constant 0 : index
    %c0_12 = arith.constant 0 : index
    %12 = vector.load %arg4[%c0_11, %c0_12] : memref<4x256xbf16, #tpu.memory_space<vmem>>, vector<4x256xbf16>
    %cst_13 = arith.constant dense<0.000000e+00> : vector<16x256xf32>
    %13 = tpu.matmul %11, %12, %cst_13 {dimension_numbers = #tpu.dot_dimension_numbers<[1], [0], [0], [1], [0, 0, 1, 1], [], []>} : vector<16x4xbf16>, vector<4x256xbf16>, vector<16x256xf32> -> vector<16x256xf32>
    %c0_14 = arith.constant 0 : index
    %c0_15 = arith.constant 0 : index
    %14 = vector.load %arg6[%c0_14, %c0_15] : memref<1x256xf32, #tpu.memory_space<vmem>>, vector<1x256xf32>
    %15 = vector.broadcast %14 : vector<1x256xf32> to vector<16x256xf32>
    %16 = arith.addf %13, %15 : vector<16x256xf32>
    %17 = vector.shape_cast %16 : vector<16x256xf32> to vector<2x8x256xf32>
    %c0_16 = arith.constant 0 : index
    %c0_17 = arith.constant 0 : index
    %c0_18 = arith.constant 0 : index
    %18 = vector.load %arg14[%c0_16, %c0_17, %c0_18] : memref<2x8x256xf32, #tpu.memory_space<vmem>>, vector<2x8x256xf32>
    tpu.vector_store %arg14[%c0_16, %c0_17, %c0_18], %17 {strides = array<i32>} : memref<2x8x256xf32, #tpu.memory_space<vmem>>, vector<2x8x256xf32>,
    %c0_19 = arith.constant 0 : index
    %c0_20 = arith.constant 0 : index
    %19 = vector.load %arg5[%c0_19, %c0_20] : memref<64x256xbf16, #tpu.memory_space<vmem>>, vector<64x256xbf16>
    %cst_21 = arith.constant 0.000000e+00 : f32
    %20 = vector.broadcast %cst_21 : f32 to vector<2x64xf32>
    %cst_22 = arith.constant 0.000000e+00 : f32
    %21 = vector.broadcast %cst_22 : f32 to vector<2x64xf32>
    %c0_23 = arith.constant 0 : index
    %c0_24 = arith.constant 0 : index
    %c0_25 = arith.constant 0 : index
    %22 = vector.load %arg14[%c0_23, %c0_24, %c0_25] : memref<2x8x256xf32, #tpu.memory_space<vmem>>, vector<2x1x256xf32>
    %23 = vector.shape_cast %22 : vector<2x1x256xf32> to vector<2x256xf32>
    %c0_26 = arith.constant 0 : index
    %c7 = arith.constant 7 : index
    %c0_27 = arith.constant 0 : index
    %24 = vector.load %arg14[%c0_26, %c7, %c0_27] : memref<2x8x256xf32, #tpu.memory_space<vmem>>, vector<2x1x256xf32>
    %25 = vector.shape_cast %24 : vector<2x1x256xf32> to vector<2x256xf32>
    %26 = vector.shape_cast %4 : vector<1x256xi1> to vector<1x256xi1>
    %27 = vector.broadcast %26 : vector<1x256xi1> to vector<2x256xi1>
    %28 = arith.select %27, %23, %25 : vector<2x256xi1>, vector<2x256xf32>
    %29 = arith.truncf %20 : vector<2x64xf32> to vector<2x64xbf16>
    %cst_28 = arith.constant dense<0.000000e+00> : vector<2x256xf32>
    %30 = tpu.matmul %29, %19, %cst_28 {dimension_numbers = #tpu.dot_dimension_numbers<[1], [0], [0], [1], [0, 0, 1, 1], [], []>} : vector<2x64xbf16>, vector<64x256xbf16>, vector<2x256xf32> -> vector<2x256xf32>
    %31 = arith.addf %28, %30 : vector<2x256xf32>
    %32 = vector.extract_strided_slice %31 {offsets = [0, 0], sizes = [2, 192], strides = [1, 1]} : vector<2x256xf32> to vector<2x192xf32>
    %33 = arith.negf %32 : vector<2x192xf32>
    %34 = math.exp %33 : vector<2x192xf32>
    %cst_29 = arith.constant 1.000000e+00 : f32
    %35 = vector.broadcast %cst_29 : f32 to vector<2x192xf32>
    %36 = arith.addf %35, %34 : vector<2x192xf32>
    %37 = arith.divf %35, %36 : vector<2x192xf32>
    %38 = vector.extract_strided_slice %37 {offsets = [0, 0], sizes = [2, 64], strides = [1, 1]} : vector<2x192xf32> to vector<2x64xf32>
    %39 = vector.extract_strided_slice %37 {offsets = [0, 64], sizes = [2, 64], strides = [1, 1]} : vector<2x192xf32> to vector<2x64xf32>
    %40 = vector.extract_strided_slice %37 {offsets = [0, 128], sizes = [2, 64], strides = [1, 1]} : vector<2x192xf32> to vector<2x64xf32>
    %41 = vector.extract_strided_slice %31 {offsets = [0, 192], sizes = [2, 64], strides = [1, 1]} : vector<2x256xf32> to vector<2x64xf32>
    %42 = math.tanh %41 : vector<2x64xf32>
    %43 = arith.mulf %39, %21 : vector<2x64xf32>
    %44 = arith.mulf %38, %42 : vector<2x64xf32>
    %45 = arith.addf %43, %44 : vector<2x64xf32>
    %46 = math.tanh %45 : vector<2x64xf32>
    %47 = arith.mulf %40, %46 : vector<2x64xf32>
    %48 = vector.extract_strided_slice %1 {offsets = [0, 0], sizes = [2, 1], strides = [1, 1]} : vector<2x8xf32> to vector<2x1xf32>
    %49 = vector.extract_strided_slice %1 {offsets = [0, 7], sizes = [2, 1], strides = [1, 1]} : vector<2x8xf32> to vector<2x1xf32>
    %50 = vector.shape_cast %5 : vector<1x64xi1> to vector<1x64xi1>
    %51 = vector.broadcast %50 : vector<1x64xi1> to vector<2x64xi1>
    %52 = vector.shape_cast %48 : vector<2x1xf32> to vector<2x1xf32>
    %53 = vector.broadcast %52 : vector<2x1xf32> to vector<2x64xf32>
    %54 = vector.shape_cast %49 : vector<2x1xf32> to vector<2x1xf32>
    %55 = vector.broadcast %54 : vector<2x1xf32> to vector<2x64xf32>
    %56 = arith.select %51, %53, %55 : vector<2x64xi1>, vector<2x64xf32>
    %cst_30 = arith.constant 0.000000e+00 : f32
    %57 = vector.broadcast %cst_30 : f32 to vector<2x64xf32>
    %58 = arith.cmpf ogt, %56, %57 : vector<2x64xf32>
    %59 = arith.select %58, %47, %20 : vector<2x64xi1>, vector<2x64xf32>
    %cst_31 = arith.constant 0.000000e+00 : f32
    %60 = vector.broadcast %cst_31 : f32 to vector<2x64xf32>
    %61 = arith.cmpf ogt, %56, %60 : vector<2x64xf32>
    %62 = arith.select %61, %45, %21 : vector<2x64xi1>, vector<2x64xf32>
    %cst_32 = arith.constant 0.000000e+00 : f32
    %63 = vector.broadcast %cst_32 : f32 to vector<2x64xf32>
    %64 = arith.cmpf ogt, %56, %63 : vector<2x64xf32>
    %cst_33 = arith.constant 0.000000e+00 : f32
    %65 = vector.broadcast %cst_33 : f32 to vector<2x64xf32>
    %66 = arith.select %64, %47, %65 : vector<2x64xi1>, vector<2x64xf32>
    %67 = vector.extract_strided_slice %66 {offsets = [0, 0], sizes = [2, 32], strides = [1, 1]} : vector<2x64xf32> to vector<2x32xf32>
    %c0_34 = arith.constant 0 : index
    %c0_35 = arith.constant 0 : index
    %c0_36 = arith.constant 0 : index
    %68 = vector.load %arg15[%c0_34, %c0_35, %c0_36] : memref<2x8x32xf32, #tpu.memory_space<vmem>>, vector<2x1x32xf32>
    %69 = vector.shape_cast %68 : vector<2x1x32xf32> to vector<2x32xf32>
    %70 = vector.shape_cast %67 : vector<2x32xf32> to vector<2x1x32xf32>
    tpu.vector_store %arg15[%c0_34, %c0_35, %c0_36], %70 {strides = array<i32>} : memref<2x8x32xf32, #tpu.memory_space<vmem>>, vector<2x1x32xf32>,
    %71 = vector.extract_strided_slice %66 {offsets = [0, 32], sizes = [2, 32], strides = [1, 1]} : vector<2x64xf32> to vector<2x32xf32>
    %c0_37 = arith.constant 0 : index
    %c7_38 = arith.constant 7 : index
    %c0_39 = arith.constant 0 : index
    %72 = vector.load %arg16[%c0_37, %c7_38, %c0_39] : memref<2x8x32xf32, #tpu.memory_space<vmem>>, vector<2x1x32xf32>
    %73 = vector.shape_cast %72 : vector<2x1x32xf32> to vector<2x32xf32>
    %74 = vector.shape_cast %71 : vector<2x32xf32> to vector<2x1x32xf32>
    tpu.vector_store %arg16[%c0_37, %c7_38, %c0_39], %74 {strides = array<i32>} : memref<2x8x32xf32, #tpu.memory_space<vmem>>, vector<2x1x32xf32>,
    %c0_40 = arith.constant 0 : index
    %c1 = arith.constant 1 : index
    %c0_41 = arith.constant 0 : index
    %75 = vector.load %arg14[%c0_40, %c1, %c0_41] : memref<2x8x256xf32, #tpu.memory_space<vmem>>, vector<2x1x256xf32>
    %76 = vector.shape_cast %75 : vector<2x1x256xf32> to vector<2x256xf32>
    %c0_42 = arith.constant 0 : index
    %c6 = arith.constant 6 : index
    %c0_43 = arith.constant 0 : index
    %77 = vector.load %arg14[%c0_42, %c6, %c0_43] : memref<2x8x256xf32, #tpu.memory_space<vmem>>, vector<2x1x256xf32>
    %78 = vector.shape_cast %77 : vector<2x1x256xf32> to vector<2x256xf32>
    %79 = vector.shape_cast %4 : vector<1x256xi1> to vector<1x256xi1>
    %80 = vector.broadcast %79 : vector<1x256xi1> to vector<2x256xi1>
    %81 = arith.select %80, %76, %78 : vector<2x256xi1>, vector<2x256xf32>
    %82 = arith.truncf %59 : vector<2x64xf32> to vector<2x64xbf16>
    %cst_44 = arith.constant dense<0.000000e+00> : vector<2x256xf32>
    %83 = tpu.matmul %82, %19, %cst_44 {dimension_numbers = #tpu.dot_dimension_numbers<[1], [0], [0], [1], [0, 0, 1, 1], [], []>} : vector<2x64xbf16>, vector<64x256xbf16>, vector<2x256xf32> -> vector<2x256xf32>
    %84 = arith.addf %81, %83 : vector<2x256xf32>
    %85 = vector.extract_strided_slice %84 {offsets = [0, 0], sizes = [2, 192], strides = [1, 1]} : vector<2x256xf32> to vector<2x192xf32>
    %86 = arith.negf %85 : vector<2x192xf32>
    %87 = math.exp %86 : vector<2x192xf32>
    %cst_45 = arith.constant 1.000000e+00 : f32
    %88 = vector.broadcast %cst_45 : f32 to vector<2x192xf32>
    %89 = arith.addf %88, %87 : vector<2x192xf32>
    %90 = arith.divf %88, %89 : vector<2x192xf32>
    %91 = vector.extract_strided_slice %90 {offsets = [0, 0], sizes = [2, 64], strides = [1, 1]} : vector<2x192xf32> to vector<2x64xf32>
    %92 = vector.extract_strided_slice %90 {offsets = [0, 64], sizes = [2, 64], strides = [1, 1]} : vector<2x192xf32> to vector<2x64xf32>
    %93 = vector.extract_strided_slice %90 {offsets = [0, 128], sizes = [2, 64], strides = [1, 1]} : vector<2x192xf32> to vector<2x64xf32>
    %94 = vector.extract_strided_slice %84 {offsets = [0, 192], sizes = [2, 64], strides = [1, 1]} : vector<2x256xf32> to vector<2x64xf32>
    %95 = math.tanh %94 : vector<2x64xf32>
    %96 = arith.mulf %92, %62 : vector<2x64xf32>
    %97 = arith.mulf %91, %95 : vector<2x64xf32>
    %98 = arith.addf %96, %97 : vector<2x64xf32>
    %99 = math.tanh %98 : vector<2x64xf32>
    %100 = arith.mulf %93, %99 : vector<2x64xf32>
    %101 = vector.extract_strided_slice %1 {offsets = [0, 1], sizes = [2, 1], strides = [1, 1]} : vector<2x8xf32> to vector<2x1xf32>
    %102 = vector.extract_strided_slice %1 {offsets = [0, 6], sizes = [2, 1], strides = [1, 1]} : vector<2x8xf32> to vector<2x1xf32>
    %103 = vector.shape_cast %5 : vector<1x64xi1> to vector<1x64xi1>
    %104 = vector.broadcast %103 : vector<1x64xi1> to vector<2x64xi1>
    %105 = vector.shape_cast %101 : vector<2x1xf32> to vector<2x1xf32>
    %106 = vector.broadcast %105 : vector<2x1xf32> to vector<2x64xf32>
    %107 = vector.shape_cast %102 : vector<2x1xf32> to vector<2x1xf32>
    %108 = vector.broadcast %107 : vector<2x1xf32> to vector<2x64xf32>
    %109 = arith.select %104, %106, %108 : vector<2x64xi1>, vector<2x64xf32>
    %cst_46 = arith.constant 0.000000e+00 : f32
    %110 = vector.broadcast %cst_46 : f32 to vector<2x64xf32>
    %111 = arith.cmpf ogt, %109, %110 : vector<2x64xf32>
    %112 = arith.select %111, %100, %59 : vector<2x64xi1>, vector<2x64xf32>
    %cst_47 = arith.constant 0.000000e+00 : f32
    %113 = vector.broadcast %cst_47 : f32 to vector<2x64xf32>
    %114 = arith.cmpf ogt, %109, %113 : vector<2x64xf32>
    %115 = arith.select %114, %98, %62 : vector<2x64xi1>, vector<2x64xf32>
    %cst_48 = arith.constant 0.000000e+00 : f32
    %116 = vector.broadcast %cst_48 : f32 to vector<2x64xf32>
    %117 = arith.cmpf ogt, %109, %116 : vector<2x64xf32>
    %cst_49 = arith.constant 0.000000e+00 : f32
    %118 = vector.broadcast %cst_49 : f32 to vector<2x64xf32>
    %119 = arith.select %117, %100, %118 : vector<2x64xi1>, vector<2x64xf32>
    %120 = vector.extract_strided_slice %119 {offsets = [0, 0], sizes = [2, 32], strides = [1, 1]} : vector<2x64xf32> to vector<2x32xf32>
    %c0_50 = arith.constant 0 : index
    %c1_51 = arith.constant 1 : index
    %c0_52 = arith.constant 0 : index
    %121 = vector.load %arg15[%c0_50, %c1_51, %c0_52] : memref<2x8x32xf32, #tpu.memory_space<vmem>>, vector<2x1x32xf32>
    %122 = vector.shape_cast %121 : vector<2x1x32xf32> to vector<2x32xf32>
    %123 = vector.shape_cast %120 : vector<2x32xf32> to vector<2x1x32xf32>
    tpu.vector_store %arg15[%c0_50, %c1_51, %c0_52], %123 {strides = array<i32>} : memref<2x8x32xf32, #tpu.memory_space<vmem>>, vector<2x1x32xf32>,
    %124 = vector.extract_strided_slice %119 {offsets = [0, 32], sizes = [2, 32], strides = [1, 1]} : vector<2x64xf32> to vector<2x32xf32>
    %c0_53 = arith.constant 0 : index
    %c6_54 = arith.constant 6 : index
    %c0_55 = arith.constant 0 : index
    %125 = vector.load %arg16[%c0_53, %c6_54, %c0_55] : memref<2x8x32xf32, #tpu.memory_space<vmem>>, vector<2x1x32xf32>
    %126 = vector.shape_cast %125 : vector<2x1x32xf32> to vector<2x32xf32>
    %127 = vector.shape_cast %124 : vector<2x32xf32> to vector<2x1x32xf32>
    tpu.vector_store %arg16[%c0_53, %c6_54, %c0_55], %127 {strides = array<i32>} : memref<2x8x32xf32, #tpu.memory_space<vmem>>, vector<2x1x32xf32>,
    %c0_56 = arith.constant 0 : index
    %c2 = arith.constant 2 : index
    %c0_57 = arith.constant 0 : index
    %128 = vector.load %arg14[%c0_56, %c2, %c0_57] : memref<2x8x256xf32, #tpu.memory_space<vmem>>, vector<2x1x256xf32>
    %129 = vector.shape_cast %128 : vector<2x1x256xf32> to vector<2x256xf32>
    %c0_58 = arith.constant 0 : index
    %c5 = arith.constant 5 : index
    %c0_59 = arith.constant 0 : index
    %130 = vector.load %arg14[%c0_58, %c5, %c0_59] : memref<2x8x256xf32, #tpu.memory_space<vmem>>, vector<2x1x256xf32>
    %131 = vector.shape_cast %130 : vector<2x1x256xf32> to vector<2x256xf32>
    %132 = vector.shape_cast %4 : vector<1x256xi1> to vector<1x256xi1>
    %133 = vector.broadcast %132 : vector<1x256xi1> to vector<2x256xi1>
    %134 = arith.select %133, %129, %131 : vector<2x256xi1>, vector<2x256xf32>
    %135 = arith.truncf %112 : vector<2x64xf32> to vector<2x64xbf16>
    %cst_60 = arith.constant dense<0.000000e+00> : vector<2x256xf32>
    %136 = tpu.matmul %135, %19, %cst_60 {dimension_numbers = #tpu.dot_dimension_numbers<[1], [0], [0], [1], [0, 0, 1, 1], [], []>} : vector<2x64xbf16>, vector<64x256xbf16>, vector<2x256xf32> -> vector<2x256xf32>
    %137 = arith.addf %134, %136 : vector<2x256xf32>
    %138 = vector.extract_strided_slice %137 {offsets = [0, 0], sizes = [2, 192], strides = [1, 1]} : vector<2x256xf32> to vector<2x192xf32>
    %139 = arith.negf %138 : vector<2x192xf32>
    %140 = math.exp %139 : vector<2x192xf32>
    %cst_61 = arith.constant 1.000000e+00 : f32
    %141 = vector.broadcast %cst_61 : f32 to vector<2x192xf32>
    %142 = arith.addf %141, %140 : vector<2x192xf32>
    %143 = arith.divf %141, %142 : vector<2x192xf32>
    %144 = vector.extract_strided_slice %143 {offsets = [0, 0], sizes = [2, 64], strides = [1, 1]} : vector<2x192xf32> to vector<2x64xf32>
    %145 = vector.extract_strided_slice %143 {offsets = [0, 64], sizes = [2, 64], strides = [1, 1]} : vector<2x192xf32> to vector<2x64xf32>
    %146 = vector.extract_strided_slice %143 {offsets = [0, 128], sizes = [2, 64], strides = [1, 1]} : vector<2x192xf32> to vector<2x64xf32>
    %147 = vector.extract_strided_slice %137 {offsets = [0, 192], sizes = [2, 64], strides = [1, 1]} : vector<2x256xf32> to vector<2x64xf32>
    %148 = math.tanh %147 : vector<2x64xf32>
    %149 = arith.mulf %145, %115 : vector<2x64xf32>
    %150 = arith.mulf %144, %148 : vector<2x64xf32>
    %151 = arith.addf %149, %150 : vector<2x64xf32>
    %152 = math.tanh %151 : vector<2x64xf32>
    %153 = arith.mulf %146, %152 : vector<2x64xf32>
    %154 = vector.extract_strided_slice %1 {offsets = [0, 2], sizes = [2, 1], strides = [1, 1]} : vector<2x8xf32> to vector<2x1xf32>
    %155 = vector.extract_strided_slice %1 {offsets = [0, 5], sizes = [2, 1], strides = [1, 1]} : vector<2x8xf32> to vector<2x1xf32>
    %156 = vector.shape_cast %5 : vector<1x64xi1> to vector<1x64xi1>
    %157 = vector.broadcast %156 : vector<1x64xi1> to vector<2x64xi1>
    %158 = vector.shape_cast %154 : vector<2x1xf32> to vector<2x1xf32>
    %159 = vector.broadcast %158 : vector<2x1xf32> to vector<2x64xf32>
    %160 = vector.shape_cast %155 : vector<2x1xf32> to vector<2x1xf32>
    %161 = vector.broadcast %160 : vector<2x1xf32> to vector<2x64xf32>
    %162 = arith.select %157, %159, %161 : vector<2x64xi1>, vector<2x64xf32>
    %cst_62 = arith.constant 0.000000e+00 : f32
    %163 = vector.broadcast %cst_62 : f32 to vector<2x64xf32>
    %164 = arith.cmpf ogt, %162, %163 : vector<2x64xf32>
    %165 = arith.select %164, %153, %112 : vector<2x64xi1>, vector<2x64xf32>
    %cst_63 = arith.constant 0.000000e+00 : f32
    %166 = vector.broadcast %cst_63 : f32 to vector<2x64xf32>
    %167 = arith.cmpf ogt, %162, %166 : vector<2x64xf32>
    %168 = arith.select %167, %151, %115 : vector<2x64xi1>, vector<2x64xf32>
    %cst_64 = arith.constant 0.000000e+00 : f32
    %169 = vector.broadcast %cst_64 : f32 to vector<2x64xf32>
    %170 = arith.cmpf ogt, %162, %169 : vector<2x64xf32>
    %cst_65 = arith.constant 0.000000e+00 : f32
    %171 = vector.broadcast %cst_65 : f32 to vector<2x64xf32>
    %172 = arith.select %170, %153, %171 : vector<2x64xi1>, vector<2x64xf32>
    %173 = vector.extract_strided_slice %172 {offsets = [0, 0], sizes = [2, 32], strides = [1, 1]} : vector<2x64xf32> to vector<2x32xf32>
    %c0_66 = arith.constant 0 : index
    %c2_67 = arith.constant 2 : index
    %c0_68 = arith.constant 0 : index
    %174 = vector.load %arg15[%c0_66, %c2_67, %c0_68] : memref<2x8x32xf32, #tpu.memory_space<vmem>>, vector<2x1x32xf32>
    %175 = vector.shape_cast %174 : vector<2x1x32xf32> to vector<2x32xf32>
    %176 = vector.shape_cast %173 : vector<2x32xf32> to vector<2x1x32xf32>
    tpu.vector_store %arg15[%c0_66, %c2_67, %c0_68], %176 {strides = array<i32>} : memref<2x8x32xf32, #tpu.memory_space<vmem>>, vector<2x1x32xf32>,
    %177 = vector.extract_strided_slice %172 {offsets = [0, 32], sizes = [2, 32], strides = [1, 1]} : vector<2x64xf32> to vector<2x32xf32>
    %c0_69 = arith.constant 0 : index
    %c5_70 = arith.constant 5 : index
    %c0_71 = arith.constant 0 : index
    %178 = vector.load %arg16[%c0_69, %c5_70, %c0_71] : memref<2x8x32xf32, #tpu.memory_space<vmem>>, vector<2x1x32xf32>
    %179 = vector.shape_cast %178 : vector<2x1x32xf32> to vector<2x32xf32>
    %180 = vector.shape_cast %177 : vector<2x32xf32> to vector<2x1x32xf32>
    tpu.vector_store %arg16[%c0_69, %c5_70, %c0_71], %180 {strides = array<i32>} : memref<2x8x32xf32, #tpu.memory_space<vmem>>, vector<2x1x32xf32>,
    %c0_72 = arith.constant 0 : index
    %c3 = arith.constant 3 : index
    %c0_73 = arith.constant 0 : index
    %181 = vector.load %arg14[%c0_72, %c3, %c0_73] : memref<2x8x256xf32, #tpu.memory_space<vmem>>, vector<2x1x256xf32>
    %182 = vector.shape_cast %181 : vector<2x1x256xf32> to vector<2x256xf32>
    %c0_74 = arith.constant 0 : index
    %c4 = arith.constant 4 : index
    %c0_75 = arith.constant 0 : index
    %183 = vector.load %arg14[%c0_74, %c4, %c0_75] : memref<2x8x256xf32, #tpu.memory_space<vmem>>, vector<2x1x256xf32>
    %184 = vector.shape_cast %183 : vector<2x1x256xf32> to vector<2x256xf32>
    %185 = vector.shape_cast %4 : vector<1x256xi1> to vector<1x256xi1>
    %186 = vector.broadcast %185 : vector<1x256xi1> to vector<2x256xi1>
    %187 = arith.select %186, %182, %184 : vector<2x256xi1>, vector<2x256xf32>
    %188 = arith.truncf %165 : vector<2x64xf32> to vector<2x64xbf16>
    %cst_76 = arith.constant dense<0.000000e+00> : vector<2x256xf32>
    %189 = tpu.matmul %188, %19, %cst_76 {dimension_numbers = #tpu.dot_dimension_numbers<[1], [0], [0], [1], [0, 0, 1, 1], [], []>} : vector<2x64xbf16>, vector<64x256xbf16>, vector<2x256xf32> -> vector<2x256xf32>
    %190 = arith.addf %187, %189 : vector<2x256xf32>
    %191 = vector.extract_strided_slice %190 {offsets = [0, 0], sizes = [2, 192], strides = [1, 1]} : vector<2x256xf32> to vector<2x192xf32>
    %192 = arith.negf %191 : vector<2x192xf32>
    %193 = math.exp %192 : vector<2x192xf32>
    %cst_77 = arith.constant 1.000000e+00 : f32
    %194 = vector.broadcast %cst_77 : f32 to vector<2x192xf32>
    %195 = arith.addf %194, %193 : vector<2x192xf32>
    %196 = arith.divf %194, %195 : vector<2x192xf32>
    %197 = vector.extract_strided_slice %196 {offsets = [0, 0], sizes = [2, 64], strides = [1, 1]} : vector<2x192xf32> to vector<2x64xf32>
    %198 = vector.extract_strided_slice %196 {offsets = [0, 64], sizes = [2, 64], strides = [1, 1]} : vector<2x192xf32> to vector<2x64xf32>
    %199 = vector.extract_strided_slice %196 {offsets = [0, 128], sizes = [2, 64], strides = [1, 1]} : vector<2x192xf32> to vector<2x64xf32>
    %200 = vector.extract_strided_slice %190 {offsets = [0, 192], sizes = [2, 64], strides = [1, 1]} : vector<2x256xf32> to vector<2x64xf32>
    %201 = math.tanh %200 : vector<2x64xf32>
    %202 = arith.mulf %198, %168 : vector<2x64xf32>
    %203 = arith.mulf %197, %201 : vector<2x64xf32>
    %204 = arith.addf %202, %203 : vector<2x64xf32>
    %205 = math.tanh %204 : vector<2x64xf32>
    %206 = arith.mulf %199, %205 : vector<2x64xf32>
    %207 = vector.extract_strided_slice %1 {offsets = [0, 3], sizes = [2, 1], strides = [1, 1]} : vector<2x8xf32> to vector<2x1xf32>
    %208 = vector.extract_strided_slice %1 {offsets = [0, 4], sizes = [2, 1], strides = [1, 1]} : vector<2x8xf32> to vector<2x1xf32>
    %209 = vector.shape_cast %5 : vector<1x64xi1> to vector<1x64xi1>
    %210 = vector.broadcast %209 : vector<1x64xi1> to vector<2x64xi1>
    %211 = vector.shape_cast %207 : vector<2x1xf32> to vector<2x1xf32>
    %212 = vector.broadcast %211 : vector<2x1xf32> to vector<2x64xf32>
    %213 = vector.shape_cast %208 : vector<2x1xf32> to vector<2x1xf32>
    %214 = vector.broadcast %213 : vector<2x1xf32> to vector<2x64xf32>
    %215 = arith.select %210, %212, %214 : vector<2x64xi1>, vector<2x64xf32>
    %cst_78 = arith.constant 0.000000e+00 : f32
    %216 = vector.broadcast %cst_78 : f32 to vector<2x64xf32>
    %217 = arith.cmpf ogt, %215, %216 : vector<2x64xf32>
    %218 = arith.select %217, %206, %165 : vector<2x64xi1>, vector<2x64xf32>
    %cst_79 = arith.constant 0.000000e+00 : f32
    %219 = vector.broadcast %cst_79 : f32 to vector<2x64xf32>
    %220 = arith.cmpf ogt, %215, %219 : vector<2x64xf32>
    %221 = arith.select %220, %204, %168 : vector<2x64xi1>, vector<2x64xf32>
    %cst_80 = arith.constant 0.000000e+00 : f32
    %222 = vector.broadcast %cst_80 : f32 to vector<2x64xf32>
    %223 = arith.cmpf ogt, %215, %222 : vector<2x64xf32>
    %cst_81 = arith.constant 0.000000e+00 : f32
    %224 = vector.broadcast %cst_81 : f32 to vector<2x64xf32>
    %225 = arith.select %223, %206, %224 : vector<2x64xi1>, vector<2x64xf32>
    %226 = vector.extract_strided_slice %225 {offsets = [0, 0], sizes = [2, 32], strides = [1, 1]} : vector<2x64xf32> to vector<2x32xf32>
    %c0_82 = arith.constant 0 : index
    %c3_83 = arith.constant 3 : index
    %c0_84 = arith.constant 0 : index
    %227 = vector.load %arg15[%c0_82, %c3_83, %c0_84] : memref<2x8x32xf32, #tpu.memory_space<vmem>>, vector<2x1x32xf32>
    %228 = vector.shape_cast %227 : vector<2x1x32xf32> to vector<2x32xf32>
    %229 = vector.shape_cast %226 : vector<2x32xf32> to vector<2x1x32xf32>
    tpu.vector_store %arg15[%c0_82, %c3_83, %c0_84], %229 {strides = array<i32>} : memref<2x8x32xf32, #tpu.memory_space<vmem>>, vector<2x1x32xf32>,
    %230 = vector.extract_strided_slice %225 {offsets = [0, 32], sizes = [2, 32], strides = [1, 1]} : vector<2x64xf32> to vector<2x32xf32>
    %c0_85 = arith.constant 0 : index
    %c4_86 = arith.constant 4 : index
    %c0_87 = arith.constant 0 : index
    %231 = vector.load %arg16[%c0_85, %c4_86, %c0_87] : memref<2x8x32xf32, #tpu.memory_space<vmem>>, vector<2x1x32xf32>
    %232 = vector.shape_cast %231 : vector<2x1x32xf32> to vector<2x32xf32>
    %233 = vector.shape_cast %230 : vector<2x32xf32> to vector<2x1x32xf32>
    tpu.vector_store %arg16[%c0_85, %c4_86, %c0_87], %233 {strides = array<i32>} : memref<2x8x32xf32, #tpu.memory_space<vmem>>, vector<2x1x32xf32>,
    %c0_88 = arith.constant 0 : index
    %c4_89 = arith.constant 4 : index
    %c0_90 = arith.constant 0 : index
    %234 = vector.load %arg14[%c0_88, %c4_89, %c0_90] : memref<2x8x256xf32, #tpu.memory_space<vmem>>, vector<2x1x256xf32>
    %235 = vector.shape_cast %234 : vector<2x1x256xf32> to vector<2x256xf32>
    %c0_91 = arith.constant 0 : index
    %c3_92 = arith.constant 3 : index
    %c0_93 = arith.constant 0 : index
    %236 = vector.load %arg14[%c0_91, %c3_92, %c0_93] : memref<2x8x256xf32, #tpu.memory_space<vmem>>, vector<2x1x256xf32>
    %237 = vector.shape_cast %236 : vector<2x1x256xf32> to vector<2x256xf32>
    %238 = vector.shape_cast %4 : vector<1x256xi1> to vector<1x256xi1>
    %239 = vector.broadcast %238 : vector<1x256xi1> to vector<2x256xi1>
    %240 = arith.select %239, %235, %237 : vector<2x256xi1>, vector<2x256xf32>
    %241 = arith.truncf %218 : vector<2x64xf32> to vector<2x64xbf16>
    %cst_94 = arith.constant dense<0.000000e+00> : vector<2x256xf32>
    %242 = tpu.matmul %241, %19, %cst_94 {dimension_numbers = #tpu.dot_dimension_numbers<[1], [0], [0], [1], [0, 0, 1, 1], [], []>} : vector<2x64xbf16>, vector<64x256xbf16>, vector<2x256xf32> -> vector<2x256xf32>
    %243 = arith.addf %240, %242 : vector<2x256xf32>
    %244 = vector.extract_strided_slice %243 {offsets = [0, 0], sizes = [2, 192], strides = [1, 1]} : vector<2x256xf32> to vector<2x192xf32>
    %245 = arith.negf %244 : vector<2x192xf32>
    %246 = math.exp %245 : vector<2x192xf32>
    %cst_95 = arith.constant 1.000000e+00 : f32
    %247 = vector.broadcast %cst_95 : f32 to vector<2x192xf32>
    %248 = arith.addf %247, %246 : vector<2x192xf32>
    %249 = arith.divf %247, %248 : vector<2x192xf32>
    %250 = vector.extract_strided_slice %249 {offsets = [0, 0], sizes = [2, 64], strides = [1, 1]} : vector<2x192xf32> to vector<2x64xf32>
    %251 = vector.extract_strided_slice %249 {offsets = [0, 64], sizes = [2, 64], strides = [1, 1]} : vector<2x192xf32> to vector<2x64xf32>
    %252 = vector.extract_strided_slice %249 {offsets = [0, 128], sizes = [2, 64], strides = [1, 1]} : vector<2x192xf32> to vector<2x64xf32>
    %253 = vector.extract_strided_slice %243 {offsets = [0, 192], sizes = [2, 64], strides = [1, 1]} : vector<2x256xf32> to vector<2x64xf32>
    %254 = math.tanh %253 : vector<2x64xf32>
    %255 = arith.mulf %251, %221 : vector<2x64xf32>
    %256 = arith.mulf %250, %254 : vector<2x64xf32>
    %257 = arith.addf %255, %256 : vector<2x64xf32>
    %258 = math.tanh %257 : vector<2x64xf32>
    %259 = arith.mulf %252, %258 : vector<2x64xf32>
    %260 = vector.extract_strided_slice %1 {offsets = [0, 4], sizes = [2, 1], strides = [1, 1]} : vector<2x8xf32> to vector<2x1xf32>
    %261 = vector.extract_strided_slice %1 {offsets = [0, 3], sizes = [2, 1], strides = [1, 1]} : vector<2x8xf32> to vector<2x1xf32>
    %262 = vector.shape_cast %5 : vector<1x64xi1> to vector<1x64xi1>
    %263 = vector.broadcast %262 : vector<1x64xi1> to vector<2x64xi1>
    %264 = vector.shape_cast %260 : vector<2x1xf32> to vector<2x1xf32>
    %265 = vector.broadcast %264 : vector<2x1xf32> to vector<2x64xf32>
    %266 = vector.shape_cast %261 : vector<2x1xf32> to vector<2x1xf32>
    %267 = vector.broadcast %266 : vector<2x1xf32> to vector<2x64xf32>
    %268 = arith.select %263, %265, %267 : vector<2x64xi1>, vector<2x64xf32>
    %cst_96 = arith.constant 0.000000e+00 : f32
    %269 = vector.broadcast %cst_96 : f32 to vector<2x64xf32>
    %270 = arith.cmpf ogt, %268, %269 : vector<2x64xf32>
    %271 = arith.select %270, %259, %218 : vector<2x64xi1>, vector<2x64xf32>
    %cst_97 = arith.constant 0.000000e+00 : f32
    %272 = vector.broadcast %cst_97 : f32 to vector<2x64xf32>
    %273 = arith.cmpf ogt, %268, %272 : vector<2x64xf32>
    %274 = arith.select %273, %257, %221 : vector<2x64xi1>, vector<2x64xf32>
    %cst_98 = arith.constant 0.000000e+00 : f32
    %275 = vector.broadcast %cst_98 : f32 to vector<2x64xf32>
    %276 = arith.cmpf ogt, %268, %275 : vector<2x64xf32>
    %cst_99 = arith.constant 0.000000e+00 : f32
    %277 = vector.broadcast %cst_99 : f32 to vector<2x64xf32>
    %278 = arith.select %276, %259, %277 : vector<2x64xi1>, vector<2x64xf32>
    %279 = vector.extract_strided_slice %278 {offsets = [0, 0], sizes = [2, 32], strides = [1, 1]} : vector<2x64xf32> to vector<2x32xf32>
    %c0_100 = arith.constant 0 : index
    %c4_101 = arith.constant 4 : index
    %c0_102 = arith.constant 0 : index
    %280 = vector.load %arg15[%c0_100, %c4_101, %c0_102] : memref<2x8x32xf32, #tpu.memory_space<vmem>>, vector<2x1x32xf32>
    %281 = vector.shape_cast %280 : vector<2x1x32xf32> to vector<2x32xf32>
    %282 = vector.shape_cast %279 : vector<2x32xf32> to vector<2x1x32xf32>
    tpu.vector_store %arg15[%c0_100, %c4_101, %c0_102], %282 {strides = array<i32>} : memref<2x8x32xf32, #tpu.memory_space<vmem>>, vector<2x1x32xf32>,
    %283 = vector.extract_strided_slice %278 {offsets = [0, 32], sizes = [2, 32], strides = [1, 1]} : vector<2x64xf32> to vector<2x32xf32>
    %c0_103 = arith.constant 0 : index
    %c3_104 = arith.constant 3 : index
    %c0_105 = arith.constant 0 : index
    %284 = vector.load %arg16[%c0_103, %c3_104, %c0_105] : memref<2x8x32xf32, #tpu.memory_space<vmem>>, vector<2x1x32xf32>
    %285 = vector.shape_cast %284 : vector<2x1x32xf32> to vector<2x32xf32>
    %286 = vector.shape_cast %283 : vector<2x32xf32> to vector<2x1x32xf32>
    tpu.vector_store %arg16[%c0_103, %c3_104, %c0_105], %286 {strides = array<i32>} : memref<2x8x32xf32, #tpu.memory_space<vmem>>, vector<2x1x32xf32>,
    %c0_106 = arith.constant 0 : index
    %c5_107 = arith.constant 5 : index
    %c0_108 = arith.constant 0 : index
    %287 = vector.load %arg14[%c0_106, %c5_107, %c0_108] : memref<2x8x256xf32, #tpu.memory_space<vmem>>, vector<2x1x256xf32>
    %288 = vector.shape_cast %287 : vector<2x1x256xf32> to vector<2x256xf32>
    %c0_109 = arith.constant 0 : index
    %c2_110 = arith.constant 2 : index
    %c0_111 = arith.constant 0 : index
    %289 = vector.load %arg14[%c0_109, %c2_110, %c0_111] : memref<2x8x256xf32, #tpu.memory_space<vmem>>, vector<2x1x256xf32>
    %290 = vector.shape_cast %289 : vector<2x1x256xf32> to vector<2x256xf32>
    %291 = vector.shape_cast %4 : vector<1x256xi1> to vector<1x256xi1>
    %292 = vector.broadcast %291 : vector<1x256xi1> to vector<2x256xi1>
    %293 = arith.select %292, %288, %290 : vector<2x256xi1>, vector<2x256xf32>
    %294 = arith.truncf %271 : vector<2x64xf32> to vector<2x64xbf16>
    %cst_112 = arith.constant dense<0.000000e+00> : vector<2x256xf32>
    %295 = tpu.matmul %294, %19, %cst_112 {dimension_numbers = #tpu.dot_dimension_numbers<[1], [0], [0], [1], [0, 0, 1, 1], [], []>} : vector<2x64xbf16>, vector<64x256xbf16>, vector<2x256xf32> -> vector<2x256xf32>
    %296 = arith.addf %293, %295 : vector<2x256xf32>
    %297 = vector.extract_strided_slice %296 {offsets = [0, 0], sizes = [2, 192], strides = [1, 1]} : vector<2x256xf32> to vector<2x192xf32>
    %298 = arith.negf %297 : vector<2x192xf32>
    %299 = math.exp %298 : vector<2x192xf32>
    %cst_113 = arith.constant 1.000000e+00 : f32
    %300 = vector.broadcast %cst_113 : f32 to vector<2x192xf32>
    %301 = arith.addf %300, %299 : vector<2x192xf32>
    %302 = arith.divf %300, %301 : vector<2x192xf32>
    %303 = vector.extract_strided_slice %302 {offsets = [0, 0], sizes = [2, 64], strides = [1, 1]} : vector<2x192xf32> to vector<2x64xf32>
    %304 = vector.extract_strided_slice %302 {offsets = [0, 64], sizes = [2, 64], strides = [1, 1]} : vector<2x192xf32> to vector<2x64xf32>
    %305 = vector.extract_strided_slice %302 {offsets = [0, 128], sizes = [2, 64], strides = [1, 1]} : vector<2x192xf32> to vector<2x64xf32>
    %306 = vector.extract_strided_slice %296 {offsets = [0, 192], sizes = [2, 64], strides = [1, 1]} : vector<2x256xf32> to vector<2x64xf32>
    %307 = math.tanh %306 : vector<2x64xf32>
    %308 = arith.mulf %304, %274 : vector<2x64xf32>
    %309 = arith.mulf %303, %307 : vector<2x64xf32>
    %310 = arith.addf %308, %309 : vector<2x64xf32>
    %311 = math.tanh %310 : vector<2x64xf32>
    %312 = arith.mulf %305, %311 : vector<2x64xf32>
    %313 = vector.extract_strided_slice %1 {offsets = [0, 5], sizes = [2, 1], strides = [1, 1]} : vector<2x8xf32> to vector<2x1xf32>
    %314 = vector.extract_strided_slice %1 {offsets = [0, 2], sizes = [2, 1], strides = [1, 1]} : vector<2x8xf32> to vector<2x1xf32>
    %315 = vector.shape_cast %5 : vector<1x64xi1> to vector<1x64xi1>
    %316 = vector.broadcast %315 : vector<1x64xi1> to vector<2x64xi1>
    %317 = vector.shape_cast %313 : vector<2x1xf32> to vector<2x1xf32>
    %318 = vector.broadcast %317 : vector<2x1xf32> to vector<2x64xf32>
    %319 = vector.shape_cast %314 : vector<2x1xf32> to vector<2x1xf32>
    %320 = vector.broadcast %319 : vector<2x1xf32> to vector<2x64xf32>
    %321 = arith.select %316, %318, %320 : vector<2x64xi1>, vector<2x64xf32>
    %cst_114 = arith.constant 0.000000e+00 : f32
    %322 = vector.broadcast %cst_114 : f32 to vector<2x64xf32>
    %323 = arith.cmpf ogt, %321, %322 : vector<2x64xf32>
    %324 = arith.select %323, %312, %271 : vector<2x64xi1>, vector<2x64xf32>
    %cst_115 = arith.constant 0.000000e+00 : f32
    %325 = vector.broadcast %cst_115 : f32 to vector<2x64xf32>
    %326 = arith.cmpf ogt, %321, %325 : vector<2x64xf32>
    %327 = arith.select %326, %310, %274 : vector<2x64xi1>, vector<2x64xf32>
    %cst_116 = arith.constant 0.000000e+00 : f32
    %328 = vector.broadcast %cst_116 : f32 to vector<2x64xf32>
    %329 = arith.cmpf ogt, %321, %328 : vector<2x64xf32>
    %cst_117 = arith.constant 0.000000e+00 : f32
    %330 = vector.broadcast %cst_117 : f32 to vector<2x64xf32>
    %331 = arith.select %329, %312, %330 : vector<2x64xi1>, vector<2x64xf32>
    %332 = vector.extract_strided_slice %331 {offsets = [0, 0], sizes = [2, 32], strides = [1, 1]} : vector<2x64xf32> to vector<2x32xf32>
    %c0_118 = arith.constant 0 : index
    %c5_119 = arith.constant 5 : index
    %c0_120 = arith.constant 0 : index
    %333 = vector.load %arg15[%c0_118, %c5_119, %c0_120] : memref<2x8x32xf32, #tpu.memory_space<vmem>>, vector<2x1x32xf32>
    %334 = vector.shape_cast %333 : vector<2x1x32xf32> to vector<2x32xf32>
    %335 = vector.shape_cast %332 : vector<2x32xf32> to vector<2x1x32xf32>
    tpu.vector_store %arg15[%c0_118, %c5_119, %c0_120], %335 {strides = array<i32>} : memref<2x8x32xf32, #tpu.memory_space<vmem>>, vector<2x1x32xf32>,
    %336 = vector.extract_strided_slice %331 {offsets = [0, 32], sizes = [2, 32], strides = [1, 1]} : vector<2x64xf32> to vector<2x32xf32>
    %c0_121 = arith.constant 0 : index
    %c2_122 = arith.constant 2 : index
    %c0_123 = arith.constant 0 : index
    %337 = vector.load %arg16[%c0_121, %c2_122, %c0_123] : memref<2x8x32xf32, #tpu.memory_space<vmem>>, vector<2x1x32xf32>
    %338 = vector.shape_cast %337 : vector<2x1x32xf32> to vector<2x32xf32>
    %339 = vector.shape_cast %336 : vector<2x32xf32> to vector<2x1x32xf32>
    tpu.vector_store %arg16[%c0_121, %c2_122, %c0_123], %339 {strides = array<i32>} : memref<2x8x32xf32, #tpu.memory_space<vmem>>, vector<2x1x32xf32>,
    %c0_124 = arith.constant 0 : index
    %c6_125 = arith.constant 6 : index
    %c0_126 = arith.constant 0 : index
    %340 = vector.load %arg14[%c0_124, %c6_125, %c0_126] : memref<2x8x256xf32, #tpu.memory_space<vmem>>, vector<2x1x256xf32>
    %341 = vector.shape_cast %340 : vector<2x1x256xf32> to vector<2x256xf32>
    %c0_127 = arith.constant 0 : index
    %c1_128 = arith.constant 1 : index
    %c0_129 = arith.constant 0 : index
    %342 = vector.load %arg14[%c0_127, %c1_128, %c0_129] : memref<2x8x256xf32, #tpu.memory_space<vmem>>, vector<2x1x256xf32>
    %343 = vector.shape_cast %342 : vector<2x1x256xf32> to vector<2x256xf32>
    %344 = vector.shape_cast %4 : vector<1x256xi1> to vector<1x256xi1>
    %345 = vector.broadcast %344 : vector<1x256xi1> to vector<2x256xi1>
    %346 = arith.select %345, %341, %343 : vector<2x256xi1>, vector<2x256xf32>
    %347 = arith.truncf %324 : vector<2x64xf32> to vector<2x64xbf16>
    %cst_130 = arith.constant dense<0.000000e+00> : vector<2x256xf32>
    %348 = tpu.matmul %347, %19, %cst_130 {dimension_numbers = #tpu.dot_dimension_numbers<[1], [0], [0], [1], [0, 0, 1, 1], [], []>} : vector<2x64xbf16>, vector<64x256xbf16>, vector<2x256xf32> -> vector<2x256xf32>
    %349 = arith.addf %346, %348 : vector<2x256xf32>
    %350 = vector.extract_strided_slice %349 {offsets = [0, 0], sizes = [2, 192], strides = [1, 1]} : vector<2x256xf32> to vector<2x192xf32>
    %351 = arith.negf %350 : vector<2x192xf32>
    %352 = math.exp %351 : vector<2x192xf32>
    %cst_131 = arith.constant 1.000000e+00 : f32
    %353 = vector.broadcast %cst_131 : f32 to vector<2x192xf32>
    %354 = arith.addf %353, %352 : vector<2x192xf32>
    %355 = arith.divf %353, %354 : vector<2x192xf32>
    %356 = vector.extract_strided_slice %355 {offsets = [0, 0], sizes = [2, 64], strides = [1, 1]} : vector<2x192xf32> to vector<2x64xf32>
    %357 = vector.extract_strided_slice %355 {offsets = [0, 64], sizes = [2, 64], strides = [1, 1]} : vector<2x192xf32> to vector<2x64xf32>
    %358 = vector.extract_strided_slice %355 {offsets = [0, 128], sizes = [2, 64], strides = [1, 1]} : vector<2x192xf32> to vector<2x64xf32>
    %359 = vector.extract_strided_slice %349 {offsets = [0, 192], sizes = [2, 64], strides = [1, 1]} : vector<2x256xf32> to vector<2x64xf32>
    %360 = math.tanh %359 : vector<2x64xf32>
    %361 = arith.mulf %357, %327 : vector<2x64xf32>
    %362 = arith.mulf %356, %360 : vector<2x64xf32>
    %363 = arith.addf %361, %362 : vector<2x64xf32>
    %364 = math.tanh %363 : vector<2x64xf32>
    %365 = arith.mulf %358, %364 : vector<2x64xf32>
    %366 = vector.extract_strided_slice %1 {offsets = [0, 6], sizes = [2, 1], strides = [1, 1]} : vector<2x8xf32> to vector<2x1xf32>
    %367 = vector.extract_strided_slice %1 {offsets = [0, 1], sizes = [2, 1], strides = [1, 1]} : vector<2x8xf32> to vector<2x1xf32>
    %368 = vector.shape_cast %5 : vector<1x64xi1> to vector<1x64xi1>
    %369 = vector.broadcast %368 : vector<1x64xi1> to vector<2x64xi1>
    %370 = vector.shape_cast %366 : vector<2x1xf32> to vector<2x1xf32>
    %371 = vector.broadcast %370 : vector<2x1xf32> to vector<2x64xf32>
    %372 = vector.shape_cast %367 : vector<2x1xf32> to vector<2x1xf32>
    %373 = vector.broadcast %372 : vector<2x1xf32> to vector<2x64xf32>
    %374 = arith.select %369, %371, %373 : vector<2x64xi1>, vector<2x64xf32>
    %cst_132 = arith.constant 0.000000e+00 : f32
    %375 = vector.broadcast %cst_132 : f32 to vector<2x64xf32>
    %376 = arith.cmpf ogt, %374, %375 : vector<2x64xf32>
    %377 = arith.select %376, %365, %324 : vector<2x64xi1>, vector<2x64xf32>
    %cst_133 = arith.constant 0.000000e+00 : f32
    %378 = vector.broadcast %cst_133 : f32 to vector<2x64xf32>
    %379 = arith.cmpf ogt, %374, %378 : vector<2x64xf32>
    %380 = arith.select %379, %363, %327 : vector<2x64xi1>, vector<2x64xf32>
    %cst_134 = arith.constant 0.000000e+00 : f32
    %381 = vector.broadcast %cst_134 : f32 to vector<2x64xf32>
    %382 = arith.cmpf ogt, %374, %381 : vector<2x64xf32>
    %cst_135 = arith.constant 0.000000e+00 : f32
    %383 = vector.broadcast %cst_135 : f32 to vector<2x64xf32>
    %384 = arith.select %382, %365, %383 : vector<2x64xi1>, vector<2x64xf32>
    %385 = vector.extract_strided_slice %384 {offsets = [0, 0], sizes = [2, 32], strides = [1, 1]} : vector<2x64xf32> to vector<2x32xf32>
    %c0_136 = arith.constant 0 : index
    %c6_137 = arith.constant 6 : index
    %c0_138 = arith.constant 0 : index
    %386 = vector.load %arg15[%c0_136, %c6_137, %c0_138] : memref<2x8x32xf32, #tpu.memory_space<vmem>>, vector<2x1x32xf32>
    %387 = vector.shape_cast %386 : vector<2x1x32xf32> to vector<2x32xf32>
    %388 = vector.shape_cast %385 : vector<2x32xf32> to vector<2x1x32xf32>
    tpu.vector_store %arg15[%c0_136, %c6_137, %c0_138], %388 {strides = array<i32>} : memref<2x8x32xf32, #tpu.memory_space<vmem>>, vector<2x1x32xf32>,
    %389 = vector.extract_strided_slice %384 {offsets = [0, 32], sizes = [2, 32], strides = [1, 1]} : vector<2x64xf32> to vector<2x32xf32>
    %c0_139 = arith.constant 0 : index
    %c1_140 = arith.constant 1 : index
    %c0_141 = arith.constant 0 : index
    %390 = vector.load %arg16[%c0_139, %c1_140, %c0_141] : memref<2x8x32xf32, #tpu.memory_space<vmem>>, vector<2x1x32xf32>
    %391 = vector.shape_cast %390 : vector<2x1x32xf32> to vector<2x32xf32>
    %392 = vector.shape_cast %389 : vector<2x32xf32> to vector<2x1x32xf32>
    tpu.vector_store %arg16[%c0_139, %c1_140, %c0_141], %392 {strides = array<i32>} : memref<2x8x32xf32, #tpu.memory_space<vmem>>, vector<2x1x32xf32>,
    %c0_142 = arith.constant 0 : index
    %c7_143 = arith.constant 7 : index
    %c0_144 = arith.constant 0 : index
    %393 = vector.load %arg14[%c0_142, %c7_143, %c0_144] : memref<2x8x256xf32, #tpu.memory_space<vmem>>, vector<2x1x256xf32>
    %394 = vector.shape_cast %393 : vector<2x1x256xf32> to vector<2x256xf32>
    %c0_145 = arith.constant 0 : index
    %c0_146 = arith.constant 0 : index
    %c0_147 = arith.constant 0 : index
    %395 = vector.load %arg14[%c0_145, %c0_146, %c0_147] : memref<2x8x256xf32, #tpu.memory_space<vmem>>, vector<2x1x256xf32>
    %396 = vector.shape_cast %395 : vector<2x1x256xf32> to vector<2x256xf32>
    %397 = vector.shape_cast %4 : vector<1x256xi1> to vector<1x256xi1>
    %398 = vector.broadcast %397 : vector<1x256xi1> to vector<2x256xi1>
    %399 = arith.select %398, %394, %396 : vector<2x256xi1>, vector<2x256xf32>
    %400 = arith.truncf %377 : vector<2x64xf32> to vector<2x64xbf16>
    %cst_148 = arith.constant dense<0.000000e+00> : vector<2x256xf32>
    %401 = tpu.matmul %400, %19, %cst_148 {dimension_numbers = #tpu.dot_dimension_numbers<[1], [0], [0], [1], [0, 0, 1, 1], [], []>} : vector<2x64xbf16>, vector<64x256xbf16>, vector<2x256xf32> -> vector<2x256xf32>
    %402 = arith.addf %399, %401 : vector<2x256xf32>
    %403 = vector.extract_strided_slice %402 {offsets = [0, 0], sizes = [2, 192], strides = [1, 1]} : vector<2x256xf32> to vector<2x192xf32>
    %404 = arith.negf %403 : vector<2x192xf32>
    %405 = math.exp %404 : vector<2x192xf32>
    %cst_149 = arith.constant 1.000000e+00 : f32
    %406 = vector.broadcast %cst_149 : f32 to vector<2x192xf32>
    %407 = arith.addf %406, %405 : vector<2x192xf32>
    %408 = arith.divf %406, %407 : vector<2x192xf32>
    %409 = vector.extract_strided_slice %408 {offsets = [0, 0], sizes = [2, 64], strides = [1, 1]} : vector<2x192xf32> to vector<2x64xf32>
    %410 = vector.extract_strided_slice %408 {offsets = [0, 64], sizes = [2, 64], strides = [1, 1]} : vector<2x192xf32> to vector<2x64xf32>
    %411 = vector.extract_strided_slice %408 {offsets = [0, 128], sizes = [2, 64], strides = [1, 1]} : vector<2x192xf32> to vector<2x64xf32>
    %412 = vector.extract_strided_slice %402 {offsets = [0, 192], sizes = [2, 64], strides = [1, 1]} : vector<2x256xf32> to vector<2x64xf32>
    %413 = math.tanh %412 : vector<2x64xf32>
    %414 = arith.mulf %410, %380 : vector<2x64xf32>
    %415 = arith.mulf %409, %413 : vector<2x64xf32>
    %416 = arith.addf %414, %415 : vector<2x64xf32>
    %417 = math.tanh %416 : vector<2x64xf32>
    %418 = arith.mulf %411, %417 : vector<2x64xf32>
    %419 = vector.extract_strided_slice %1 {offsets = [0, 7], sizes = [2, 1], strides = [1, 1]} : vector<2x8xf32> to vector<2x1xf32>
    %420 = vector.extract_strided_slice %1 {offsets = [0, 0], sizes = [2, 1], strides = [1, 1]} : vector<2x8xf32> to vector<2x1xf32>
    %421 = vector.shape_cast %5 : vector<1x64xi1> to vector<1x64xi1>
    %422 = vector.broadcast %421 : vector<1x64xi1> to vector<2x64xi1>
    %423 = vector.shape_cast %419 : vector<2x1xf32> to vector<2x1xf32>
    %424 = vector.broadcast %423 : vector<2x1xf32> to vector<2x64xf32>
    %425 = vector.shape_cast %420 : vector<2x1xf32> to vector<2x1xf32>
    %426 = vector.broadcast %425 : vector<2x1xf32> to vector<2x64xf32>
    %427 = arith.select %422, %424, %426 : vector<2x64xi1>, vector<2x64xf32>
    %cst_150 = arith.constant 0.000000e+00 : f32
    %428 = vector.broadcast %cst_150 : f32 to vector<2x64xf32>
    %429 = arith.cmpf ogt, %427, %428 : vector<2x64xf32>
    %430 = arith.select %429, %418, %377 : vector<2x64xi1>, vector<2x64xf32>
    %cst_151 = arith.constant 0.000000e+00 : f32
    %431 = vector.broadcast %cst_151 : f32 to vector<2x64xf32>
    %432 = arith.cmpf ogt, %427, %431 : vector<2x64xf32>
    %433 = arith.select %432, %416, %380 : vector<2x64xi1>, vector<2x64xf32>
    %cst_152 = arith.constant 0.000000e+00 : f32
    %434 = vector.broadcast %cst_152 : f32 to vector<2x64xf32>
    %435 = arith.cmpf ogt, %427, %434 : vector<2x64xf32>
    %cst_153 = arith.constant 0.000000e+00 : f32
    %436 = vector.broadcast %cst_153 : f32 to vector<2x64xf32>
    %437 = arith.select %435, %418, %436 : vector<2x64xi1>, vector<2x64xf32>
    %438 = vector.extract_strided_slice %437 {offsets = [0, 0], sizes = [2, 32], strides = [1, 1]} : vector<2x64xf32> to vector<2x32xf32>
    %c0_154 = arith.constant 0 : index
    %c7_155 = arith.constant 7 : index
    %c0_156 = arith.constant 0 : index
    %439 = vector.load %arg15[%c0_154, %c7_155, %c0_156] : memref<2x8x32xf32, #tpu.memory_space<vmem>>, vector<2x1x32xf32>
    %440 = vector.shape_cast %439 : vector<2x1x32xf32> to vector<2x32xf32>
    %441 = vector.shape_cast %438 : vector<2x32xf32> to vector<2x1x32xf32>
    tpu.vector_store %arg15[%c0_154, %c7_155, %c0_156], %441 {strides = array<i32>} : memref<2x8x32xf32, #tpu.memory_space<vmem>>, vector<2x1x32xf32>,
    %442 = vector.extract_strided_slice %437 {offsets = [0, 32], sizes = [2, 32], strides = [1, 1]} : vector<2x64xf32> to vector<2x32xf32>
    %c0_157 = arith.constant 0 : index
    %c0_158 = arith.constant 0 : index
    %c0_159 = arith.constant 0 : index
    %443 = vector.load %arg16[%c0_157, %c0_158, %c0_159] : memref<2x8x32xf32, #tpu.memory_space<vmem>>, vector<2x1x32xf32>
    %444 = vector.shape_cast %443 : vector<2x1x32xf32> to vector<2x32xf32>
    %445 = vector.shape_cast %442 : vector<2x32xf32> to vector<2x1x32xf32>
    tpu.vector_store %arg16[%c0_157, %c0_158, %c0_159], %445 {strides = array<i32>} : memref<2x8x32xf32, #tpu.memory_space<vmem>>, vector<2x1x32xf32>,
    %446 = vector.extract_strided_slice %430 {offsets = [0, 0], sizes = [2, 32], strides = [1, 1]} : vector<2x64xf32> to vector<2x32xf32>
    %447 = vector.extract_strided_slice %433 {offsets = [0, 0], sizes = [2, 32], strides = [1, 1]} : vector<2x64xf32> to vector<2x32xf32>
    %c0_160 = arith.constant 0 : index
    %c0_161 = arith.constant 0 : index
    %c0_162 = arith.constant 0 : index
    %448 = vector.load %arg15[%c0_160, %c0_161, %c0_162] : memref<2x8x32xf32, #tpu.memory_space<vmem>>, vector<2x8x32xf32>
    %c0_163 = arith.constant 0 : index
    %c0_164 = arith.constant 0 : index
    %c0_165 = arith.constant 0 : index
    %449 = vector.load %arg16[%c0_163, %c0_164, %c0_165] : memref<2x8x32xf32, #tpu.memory_space<vmem>>, vector<2x8x32xf32>
    %450 = arith.addf %448, %449 : vector<2x8x32xf32>
    %c0_166 = arith.constant 0 : index
    %c0_167 = arith.constant 0 : index
    %c0_168 = arith.constant 0 : index
    %451 = vector.load %arg15[%c0_166, %c0_167, %c0_168] : memref<2x8x32xf32, #tpu.memory_space<vmem>>, vector<2x8x32xf32>
    tpu.vector_store %arg15[%c0_166, %c0_167, %c0_168], %450 {strides = array<i32>} : memref<2x8x32xf32, #tpu.memory_space<vmem>>, vector<2x8x32xf32>,
    %452 = vector.shape_cast %450 : vector<2x8x32xf32> to vector<16x32xf32>
    %453 = arith.truncf %452 : vector<16x32xf32> to vector<16x32xbf16>
    %c0_169 = arith.constant 0 : index
    %c0_170 = arith.constant 0 : index
    %454 = vector.load %arg9[%c0_169, %c0_170] : memref<32x32xbf16, #tpu.memory_space<vmem>>, vector<32x32xbf16>
    %cst_171 = arith.constant dense<0.000000e+00> : vector<16x32xf32>
    %455 = tpu.matmul %453, %454, %cst_171 {dimension_numbers = #tpu.dot_dimension_numbers<[1], [0], [0], [1], [0, 0, 1, 1], [], []>} : vector<16x32xbf16>, vector<32x32xbf16>, vector<16x32xf32> -> vector<16x32xf32>
    %456 = vector.shape_cast %455 : vector<16x32xf32> to vector<2x8x32xf32>
    %c0_172 = arith.constant 0 : index
    %c0_173 = arith.constant 0 : index
    %c0_174 = arith.constant 0 : index
    %457 = vector.load %arg16[%c0_172, %c0_173, %c0_174] : memref<2x8x32xf32, #tpu.memory_space<vmem>>, vector<2x8x32xf32>
    tpu.vector_store %arg16[%c0_172, %c0_173, %c0_174], %456 {strides = array<i32>} : memref<2x8x32xf32, #tpu.memory_space<vmem>>, vector<2x8x32xf32>,
    %c0_175 = arith.constant 0 : index
    %c0_176 = arith.constant 0 : index
    %458 = vector.load %arg7[%c0_175, %c0_176] : memref<64x128xbf16, #tpu.memory_space<vmem>>, vector<64x128xbf16>
    %c0_177 = arith.constant 0 : index
    %c0_178 = arith.constant 0 : index
    %459 = vector.load %arg10[%c0_177, %c0_178] : memref<32x32xbf16, #tpu.memory_space<vmem>>, vector<32x32xbf16>
    %cst_179 = arith.constant 0.000000e+00 : f32
    %460 = vector.broadcast %cst_179 : f32 to vector<2x32xf32>
    %c0_i32 = arith.constant 0 : i32
    %461 = vector.broadcast %c0_i32 : i32 to vector<2x8xi32>
    %462 = tpu.concatenate %460, %446 in 1 : vector<2x32xf32>, vector<2x32xf32> -> vector<2x64xf32>
    %463 = arith.truncf %462 : vector<2x64xf32> to vector<2x64xbf16>
    %cst_180 = arith.constant dense<0.000000e+00> : vector<2x128xf32>
    %464 = tpu.matmul %463, %458, %cst_180 {dimension_numbers = #tpu.dot_dimension_numbers<[1], [0], [0], [1], [0, 0, 1, 1], [], []>} : vector<2x64xbf16>, vector<64x128xbf16>, vector<2x128xf32> -> vector<2x128xf32>
    %465 = vector.broadcast %9 : vector<1x128xf32> to vector<2x128xf32>
    %466 = arith.addf %464, %465 : vector<2x128xf32>
    %467 = vector.extract_strided_slice %466 {offsets = [0, 0], sizes = [2, 96], strides = [1, 1]} : vector<2x128xf32> to vector<2x96xf32>
    %468 = arith.negf %467 : vector<2x96xf32>
    %469 = math.exp %468 : vector<2x96xf32>
    %cst_181 = arith.constant 1.000000e+00 : f32
    %470 = vector.broadcast %cst_181 : f32 to vector<2x96xf32>
    %471 = arith.addf %470, %469 : vector<2x96xf32>
    %472 = arith.divf %470, %471 : vector<2x96xf32>
    %473 = vector.extract_strided_slice %472 {offsets = [0, 0], sizes = [2, 32], strides = [1, 1]} : vector<2x96xf32> to vector<2x32xf32>
    %474 = vector.extract_strided_slice %472 {offsets = [0, 32], sizes = [2, 32], strides = [1, 1]} : vector<2x96xf32> to vector<2x32xf32>
    %475 = vector.extract_strided_slice %472 {offsets = [0, 64], sizes = [2, 32], strides = [1, 1]} : vector<2x96xf32> to vector<2x32xf32>
    %476 = vector.extract_strided_slice %466 {offsets = [0, 96], sizes = [2, 32], strides = [1, 1]} : vector<2x128xf32> to vector<2x32xf32>
    %477 = math.tanh %476 : vector<2x32xf32>
    %478 = arith.mulf %474, %447 : vector<2x32xf32>
    %479 = arith.mulf %473, %477 : vector<2x32xf32>
    %480 = arith.addf %478, %479 : vector<2x32xf32>
    %481 = math.tanh %480 : vector<2x32xf32>
    %482 = arith.mulf %475, %481 : vector<2x32xf32>
    %483 = arith.truncf %482 : vector<2x32xf32> to vector<2x32xbf16>
    %cst_182 = arith.constant dense<0.000000e+00> : vector<2x32xf32>
    %484 = tpu.matmul %483, %459, %cst_182 {dimension_numbers = #tpu.dot_dimension_numbers<[1], [0], [0], [1], [0, 0, 1, 1], [], []>} : vector<2x32xbf16>, vector<32x32xbf16>, vector<2x32xf32> -> vector<2x32xf32>
    %c0_183 = arith.constant 0 : index
    %c0_184 = arith.constant 0 : index
    %c0_185 = arith.constant 0 : index
    %485 = vector.load %arg16[%c0_183, %c0_184, %c0_185] : memref<2x8x32xf32, #tpu.memory_space<vmem>>, vector<2x8x32xf32>
    %486 = vector.shape_cast %484 : vector<2x32xf32> to vector<2x1x32xf32>
    %487 = vector.broadcast %486 : vector<2x1x32xf32> to vector<2x8x32xf32>
    %488 = arith.addf %485, %487 : vector<2x8x32xf32>
    %489 = math.tanh %488 : vector<2x8x32xf32>
    %490 = vector.broadcast %8 : vector<1x1x32xf32> to vector<2x8x32xf32>
    %491 = arith.mulf %489, %490 : vector<2x8x32xf32>
    %cst_186 = arith.constant dense<0.000000e+00> : vector<2x8xf32>
    %492 = vector.multi_reduction <add>, %491, %cst_186 [2] : vector<2x8x32xf32> to vector<2x8xf32>
    %493 = vector.extract_strided_slice %1 {offsets = [0, 0], sizes = [2, 1], strides = [1, 1]} : vector<2x8xf32> to vector<2x1xf32>
    %494 = vector.broadcast %493 : vector<2x1xf32> to vector<2x8xf32>
    %495 = arith.mulf %1, %494 : vector<2x8xf32>
    %cst_187 = arith.constant 0.000000e+00 : f32
    %496 = vector.broadcast %cst_187 : f32 to vector<2x8xf32>
    %497 = arith.cmpf ogt, %495, %496 : vector<2x8xf32>
    %cst_188 = arith.constant 0.000000e+00 : f32
    %cst_189 = arith.constant -103.278931 : f32
    %498 = vector.broadcast %cst_188 : f32 to vector<2x8xf32>
    %499 = vector.broadcast %cst_189 : f32 to vector<2x8xf32>
    %500 = arith.select %497, %498, %499 : vector<2x8xi1>, vector<2x8xf32>
    %501 = arith.addf %492, %500 : vector<2x8xf32>
    %cst_190 = arith.constant dense<0xFF800000> : vector<2xf32>
    %502 = vector.multi_reduction <maximumf>, %501, %cst_190 [1] : vector<2x8xf32> to vector<2xf32>
    %503 = vector.shape_cast %502 : vector<2xf32> to vector<2x1xf32>
    %504 = vector.broadcast %503 : vector<2x1xf32> to vector<2x8xf32>
    %505 = arith.subf %501, %504 : vector<2x8xf32>
    %506 = math.exp %505 : vector<2x8xf32>
    %cst_191 = arith.constant dense<0.000000e+00> : vector<2xf32>
    %507 = vector.multi_reduction <add>, %506, %cst_191 [1] : vector<2x8xf32> to vector<2xf32>
    %508 = vector.shape_cast %507 : vector<2xf32> to vector<2x1xf32>
    %509 = math.log %508 : vector<2x1xf32>
    %510 = vector.broadcast %503 : vector<2x1xf32> to vector<2x8xf32>
    %511 = arith.subf %501, %510 : vector<2x8xf32>
    %512 = vector.broadcast %509 : vector<2x1xf32> to vector<2x8xf32>
    %513 = arith.subf %511, %512 : vector<2x8xf32>
    %c0_192 = arith.constant 0 : index
    %c0_193 = arith.constant 0 : index
    %c0_194 = arith.constant 0 : index
    %514 = vector.load %arg12[%c0_192, %c0_193, %c0_194] : memref<2x8x8xf32, #tpu.memory_space<vmem>>, vector<2x1x8xf32>
    %515 = vector.shape_cast %514 : vector<2x1x8xf32> to vector<2x8xf32>
    %516 = vector.shape_cast %513 : vector<2x8xf32> to vector<2x1x8xf32>
    tpu.vector_store %arg12[%c0_192, %c0_193, %c0_194], %516 {strides = array<i32>} : memref<2x8x8xf32, #tpu.memory_space<vmem>>, vector<2x1x8xf32>,
    %cst_195 = arith.constant 0.000000e+00 : f32
    %517 = vector.broadcast %cst_195 : f32 to vector<2x8xf32>
    %518 = arith.cmpf oeq, %495, %517 : vector<2x8xf32>
    %cst_196 = arith.constant -1.000000e+07 : f32
    %519 = vector.broadcast %cst_196 : f32 to vector<2x8xf32>
    %520 = arith.select %518, %519, %513 : vector<2x8xi1>, vector<2x8xf32>
    %cst_197 = arith.constant dense<0xFF800000> : vector<2xf32>
    %521 = vector.multi_reduction <maximumf>, %520, %cst_197 [1] : vector<2x8xf32> to vector<2xf32>
    %522 = vector.shape_cast %521 : vector<2xf32> to vector<2x1xf32>
    %523 = vector.broadcast %522 : vector<2x1xf32> to vector<2x8xf32>
    %524 = arith.cmpf oeq, %520, %523 : vector<2x8xf32>
    %c8_i32 = arith.constant 8 : i32
    %525 = vector.broadcast %c8_i32 : i32 to vector<2x8xi32>
    %526 = arith.select %524, %6, %525 : vector<2x8xi1>, vector<2x8xi32>
    %cst_198 = arith.constant dense<2147483647> : vector<2xi32>
    %527 = vector.multi_reduction <minsi>, %526, %cst_198 [1] : vector<2x8xi32> to vector<2xi32>
    %528 = vector.shape_cast %527 : vector<2xi32> to vector<2x1xi32>
    %c0_i32_199 = arith.constant 0 : i32
    %529 = vector.broadcast %c0_i32_199 : i32 to vector<2x8xi32>
    %530 = arith.cmpi eq, %6, %529 : vector<2x8xi32>
    %531 = vector.shape_cast %528 : vector<2x1xi32> to vector<2x1xi32>
    %532 = vector.broadcast %531 : vector<2x1xi32> to vector<2x8xi32>
    %533 = arith.select %530, %532, %461 : vector<2x8xi1>, vector<2x8xi32>
    %534 = vector.broadcast %528 : vector<2x1xi32> to vector<2x8xi32>
    %535 = arith.cmpi eq, %6, %534 : vector<2x8xi32>
    %536 = arith.extui %535 : vector<2x8xi1> to vector<2x8xi32>
    %537 = arith.sitofp %536 : vector<2x8xi32> to vector<2x8xf32>
    %538 = vector.shape_cast %537 : vector<2x8xf32> to vector<2x8x1xf32>
    %c0_200 = arith.constant 0 : index
    %c0_201 = arith.constant 0 : index
    %c0_202 = arith.constant 0 : index
    %539 = vector.load %arg15[%c0_200, %c0_201, %c0_202] : memref<2x8x32xf32, #tpu.memory_space<vmem>>, vector<2x8x32xf32>
    %540 = vector.broadcast %538 : vector<2x8x1xf32> to vector<2x8x32xf32>
    %541 = arith.mulf %540, %539 : vector<2x8x32xf32>
    %cst_203 = arith.constant dense<0.000000e+00> : vector<2x32xf32>
    %542 = vector.multi_reduction <add>, %541, %cst_203 [1] : vector<2x8x32xf32> to vector<2x32xf32>
    %543 = tpu.concatenate %542, %482 in 1 : vector<2x32xf32>, vector<2x32xf32> -> vector<2x64xf32>
    %544 = arith.truncf %543 : vector<2x64xf32> to vector<2x64xbf16>
    %cst_204 = arith.constant dense<0.000000e+00> : vector<2x128xf32>
    %545 = tpu.matmul %544, %458, %cst_204 {dimension_numbers = #tpu.dot_dimension_numbers<[1], [0], [0], [1], [0, 0, 1, 1], [], []>} : vector<2x64xbf16>, vector<64x128xbf16>, vector<2x128xf32> -> vector<2x128xf32>
    %546 = vector.broadcast %9 : vector<1x128xf32> to vector<2x128xf32>
    %547 = arith.addf %545, %546 : vector<2x128xf32>
    %548 = vector.extract_strided_slice %547 {offsets = [0, 0], sizes = [2, 96], strides = [1, 1]} : vector<2x128xf32> to vector<2x96xf32>
    %549 = arith.negf %548 : vector<2x96xf32>
    %550 = math.exp %549 : vector<2x96xf32>
    %cst_205 = arith.constant 1.000000e+00 : f32
    %551 = vector.broadcast %cst_205 : f32 to vector<2x96xf32>
    %552 = arith.addf %551, %550 : vector<2x96xf32>
    %553 = arith.divf %551, %552 : vector<2x96xf32>
    %554 = vector.extract_strided_slice %553 {offsets = [0, 0], sizes = [2, 32], strides = [1, 1]} : vector<2x96xf32> to vector<2x32xf32>
    %555 = vector.extract_strided_slice %553 {offsets = [0, 32], sizes = [2, 32], strides = [1, 1]} : vector<2x96xf32> to vector<2x32xf32>
    %556 = vector.extract_strided_slice %553 {offsets = [0, 64], sizes = [2, 32], strides = [1, 1]} : vector<2x96xf32> to vector<2x32xf32>
    %557 = vector.extract_strided_slice %547 {offsets = [0, 96], sizes = [2, 32], strides = [1, 1]} : vector<2x128xf32> to vector<2x32xf32>
    %558 = math.tanh %557 : vector<2x32xf32>
    %559 = arith.mulf %555, %480 : vector<2x32xf32>
    %560 = arith.mulf %554, %558 : vector<2x32xf32>
    %561 = arith.addf %559, %560 : vector<2x32xf32>
    %562 = math.tanh %561 : vector<2x32xf32>
    %563 = arith.mulf %556, %562 : vector<2x32xf32>
    %564 = arith.truncf %563 : vector<2x32xf32> to vector<2x32xbf16>
    %cst_206 = arith.constant dense<0.000000e+00> : vector<2x32xf32>
    %565 = tpu.matmul %564, %459, %cst_206 {dimension_numbers = #tpu.dot_dimension_numbers<[1], [0], [0], [1], [0, 0, 1, 1], [], []>} : vector<2x32xbf16>, vector<32x32xbf16>, vector<2x32xf32> -> vector<2x32xf32>
    %c0_207 = arith.constant 0 : index
    %c0_208 = arith.constant 0 : index
    %c0_209 = arith.constant 0 : index
    %566 = vector.load %arg16[%c0_207, %c0_208, %c0_209] : memref<2x8x32xf32, #tpu.memory_space<vmem>>, vector<2x8x32xf32>
    %567 = vector.shape_cast %565 : vector<2x32xf32> to vector<2x1x32xf32>
    %568 = vector.broadcast %567 : vector<2x1x32xf32> to vector<2x8x32xf32>
    %569 = arith.addf %566, %568 : vector<2x8x32xf32>
    %570 = math.tanh %569 : vector<2x8x32xf32>
    %571 = vector.broadcast %8 : vector<1x1x32xf32> to vector<2x8x32xf32>
    %572 = arith.mulf %570, %571 : vector<2x8x32xf32>
    %cst_210 = arith.constant dense<0.000000e+00> : vector<2x8xf32>
    %573 = vector.multi_reduction <add>, %572, %cst_210 [2] : vector<2x8x32xf32> to vector<2x8xf32>
    %574 = vector.extract_strided_slice %1 {offsets = [0, 1], sizes = [2, 1], strides = [1, 1]} : vector<2x8xf32> to vector<2x1xf32>
    %575 = vector.broadcast %574 : vector<2x1xf32> to vector<2x8xf32>
    %576 = arith.mulf %1, %575 : vector<2x8xf32>
    %cst_211 = arith.constant 0.000000e+00 : f32
    %577 = vector.broadcast %cst_211 : f32 to vector<2x8xf32>
    %578 = arith.cmpf ogt, %576, %577 : vector<2x8xf32>
    %cst_212 = arith.constant 0.000000e+00 : f32
    %cst_213 = arith.constant -103.278931 : f32
    %579 = vector.broadcast %cst_212 : f32 to vector<2x8xf32>
    %580 = vector.broadcast %cst_213 : f32 to vector<2x8xf32>
    %581 = arith.select %578, %579, %580 : vector<2x8xi1>, vector<2x8xf32>
    %582 = arith.addf %573, %581 : vector<2x8xf32>
    %cst_214 = arith.constant dense<0xFF800000> : vector<2xf32>
    %583 = vector.multi_reduction <maximumf>, %582, %cst_214 [1] : vector<2x8xf32> to vector<2xf32>
    %584 = vector.shape_cast %583 : vector<2xf32> to vector<2x1xf32>
    %585 = vector.broadcast %584 : vector<2x1xf32> to vector<2x8xf32>
    %586 = arith.subf %582, %585 : vector<2x8xf32>
    %587 = math.exp %586 : vector<2x8xf32>
    %cst_215 = arith.constant dense<0.000000e+00> : vector<2xf32>
    %588 = vector.multi_reduction <add>, %587, %cst_215 [1] : vector<2x8xf32> to vector<2xf32>
    %589 = vector.shape_cast %588 : vector<2xf32> to vector<2x1xf32>
    %590 = math.log %589 : vector<2x1xf32>
    %591 = vector.broadcast %584 : vector<2x1xf32> to vector<2x8xf32>
    %592 = arith.subf %582, %591 : vector<2x8xf32>
    %593 = vector.broadcast %590 : vector<2x1xf32> to vector<2x8xf32>
    %594 = arith.subf %592, %593 : vector<2x8xf32>
    %c0_216 = arith.constant 0 : index
    %c1_217 = arith.constant 1 : index
    %c0_218 = arith.constant 0 : index
    %595 = vector.load %arg12[%c0_216, %c1_217, %c0_218] : memref<2x8x8xf32, #tpu.memory_space<vmem>>, vector<2x1x8xf32>
    %596 = vector.shape_cast %595 : vector<2x1x8xf32> to vector<2x8xf32>
    %597 = vector.shape_cast %594 : vector<2x8xf32> to vector<2x1x8xf32>
    tpu.vector_store %arg12[%c0_216, %c1_217, %c0_218], %597 {strides = array<i32>} : memref<2x8x8xf32, #tpu.memory_space<vmem>>, vector<2x1x8xf32>,
    %cst_219 = arith.constant 0.000000e+00 : f32
    %598 = vector.broadcast %cst_219 : f32 to vector<2x8xf32>
    %599 = arith.cmpf oeq, %576, %598 : vector<2x8xf32>
    %cst_220 = arith.constant -1.000000e+07 : f32
    %600 = vector.broadcast %cst_220 : f32 to vector<2x8xf32>
    %601 = arith.select %599, %600, %594 : vector<2x8xi1>, vector<2x8xf32>
    %cst_221 = arith.constant dense<0xFF800000> : vector<2xf32>
    %602 = vector.multi_reduction <maximumf>, %601, %cst_221 [1] : vector<2x8xf32> to vector<2xf32>
    %603 = vector.shape_cast %602 : vector<2xf32> to vector<2x1xf32>
    %604 = vector.broadcast %603 : vector<2x1xf32> to vector<2x8xf32>
    %605 = arith.cmpf oeq, %601, %604 : vector<2x8xf32>
    %c8_i32_222 = arith.constant 8 : i32
    %606 = vector.broadcast %c8_i32_222 : i32 to vector<2x8xi32>
    %607 = arith.select %605, %6, %606 : vector<2x8xi1>, vector<2x8xi32>
    %cst_223 = arith.constant dense<2147483647> : vector<2xi32>
    %608 = vector.multi_reduction <minsi>, %607, %cst_223 [1] : vector<2x8xi32> to vector<2xi32>
    %609 = vector.shape_cast %608 : vector<2xi32> to vector<2x1xi32>
    %c1_i32 = arith.constant 1 : i32
    %610 = vector.broadcast %c1_i32 : i32 to vector<2x8xi32>
    %611 = arith.cmpi eq, %6, %610 : vector<2x8xi32>
    %612 = vector.shape_cast %609 : vector<2x1xi32> to vector<2x1xi32>
    %613 = vector.broadcast %612 : vector<2x1xi32> to vector<2x8xi32>
    %614 = arith.select %611, %613, %533 : vector<2x8xi1>, vector<2x8xi32>
    %615 = vector.broadcast %609 : vector<2x1xi32> to vector<2x8xi32>
    %616 = arith.cmpi eq, %6, %615 : vector<2x8xi32>
    %617 = arith.extui %616 : vector<2x8xi1> to vector<2x8xi32>
    %618 = arith.sitofp %617 : vector<2x8xi32> to vector<2x8xf32>
    %619 = vector.shape_cast %618 : vector<2x8xf32> to vector<2x8x1xf32>
    %c0_224 = arith.constant 0 : index
    %c0_225 = arith.constant 0 : index
    %c0_226 = arith.constant 0 : index
    %620 = vector.load %arg15[%c0_224, %c0_225, %c0_226] : memref<2x8x32xf32, #tpu.memory_space<vmem>>, vector<2x8x32xf32>
    %621 = vector.broadcast %619 : vector<2x8x1xf32> to vector<2x8x32xf32>
    %622 = arith.mulf %621, %620 : vector<2x8x32xf32>
    %cst_227 = arith.constant dense<0.000000e+00> : vector<2x32xf32>
    %623 = vector.multi_reduction <add>, %622, %cst_227 [1] : vector<2x8x32xf32> to vector<2x32xf32>
    %624 = tpu.concatenate %623, %563 in 1 : vector<2x32xf32>, vector<2x32xf32> -> vector<2x64xf32>
    %625 = arith.truncf %624 : vector<2x64xf32> to vector<2x64xbf16>
    %cst_228 = arith.constant dense<0.000000e+00> : vector<2x128xf32>
    %626 = tpu.matmul %625, %458, %cst_228 {dimension_numbers = #tpu.dot_dimension_numbers<[1], [0], [0], [1], [0, 0, 1, 1], [], []>} : vector<2x64xbf16>, vector<64x128xbf16>, vector<2x128xf32> -> vector<2x128xf32>
    %627 = vector.broadcast %9 : vector<1x128xf32> to vector<2x128xf32>
    %628 = arith.addf %626, %627 : vector<2x128xf32>
    %629 = vector.extract_strided_slice %628 {offsets = [0, 0], sizes = [2, 96], strides = [1, 1]} : vector<2x128xf32> to vector<2x96xf32>
    %630 = arith.negf %629 : vector<2x96xf32>
    %631 = math.exp %630 : vector<2x96xf32>
    %cst_229 = arith.constant 1.000000e+00 : f32
    %632 = vector.broadcast %cst_229 : f32 to vector<2x96xf32>
    %633 = arith.addf %632, %631 : vector<2x96xf32>
    %634 = arith.divf %632, %633 : vector<2x96xf32>
    %635 = vector.extract_strided_slice %634 {offsets = [0, 0], sizes = [2, 32], strides = [1, 1]} : vector<2x96xf32> to vector<2x32xf32>
    %636 = vector.extract_strided_slice %634 {offsets = [0, 32], sizes = [2, 32], strides = [1, 1]} : vector<2x96xf32> to vector<2x32xf32>
    %637 = vector.extract_strided_slice %634 {offsets = [0, 64], sizes = [2, 32], strides = [1, 1]} : vector<2x96xf32> to vector<2x32xf32>
    %638 = vector.extract_strided_slice %628 {offsets = [0, 96], sizes = [2, 32], strides = [1, 1]} : vector<2x128xf32> to vector<2x32xf32>
    %639 = math.tanh %638 : vector<2x32xf32>
    %640 = arith.mulf %636, %561 : vector<2x32xf32>
    %641 = arith.mulf %635, %639 : vector<2x32xf32>
    %642 = arith.addf %640, %641 : vector<2x32xf32>
    %643 = math.tanh %642 : vector<2x32xf32>
    %644 = arith.mulf %637, %643 : vector<2x32xf32>
    %645 = arith.truncf %644 : vector<2x32xf32> to vector<2x32xbf16>
    %cst_230 = arith.constant dense<0.000000e+00> : vector<2x32xf32>
    %646 = tpu.matmul %645, %459, %cst_230 {dimension_numbers = #tpu.dot_dimension_numbers<[1], [0], [0], [1], [0, 0, 1, 1], [], []>} : vector<2x32xbf16>, vector<32x32xbf16>, vector<2x32xf32> -> vector<2x32xf32>
    %c0_231 = arith.constant 0 : index
    %c0_232 = arith.constant 0 : index
    %c0_233 = arith.constant 0 : index
    %647 = vector.load %arg16[%c0_231, %c0_232, %c0_233] : memref<2x8x32xf32, #tpu.memory_space<vmem>>, vector<2x8x32xf32>
    %648 = vector.shape_cast %646 : vector<2x32xf32> to vector<2x1x32xf32>
    %649 = vector.broadcast %648 : vector<2x1x32xf32> to vector<2x8x32xf32>
    %650 = arith.addf %647, %649 : vector<2x8x32xf32>
    %651 = math.tanh %650 : vector<2x8x32xf32>
    %652 = vector.broadcast %8 : vector<1x1x32xf32> to vector<2x8x32xf32>
    %653 = arith.mulf %651, %652 : vector<2x8x32xf32>
    %cst_234 = arith.constant dense<0.000000e+00> : vector<2x8xf32>
    %654 = vector.multi_reduction <add>, %653, %cst_234 [2] : vector<2x8x32xf32> to vector<2x8xf32>
    %655 = vector.extract_strided_slice %1 {offsets = [0, 2], sizes = [2, 1], strides = [1, 1]} : vector<2x8xf32> to vector<2x1xf32>
    %656 = vector.broadcast %655 : vector<2x1xf32> to vector<2x8xf32>
    %657 = arith.mulf %1, %656 : vector<2x8xf32>
    %cst_235 = arith.constant 0.000000e+00 : f32
    %658 = vector.broadcast %cst_235 : f32 to vector<2x8xf32>
    %659 = arith.cmpf ogt, %657, %658 : vector<2x8xf32>
    %cst_236 = arith.constant 0.000000e+00 : f32
    %cst_237 = arith.constant -103.278931 : f32
    %660 = vector.broadcast %cst_236 : f32 to vector<2x8xf32>
    %661 = vector.broadcast %cst_237 : f32 to vector<2x8xf32>
    %662 = arith.select %659, %660, %661 : vector<2x8xi1>, vector<2x8xf32>
    %663 = arith.addf %654, %662 : vector<2x8xf32>
    %cst_238 = arith.constant dense<0xFF800000> : vector<2xf32>
    %664 = vector.multi_reduction <maximumf>, %663, %cst_238 [1] : vector<2x8xf32> to vector<2xf32>
    %665 = vector.shape_cast %664 : vector<2xf32> to vector<2x1xf32>
    %666 = vector.broadcast %665 : vector<2x1xf32> to vector<2x8xf32>
    %667 = arith.subf %663, %666 : vector<2x8xf32>
    %668 = math.exp %667 : vector<2x8xf32>
    %cst_239 = arith.constant dense<0.000000e+00> : vector<2xf32>
    %669 = vector.multi_reduction <add>, %668, %cst_239 [1] : vector<2x8xf32> to vector<2xf32>
    %670 = vector.shape_cast %669 : vector<2xf32> to vector<2x1xf32>
    %671 = math.log %670 : vector<2x1xf32>
    %672 = vector.broadcast %665 : vector<2x1xf32> to vector<2x8xf32>
    %673 = arith.subf %663, %672 : vector<2x8xf32>
    %674 = vector.broadcast %671 : vector<2x1xf32> to vector<2x8xf32>
    %675 = arith.subf %673, %674 : vector<2x8xf32>
    %c0_240 = arith.constant 0 : index
    %c2_241 = arith.constant 2 : index
    %c0_242 = arith.constant 0 : index
    %676 = vector.load %arg12[%c0_240, %c2_241, %c0_242] : memref<2x8x8xf32, #tpu.memory_space<vmem>>, vector<2x1x8xf32>
    %677 = vector.shape_cast %676 : vector<2x1x8xf32> to vector<2x8xf32>
    %678 = vector.shape_cast %675 : vector<2x8xf32> to vector<2x1x8xf32>
    tpu.vector_store %arg12[%c0_240, %c2_241, %c0_242], %678 {strides = array<i32>} : memref<2x8x8xf32, #tpu.memory_space<vmem>>, vector<2x1x8xf32>,
    %cst_243 = arith.constant 0.000000e+00 : f32
    %679 = vector.broadcast %cst_243 : f32 to vector<2x8xf32>
    %680 = arith.cmpf oeq, %657, %679 : vector<2x8xf32>
    %cst_244 = arith.constant -1.000000e+07 : f32
    %681 = vector.broadcast %cst_244 : f32 to vector<2x8xf32>
    %682 = arith.select %680, %681, %675 : vector<2x8xi1>, vector<2x8xf32>
    %cst_245 = arith.constant dense<0xFF800000> : vector<2xf32>
    %683 = vector.multi_reduction <maximumf>, %682, %cst_245 [1] : vector<2x8xf32> to vector<2xf32>
    %684 = vector.shape_cast %683 : vector<2xf32> to vector<2x1xf32>
    %685 = vector.broadcast %684 : vector<2x1xf32> to vector<2x8xf32>
    %686 = arith.cmpf oeq, %682, %685 : vector<2x8xf32>
    %c8_i32_246 = arith.constant 8 : i32
    %687 = vector.broadcast %c8_i32_246 : i32 to vector<2x8xi32>
    %688 = arith.select %686, %6, %687 : vector<2x8xi1>, vector<2x8xi32>
    %cst_247 = arith.constant dense<2147483647> : vector<2xi32>
    %689 = vector.multi_reduction <minsi>, %688, %cst_247 [1] : vector<2x8xi32> to vector<2xi32>
    %690 = vector.shape_cast %689 : vector<2xi32> to vector<2x1xi32>
    %c2_i32 = arith.constant 2 : i32
    %691 = vector.broadcast %c2_i32 : i32 to vector<2x8xi32>
    %692 = arith.cmpi eq, %6, %691 : vector<2x8xi32>
    %693 = vector.shape_cast %690 : vector<2x1xi32> to vector<2x1xi32>
    %694 = vector.broadcast %693 : vector<2x1xi32> to vector<2x8xi32>
    %695 = arith.select %692, %694, %614 : vector<2x8xi1>, vector<2x8xi32>
    %696 = vector.broadcast %690 : vector<2x1xi32> to vector<2x8xi32>
    %697 = arith.cmpi eq, %6, %696 : vector<2x8xi32>
    %698 = arith.extui %697 : vector<2x8xi1> to vector<2x8xi32>
    %699 = arith.sitofp %698 : vector<2x8xi32> to vector<2x8xf32>
    %700 = vector.shape_cast %699 : vector<2x8xf32> to vector<2x8x1xf32>
    %c0_248 = arith.constant 0 : index
    %c0_249 = arith.constant 0 : index
    %c0_250 = arith.constant 0 : index
    %701 = vector.load %arg15[%c0_248, %c0_249, %c0_250] : memref<2x8x32xf32, #tpu.memory_space<vmem>>, vector<2x8x32xf32>
    %702 = vector.broadcast %700 : vector<2x8x1xf32> to vector<2x8x32xf32>
    %703 = arith.mulf %702, %701 : vector<2x8x32xf32>
    %cst_251 = arith.constant dense<0.000000e+00> : vector<2x32xf32>
    %704 = vector.multi_reduction <add>, %703, %cst_251 [1] : vector<2x8x32xf32> to vector<2x32xf32>
    %705 = tpu.concatenate %704, %644 in 1 : vector<2x32xf32>, vector<2x32xf32> -> vector<2x64xf32>
    %706 = arith.truncf %705 : vector<2x64xf32> to vector<2x64xbf16>
    %cst_252 = arith.constant dense<0.000000e+00> : vector<2x128xf32>
    %707 = tpu.matmul %706, %458, %cst_252 {dimension_numbers = #tpu.dot_dimension_numbers<[1], [0], [0], [1], [0, 0, 1, 1], [], []>} : vector<2x64xbf16>, vector<64x128xbf16>, vector<2x128xf32> -> vector<2x128xf32>
    %708 = vector.broadcast %9 : vector<1x128xf32> to vector<2x128xf32>
    %709 = arith.addf %707, %708 : vector<2x128xf32>
    %710 = vector.extract_strided_slice %709 {offsets = [0, 0], sizes = [2, 96], strides = [1, 1]} : vector<2x128xf32> to vector<2x96xf32>
    %711 = arith.negf %710 : vector<2x96xf32>
    %712 = math.exp %711 : vector<2x96xf32>
    %cst_253 = arith.constant 1.000000e+00 : f32
    %713 = vector.broadcast %cst_253 : f32 to vector<2x96xf32>
    %714 = arith.addf %713, %712 : vector<2x96xf32>
    %715 = arith.divf %713, %714 : vector<2x96xf32>
    %716 = vector.extract_strided_slice %715 {offsets = [0, 0], sizes = [2, 32], strides = [1, 1]} : vector<2x96xf32> to vector<2x32xf32>
    %717 = vector.extract_strided_slice %715 {offsets = [0, 32], sizes = [2, 32], strides = [1, 1]} : vector<2x96xf32> to vector<2x32xf32>
    %718 = vector.extract_strided_slice %715 {offsets = [0, 64], sizes = [2, 32], strides = [1, 1]} : vector<2x96xf32> to vector<2x32xf32>
    %719 = vector.extract_strided_slice %709 {offsets = [0, 96], sizes = [2, 32], strides = [1, 1]} : vector<2x128xf32> to vector<2x32xf32>
    %720 = math.tanh %719 : vector<2x32xf32>
    %721 = arith.mulf %717, %642 : vector<2x32xf32>
    %722 = arith.mulf %716, %720 : vector<2x32xf32>
    %723 = arith.addf %721, %722 : vector<2x32xf32>
    %724 = math.tanh %723 : vector<2x32xf32>
    %725 = arith.mulf %718, %724 : vector<2x32xf32>
    %726 = arith.truncf %725 : vector<2x32xf32> to vector<2x32xbf16>
    %cst_254 = arith.constant dense<0.000000e+00> : vector<2x32xf32>
    %727 = tpu.matmul %726, %459, %cst_254 {dimension_numbers = #tpu.dot_dimension_numbers<[1], [0], [0], [1], [0, 0, 1, 1], [], []>} : vector<2x32xbf16>, vector<32x32xbf16>, vector<2x32xf32> -> vector<2x32xf32>
    %c0_255 = arith.constant 0 : index
    %c0_256 = arith.constant 0 : index
    %c0_257 = arith.constant 0 : index
    %728 = vector.load %arg16[%c0_255, %c0_256, %c0_257] : memref<2x8x32xf32, #tpu.memory_space<vmem>>, vector<2x8x32xf32>
    %729 = vector.shape_cast %727 : vector<2x32xf32> to vector<2x1x32xf32>
    %730 = vector.broadcast %729 : vector<2x1x32xf32> to vector<2x8x32xf32>
    %731 = arith.addf %728, %730 : vector<2x8x32xf32>
    %732 = math.tanh %731 : vector<2x8x32xf32>
    %733 = vector.broadcast %8 : vector<1x1x32xf32> to vector<2x8x32xf32>
    %734 = arith.mulf %732, %733 : vector<2x8x32xf32>
    %cst_258 = arith.constant dense<0.000000e+00> : vector<2x8xf32>
    %735 = vector.multi_reduction <add>, %734, %cst_258 [2] : vector<2x8x32xf32> to vector<2x8xf32>
    %736 = vector.extract_strided_slice %1 {offsets = [0, 3], sizes = [2, 1], strides = [1, 1]} : vector<2x8xf32> to vector<2x1xf32>
    %737 = vector.broadcast %736 : vector<2x1xf32> to vector<2x8xf32>
    %738 = arith.mulf %1, %737 : vector<2x8xf32>
    %cst_259 = arith.constant 0.000000e+00 : f32
    %739 = vector.broadcast %cst_259 : f32 to vector<2x8xf32>
    %740 = arith.cmpf ogt, %738, %739 : vector<2x8xf32>
    %cst_260 = arith.constant 0.000000e+00 : f32
    %cst_261 = arith.constant -103.278931 : f32
    %741 = vector.broadcast %cst_260 : f32 to vector<2x8xf32>
    %742 = vector.broadcast %cst_261 : f32 to vector<2x8xf32>
    %743 = arith.select %740, %741, %742 : vector<2x8xi1>, vector<2x8xf32>
    %744 = arith.addf %735, %743 : vector<2x8xf32>
    %cst_262 = arith.constant dense<0xFF800000> : vector<2xf32>
    %745 = vector.multi_reduction <maximumf>, %744, %cst_262 [1] : vector<2x8xf32> to vector<2xf32>
    %746 = vector.shape_cast %745 : vector<2xf32> to vector<2x1xf32>
    %747 = vector.broadcast %746 : vector<2x1xf32> to vector<2x8xf32>
    %748 = arith.subf %744, %747 : vector<2x8xf32>
    %749 = math.exp %748 : vector<2x8xf32>
    %cst_263 = arith.constant dense<0.000000e+00> : vector<2xf32>
    %750 = vector.multi_reduction <add>, %749, %cst_263 [1] : vector<2x8xf32> to vector<2xf32>
    %751 = vector.shape_cast %750 : vector<2xf32> to vector<2x1xf32>
    %752 = math.log %751 : vector<2x1xf32>
    %753 = vector.broadcast %746 : vector<2x1xf32> to vector<2x8xf32>
    %754 = arith.subf %744, %753 : vector<2x8xf32>
    %755 = vector.broadcast %752 : vector<2x1xf32> to vector<2x8xf32>
    %756 = arith.subf %754, %755 : vector<2x8xf32>
    %c0_264 = arith.constant 0 : index
    %c3_265 = arith.constant 3 : index
    %c0_266 = arith.constant 0 : index
    %757 = vector.load %arg12[%c0_264, %c3_265, %c0_266] : memref<2x8x8xf32, #tpu.memory_space<vmem>>, vector<2x1x8xf32>
    %758 = vector.shape_cast %757 : vector<2x1x8xf32> to vector<2x8xf32>
    %759 = vector.shape_cast %756 : vector<2x8xf32> to vector<2x1x8xf32>
    tpu.vector_store %arg12[%c0_264, %c3_265, %c0_266], %759 {strides = array<i32>} : memref<2x8x8xf32, #tpu.memory_space<vmem>>, vector<2x1x8xf32>,
    %cst_267 = arith.constant 0.000000e+00 : f32
    %760 = vector.broadcast %cst_267 : f32 to vector<2x8xf32>
    %761 = arith.cmpf oeq, %738, %760 : vector<2x8xf32>
    %cst_268 = arith.constant -1.000000e+07 : f32
    %762 = vector.broadcast %cst_268 : f32 to vector<2x8xf32>
    %763 = arith.select %761, %762, %756 : vector<2x8xi1>, vector<2x8xf32>
    %cst_269 = arith.constant dense<0xFF800000> : vector<2xf32>
    %764 = vector.multi_reduction <maximumf>, %763, %cst_269 [1] : vector<2x8xf32> to vector<2xf32>
    %765 = vector.shape_cast %764 : vector<2xf32> to vector<2x1xf32>
    %766 = vector.broadcast %765 : vector<2x1xf32> to vector<2x8xf32>
    %767 = arith.cmpf oeq, %763, %766 : vector<2x8xf32>
    %c8_i32_270 = arith.constant 8 : i32
    %768 = vector.broadcast %c8_i32_270 : i32 to vector<2x8xi32>
    %769 = arith.select %767, %6, %768 : vector<2x8xi1>, vector<2x8xi32>
    %cst_271 = arith.constant dense<2147483647> : vector<2xi32>
    %770 = vector.multi_reduction <minsi>, %769, %cst_271 [1] : vector<2x8xi32> to vector<2xi32>
    %771 = vector.shape_cast %770 : vector<2xi32> to vector<2x1xi32>
    %c3_i32 = arith.constant 3 : i32
    %772 = vector.broadcast %c3_i32 : i32 to vector<2x8xi32>
    %773 = arith.cmpi eq, %6, %772 : vector<2x8xi32>
    %774 = vector.shape_cast %771 : vector<2x1xi32> to vector<2x1xi32>
    %775 = vector.broadcast %774 : vector<2x1xi32> to vector<2x8xi32>
    %776 = arith.select %773, %775, %695 : vector<2x8xi1>, vector<2x8xi32>
    %777 = vector.broadcast %771 : vector<2x1xi32> to vector<2x8xi32>
    %778 = arith.cmpi eq, %6, %777 : vector<2x8xi32>
    %779 = arith.extui %778 : vector<2x8xi1> to vector<2x8xi32>
    %780 = arith.sitofp %779 : vector<2x8xi32> to vector<2x8xf32>
    %781 = vector.shape_cast %780 : vector<2x8xf32> to vector<2x8x1xf32>
    %c0_272 = arith.constant 0 : index
    %c0_273 = arith.constant 0 : index
    %c0_274 = arith.constant 0 : index
    %782 = vector.load %arg15[%c0_272, %c0_273, %c0_274] : memref<2x8x32xf32, #tpu.memory_space<vmem>>, vector<2x8x32xf32>
    %783 = vector.broadcast %781 : vector<2x8x1xf32> to vector<2x8x32xf32>
    %784 = arith.mulf %783, %782 : vector<2x8x32xf32>
    %cst_275 = arith.constant dense<0.000000e+00> : vector<2x32xf32>
    %785 = vector.multi_reduction <add>, %784, %cst_275 [1] : vector<2x8x32xf32> to vector<2x32xf32>
    %786 = tpu.concatenate %785, %725 in 1 : vector<2x32xf32>, vector<2x32xf32> -> vector<2x64xf32>
    %787 = arith.truncf %786 : vector<2x64xf32> to vector<2x64xbf16>
    %cst_276 = arith.constant dense<0.000000e+00> : vector<2x128xf32>
    %788 = tpu.matmul %787, %458, %cst_276 {dimension_numbers = #tpu.dot_dimension_numbers<[1], [0], [0], [1], [0, 0, 1, 1], [], []>} : vector<2x64xbf16>, vector<64x128xbf16>, vector<2x128xf32> -> vector<2x128xf32>
    %789 = vector.broadcast %9 : vector<1x128xf32> to vector<2x128xf32>
    %790 = arith.addf %788, %789 : vector<2x128xf32>
    %791 = vector.extract_strided_slice %790 {offsets = [0, 0], sizes = [2, 96], strides = [1, 1]} : vector<2x128xf32> to vector<2x96xf32>
    %792 = arith.negf %791 : vector<2x96xf32>
    %793 = math.exp %792 : vector<2x96xf32>
    %cst_277 = arith.constant 1.000000e+00 : f32
    %794 = vector.broadcast %cst_277 : f32 to vector<2x96xf32>
    %795 = arith.addf %794, %793 : vector<2x96xf32>
    %796 = arith.divf %794, %795 : vector<2x96xf32>
    %797 = vector.extract_strided_slice %796 {offsets = [0, 0], sizes = [2, 32], strides = [1, 1]} : vector<2x96xf32> to vector<2x32xf32>
    %798 = vector.extract_strided_slice %796 {offsets = [0, 32], sizes = [2, 32], strides = [1, 1]} : vector<2x96xf32> to vector<2x32xf32>
    %799 = vector.extract_strided_slice %796 {offsets = [0, 64], sizes = [2, 32], strides = [1, 1]} : vector<2x96xf32> to vector<2x32xf32>
    %800 = vector.extract_strided_slice %790 {offsets = [0, 96], sizes = [2, 32], strides = [1, 1]} : vector<2x128xf32> to vector<2x32xf32>
    %801 = math.tanh %800 : vector<2x32xf32>
    %802 = arith.mulf %798, %723 : vector<2x32xf32>
    %803 = arith.mulf %797, %801 : vector<2x32xf32>
    %804 = arith.addf %802, %803 : vector<2x32xf32>
    %805 = math.tanh %804 : vector<2x32xf32>
    %806 = arith.mulf %799, %805 : vector<2x32xf32>
    %807 = arith.truncf %806 : vector<2x32xf32> to vector<2x32xbf16>
    %cst_278 = arith.constant dense<0.000000e+00> : vector<2x32xf32>
    %808 = tpu.matmul %807, %459, %cst_278 {dimension_numbers = #tpu.dot_dimension_numbers<[1], [0], [0], [1], [0, 0, 1, 1], [], []>} : vector<2x32xbf16>, vector<32x32xbf16>, vector<2x32xf32> -> vector<2x32xf32>
    %c0_279 = arith.constant 0 : index
    %c0_280 = arith.constant 0 : index
    %c0_281 = arith.constant 0 : index
    %809 = vector.load %arg16[%c0_279, %c0_280, %c0_281] : memref<2x8x32xf32, #tpu.memory_space<vmem>>, vector<2x8x32xf32>
    %810 = vector.shape_cast %808 : vector<2x32xf32> to vector<2x1x32xf32>
    %811 = vector.broadcast %810 : vector<2x1x32xf32> to vector<2x8x32xf32>
    %812 = arith.addf %809, %811 : vector<2x8x32xf32>
    %813 = math.tanh %812 : vector<2x8x32xf32>
    %814 = vector.broadcast %8 : vector<1x1x32xf32> to vector<2x8x32xf32>
    %815 = arith.mulf %813, %814 : vector<2x8x32xf32>
    %cst_282 = arith.constant dense<0.000000e+00> : vector<2x8xf32>
    %816 = vector.multi_reduction <add>, %815, %cst_282 [2] : vector<2x8x32xf32> to vector<2x8xf32>
    %817 = vector.extract_strided_slice %1 {offsets = [0, 4], sizes = [2, 1], strides = [1, 1]} : vector<2x8xf32> to vector<2x1xf32>
    %818 = vector.broadcast %817 : vector<2x1xf32> to vector<2x8xf32>
    %819 = arith.mulf %1, %818 : vector<2x8xf32>
    %cst_283 = arith.constant 0.000000e+00 : f32
    %820 = vector.broadcast %cst_283 : f32 to vector<2x8xf32>
    %821 = arith.cmpf ogt, %819, %820 : vector<2x8xf32>
    %cst_284 = arith.constant 0.000000e+00 : f32
    %cst_285 = arith.constant -103.278931 : f32
    %822 = vector.broadcast %cst_284 : f32 to vector<2x8xf32>
    %823 = vector.broadcast %cst_285 : f32 to vector<2x8xf32>
    %824 = arith.select %821, %822, %823 : vector<2x8xi1>, vector<2x8xf32>
    %825 = arith.addf %816, %824 : vector<2x8xf32>
    %cst_286 = arith.constant dense<0xFF800000> : vector<2xf32>
    %826 = vector.multi_reduction <maximumf>, %825, %cst_286 [1] : vector<2x8xf32> to vector<2xf32>
    %827 = vector.shape_cast %826 : vector<2xf32> to vector<2x1xf32>
    %828 = vector.broadcast %827 : vector<2x1xf32> to vector<2x8xf32>
    %829 = arith.subf %825, %828 : vector<2x8xf32>
    %830 = math.exp %829 : vector<2x8xf32>
    %cst_287 = arith.constant dense<0.000000e+00> : vector<2xf32>
    %831 = vector.multi_reduction <add>, %830, %cst_287 [1] : vector<2x8xf32> to vector<2xf32>
    %832 = vector.shape_cast %831 : vector<2xf32> to vector<2x1xf32>
    %833 = math.log %832 : vector<2x1xf32>
    %834 = vector.broadcast %827 : vector<2x1xf32> to vector<2x8xf32>
    %835 = arith.subf %825, %834 : vector<2x8xf32>
    %836 = vector.broadcast %833 : vector<2x1xf32> to vector<2x8xf32>
    %837 = arith.subf %835, %836 : vector<2x8xf32>
    %c0_288 = arith.constant 0 : index
    %c4_289 = arith.constant 4 : index
    %c0_290 = arith.constant 0 : index
    %838 = vector.load %arg12[%c0_288, %c4_289, %c0_290] : memref<2x8x8xf32, #tpu.memory_space<vmem>>, vector<2x1x8xf32>
    %839 = vector.shape_cast %838 : vector<2x1x8xf32> to vector<2x8xf32>
    %840 = vector.shape_cast %837 : vector<2x8xf32> to vector<2x1x8xf32>
    tpu.vector_store %arg12[%c0_288, %c4_289, %c0_290], %840 {strides = array<i32>} : memref<2x8x8xf32, #tpu.memory_space<vmem>>, vector<2x1x8xf32>,
    %cst_291 = arith.constant 0.000000e+00 : f32
    %841 = vector.broadcast %cst_291 : f32 to vector<2x8xf32>
    %842 = arith.cmpf oeq, %819, %841 : vector<2x8xf32>
    %cst_292 = arith.constant -1.000000e+07 : f32
    %843 = vector.broadcast %cst_292 : f32 to vector<2x8xf32>
    %844 = arith.select %842, %843, %837 : vector<2x8xi1>, vector<2x8xf32>
    %cst_293 = arith.constant dense<0xFF800000> : vector<2xf32>
    %845 = vector.multi_reduction <maximumf>, %844, %cst_293 [1] : vector<2x8xf32> to vector<2xf32>
    %846 = vector.shape_cast %845 : vector<2xf32> to vector<2x1xf32>
    %847 = vector.broadcast %846 : vector<2x1xf32> to vector<2x8xf32>
    %848 = arith.cmpf oeq, %844, %847 : vector<2x8xf32>
    %c8_i32_294 = arith.constant 8 : i32
    %849 = vector.broadcast %c8_i32_294 : i32 to vector<2x8xi32>
    %850 = arith.select %848, %6, %849 : vector<2x8xi1>, vector<2x8xi32>
    %cst_295 = arith.constant dense<2147483647> : vector<2xi32>
    %851 = vector.multi_reduction <minsi>, %850, %cst_295 [1] : vector<2x8xi32> to vector<2xi32>
    %852 = vector.shape_cast %851 : vector<2xi32> to vector<2x1xi32>
    %c4_i32 = arith.constant 4 : i32
    %853 = vector.broadcast %c4_i32 : i32 to vector<2x8xi32>
    %854 = arith.cmpi eq, %6, %853 : vector<2x8xi32>
    %855 = vector.shape_cast %852 : vector<2x1xi32> to vector<2x1xi32>
    %856 = vector.broadcast %855 : vector<2x1xi32> to vector<2x8xi32>
    %857 = arith.select %854, %856, %776 : vector<2x8xi1>, vector<2x8xi32>
    %858 = vector.broadcast %852 : vector<2x1xi32> to vector<2x8xi32>
    %859 = arith.cmpi eq, %6, %858 : vector<2x8xi32>
    %860 = arith.extui %859 : vector<2x8xi1> to vector<2x8xi32>
    %861 = arith.sitofp %860 : vector<2x8xi32> to vector<2x8xf32>
    %862 = vector.shape_cast %861 : vector<2x8xf32> to vector<2x8x1xf32>
    %c0_296 = arith.constant 0 : index
    %c0_297 = arith.constant 0 : index
    %c0_298 = arith.constant 0 : index
    %863 = vector.load %arg15[%c0_296, %c0_297, %c0_298] : memref<2x8x32xf32, #tpu.memory_space<vmem>>, vector<2x8x32xf32>
    %864 = vector.broadcast %862 : vector<2x8x1xf32> to vector<2x8x32xf32>
    %865 = arith.mulf %864, %863 : vector<2x8x32xf32>
    %cst_299 = arith.constant dense<0.000000e+00> : vector<2x32xf32>
    %866 = vector.multi_reduction <add>, %865, %cst_299 [1] : vector<2x8x32xf32> to vector<2x32xf32>
    %867 = tpu.concatenate %866, %806 in 1 : vector<2x32xf32>, vector<2x32xf32> -> vector<2x64xf32>
    %868 = arith.truncf %867 : vector<2x64xf32> to vector<2x64xbf16>
    %cst_300 = arith.constant dense<0.000000e+00> : vector<2x128xf32>
    %869 = tpu.matmul %868, %458, %cst_300 {dimension_numbers = #tpu.dot_dimension_numbers<[1], [0], [0], [1], [0, 0, 1, 1], [], []>} : vector<2x64xbf16>, vector<64x128xbf16>, vector<2x128xf32> -> vector<2x128xf32>
    %870 = vector.broadcast %9 : vector<1x128xf32> to vector<2x128xf32>
    %871 = arith.addf %869, %870 : vector<2x128xf32>
    %872 = vector.extract_strided_slice %871 {offsets = [0, 0], sizes = [2, 96], strides = [1, 1]} : vector<2x128xf32> to vector<2x96xf32>
    %873 = arith.negf %872 : vector<2x96xf32>
    %874 = math.exp %873 : vector<2x96xf32>
    %cst_301 = arith.constant 1.000000e+00 : f32
    %875 = vector.broadcast %cst_301 : f32 to vector<2x96xf32>
    %876 = arith.addf %875, %874 : vector<2x96xf32>
    %877 = arith.divf %875, %876 : vector<2x96xf32>
    %878 = vector.extract_strided_slice %877 {offsets = [0, 0], sizes = [2, 32], strides = [1, 1]} : vector<2x96xf32> to vector<2x32xf32>
    %879 = vector.extract_strided_slice %877 {offsets = [0, 32], sizes = [2, 32], strides = [1, 1]} : vector<2x96xf32> to vector<2x32xf32>
    %880 = vector.extract_strided_slice %877 {offsets = [0, 64], sizes = [2, 32], strides = [1, 1]} : vector<2x96xf32> to vector<2x32xf32>
    %881 = vector.extract_strided_slice %871 {offsets = [0, 96], sizes = [2, 32], strides = [1, 1]} : vector<2x128xf32> to vector<2x32xf32>
    %882 = math.tanh %881 : vector<2x32xf32>
    %883 = arith.mulf %879, %804 : vector<2x32xf32>
    %884 = arith.mulf %878, %882 : vector<2x32xf32>
    %885 = arith.addf %883, %884 : vector<2x32xf32>
    %886 = math.tanh %885 : vector<2x32xf32>
    %887 = arith.mulf %880, %886 : vector<2x32xf32>
    %888 = arith.truncf %887 : vector<2x32xf32> to vector<2x32xbf16>
    %cst_302 = arith.constant dense<0.000000e+00> : vector<2x32xf32>
    %889 = tpu.matmul %888, %459, %cst_302 {dimension_numbers = #tpu.dot_dimension_numbers<[1], [0], [0], [1], [0, 0, 1, 1], [], []>} : vector<2x32xbf16>, vector<32x32xbf16>, vector<2x32xf32> -> vector<2x32xf32>
    %c0_303 = arith.constant 0 : index
    %c0_304 = arith.constant 0 : index
    %c0_305 = arith.constant 0 : index
    %890 = vector.load %arg16[%c0_303, %c0_304, %c0_305] : memref<2x8x32xf32, #tpu.memory_space<vmem>>, vector<2x8x32xf32>
    %891 = vector.shape_cast %889 : vector<2x32xf32> to vector<2x1x32xf32>
    %892 = vector.broadcast %891 : vector<2x1x32xf32> to vector<2x8x32xf32>
    %893 = arith.addf %890, %892 : vector<2x8x32xf32>
    %894 = math.tanh %893 : vector<2x8x32xf32>
    %895 = vector.broadcast %8 : vector<1x1x32xf32> to vector<2x8x32xf32>
    %896 = arith.mulf %894, %895 : vector<2x8x32xf32>
    %cst_306 = arith.constant dense<0.000000e+00> : vector<2x8xf32>
    %897 = vector.multi_reduction <add>, %896, %cst_306 [2] : vector<2x8x32xf32> to vector<2x8xf32>
    %898 = vector.extract_strided_slice %1 {offsets = [0, 5], sizes = [2, 1], strides = [1, 1]} : vector<2x8xf32> to vector<2x1xf32>
    %899 = vector.broadcast %898 : vector<2x1xf32> to vector<2x8xf32>
    %900 = arith.mulf %1, %899 : vector<2x8xf32>
    %cst_307 = arith.constant 0.000000e+00 : f32
    %901 = vector.broadcast %cst_307 : f32 to vector<2x8xf32>
    %902 = arith.cmpf ogt, %900, %901 : vector<2x8xf32>
    %cst_308 = arith.constant 0.000000e+00 : f32
    %cst_309 = arith.constant -103.278931 : f32
    %903 = vector.broadcast %cst_308 : f32 to vector<2x8xf32>
    %904 = vector.broadcast %cst_309 : f32 to vector<2x8xf32>
    %905 = arith.select %902, %903, %904 : vector<2x8xi1>, vector<2x8xf32>
    %906 = arith.addf %897, %905 : vector<2x8xf32>
    %cst_310 = arith.constant dense<0xFF800000> : vector<2xf32>
    %907 = vector.multi_reduction <maximumf>, %906, %cst_310 [1] : vector<2x8xf32> to vector<2xf32>
    %908 = vector.shape_cast %907 : vector<2xf32> to vector<2x1xf32>
    %909 = vector.broadcast %908 : vector<2x1xf32> to vector<2x8xf32>
    %910 = arith.subf %906, %909 : vector<2x8xf32>
    %911 = math.exp %910 : vector<2x8xf32>
    %cst_311 = arith.constant dense<0.000000e+00> : vector<2xf32>
    %912 = vector.multi_reduction <add>, %911, %cst_311 [1] : vector<2x8xf32> to vector<2xf32>
    %913 = vector.shape_cast %912 : vector<2xf32> to vector<2x1xf32>
    %914 = math.log %913 : vector<2x1xf32>
    %915 = vector.broadcast %908 : vector<2x1xf32> to vector<2x8xf32>
    %916 = arith.subf %906, %915 : vector<2x8xf32>
    %917 = vector.broadcast %914 : vector<2x1xf32> to vector<2x8xf32>
    %918 = arith.subf %916, %917 : vector<2x8xf32>
    %c0_312 = arith.constant 0 : index
    %c5_313 = arith.constant 5 : index
    %c0_314 = arith.constant 0 : index
    %919 = vector.load %arg12[%c0_312, %c5_313, %c0_314] : memref<2x8x8xf32, #tpu.memory_space<vmem>>, vector<2x1x8xf32>
    %920 = vector.shape_cast %919 : vector<2x1x8xf32> to vector<2x8xf32>
    %921 = vector.shape_cast %918 : vector<2x8xf32> to vector<2x1x8xf32>
    tpu.vector_store %arg12[%c0_312, %c5_313, %c0_314], %921 {strides = array<i32>} : memref<2x8x8xf32, #tpu.memory_space<vmem>>, vector<2x1x8xf32>,
    %cst_315 = arith.constant 0.000000e+00 : f32
    %922 = vector.broadcast %cst_315 : f32 to vector<2x8xf32>
    %923 = arith.cmpf oeq, %900, %922 : vector<2x8xf32>
    %cst_316 = arith.constant -1.000000e+07 : f32
    %924 = vector.broadcast %cst_316 : f32 to vector<2x8xf32>
    %925 = arith.select %923, %924, %918 : vector<2x8xi1>, vector<2x8xf32>
    %cst_317 = arith.constant dense<0xFF800000> : vector<2xf32>
    %926 = vector.multi_reduction <maximumf>, %925, %cst_317 [1] : vector<2x8xf32> to vector<2xf32>
    %927 = vector.shape_cast %926 : vector<2xf32> to vector<2x1xf32>
    %928 = vector.broadcast %927 : vector<2x1xf32> to vector<2x8xf32>
    %929 = arith.cmpf oeq, %925, %928 : vector<2x8xf32>
    %c8_i32_318 = arith.constant 8 : i32
    %930 = vector.broadcast %c8_i32_318 : i32 to vector<2x8xi32>
    %931 = arith.select %929, %6, %930 : vector<2x8xi1>, vector<2x8xi32>
    %cst_319 = arith.constant dense<2147483647> : vector<2xi32>
    %932 = vector.multi_reduction <minsi>, %931, %cst_319 [1] : vector<2x8xi32> to vector<2xi32>
    %933 = vector.shape_cast %932 : vector<2xi32> to vector<2x1xi32>
    %c5_i32 = arith.constant 5 : i32
    %934 = vector.broadcast %c5_i32 : i32 to vector<2x8xi32>
    %935 = arith.cmpi eq, %6, %934 : vector<2x8xi32>
    %936 = vector.shape_cast %933 : vector<2x1xi32> to vector<2x1xi32>
    %937 = vector.broadcast %936 : vector<2x1xi32> to vector<2x8xi32>
    %938 = arith.select %935, %937, %857 : vector<2x8xi1>, vector<2x8xi32>
    %939 = vector.broadcast %933 : vector<2x1xi32> to vector<2x8xi32>
    %940 = arith.cmpi eq, %6, %939 : vector<2x8xi32>
    %941 = arith.extui %940 : vector<2x8xi1> to vector<2x8xi32>
    %942 = arith.sitofp %941 : vector<2x8xi32> to vector<2x8xf32>
    %943 = vector.shape_cast %942 : vector<2x8xf32> to vector<2x8x1xf32>
    %c0_320 = arith.constant 0 : index
    %c0_321 = arith.constant 0 : index
    %c0_322 = arith.constant 0 : index
    %944 = vector.load %arg15[%c0_320, %c0_321, %c0_322] : memref<2x8x32xf32, #tpu.memory_space<vmem>>, vector<2x8x32xf32>
    %945 = vector.broadcast %943 : vector<2x8x1xf32> to vector<2x8x32xf32>
    %946 = arith.mulf %945, %944 : vector<2x8x32xf32>
    %cst_323 = arith.constant dense<0.000000e+00> : vector<2x32xf32>
    %947 = vector.multi_reduction <add>, %946, %cst_323 [1] : vector<2x8x32xf32> to vector<2x32xf32>
    %948 = tpu.concatenate %947, %887 in 1 : vector<2x32xf32>, vector<2x32xf32> -> vector<2x64xf32>
    %949 = arith.truncf %948 : vector<2x64xf32> to vector<2x64xbf16>
    %cst_324 = arith.constant dense<0.000000e+00> : vector<2x128xf32>
    %950 = tpu.matmul %949, %458, %cst_324 {dimension_numbers = #tpu.dot_dimension_numbers<[1], [0], [0], [1], [0, 0, 1, 1], [], []>} : vector<2x64xbf16>, vector<64x128xbf16>, vector<2x128xf32> -> vector<2x128xf32>
    %951 = vector.broadcast %9 : vector<1x128xf32> to vector<2x128xf32>
    %952 = arith.addf %950, %951 : vector<2x128xf32>
    %953 = vector.extract_strided_slice %952 {offsets = [0, 0], sizes = [2, 96], strides = [1, 1]} : vector<2x128xf32> to vector<2x96xf32>
    %954 = arith.negf %953 : vector<2x96xf32>
    %955 = math.exp %954 : vector<2x96xf32>
    %cst_325 = arith.constant 1.000000e+00 : f32
    %956 = vector.broadcast %cst_325 : f32 to vector<2x96xf32>
    %957 = arith.addf %956, %955 : vector<2x96xf32>
    %958 = arith.divf %956, %957 : vector<2x96xf32>
    %959 = vector.extract_strided_slice %958 {offsets = [0, 0], sizes = [2, 32], strides = [1, 1]} : vector<2x96xf32> to vector<2x32xf32>
    %960 = vector.extract_strided_slice %958 {offsets = [0, 32], sizes = [2, 32], strides = [1, 1]} : vector<2x96xf32> to vector<2x32xf32>
    %961 = vector.extract_strided_slice %958 {offsets = [0, 64], sizes = [2, 32], strides = [1, 1]} : vector<2x96xf32> to vector<2x32xf32>
    %962 = vector.extract_strided_slice %952 {offsets = [0, 96], sizes = [2, 32], strides = [1, 1]} : vector<2x128xf32> to vector<2x32xf32>
    %963 = math.tanh %962 : vector<2x32xf32>
    %964 = arith.mulf %960, %885 : vector<2x32xf32>
    %965 = arith.mulf %959, %963 : vector<2x32xf32>
    %966 = arith.addf %964, %965 : vector<2x32xf32>
    %967 = math.tanh %966 : vector<2x32xf32>
    %968 = arith.mulf %961, %967 : vector<2x32xf32>
    %969 = arith.truncf %968 : vector<2x32xf32> to vector<2x32xbf16>
    %cst_326 = arith.constant dense<0.000000e+00> : vector<2x32xf32>
    %970 = tpu.matmul %969, %459, %cst_326 {dimension_numbers = #tpu.dot_dimension_numbers<[1], [0], [0], [1], [0, 0, 1, 1], [], []>} : vector<2x32xbf16>, vector<32x32xbf16>, vector<2x32xf32> -> vector<2x32xf32>
    %c0_327 = arith.constant 0 : index
    %c0_328 = arith.constant 0 : index
    %c0_329 = arith.constant 0 : index
    %971 = vector.load %arg16[%c0_327, %c0_328, %c0_329] : memref<2x8x32xf32, #tpu.memory_space<vmem>>, vector<2x8x32xf32>
    %972 = vector.shape_cast %970 : vector<2x32xf32> to vector<2x1x32xf32>
    %973 = vector.broadcast %972 : vector<2x1x32xf32> to vector<2x8x32xf32>
    %974 = arith.addf %971, %973 : vector<2x8x32xf32>
    %975 = math.tanh %974 : vector<2x8x32xf32>
    %976 = vector.broadcast %8 : vector<1x1x32xf32> to vector<2x8x32xf32>
    %977 = arith.mulf %975, %976 : vector<2x8x32xf32>
    %cst_330 = arith.constant dense<0.000000e+00> : vector<2x8xf32>
    %978 = vector.multi_reduction <add>, %977, %cst_330 [2] : vector<2x8x32xf32> to vector<2x8xf32>
    %979 = vector.extract_strided_slice %1 {offsets = [0, 6], sizes = [2, 1], strides = [1, 1]} : vector<2x8xf32> to vector<2x1xf32>
    %980 = vector.broadcast %979 : vector<2x1xf32> to vector<2x8xf32>
    %981 = arith.mulf %1, %980 : vector<2x8xf32>
    %cst_331 = arith.constant 0.000000e+00 : f32
    %982 = vector.broadcast %cst_331 : f32 to vector<2x8xf32>
    %983 = arith.cmpf ogt, %981, %982 : vector<2x8xf32>
    %cst_332 = arith.constant 0.000000e+00 : f32
    %cst_333 = arith.constant -103.278931 : f32
    %984 = vector.broadcast %cst_332 : f32 to vector<2x8xf32>
    %985 = vector.broadcast %cst_333 : f32 to vector<2x8xf32>
    %986 = arith.select %983, %984, %985 : vector<2x8xi1>, vector<2x8xf32>
    %987 = arith.addf %978, %986 : vector<2x8xf32>
    %cst_334 = arith.constant dense<0xFF800000> : vector<2xf32>
    %988 = vector.multi_reduction <maximumf>, %987, %cst_334 [1] : vector<2x8xf32> to vector<2xf32>
    %989 = vector.shape_cast %988 : vector<2xf32> to vector<2x1xf32>
    %990 = vector.broadcast %989 : vector<2x1xf32> to vector<2x8xf32>
    %991 = arith.subf %987, %990 : vector<2x8xf32>
    %992 = math.exp %991 : vector<2x8xf32>
    %cst_335 = arith.constant dense<0.000000e+00> : vector<2xf32>
    %993 = vector.multi_reduction <add>, %992, %cst_335 [1] : vector<2x8xf32> to vector<2xf32>
    %994 = vector.shape_cast %993 : vector<2xf32> to vector<2x1xf32>
    %995 = math.log %994 : vector<2x1xf32>
    %996 = vector.broadcast %989 : vector<2x1xf32> to vector<2x8xf32>
    %997 = arith.subf %987, %996 : vector<2x8xf32>
    %998 = vector.broadcast %995 : vector<2x1xf32> to vector<2x8xf32>
    %999 = arith.subf %997, %998 : vector<2x8xf32>
    %c0_336 = arith.constant 0 : index
    %c6_337 = arith.constant 6 : index
    %c0_338 = arith.constant 0 : index
    %1000 = vector.load %arg12[%c0_336, %c6_337, %c0_338] : memref<2x8x8xf32, #tpu.memory_space<vmem>>, vector<2x1x8xf32>
    %1001 = vector.shape_cast %1000 : vector<2x1x8xf32> to vector<2x8xf32>
    %1002 = vector.shape_cast %999 : vector<2x8xf32> to vector<2x1x8xf32>
    tpu.vector_store %arg12[%c0_336, %c6_337, %c0_338], %1002 {strides = array<i32>} : memref<2x8x8xf32, #tpu.memory_space<vmem>>, vector<2x1x8xf32>,
    %cst_339 = arith.constant 0.000000e+00 : f32
    %1003 = vector.broadcast %cst_339 : f32 to vector<2x8xf32>
    %1004 = arith.cmpf oeq, %981, %1003 : vector<2x8xf32>
    %cst_340 = arith.constant -1.000000e+07 : f32
    %1005 = vector.broadcast %cst_340 : f32 to vector<2x8xf32>
    %1006 = arith.select %1004, %1005, %999 : vector<2x8xi1>, vector<2x8xf32>
    %cst_341 = arith.constant dense<0xFF800000> : vector<2xf32>
    %1007 = vector.multi_reduction <maximumf>, %1006, %cst_341 [1] : vector<2x8xf32> to vector<2xf32>
    %1008 = vector.shape_cast %1007 : vector<2xf32> to vector<2x1xf32>
    %1009 = vector.broadcast %1008 : vector<2x1xf32> to vector<2x8xf32>
    %1010 = arith.cmpf oeq, %1006, %1009 : vector<2x8xf32>
    %c8_i32_342 = arith.constant 8 : i32
    %1011 = vector.broadcast %c8_i32_342 : i32 to vector<2x8xi32>
    %1012 = arith.select %1010, %6, %1011 : vector<2x8xi1>, vector<2x8xi32>
    %cst_343 = arith.constant dense<2147483647> : vector<2xi32>
    %1013 = vector.multi_reduction <minsi>, %1012, %cst_343 [1] : vector<2x8xi32> to vector<2xi32>
    %1014 = vector.shape_cast %1013 : vector<2xi32> to vector<2x1xi32>
    %c6_i32 = arith.constant 6 : i32
    %1015 = vector.broadcast %c6_i32 : i32 to vector<2x8xi32>
    %1016 = arith.cmpi eq, %6, %1015 : vector<2x8xi32>
    %1017 = vector.shape_cast %1014 : vector<2x1xi32> to vector<2x1xi32>
    %1018 = vector.broadcast %1017 : vector<2x1xi32> to vector<2x8xi32>
    %1019 = arith.select %1016, %1018, %938 : vector<2x8xi1>, vector<2x8xi32>
    %1020 = vector.broadcast %1014 : vector<2x1xi32> to vector<2x8xi32>
    %1021 = arith.cmpi eq, %6, %1020 : vector<2x8xi32>
    %1022 = arith.extui %1021 : vector<2x8xi1> to vector<2x8xi32>
    %1023 = arith.sitofp %1022 : vector<2x8xi32> to vector<2x8xf32>
    %1024 = vector.shape_cast %1023 : vector<2x8xf32> to vector<2x8x1xf32>
    %c0_344 = arith.constant 0 : index
    %c0_345 = arith.constant 0 : index
    %c0_346 = arith.constant 0 : index
    %1025 = vector.load %arg15[%c0_344, %c0_345, %c0_346] : memref<2x8x32xf32, #tpu.memory_space<vmem>>, vector<2x8x32xf32>
    %1026 = vector.broadcast %1024 : vector<2x8x1xf32> to vector<2x8x32xf32>
    %1027 = arith.mulf %1026, %1025 : vector<2x8x32xf32>
    %cst_347 = arith.constant dense<0.000000e+00> : vector<2x32xf32>
    %1028 = vector.multi_reduction <add>, %1027, %cst_347 [1] : vector<2x8x32xf32> to vector<2x32xf32>
    %1029 = tpu.concatenate %1028, %968 in 1 : vector<2x32xf32>, vector<2x32xf32> -> vector<2x64xf32>
    %1030 = arith.truncf %1029 : vector<2x64xf32> to vector<2x64xbf16>
    %cst_348 = arith.constant dense<0.000000e+00> : vector<2x128xf32>
    %1031 = tpu.matmul %1030, %458, %cst_348 {dimension_numbers = #tpu.dot_dimension_numbers<[1], [0], [0], [1], [0, 0, 1, 1], [], []>} : vector<2x64xbf16>, vector<64x128xbf16>, vector<2x128xf32> -> vector<2x128xf32>
    %1032 = vector.broadcast %9 : vector<1x128xf32> to vector<2x128xf32>
    %1033 = arith.addf %1031, %1032 : vector<2x128xf32>
    %1034 = vector.extract_strided_slice %1033 {offsets = [0, 0], sizes = [2, 96], strides = [1, 1]} : vector<2x128xf32> to vector<2x96xf32>
    %1035 = arith.negf %1034 : vector<2x96xf32>
    %1036 = math.exp %1035 : vector<2x96xf32>
    %cst_349 = arith.constant 1.000000e+00 : f32
    %1037 = vector.broadcast %cst_349 : f32 to vector<2x96xf32>
    %1038 = arith.addf %1037, %1036 : vector<2x96xf32>
    %1039 = arith.divf %1037, %1038 : vector<2x96xf32>
    %1040 = vector.extract_strided_slice %1039 {offsets = [0, 0], sizes = [2, 32], strides = [1, 1]} : vector<2x96xf32> to vector<2x32xf32>
    %1041 = vector.extract_strided_slice %1039 {offsets = [0, 32], sizes = [2, 32], strides = [1, 1]} : vector<2x96xf32> to vector<2x32xf32>
    %1042 = vector.extract_strided_slice %1039 {offsets = [0, 64], sizes = [2, 32], strides = [1, 1]} : vector<2x96xf32> to vector<2x32xf32>
    %1043 = vector.extract_strided_slice %1033 {offsets = [0, 96], sizes = [2, 32], strides = [1, 1]} : vector<2x128xf32> to vector<2x32xf32>
    %1044 = math.tanh %1043 : vector<2x32xf32>
    %1045 = arith.mulf %1041, %966 : vector<2x32xf32>
    %1046 = arith.mulf %1040, %1044 : vector<2x32xf32>
    %1047 = arith.addf %1045, %1046 : vector<2x32xf32>
    %1048 = math.tanh %1047 : vector<2x32xf32>
    %1049 = arith.mulf %1042, %1048 : vector<2x32xf32>
    %1050 = arith.truncf %1049 : vector<2x32xf32> to vector<2x32xbf16>
    %cst_350 = arith.constant dense<0.000000e+00> : vector<2x32xf32>
    %1051 = tpu.matmul %1050, %459, %cst_350 {dimension_numbers = #tpu.dot_dimension_numbers<[1], [0], [0], [1], [0, 0, 1, 1], [], []>} : vector<2x32xbf16>, vector<32x32xbf16>, vector<2x32xf32> -> vector<2x32xf32>
    %c0_351 = arith.constant 0 : index
    %c0_352 = arith.constant 0 : index
    %c0_353 = arith.constant 0 : index
    %1052 = vector.load %arg16[%c0_351, %c0_352, %c0_353] : memref<2x8x32xf32, #tpu.memory_space<vmem>>, vector<2x8x32xf32>
    %1053 = vector.shape_cast %1051 : vector<2x32xf32> to vector<2x1x32xf32>
    %1054 = vector.broadcast %1053 : vector<2x1x32xf32> to vector<2x8x32xf32>
    %1055 = arith.addf %1052, %1054 : vector<2x8x32xf32>
    %1056 = math.tanh %1055 : vector<2x8x32xf32>
    %1057 = vector.broadcast %8 : vector<1x1x32xf32> to vector<2x8x32xf32>
    %1058 = arith.mulf %1056, %1057 : vector<2x8x32xf32>
    %cst_354 = arith.constant dense<0.000000e+00> : vector<2x8xf32>
    %1059 = vector.multi_reduction <add>, %1058, %cst_354 [2] : vector<2x8x32xf32> to vector<2x8xf32>
    %1060 = vector.extract_strided_slice %1 {offsets = [0, 7], sizes = [2, 1], strides = [1, 1]} : vector<2x8xf32> to vector<2x1xf32>
    %1061 = vector.broadcast %1060 : vector<2x1xf32> to vector<2x8xf32>
    %1062 = arith.mulf %1, %1061 : vector<2x8xf32>
    %cst_355 = arith.constant 0.000000e+00 : f32
    %1063 = vector.broadcast %cst_355 : f32 to vector<2x8xf32>
    %1064 = arith.cmpf ogt, %1062, %1063 : vector<2x8xf32>
    %cst_356 = arith.constant 0.000000e+00 : f32
    %cst_357 = arith.constant -103.278931 : f32
    %1065 = vector.broadcast %cst_356 : f32 to vector<2x8xf32>
    %1066 = vector.broadcast %cst_357 : f32 to vector<2x8xf32>
    %1067 = arith.select %1064, %1065, %1066 : vector<2x8xi1>, vector<2x8xf32>
    %1068 = arith.addf %1059, %1067 : vector<2x8xf32>
    %cst_358 = arith.constant dense<0xFF800000> : vector<2xf32>
    %1069 = vector.multi_reduction <maximumf>, %1068, %cst_358 [1] : vector<2x8xf32> to vector<2xf32>
    %1070 = vector.shape_cast %1069 : vector<2xf32> to vector<2x1xf32>
    %1071 = vector.broadcast %1070 : vector<2x1xf32> to vector<2x8xf32>
    %1072 = arith.subf %1068, %1071 : vector<2x8xf32>
    %1073 = math.exp %1072 : vector<2x8xf32>
    %cst_359 = arith.constant dense<0.000000e+00> : vector<2xf32>
    %1074 = vector.multi_reduction <add>, %1073, %cst_359 [1] : vector<2x8xf32> to vector<2xf32>
    %1075 = vector.shape_cast %1074 : vector<2xf32> to vector<2x1xf32>
    %1076 = math.log %1075 : vector<2x1xf32>
    %1077 = vector.broadcast %1070 : vector<2x1xf32> to vector<2x8xf32>
    %1078 = arith.subf %1068, %1077 : vector<2x8xf32>
    %1079 = vector.broadcast %1076 : vector<2x1xf32> to vector<2x8xf32>
    %1080 = arith.subf %1078, %1079 : vector<2x8xf32>
    %c0_360 = arith.constant 0 : index
    %c7_361 = arith.constant 7 : index
    %c0_362 = arith.constant 0 : index
    %1081 = vector.load %arg12[%c0_360, %c7_361, %c0_362] : memref<2x8x8xf32, #tpu.memory_space<vmem>>, vector<2x1x8xf32>
    %1082 = vector.shape_cast %1081 : vector<2x1x8xf32> to vector<2x8xf32>
    %1083 = vector.shape_cast %1080 : vector<2x8xf32> to vector<2x1x8xf32>
    tpu.vector_store %arg12[%c0_360, %c7_361, %c0_362], %1083 {strides = array<i32>} : memref<2x8x8xf32, #tpu.memory_space<vmem>>, vector<2x1x8xf32>,
    %cst_363 = arith.constant 0.000000e+00 : f32
    %1084 = vector.broadcast %cst_363 : f32 to vector<2x8xf32>
    %1085 = arith.cmpf oeq, %1062, %1084 : vector<2x8xf32>
    %cst_364 = arith.constant -1.000000e+07 : f32
    %1086 = vector.broadcast %cst_364 : f32 to vector<2x8xf32>
    %1087 = arith.select %1085, %1086, %1080 : vector<2x8xi1>, vector<2x8xf32>
    %cst_365 = arith.constant dense<0xFF800000> : vector<2xf32>
    %1088 = vector.multi_reduction <maximumf>, %1087, %cst_365 [1] : vector<2x8xf32> to vector<2xf32>
    %1089 = vector.shape_cast %1088 : vector<2xf32> to vector<2x1xf32>
    %1090 = vector.broadcast %1089 : vector<2x1xf32> to vector<2x8xf32>
    %1091 = arith.cmpf oeq, %1087, %1090 : vector<2x8xf32>
    %c8_i32_366 = arith.constant 8 : i32
    %1092 = vector.broadcast %c8_i32_366 : i32 to vector<2x8xi32>
    %1093 = arith.select %1091, %6, %1092 : vector<2x8xi1>, vector<2x8xi32>
    %cst_367 = arith.constant dense<2147483647> : vector<2xi32>
    %1094 = vector.multi_reduction <minsi>, %1093, %cst_367 [1] : vector<2x8xi32> to vector<2xi32>
    %1095 = vector.shape_cast %1094 : vector<2xi32> to vector<2x1xi32>
    %c7_i32 = arith.constant 7 : i32
    %1096 = vector.broadcast %c7_i32 : i32 to vector<2x8xi32>
    %1097 = arith.cmpi eq, %6, %1096 : vector<2x8xi32>
    %1098 = vector.shape_cast %1095 : vector<2x1xi32> to vector<2x1xi32>
    %1099 = vector.broadcast %1098 : vector<2x1xi32> to vector<2x8xi32>
    %1100 = arith.select %1097, %1099, %1019 : vector<2x8xi1>, vector<2x8xi32>
    %c0_368 = arith.constant 0 : index
    %c0_369 = arith.constant 0 : index
    %c0_370 = arith.constant 0 : index
    %1101 = vector.load %arg13[%c0_368, %c0_369, %c0_370] : memref<2x1x8xi32, #tpu.memory_space<vmem>>, vector<2x1x8xi32>
    %1102 = vector.shape_cast %1101 : vector<2x1x8xi32> to vector<2x8xi32>
    %1103 = vector.shape_cast %1100 : vector<2x8xi32> to vector<2x1x8xi32>
    tpu.vector_store %arg13[%c0_368, %c0_369, %c0_370], %1103 {strides = array<i32>} : memref<2x1x8xi32, #tpu.memory_space<vmem>>, vector<2x1x8xi32>,
    return
  }
  func.func @transform_0(%arg0: i32) -> (i32, i32, i32) {
    %c0_i32 = arith.constant 0 : i32
    %c0_i32_0 = arith.constant 0 : i32
    %c0_i32_1 = arith.constant 0 : i32
    return %arg0, %c0_i32, %c0_i32_0 : i32, i32, i32
  }
  func.func @transform_1(%arg0: i32) -> (i32, i32, i32) {
    %c0_i32 = arith.constant 0 : i32
    %c0_i32_0 = arith.constant 0 : i32
    %c0_i32_1 = arith.constant 0 : i32
    return %arg0, %c0_i32, %c0_i32_0 : i32, i32, i32
  }
  func.func @transform_2(%arg0: i32) -> (i32, i32) {
    %c0_i32 = arith.constant 0 : i32
    %c0_i32_0 = arith.constant 0 : i32
    %c0_i32_1 = arith.constant 0 : i32
    return %c0_i32, %c0_i32_0 : i32, i32
  }
  func.func @transform_3(%arg0: i32) -> (i32, i32) {
    %c0_i32 = arith.constant 0 : i32
    %c0_i32_0 = arith.constant 0 : i32
    %c0_i32_1 = arith.constant 0 : i32
    return %c0_i32, %c0_i32_0 : i32, i32
  }
  func.func @transform_4(%arg0: i32) -> (i32, i32) {
    %c0_i32 = arith.constant 0 : i32
    %c0_i32_0 = arith.constant 0 : i32
    %c0_i32_1 = arith.constant 0 : i32
    return %c0_i32, %c0_i32_0 : i32, i32
  }
  func.func @transform_5(%arg0: i32) -> (i32, i32) {
    %c0_i32 = arith.constant 0 : i32
    %c0_i32_0 = arith.constant 0 : i32
    %c0_i32_1 = arith.constant 0 : i32
    return %c0_i32, %c0_i32_0 : i32, i32
  }
  func.func @transform_6(%arg0: i32) -> (i32, i32) {
    %c0_i32 = arith.constant 0 : i32
    %c0_i32_0 = arith.constant 0 : i32
    %c0_i32_1 = arith.constant 0 : i32
    return %c0_i32, %c0_i32_0 : i32, i32
  }
  func.func @transform_7(%arg0: i32) -> (i32, i32) {
    %c0_i32 = arith.constant 0 : i32
    %c0_i32_0 = arith.constant 0 : i32
    %c0_i32_1 = arith.constant 0 : i32
    return %c0_i32, %c0_i32_0 : i32, i32
  }
  func.func @transform_8(%arg0: i32) -> (i32, i32) {
    %c0_i32 = arith.constant 0 : i32
    %c0_i32_0 = arith.constant 0 : i32
    %c0_i32_1 = arith.constant 0 : i32
    return %c0_i32, %c0_i32_0 : i32, i32
  }
  func.func @transform_9(%arg0: i32) -> (i32, i32) {
    %c0_i32 = arith.constant 0 : i32
    %c0_i32_0 = arith.constant 0 : i32
    %c0_i32_1 = arith.constant 0 : i32
    return %c0_i32, %c0_i32_0 : i32, i32
  }
  func.func @transform_10(%arg0: i32) -> (i32, i32) {
    %c0_i32 = arith.constant 0 : i32
    %c0_i32_0 = arith.constant 0 : i32
    %c0_i32_1 = arith.constant 0 : i32
    return %c0_i32, %c0_i32_0 : i32, i32
  }
  func.func @transform_11(%arg0: i32) -> (i32, i32, i32) {
    %c0_i32 = arith.constant 0 : i32
    %c0_i32_0 = arith.constant 0 : i32
    %c0_i32_1 = arith.constant 0 : i32
    return %arg0, %c0_i32, %c0_i32_0 : i32, i32, i32
  }
  func.func @transform_12(%arg0: i32) -> (i32, i32, i32) {
    %c0_i32 = arith.constant 0 : i32
    %c0_i32_0 = arith.constant 0 : i32
    %c0_i32_1 = arith.constant 0 : i32
    return %arg0, %c0_i32, %c0_i32_0 : i32, i32, i32
  }
}

</mosaic_0001>

<bundles_post_ra>
// kernel: tpu_custom_call.1
= control target key start
LH: loop header
LB: loop body
LE: loop exit
PB: predicated region body
PF: predicated region fallthrough
CT: control target
= control target key end

     0   :  { %18 = vsyncpa [#allocation6], 0  ;;  %s10470_s0 = inlined_call_operand.vmem [shape: bf16[2,8,4], index: 0, kind: input, shape index: {}]   ;;  %s10471_s1 = inlined_call_operand.vmem [shape: f32[2,1,8], index: 1, kind: input, shape index: {}]   ;;  %s10472_s2 = inlined_call_operand.hbm [shape: f32[1,256], index: 2, kind: input, shape index: {}]   ;;  %s10473_s3 = inlined_call_operand.hbm [shape: bf16[4,256], index: 3, kind: input, shape index: {}]   ;;  %s10474_s4 = inlined_call_operand.hbm [shape: bf16[64,256], index: 4, kind: input, shape index: {}]   ;;  %s10475_s5 = inlined_call_operand.hbm [shape: f32[1,256], index: 5, kind: input, shape index: {}]   ;;  %s10476_s6 = inlined_call_operand.vmem [shape: bf16[64,128], index: 6, kind: input, shape index: {}]   ;;  %s10477_s7 = inlined_call_operand.vmem [shape: f32[1,128], index: 7, kind: input, shape index: {}]   ;;  %s10478_s8 = inlined_call_operand.hbm [shape: bf16[32,32], index: 8, kind: input, shape index: {}]   ;;  %s10479_s9 = inlined_call_operand.hbm [shape: bf16[32,32], index: 9, kind: input, shape index: {}]   ;;  %s10480_s10 = inlined_call_operand.vmem [shape: f32[1,32], index: 10, kind: input, shape index: {}]   ;;  %s10481_s11 = inlined_call_operand.hbm [shape: f32[2,8,8], index: 11, kind: output, shape index: {0}]   ;;  %s10482_s12 = inlined_call_operand.hbm [shape: s32[2,1,8], index: 12, kind: output, shape index: {1}]  }
   0x1   :  { %19 = vsyncpa [#allocation9], 0 }
   0x2   :  { %20 = vsyncpa [#allocation12], 0 }
   0x3   :  { %21 = vsyncpa [#allocation15], 0 }
   0x4   :  { %22 = vsyncpa [#allocation7], 0 }
   0x5   :  { %23 = vsyncpa [#allocation18], 0  ;;  %s8253_s21 = smov [#allocation8]   ;;  %s8254_s23 = smov [#allocation11]  }
   0x6   :  { %s44_s22 = sshll.u32 %s8253_s21, 4  ;;  %s66_s24 = sshll.u32 %s8254_s23, 4  ;;  %s45_s22 = int_to_ptr.vmem [resolvable:$true] %s44_s22  ;;  %s67_s24 = int_to_ptr.vmem [resolvable:$true] %s66_s24 }
   0x7   :  { %s8065_s27 = scalar_lea.hbm %s10473_s3, 64 }
   0x8   :  { %p8066_p0 = scmp.ne.s32.totalorder %s10473_s3, %s8065_s27  ;;  %p8069_p1 = scmp.lt.u32.totalorder %s8065_s27, %s10473_s3 }
   0xa   :  { %p8071_p2 = pnand %p8069_p1, %p8066_p0 }
   0xc   :  { %8074 = shalt.err (!%p8071_p2)
}
   0xd   :  { %s8075_s14 = scalar_lea.vmem %s45_s22, 64  ;;  %p8080_p4 = scmp.lt.s32.totalorder %s45_s22, %s45_s22 }
   0xe   :  { %p8076_p3 = scmp.ne.s32.totalorder %s45_s22, %s8075_s14  ;;  %p8081_p5 = scmp.lt.s32.totalorder %s8075_s14, %s8075_s14 }
  0x10   :  { %p8082_p6 = por %p8081_p5, %p8080_p4 }
  0x12   :  { %p8083_p7 = pnand %p8082_p6, %p8076_p3 }
  0x14   :  { %8086 = shalt.err (!%p8083_p7)
}
  0x15   :  { %47 = dma.hbm_to_vmem [thread:$0]  %s10473_s3, 64, %s45_s22, [#allocation9]  }
  0x16   :  { %s8087_s19 = scalar_lea.hbm %s10475_s5, 32 }
  0x17   :  { %p8088_p8 = scmp.ne.s32.totalorder %s10475_s5, %s8087_s19  ;;  %p8091_p9 = scmp.lt.u32.totalorder %s8087_s19, %s10475_s5 }
  0x19   :  { %p8093_p10 = pnand %p8091_p9, %p8088_p8 }
  0x1b   :  { %8096 = shalt.err (!%p8093_p10)
}
  0x1c   :  { %s8097_s26 = scalar_lea.vmem %s67_s24, 32  ;;  %p8102_p12 = scmp.lt.s32.totalorder %s67_s24, %s67_s24 }
  0x1d   :  { %p8098_p11 = scmp.ne.s32.totalorder %s67_s24, %s8097_s26  ;;  %p8103_p13 = scmp.lt.s32.totalorder %s8097_s26, %s8097_s26 }
  0x1f   :  { %p8104_p0 = por %p8103_p13, %p8102_p12 }
  0x21   :  { %p8105_p1 = pnand %p8104_p0, %p8098_p11 }
  0x23   :  { %8108 = shalt.err (!%p8105_p1)
}
  0x24   :  { %69 = dma.hbm_to_vmem [thread:$0]  %s10475_s5, 32, %s67_s24, [#allocation12]  }
  0x25   :  { %s8255_s27 = smov [#allocation5]   ;;  %s8256_s29 = smov [#allocation10]  }
  0x26   :  { %s34_s28 = sshll.u32 %s8255_s27, 4  ;;  %s53_s30 = sshll.u32 %s8256_s29, 4  ;;  %s35_s28 = int_to_ptr.vmem [resolvable:$true] %s34_s28  ;;  %s8370_s30 = int_to_ptr.vmem [resolvable:$true] %s53_s30 }
  0x27   :  { %s8109_s15 = scalar_lea.hbm %s10472_s2, 32 }
  0x28   :  { %p8110_p2 = scmp.ne.s32.totalorder %s10472_s2, %s8109_s15  ;;  %p8113_p3 = scmp.lt.u32.totalorder %s8109_s15, %s10472_s2 }
  0x2a   :  { %p8115_p4 = pnand %p8113_p3, %p8110_p2 }
  0x2c   :  { %8118 = shalt.err (!%p8115_p4)
}
  0x2d   :  { %s8119_s5 = scalar_lea.vmem %s35_s28, 32  ;;  %p8124_p6 = scmp.lt.s32.totalorder %s35_s28, %s35_s28 }
  0x2e   :  { %p8120_p5 = scmp.ne.s32.totalorder %s35_s28, %s8119_s5  ;;  %p8125_p7 = scmp.lt.s32.totalorder %s8119_s5, %s8119_s5 }
  0x30   :  { %p8126_p8 = por %p8125_p7, %p8124_p6 }
  0x32   :  { %p8127_p9 = pnand %p8126_p8, %p8120_p5 }
  0x34   :  { %8130 = shalt.err (!%p8127_p9)
}
  0x35   :  { %37 = dma.hbm_to_vmem [thread:$0]  %s10472_s2, 32, %s35_s28, [#allocation6]  }
  0x36   :  { %s8131_s25 = scalar_lea.hbm %s10474_s4, 1024 }
  0x37   :  { %p8132_p10 = scmp.ne.s32.totalorder %s10474_s4, %s8131_s25  ;;  %p8135_p11 = scmp.lt.u32.totalorder %s8131_s25, %s10474_s4 }
  0x39   :  { %p8137_p12 = pnand %p8135_p11, %p8132_p10 }
  0x3b   :  { %8140 = shalt.err (!%p8137_p12)
}
  0x3c   :  { %s8141_s29 = scalar_lea.vmem %s8370_s30, 1024  ;;  %p8146_p0 = scmp.lt.s32.totalorder %s8370_s30, %s8370_s30 }
  0x3d   :  { %p8142_p13 = scmp.ne.s32.totalorder %s8370_s30, %s8141_s29  ;;  %p8147_p1 = scmp.lt.s32.totalorder %s8141_s29, %s8141_s29 }
  0x3f   :  { %p8148_p2 = por %p8147_p1, %p8146_p0 }
  0x41   :  { %p8149_p3 = pnand %p8148_p2, %p8142_p13 }
  0x43   :  { %8152 = shalt.err (!%p8149_p3)
}
  0x44   :  { %s8257_s2 = smov 128   ;;  %s8258_s28 = smov 8  }
  0x45   :  { %59 = dma.hbm_to_vmem [thread:$0]  %s10474_s4, 1024, %s8370_s30, [#allocation9], %s8257_s2, %s8257_s2, %s8258_s28  }
  0x46   :  { %s8259_s15 = smov [#allocation13]   ;;  %s8153_s19 = scalar_lea.hbm %s10478_s8, 256 }
  0x47   :  { %s79_s16 = sshll.u32 %s8259_s15, 4  ;;  %p8154_p4 = scmp.ne.s32.totalorder %s10478_s8, %s8153_s19  ;;  %s80_s16 = int_to_ptr.vmem [resolvable:$true] %s79_s16 }
  0x48   :  { %p8157_p5 = scmp.lt.u32.totalorder %s8153_s19, %s10478_s8 }
  0x4a   :  { %p8159_p6 = pnand %p8157_p5, %p8154_p4 }
  0x4c   :  { %8162 = shalt.err (!%p8159_p6)
}
  0x4d   :  { %s8163_s23 = scalar_lea.vmem %s80_s16, 256  ;;  %p8168_p8 = scmp.lt.s32.totalorder %s80_s16, %s80_s16 }
  0x4e   :  { %p8164_p7 = scmp.ne.s32.totalorder %s80_s16, %s8163_s23  ;;  %p8169_p9 = scmp.lt.s32.totalorder %s8163_s23, %s8163_s23 }
  0x50   :  { %p8170_p10 = por %p8169_p9, %p8168_p8 }
  0x52   :  { %p8171_p11 = pnand %p8170_p10, %p8164_p7 }
  0x54   :  { %8174 = shalt.err (!%p8171_p11)
}
  0x55   :  { %s8260_s4 = smov 64   ;;  %s8261_s30 = smov 4  }
  0x56   :  { %85 = dma.hbm_to_vmem [thread:$0]  %s10478_s8, 256, %s80_s16, [#allocation12], %s8260_s4, %s8260_s4, %s8261_s30  }
  0x57   :  { %s8262_s3 = smov [#allocation14]   ;;  %s8175_s13 = scalar_lea.hbm %s10479_s9, 256 }
  0x58   :  { %s91_s22 = sshll.u32 %s8262_s3, 4  ;;  %p8176_p12 = scmp.ne.s32.totalorder %s10479_s9, %s8175_s13  ;;  %s92_s22 = int_to_ptr.vmem [resolvable:$true] %s91_s22 }
  0x59   :  { %p8179_p13 = scmp.lt.u32.totalorder %s8175_s13, %s10479_s9 }
  0x5b   :  { %p8181_p0 = pnand %p8179_p13, %p8176_p12 }
  0x5d   :  { %8184 = shalt.err (!%p8181_p0)
}
  0x5e   :  { %s8185_s19 = scalar_lea.vmem %s92_s22, 256  ;;  %p8190_p2 = scmp.lt.s32.totalorder %s92_s22, %s92_s22 }
  0x5f   :  { %p8186_p1 = scmp.ne.s32.totalorder %s92_s22, %s8185_s19  ;;  %p8191_p3 = scmp.lt.s32.totalorder %s8185_s19, %s8185_s19 }
  0x61   :  { %p8192_p4 = por %p8191_p3, %p8190_p2 }
  0x63   :  { %p8193_p5 = pnand %p8192_p4, %p8186_p1 }
  0x65   :  { %8196 = shalt.err (!%p8193_p5)
}
  0x66   :  { %97 = dma.hbm_to_vmem [thread:$0]  %s10479_s9, 256, %s92_s22, [#allocation15], %s8260_s4, %s8260_s4, %s8261_s30  }
  0x67   :  { %8241 = dma.done.wait [#allocation6], 32  }
  0x68   :  { %8242 = vsyncadd [#allocation6], 4294967264 }
  0x69   :  { %8243 = dma.done.wait [#allocation9], 1088  }
  0x6a   :  { %8244 = vsyncadd [#allocation9], 4294966208 }
  0x6b   :  { %8245 = dma.done.wait [#allocation12], 288  }
  0x6c   :  { %8246 = vsyncadd [#allocation12], 4294967008 }
  0x6d   :  { %8247 = dma.done.wait [#allocation15], 256  }
  0x6e   :  { %8248 = vsyncadd [#allocation15], 4294967040  ;;  %v10484_v0 = vmov 0   ;;  %vm160_vm0 = vcmask 1041408   ;;  %v7775_v4 = vld [vmem:[%s10470_s0] sm:$0xff]   ;;  %vm156_vm1 = vcmask 31744   ;;  %v10483_v13 = vlaneseq }
  0x6f   :  { %199 = vmatprep.mubr.bf16.mxu0 %v10484_v0  ;;  %372 = vmatprep.mubr.bf16.mxu1 %v10484_v0  ;;  %v7389_v1 = vld.sshfl [vmem:[#allocation8] sm:$0x33 pattern:$0x76325410]  ;;  %v8438_v5 = vld [vmem:[#allocation10 + $0x4] ss:$8 sps:$4 sm:$0xff]  }
  0x70   :  { %7760 = vset.pattern.permute.xlu1 %v10484_v0  ;;  %v155_v2 = vcombine.high %v7389_v1, %v7389_v1  ;;  %v162_v3 = vsel %vm160_vm0, %v7389_v1, 0  ;;  %v8440_v6 = vld [vmem:[#allocation10] ss:$8 sps:$4 sm:$0xff]   ;;  %v8442_v7 = vld [vmem:[#allocation10 + $0x14] ss:$8 sps:$4 sm:$0xff]   ;;  %340 = vmatprep.subr.bf16.mxu1 %v8438_v5  ;;  %v8484_v14 = vshrl.u32 %v10483_v13, 7 }
  0x71   :  { %341 = vmatpush1.bf16.msra.mxu1 %v8440_v6  ;;  %v8446_v8 = vld [vmem:[#allocation10 + $0x10] ss:$8 sps:$4 sm:$0xff]   ;;  %v8450_v9 = vld [vmem:[#allocation10 + $0x24] ss:$8 sps:$4 sm:$0xff]   ;;  %v8452_v10 = vld [vmem:[#allocation10 + $0x20] ss:$8 sps:$4 sm:$0xff]  }
  0x72   :  { %7390 = vmatprep.subr.msk.bf16.mxu0 %vm160_vm0, %v155_v2  ;;  %342 = vmatprep.subr.bf16.mxu1 %v8442_v7  ;;  %v8454_v11 = vld [vmem:[#allocation10 + $0x34] ss:$8 sps:$4 sm:$0xff]   ;;  %v8463_v12 = vld [vmem:[#allocation10 + $0x30] ss:$8 sps:$4 sm:$0xff]   ;;  %v8487_v15 = vsub.s32 0, %v8484_v14  ;;  %v8490_v17 = vsub.s32 1, %v8484_v14 }
  0x73   :  { %168 = vmatpush1.bf16.msra.mxu0 %v162_v3  ;;  %v130_v16 = vld [vmem:[#allocation11] sm:$0x3]  ;;  %v121_v28 = vld [vmem:[#allocation5] sm:$0x3]  ;;  %v8264_v29 = vmov 1966171168  }
  0x74   :  { %603 = vmatprep.subr.bf16.mxu0 %v8438_v5  ;;  %v135_v18 = vrot.slane %v130_v16, %v8487_v15  ;;  %v139_v19 = vrot.slane %v130_v16, %v8490_v17  ;;  %v244_v30 = vunpack.c.l.s4 %v8264_v29  ;;  %vm122_vm2 = vcmp.gt.f32.partialorder %v121_v28, 0.0  ;;  %s8274_s13 = smov 32   ;;  %s8275_s17 = smov 96  }
  0x75   :  { %343 = vmatpush1.bf16.msra.mxu1 %v8446_v8  ;;  %v229_v32 = vsel %vm122_vm2, 1, %v10484_v0  ;;  %vm336_vm6 = vcmask 523264   ;;  %vm516_vm7 = vcmask 253952   ;;  %vm8273_vm14 = vmmov 0  }
  0x76   :  { %7391 = vmatmul.mubr.msk.bf16.vlgmr.msra.gmra.mrb[0].mxu0 %vm156_vm1, %v7775_v4  ;;  %344 = vmatprep.subr.bf16.mxu1 %v8450_v9  ;;  %v245_v31 = vunpack.c.0.s8 %v244_v30  ;;  %v233_v39 = vrot.slane %v229_v32, %v8487_v15  ;;  %v237_v40 = vrot.slane %v229_v32, %v8490_v17  ;;  %vm2108_vm0 = vcmask 261120  }
  0x77   :  { %604 = vmatpush1.bf16.msra.mxu0 %v8440_v6  ;;  %635 = vmatprep.mubr.bf16.mxu0 %v10484_v0 }
  0x78   :  { %605 = vmatprep.subr.bf16.mxu0 %v8442_v7  ;;  %v8496_v35 = vsub.s32 %v245_v31, %v8484_v14  ;;  %vm8502_vm3 = vcmp.eq.s32.totalorder %v233_v39, 1  ;;  %vm8506_vm4 = vcmp.eq.s32.totalorder %v237_v40, 1 }
  0x79   :  { %345 = vmatpush1.bf16.msra.mxu1 %v8452_v10 }
  0x7a   :  { %346 = vmatprep.subr.bf16.mxu1 %v8454_v11 }
  0x7b   :  { %606 = vmatpush1.bf16.msra.mxu0 %v8446_v8 }
  0x7c   :  { %607 = vmatprep.subr.bf16.mxu0 %v8450_v9 }
  0x7d   :  { %347 = vmatpush1.bf16.msra.mxu1 %v8463_v12 }
  0x7e   :  { %868 = vmatprep.subr.bf16.mxu1 %v8438_v5 }
  0x7f   :  { %608 = vmatpush1.bf16.msra.mxu0 %v8452_v10 }
  0x80   :  { %609 = vmatprep.subr.bf16.mxu0 %v8454_v11  ;;  %373 = vmatmul.mubr.bf16.vlgmr.msra.gmra.mrb[0].mxu1 %v10484_v0 }
  0x81   :  { %869 = vmatpush1.bf16.msra.mxu1 %v8440_v6  ;;  %900 = vmatprep.mubr.bf16.mxu1 %v10484_v0 }
  0x82   :  { %870 = vmatprep.subr.bf16.mxu1 %v8442_v7 }
  0x83   :  { %610 = vmatpush1.bf16.msra.mxu0 %v8463_v12 }
  0x84   :  { %1133 = vmatprep.subr.bf16.mxu0 %v8438_v5 }
  0x85   :  { %871 = vmatpush1.bf16.msra.mxu1 %v8446_v8 }
  0x86   :  { %872 = vmatprep.subr.bf16.mxu1 %v8450_v9 }
  0x89   :  { %873 = vmatpush1.bf16.msra.mxu1 %v8452_v10 }
  0x8a   :  { %874 = vmatprep.subr.bf16.mxu1 %v8454_v11 }
  0x8d   :  { %875 = vmatpush1.bf16.msra.mxu1 %v8463_v12 }
  0x8e   :  { %1394 = vmatprep.subr.bf16.mxu1 %v8438_v5 }
 0x149   :  { %v201_v20 = vpop.f32.mrb[0].mxu0 }
 0x14a   :  { %v202_v21 = vadd.f32 %v201_v20, %v135_v18  ;;  %v203_v22 = vpop.f32.mrb[1].mxu0 }
 0x14b   :  { %v204_v23 = vadd.f32 %v203_v22, %v139_v19  ;;  %v205_v24 = vpop.f32.mrb[2].mxu0 }
 0x14c   :  { %210 = vst [vmem:[#allocation2] sm:$0xff] %v202_v21  ;;  %v206_v25 = vadd.f32 %v205_v24, %v135_v18  ;;  %v207_v26 = vpop.f32.mrb[3].mxu0 }
 0x14d   :  { %211 = vst [vmem:[#allocation2 + $0x8] sm:$0xff] %v204_v23  ;;  %v208_v27 = vadd.f32 %v207_v26, %v139_v19 }
 0x14e   :  { %212 = vst [vmem:[#allocation2 + $0x10] sm:$0xff] %v206_v25 }
 0x14f   :  { %213 = vst [vmem:[#allocation2 + $0x18] sm:$0xff] %v208_v27 }
 0x153   :  { %v374_v44 = vpop.f32.mrb[0].mxu1 }
 0x154   :  { %v222_v33 = vld [vmem:[#allocation2] ss:$8 sm:$0x3]  ;;  %v226_v34 = vld [vmem:[#allocation2 + $0x7] ss:$8 sm:$0x3] }
 0x155   :  { %v536_v36 = vld [vmem:[#allocation2 + $0x1] ss:$8 sm:$0x3]  ;;  %v540_v41 = vld [vmem:[#allocation2 + $0x6] ss:$8 sm:$0x3] }
 0x156   :  { %v224_v37 = vld [vmem:[#allocation2 + $0x10] ss:$8 sm:$0x3]  ;;  %v228_v38 = vld [vmem:[#allocation2 + $0x17] ss:$8 sm:$0x3] }
 0x157   :  { %v242_v42 = vcombine.low %v222_v33, %v224_v37  ;;  %v269_v43 = vcombine.low %v226_v34, %v228_v38  ;;  %v538_v45 = vld [vmem:[#allocation2 + $0x11] ss:$8 sm:$0x3]  ;;  %v376_v46 = vpop.f32.mrb[1].mxu1 }
 0x158   :  { %v542_v47 = vld [vmem:[#allocation2 + $0x16] ss:$8 sm:$0x3]  ;;  %v545_v48 = vcombine.low %v536_v36, %v538_v45  ;;  %v378_v51 = vpop.f32.mrb[2].mxu1  ;;  %v8265_v45 = vmov 7  }
 0x159   :  { %v249_v49 = vrot.slane %v242_v42, %v8496_v35  ;;  %v276_v50 = vrot.slane %v269_v43, %v8496_v35  ;;  %v572_v52 = vcombine.low %v540_v41, %v542_v47  ;;  %v379_v55 = vpop.f32.mrb[3].mxu1  ;;  %v803_v57 = vld [vmem:[#allocation2 + $0x12] ss:$8 sm:$0x3]  ;;  %v8553_v42 = vld [vmem:[%s10471_s1] sm:$0x1]  ;;  %7761 = vset.pattern.permute.xlu0 %v8265_v45 }
 0x15a   :  { %v8511_v56 = vrot.slane %v545_v48, %v8496_v35  ;;  %v801_v62 = vld [vmem:[#allocation2 + $0x2] ss:$8 sm:$0x3]  ;;  %v807_v63 = vld [vmem:[#allocation2 + $0x15] ss:$8 sm:$0x3]  ;;  %415 = vperm.xlu1 %7760, %v8553_v42  }
 0x15b   :  { %v257_v58 = vrot.slane %v249_v49, %v8496_v35  ;;  %v284_v59 = vrot.slane %v276_v50, %v8496_v35  ;;  %v250_v60 = vcombine.high %v249_v49, %v249_v49  ;;  %v277_v61 = vcombine.high %v276_v50, %v276_v50  ;;  %v805_v3 = vld [vmem:[#allocation2 + $0x5] ss:$8 sm:$0x3]  ;;  %v1068_v16 = vld [vmem:[#allocation2 + $0x13] ss:$8 sm:$0x3] }
 0x15c   :  { %v560_v1 = vrot.slane %v8511_v56, %v8496_v35  ;;  %v8518_v2 = vrot.slane %v572_v52, %v8496_v35  ;;  %v810_v4 = vcombine.low %v801_v62, %v803_v57  ;;  %v837_v21 = vcombine.low %v805_v3, %v807_v63  ;;  %v1066_v24 = vld [vmem:[#allocation2 + $0x3] ss:$8 sm:$0x3]  ;;  %v1070_v33 = vld [vmem:[#allocation2 + $0x4] ss:$8 sm:$0x3] }
 0x15d   :  { %v294_v18 = vsel %vm8502_vm3, %v257_v58, %v284_v59  ;;  %v264_v19 = vrot.slane %v250_v60, %v8496_v35  ;;  %v291_v20 = vrot.slane %v277_v61, %v8496_v35  ;;  %v1075_v28 = vcombine.low %v1066_v24, %v1068_v16  ;;  %v1072_v34 = vld [vmem:[#allocation2 + $0x14] ss:$8 sm:$0x3]  ;;  %v1330_v38 = vld [vmem:[#allocation2 + $0x4] ss:$8 sm:$0x3] }
 0x15e   :  { %v8524_v22 = vadd.f32 %v374_v44, %v294_v18  ;;  %v587_v23 = vrot.slane %v8518_v2, %v8496_v35  ;;  %v8531_v26 = vrot.slane %v810_v4, %v8496_v35  ;;  %v8534_v27 = vrot.slane %v837_v21, %v8496_v35  ;;  %v1331_v36 = vld [vmem:[#allocation2 + $0x14] ss:$8 sm:$0x3]  ;;  %v1332_v39 = vld [vmem:[#allocation2 + $0x3] ss:$8 sm:$0x3] }
 0x15f   :  { %v295_v25 = vsel %vm8506_vm4, %v264_v19, %v291_v20  ;;  %v8547_v37 = vrot.slane %v1075_v28, %v8496_v35  ;;  %v1333_v40 = vld [vmem:[#allocation2 + $0x13] ss:$8 sm:$0x3]  ;;  %v1524_v41 = vld [vmem:[#allocation2 + $0x15] ss:$8 sm:$0x3]  ;;  %v1336_v50 = vcombine.low %v1330_v38, %v1331_v36 }
 0x160   :  { %v8536_v29 = vadd.f32 %v376_v46, %v295_v25  ;;  %v8540_v30 = vsel %vm8502_vm3, %v560_v1, %v587_v23  ;;  %v825_v31 = vrot.slane %v8531_v26, %v8496_v35  ;;  %v852_v32 = vrot.slane %v8534_v27, %v8496_v35  ;;  %v1526_v44 = vld [vmem:[#allocation2 + $0x12] ss:$8 sm:$0x3]  ;;  %v1523_v47 = vld [vmem:[#allocation2 + $0x5] ss:$8 sm:$0x3] }
 0x161   :  { %v1102_v46 = vcombine.low %v1070_v33, %v1072_v34  ;;  %v1717_v48 = vld [vmem:[#allocation2 + $0x16] ss:$8 sm:$0x3]  ;;  %v8563_v49 = vld [vmem:[%s10471_s1 + $0x1] sm:$0x1]  ;;  %v1363_v51 = vcombine.low %v1332_v39, %v1333_v40  ;;  %v1529_v55 = vcombine.low %v1523_v47, %v1524_v41  ;;  %v1090_v57 = vrot.slane %v8547_v37, %v8496_v35 }
 0x162   :  { %7796 = vtanh.f32 %v8536_v29  ;;  %v8557_v43 = vsel %vm8502_vm3, %v825_v31, %v852_v32  ;;  %v1525_v52 = vld [vmem:[#allocation2 + $0x2] ss:$8 sm:$0x3]  ;;  %v1716_v60 = vld [vmem:[#allocation2 + $0x6] ss:$8 sm:$0x3]  ;;  %v8571_v61 = vrot.slane %v1336_v50, %v8496_v35  ;;  %424 = vperm.xlu1 %7760, %v8563_v49  }
 0x163   :  { %v8568_v58 = vrot.slane %v1102_v46, %v8496_v35  ;;  %v1556_v59 = vcombine.low %v1525_v52, %v1526_v44  ;;  %v8574_v62 = vrot.slane %v1363_v51, %v8496_v35  ;;  %v8577_v63 = vrot.slane %v1529_v55, %v8496_v35  ;;  %v1719_v23 = vld [vmem:[#allocation2 + $0x11] ss:$8 sm:$0x3]  ;;  %v1910_v28 = vld [vmem:[#allocation2 + $0x17] ss:$8 sm:$0x3] }
 0x164   :  { %v1722_v1 = vcombine.low %v1716_v60, %v1717_v48  ;;  %v1351_v16 = vrot.slane %v8571_v61, %v8496_v35  ;;  %v1912_v31 = vld [vmem:[#allocation2 + $0x10] ss:$8 sm:$0x3]  ;;  %v1718_v33 = vld [vmem:[#allocation2 + $0x1] ss:$8 sm:$0x3] }
 0x165   :  { %v1117_v3 = vrot.slane %v8568_v58, %v8496_v35  ;;  %v8583_v4 = vrot.slane %v1556_v59, %v8496_v35  ;;  %v1378_v18 = vrot.slane %v8574_v62, %v8496_v35  ;;  %v1544_v20 = vrot.slane %v8577_v63, %v8496_v35  ;;  %v1909_v38 = vld [vmem:[#allocation2 + $0x7] ss:$8 sm:$0x3]  ;;  %v1911_v39 = vld [vmem:[#allocation2] ss:$8 sm:$0x3] }
 0x166   :  { %v8602_v25 = vrot.slane %v1722_v1, %v8496_v35  ;;  %7762 = vset.pattern.permute.xlu1 %v8265_v45  ;;  %v1749_v36 = vcombine.low %v1718_v33, %v1719_v23  ;;  %v1915_v40 = vcombine.low %v1909_v38, %v1910_v28  ;;  %v1942_v41 = vcombine.low %v1911_v39, %v1912_v31 }
 0x167   :  { %v8591_v19 = vsel %vm8502_vm3, %v1090_v57, %v1117_v3  ;;  %v1571_v21 = vrot.slane %v8583_v4, %v8496_v35  ;;  %v8599_v24 = vsel %vm8502_vm3, %v1351_v16, %v1378_v18  ;;  %440 = vperm.xlu1 %7762, %v8563_v49   ;;  %v7400_v57 = vmul.f32 -1.442695, %v8524_v22 }
 0x168   :  { %v1737_v44 = vrot.slane %v8602_v25, %v8496_v35  ;;  %v8613_v45 = vrot.slane %v1749_v36, %v8496_v35  ;;  %v8616_v46 = vrot.slane %v1915_v40, %v8496_v35  ;;  %v8619_v47 = vrot.slane %v1942_v41, %v8496_v35 }
 0x169   :  { %v8606_v32 = vsel %vm8502_vm3, %v1544_v20, %v1571_v21  ;;  %7798 = vpow2.f32 %v7400_v57 }
 0x16a   :  { %v1764_v48 = vrot.slane %v8613_v45, %v8496_v35  ;;  %v1930_v50 = vrot.slane %v8616_v46, %v8496_v35  ;;  %v1957_v51 = vrot.slane %v8619_v47, %v8496_v35 }
 0x16c   :  { %v7797_v34 = vpop.eup %7796  ;;  %v8629_v52 = vsel %vm8502_vm3, %v1737_v44, %v1764_v48  ;;  %v8633_v55 = vsel %vm8502_vm3, %v1930_v50, %v1957_v51 }
 0x16d   :  { %398 = vrot.lane.b32.xlu0 %v7797_v34, %s8260_s4 }
 0x173   :  { %v7799_v59 = vpop.eup %7798 }
 0x174   :  { %v389_v60 = vadd.f32 1.0, %v7799_v59  ;;  %v7401_v59 = vmul.f32 -1.442695, %v8536_v29 }
 0x176   :  { %7800 = vrcp.f32 %v389_v60 }
 0x180   :  { %v7801_v1 = vpop.eup %7800 }
 0x181   :  { %v396_v18 = vmul.f32 0.0, %v7801_v1 }
 0x1d9   :  { %v416_v23 = vpop.permute.xlu1 %415 }
 0x1da   :  { %v8640_v22 = vrot.slane %v416_v23, %v8487_v15 }
 0x1df   :  { %v399_v3 = vpop.permute.xlu0 %398 }
 0x1e0   :  { %v401_v16 = vmul.f32 %v7801_v1, %v399_v3 }
 0x1e1   :  { %v425_v28 = vpop.permute.xlu1 %424 }
 0x1e2   :  { %403 = vrot.lane.b32.xlu0 %v401_v16, %s8260_s4  ;;  %v8643_v31 = vrot.slane %v425_v28, %v8487_v15 }
 0x1e4   :  { %v449_v36 = vcombine.low %v8640_v22, %v8643_v31 }
 0x1e6   :  { %432 = vperm.xlu0 %7761, %v8553_v42   ;;  %v441_v34 = vpop.permute.xlu1 %440  ;;  %v456_v41 = vrot.slane %v449_v36, %v8496_v35 }
 0x1e7   :  { %v8649_v38 = vrot.slane %v441_v34, %v8487_v15 }
 0x1e8   :  { %v8659_v50 = vrot.slane %v456_v41, %v8496_v35  ;;  %v553_v41 = vcombine.high %v8511_v56, %v8511_v56  ;;  %v8267_v56 = vmov 6  }
 0x1e9   :  { %10496 = vst [vmem:[#allocation25_spill] sm:$0xff] %v8649_v38 }
 0x254   :  { %v404_v20 = vpop.permute.xlu0 %403 }
 0x255   :  { %v406_v21 = vadd.f32 %v404_v20, %v396_v18 }
 0x257   :  { %7802 = vtanh.f32 %v406_v21  ;;  %487 = vrot.lane.b32.xlu0 %v406_v21, %s8260_s4 }
 0x258   :  { %7804 = vpow2.f32 %v7401_v59 }
 0x261   :  { %v7803_v33 = vpop.eup %7802 }
 0x262   :  { %409 = vrot.lane.b32.xlu1 %v7803_v33, %s8260_s4  ;;  %v7805_v60 = vpop.eup %7804 }
 0x263   :  { %v390_v3 = vadd.f32 1.0, %v7805_v60 }
 0x265   :  { %v433_v39 = vpop.permute.xlu0 %432  ;;  %7806 = vrcp.f32 %v390_v3 }
 0x266   :  { %v8652_v40 = vrot.slane %v433_v39, %v8487_v15 }
 0x268   :  { %10497 = vst [vmem:[#allocation26_spill] sm:$0xff] %v8652_v40  ;;  %v467_v44 = vcombine.low %v8652_v40, %v8649_v38 }
 0x26a   :  { %v474_v48 = vrot.slane %v467_v44, %v8496_v35  ;;  %v580_v44 = vcombine.high %v8518_v2, %v8518_v2 }
 0x26c   :  { %v8662_v51 = vrot.slane %v474_v48, %v8496_v35  ;;  %v567_v48 = vrot.slane %v553_v41, %v8496_v35  ;;  %v594_v59 = vrot.slane %v580_v44, %v8496_v35 }
 0x26e   :  { %v483_v1 = vsel %vm8502_vm3, %v8659_v50, %v8662_v51  ;;  %v598_v3 = vsel %vm8506_vm4, %v567_v48, %v594_v59 }
 0x26f   :  { %vm484_vm5 = vcmp.gt.f32.partialorder %v483_v1, 0.0  ;;  %v7807_v20 = vpop.eup %7806 }
 0x2c9   :  { %v488_v16 = vpop.permute.xlu0 %487 }
 0x2ca   :  { %v8673_v18 = vsel %vm484_vm5, %v488_v16, 0.0 }
 0x2cb   :  { %660 = vrot.lane.b32.xlu0 %v8673_v18, %s8260_s4 }
 0x2d4   :  { %v410_v21 = vpop.permute.xlu1 %409 }
 0x2d5   :  { %v412_v23 = vmul.f32 %v7807_v20, %v410_v21 }
 0x2d7   :  { %v8677_v29 = vsel %vm484_vm5, %v412_v23, 0.0 }
 0x2d8   :  { %v498_v28 = vrot.slane %v8677_v29, %v8496_v35  ;;  %v599_v33 = vpack.c.bf16 %v8677_v29, %v8677_v29 }
 0x2da   :  { %7402 = vmatmul.mubr.msk.bf16.vlgmr.msra.gmra.mrb[4].mxu0 %vm336_vm6, %v599_v33  ;;  %v8685_v34 = vrot.slane %v498_v28, %v8496_v35  ;;  %v499_v36 = vcombine.high %v498_v28, %v498_v28  ;;  %v8266_v28 = vmov 1  }
 0x2db   :  { %1134 = vmatpush1.bf16.msra.mxu0 %v8440_v6  ;;  %1165 = vmatprep.mubr.bf16.mxu0 %v10484_v0 }
 0x2dc   :  { %1135 = vmatprep.subr.bf16.mxu0 %v8442_v7  ;;  %517 = vst.msk [vmem:[#allocation3] sm:$0x1] %vm516_vm7, %v8685_v34  ;;  %v8693_v39 = vrot.slane %v499_v36, %v8496_v35  ;;  %7763 = vset.pattern.permute.xlu0 %v8266_v28 }
 0x2dd   :  { %7764 = vset.pattern.permute.xlu1 %v8266_v28  ;;  %681 = vperm.xlu0 %7763, %v8553_v42  }
 0x2de   :  { %518 = vst.msk [vmem:[#allocation3 + $0x8] sm:$0x1] %vm516_vm7, %v8693_v39 }
 0x2df   :  { %1136 = vmatpush1.bf16.msra.mxu0 %v8446_v8 }
 0x2e0   :  { %1137 = vmatprep.subr.bf16.mxu0 %v8450_v9 }
 0x2e1   :  { %7766 = vset.pattern.permute.xlu0 %v8267_v56 }
 0x2e2   :  { %705 = vperm.xlu0 %7766, %v8563_v49  }
 0x2e3   :  { %1138 = vmatpush1.bf16.msra.mxu0 %v8452_v10 }
 0x2e4   :  { %1139 = vmatprep.subr.bf16.mxu0 %v8454_v11 }
 0x2e7   :  { %1140 = vmatpush1.bf16.msra.mxu0 %v8463_v12 }
 0x2e8   :  { %1587 = vmatprep.subr.bf16.mxu0 %v8438_v5 }
 0x33d   :  { %v661_v59 = vpop.permute.xlu0 %660 }
 0x3ad   :  { %v637_v60 = vpop.f32.mrb[4].mxu0 }
 0x3ae   :  { %v644_v1 = vadd.f32 %v637_v60, %v8540_v30  ;;  %v639_v16 = vpop.f32.mrb[5].mxu0 }
 0x3af   :  { %v645_v20 = vadd.f32 %v639_v16, %v598_v3  ;;  %v641_v21 = vpop.f32.mrb[6].mxu0 }
 0x3b0   :  { %v642_v23 = vpop.f32.mrb[7].mxu0  ;;  %v7403_v30 = vmul.f32 -1.442695, %v644_v1  ;;  %v682_v1 = vpop.permute.xlu0 %681 }
 0x3b1   :  { %7808 = vtanh.f32 %v645_v20  ;;  %v8720_v23 = vrot.slane %v682_v1, %v8487_v15  ;;  %v7404_v1 = vmul.f32 -1.442695, %v645_v20 }
 0x3b2   :  { %7810 = vpow2.f32 %v7403_v30 }
 0x3bb   :  { %v7809_v2 = vpop.eup %7808 }
 0x3bc   :  { %665 = vrot.lane.b32.xlu1 %v7809_v2, %s8260_s4  ;;  %v7811_v33 = vpop.eup %7810 }
 0x3bd   :  { %v652_v36 = vadd.f32 1.0, %v7811_v33 }
 0x3bf   :  { %7812 = vrcp.f32 %v652_v36 }
 0x3c9   :  { %v7813_v41 = vpop.eup %7812 }
 0x3ca   :  { %v663_v60 = vmul.f32 %v7813_v41, %v661_v59 }
 0x42e   :  { %v666_v44 = vpop.permute.xlu1 %665 }
 0x42f   :  { %v668_v48 = vmul.f32 %v7813_v41, %v666_v44 }
 0x431   :  { %670 = vrot.lane.b32.xlu1 %v668_v48, %s8260_s4 }
 0x435   :  { %689 = vperm.xlu1 %7764, %v8563_v49  }
 0x439   :  { %7765 = vset.pattern.permute.xlu1 %v8267_v56  ;;  %v706_v56 = vpop.permute.xlu0 %705 }
 0x43a   :  { %697 = vperm.xlu1 %7765, %v8553_v42   ;;  %v8729_v33 = vrot.slane %v706_v56, %v8487_v15 }
 0x43c   :  { %10498 = vst [vmem:[#allocation27_spill] sm:$0xff] %v8729_v33 }
 0x4a3   :  { %v671_v3 = vpop.permute.xlu1 %670 }
 0x4a4   :  { %v673_v16 = vadd.f32 %v671_v3, %v663_v60 }
 0x4a6   :  { %7814 = vtanh.f32 %v673_v16 }
 0x4a7   :  { %7816 = vpow2.f32 %v7404_v1 }
 0x4b0   :  { %v7815_v21 = vpop.eup %7814 }
 0x4b1   :  { %676 = vrot.lane.b32.xlu1 %v7815_v21, %s8260_s4  ;;  %v7817_v21 = vpop.eup %7816 }
 0x4b4   :  { %v690_v28 = vpop.permute.xlu1 %689 }
 0x4b5   :  { %752 = vrot.lane.b32.xlu1 %v673_v16, %s8260_s4  ;;  %v8724_v2 = vrot.slane %v690_v28, %v8487_v15  ;;  %v653_v28 = vadd.f32 1.0, %v7817_v21 }
 0x4b7   :  { %v714_v30 = vcombine.low %v8720_v23, %v8724_v2  ;;  %7818 = vrcp.f32 %v653_v28 }
 0x4b9   :  { %v698_v36 = vpop.permute.xlu1 %697  ;;  %v721_v41 = vrot.slane %v714_v30, %v8496_v35 }
 0x4ba   :  { %v8733_v44 = vrot.slane %v698_v36, %v8487_v15 }
 0x4bb   :  { %v8739_v60 = vrot.slane %v721_v41, %v8496_v35 }
 0x4bc   :  { %10499 = vst [vmem:[#allocation28_spill] sm:$0xff] %v8733_v44  ;;  %v732_v48 = vcombine.low %v8733_v44, %v8729_v33 }
 0x4be   :  { %v739_v59 = vrot.slane %v732_v48, %v8496_v35 }
 0x4c0   :  { %v8742_v3 = vrot.slane %v739_v59, %v8496_v35 }
 0x4c1   :  { %v7819_v30 = vpop.eup %7818 }
 0x4c2   :  { %v748_v56 = vsel %vm8502_vm3, %v8739_v60, %v8742_v3 }
 0x4c3   :  { %vm749_vm8 = vcmp.gt.f32.partialorder %v748_v56, 0.0  ;;  %v845_v56 = vcombine.high %v8534_v27, %v8534_v27 }
 0x523   :  { %v677_v36 = vpop.permute.xlu1 %676 }
 0x524   :  { %v679_v41 = vmul.f32 %v7819_v30, %v677_v36  ;;  %v859_v36 = vrot.slane %v845_v56, %v8496_v35 }
 0x526   :  { %v8753_v48 = vsel %vm749_vm8, %v679_v41, %v8677_v29  ;;  %v756_v59 = vsel %vm749_vm8, %v679_v41, 0.0 }
 0x527   :  { %v753_v13 = vpop.permute.xlu1 %752  ;;  %v764_v20 = vrot.slane %v756_v59, %v8496_v35  ;;  %v864_v1 = vpack.c.bf16 %v8753_v48, %v8753_v48 }
 0x528   :  { %v8759_v21 = vsel %vm749_vm8, %v753_v13, %v8673_v18  ;;  %v818_v18 = vcombine.high %v8531_v26, %v8531_v26  ;;  %v8269_v26 = vmov 5  }
 0x529   :  { %925 = vrot.lane.b32.xlu1 %v8759_v21, %s8260_s4  ;;  %7405 = vmatmul.mubr.msk.bf16.vlgmr.msra.gmra.mrb[4].mxu1 %vm336_vm6, %v864_v1  ;;  %v8765_v28 = vrot.slane %v764_v20, %v8496_v35  ;;  %v765_v29 = vcombine.high %v764_v20, %v764_v20 }
 0x52a   :  { %1395 = vmatpush1.bf16.msra.mxu1 %v8440_v6  ;;  %1426 = vmatprep.mubr.bf16.mxu1 %v10484_v0  ;;  %v832_v30 = vrot.slane %v818_v18, %v8496_v35  ;;  %v8268_v0 = vmov 2  }
 0x52b   :  { %1396 = vmatprep.subr.bf16.mxu1 %v8442_v7  ;;  %782 = vst.msk [vmem:[#allocation3 + $0x1] sm:$0x1] %vm516_vm7, %v8765_v28  ;;  %v8773_v13 = vrot.slane %v765_v29, %v8496_v35  ;;  %7767 = vset.pattern.permute.xlu1 %v8268_v0 }
 0x52c   :  { %v863_v20 = vsel %vm8506_vm4, %v832_v30, %v859_v36  ;;  %7768 = vset.pattern.permute.xlu0 %v8268_v0 }
 0x52d   :  { %783 = vst.msk [vmem:[#allocation3 + $0x9] sm:$0x1] %vm516_vm7, %v8773_v13  ;;  %946 = vperm.xlu1 %7767, %v8553_v42  }
 0x52e   :  { %1397 = vmatpush1.bf16.msra.mxu1 %v8446_v8 }
 0x52f   :  { %1398 = vmatprep.subr.bf16.mxu1 %v8450_v9 }
 0x531   :  { %7769 = vset.pattern.permute.xlu1 %v8269_v26 }
 0x532   :  { %1399 = vmatpush1.bf16.msra.mxu1 %v8452_v10  ;;  %962 = vperm.xlu1 %7769, %v8553_v42  }
 0x533   :  { %1400 = vmatprep.subr.bf16.mxu1 %v8454_v11 }
 0x536   :  { %1401 = vmatpush1.bf16.msra.mxu1 %v8463_v12  ;;  %970 = vperm.xlu1 %7769, %v8563_v49  }
 0x537   :  { %1780 = vmatprep.subr.bf16.mxu1 %v8438_v5 }
 0x59b   :  { %v926_v0 = vpop.permute.xlu1 %925 }
 0x5ac   :  { %v947_v36 = vpop.permute.xlu1 %946 }
 0x5fc   :  { %v902_v41 = vpop.f32.mrb[4].mxu1 }
 0x5fd   :  { %v909_v59 = vadd.f32 %v902_v41, %v8557_v43  ;;  %v904_v1 = vpop.f32.mrb[5].mxu1 }
 0x5fe   :  { %v910_v29 = vadd.f32 %v904_v1, %v863_v20  ;;  %v906_v57 = vpop.f32.mrb[6].mxu1 }
 0x5ff   :  { %v907_v16 = vpop.f32.mrb[7].mxu1  ;;  %v7406_v43 = vmul.f32 -1.442695, %v909_v59  ;;  %v963_v59 = vpop.permute.xlu1 %962 }
 0x600   :  { %7820 = vtanh.f32 %v910_v29 }
 0x601   :  { %7822 = vpow2.f32 %v7406_v43 }
 0x603   :  { %v971_v26 = vpop.permute.xlu1 %970 }
 0x604   :  { %v8803_v43 = vrot.slane %v971_v26, %v8487_v15  ;;  %v7407_v26 = vmul.f32 -1.442695, %v910_v29 }
 0x606   :  { %10501 = vst [vmem:[#allocation30_spill] sm:$0xff] %v8803_v43 }
 0x60a   :  { %v7821_v27 = vpop.eup %7820 }
 0x60b   :  { %930 = vrot.lane.b32.xlu0 %v7821_v27, %s8260_s4  ;;  %v7823_v18 = vpop.eup %7822  ;;  %v8800_v27 = vrot.slane %v963_v59, %v8487_v15 }
 0x60c   :  { %v917_v57 = vadd.f32 1.0, %v7823_v18 }
 0x60d   :  { %10500 = vst [vmem:[#allocation29_spill] sm:$0xff] %v8800_v27 }
 0x60e   :  { %7824 = vrcp.f32 %v917_v57  ;;  %v8807_v57 = vrot.slane %v947_v36, %v8487_v15 }
 0x618   :  { %v7825_v16 = vpop.eup %7824 }
 0x619   :  { %v928_v41 = vmul.f32 %v7825_v16, %v926_v0 }
 0x67d   :  { %v931_v56 = vpop.permute.xlu0 %930 }
 0x67e   :  { %v933_v30 = vmul.f32 %v7825_v16, %v931_v56  ;;  %v997_v16 = vcombine.low %v8800_v27, %v8803_v43 }
 0x680   :  { %935 = vrot.lane.b32.xlu0 %v933_v30, %s8260_s4  ;;  %v1004_v0 = vrot.slane %v997_v16, %v8496_v35 }
 0x682   :  { %v8822_v36 = vrot.slane %v1004_v0, %v8496_v35 }
 0x684   :  { %954 = vperm.xlu0 %7768, %v8563_v49  }
 0x6f2   :  { %v936_v20 = vpop.permute.xlu0 %935 }
 0x6f3   :  { %v938_v1 = vadd.f32 %v936_v20, %v928_v41 }
 0x6f5   :  { %1017 = vrot.lane.b32.xlu1 %v938_v1, %s8260_s4  ;;  %7826 = vtanh.f32 %v938_v1 }
 0x6f6   :  { %7828 = vpow2.f32 %v7407_v26 }
 0x6ff   :  { %v7827_v18 = vpop.eup %7826 }
 0x700   :  { %941 = vrot.lane.b32.xlu0 %v7827_v18, %s8260_s4  ;;  %v7829_v18 = vpop.eup %7828 }
 0x703   :  { %v955_v56 = vpop.permute.xlu0 %954 }
 0x704   :  { %v8812_v30 = vrot.slane %v955_v56, %v8487_v15  ;;  %v918_v56 = vadd.f32 1.0, %v7829_v18 }
 0x706   :  { %v979_v41 = vcombine.low %v8807_v57, %v8812_v30  ;;  %7830 = vrcp.f32 %v918_v56  ;;  %v10502_v56 = vmov 0  }
 0x708   :  { %v986_v20 = vrot.slane %v979_v41, %v8496_v35 }
 0x70a   :  { %v8819_v1 = vrot.slane %v986_v20, %v8496_v35 }
 0x70c   :  { %v1013_v16 = vsel %vm8502_vm3, %v8819_v1, %v8822_v36 }
 0x70d   :  { %vm1014_vm9 = vcmp.gt.f32.partialorder %v1013_v16, 0.0 }
 0x710   :  { %v7831_v20 = vpop.eup %7830 }
 0x767   :  { %v1018_v41 = vpop.permute.xlu1 %1017 }
 0x768   :  { %v8833_v0 = vsel %vm1014_vm9, %v1018_v41, %v8759_v21 }
 0x769   :  { %1190 = vrot.lane.b32.xlu1 %v8833_v0, %s8260_s4 }
 0x772   :  { %v942_v59 = vpop.permute.xlu0 %941 }
 0x773   :  { %v944_v29 = vmul.f32 %v7831_v20, %v942_v59 }
 0x775   :  { %v8838_v26 = vsel %vm1014_vm9, %v944_v29, %v8753_v48  ;;  %v1021_v40 = vsel %vm1014_vm9, %v944_v29, 0.0 }
 0x776   :  { %v1029_v38 = vrot.slane %v1021_v40, %v8496_v35  ;;  %v1129_v18 = vpack.c.bf16 %v8838_v26, %v8838_v26 }
 0x778   :  { %v1030_v16 = vcombine.high %v1029_v38, %v1029_v38  ;;  %7408 = vmatmul.mubr.msk.bf16.vlgmr.msra.gmra.mrb[8].mxu0 %vm336_vm6, %v1129_v18  ;;  %v8845_v21 = vrot.slane %v1029_v38, %v8496_v35 }
 0x779   :  { %1588 = vmatpush1.bf16.msra.mxu0 %v8440_v6  ;;  %1619 = vmatprep.mubr.bf16.mxu0 %v10502_v56  ;;  %v1083_v6 = vcombine.high %v8547_v37, %v8547_v37  ;;  %v8271_v37 = vmov 4  }
 0x77a   :  { %1589 = vmatprep.subr.bf16.mxu0 %v8442_v7  ;;  %1047 = vst.msk [vmem:[#allocation3 + $0x2] sm:$0x1] %vm516_vm7, %v8845_v21  ;;  %v8853_v40 = vrot.slane %v1030_v16, %v8496_v35  ;;  %v1110_v7 = vcombine.high %v8568_v58, %v8568_v58  ;;  %v8270_v16 = vmov 3  }
 0x77b   :  { %v1097_v38 = vrot.slane %v1083_v6, %v8496_v35  ;;  %7770 = vset.pattern.permute.xlu1 %v8270_v16  ;;  %7771 = vset.pattern.permute.xlu0 %v8270_v16 }
 0x77c   :  { %1048 = vst.msk [vmem:[#allocation3 + $0xa] sm:$0x1] %vm516_vm7, %v8853_v40  ;;  %1211 = vperm.xlu1 %7770, %v8553_v42  }
 0x77d   :  { %1590 = vmatpush1.bf16.msra.mxu0 %v8446_v8  ;;  %v1124_v8 = vrot.slane %v1110_v7, %v8496_v35 }
 0x77e   :  { %1591 = vmatprep.subr.bf16.mxu0 %v8450_v9 }
 0x77f   :  { %v1128_v41 = vsel %vm8506_vm4, %v1097_v38, %v1124_v8 }
 0x780   :  { %7772 = vset.pattern.permute.xlu1 %v8271_v37 }
 0x781   :  { %1592 = vmatpush1.bf16.msra.mxu0 %v8452_v10  ;;  %1227 = vperm.xlu1 %7772, %v8553_v42  }
 0x782   :  { %1593 = vmatprep.subr.bf16.mxu0 %v8454_v11 }
 0x785   :  { %1594 = vmatpush1.bf16.msra.mxu0 %v8463_v12  ;;  %1235 = vperm.xlu1 %7772, %v8563_v49  }
 0x786   :  { %1973 = vmatprep.subr.bf16.mxu0 %v8438_v5 }
 0x789   :  { %7774 = vset.pattern.permute.xlu1 %v10502_v56 }
 0x7db   :  { %v1191_v42 = vpop.permute.xlu1 %1190 }
 0x84b   :  { %v1167_v48 = vpop.f32.mrb[8].mxu0 }
 0x84c   :  { %v1174_v59 = vadd.f32 %v1167_v48, %v8591_v19  ;;  %v1169_v20 = vpop.f32.mrb[9].mxu0 }
 0x84d   :  { %v1175_v29 = vadd.f32 %v1169_v20, %v1128_v41  ;;  %v1171_v18 = vpop.f32.mrb[10].mxu0  ;;  %v1212_v41 = vpop.permute.xlu1 %1211 }
 0x84e   :  { %v1172_v5 = vpop.f32.mrb[11].mxu0  ;;  %v7409_v19 = vmul.f32 -1.442695, %v1174_v59 }
 0x84f   :  { %7832 = vtanh.f32 %v1175_v29 }
 0x850   :  { %7834 = vpow2.f32 %v7409_v19 }
 0x851   :  { %v1228_v59 = vpop.permute.xlu1 %1227 }
 0x852   :  { %v8882_v37 = vrot.slane %v1228_v59, %v8487_v15 }
 0x855   :  { %v1236_v16 = vpop.permute.xlu1 %1235 }
 0x859   :  { %v7833_v58 = vpop.eup %7832 }
 0x85a   :  { %1195 = vrot.lane.b32.xlu0 %v7833_v58, %s8260_s4  ;;  %v7835_v6 = vpop.eup %7834  ;;  %v8885_v58 = vrot.slane %v1236_v16, %v8487_v15 }
 0x85b   :  { %v1182_v7 = vadd.f32 1.0, %v7835_v6 }
 0x85c   :  { %v1262_v6 = vcombine.low %v8882_v37, %v8885_v58 }
 0x85d   :  { %7836 = vrcp.f32 %v1182_v7 }
 0x867   :  { %v7837_v38 = vpop.eup %7836 }
 0x868   :  { %v1193_v20 = vmul.f32 %v7837_v38, %v1191_v42 }
 0x8cc   :  { %v1196_v8 = vpop.permute.xlu0 %1195 }
 0x8cd   :  { %v1198_v48 = vmul.f32 %v7837_v38, %v1196_v8  ;;  %v1269_v8 = vrot.slane %v1262_v6, %v8496_v35 }
 0x8cf   :  { %1200 = vrot.lane.b32.xlu0 %v1198_v48, %s8260_s4 }
 0x8d3   :  { %1219 = vperm.xlu0 %7771, %v8563_v49   ;;  %v8889_v49 = vrot.slane %v1212_v41, %v8487_v15  ;;  %v8904_v41 = vrot.slane %v1269_v8, %v8496_v35 }
 0x8d7   :  { %7773 = vset.pattern.permute.xlu0 %v10502_v56 }
 0x941   :  { %v1201_v18 = vpop.permute.xlu0 %1200 }
 0x942   :  { %v1203_v5 = vadd.f32 %v1201_v18, %v1193_v20 }
 0x944   :  { %1282 = vrot.lane.b32.xlu1 %v1203_v5, %s8260_s4  ;;  %7838 = vtanh.f32 %v1203_v5  ;;  %v7410_v5 = vmul.f32 -1.442695, %v1175_v29 }
 0x946   :  { %7840 = vpow2.f32 %v7410_v5 }
 0x94e   :  { %v7839_v19 = vpop.eup %7838 }
 0x94f   :  { %1206 = vrot.lane.b32.xlu0 %v7839_v19, %s8260_s4 }
 0x950   :  { %v7841_v59 = vpop.eup %7840 }
 0x951   :  { %v1183_v19 = vadd.f32 1.0, %v7841_v59 }
 0x952   :  { %v1220_v7 = vpop.permute.xlu0 %1219 }
 0x953   :  { %v8894_v38 = vrot.slane %v1220_v7, %v8487_v15  ;;  %7842 = vrcp.f32 %v1183_v19  ;;  %v8929_v19 = vld [vmem:[#allocation10] ss:$8 sps:$4 sm:$0xff]  }
 0x955   :  { %v1244_v48 = vcombine.low %v8889_v49, %v8894_v38 }
 0x957   :  { %v1251_v42 = vrot.slane %v1244_v48, %v8496_v35 }
 0x959   :  { %v8901_v20 = vrot.slane %v1251_v42, %v8496_v35 }
 0x95b   :  { %v1278_v16 = vsel %vm8502_vm3, %v8901_v20, %v8904_v41 }
 0x95c   :  { %vm1279_vm10 = vcmp.gt.f32.partialorder %v1278_v16, 0.0 }
 0x95d   :  { %v7843_v8 = vpop.eup %7842 }
 0x9b6   :  { %v1283_v6 = vpop.permute.xlu1 %1282 }
 0x9b7   :  { %v8915_v7 = vsel %vm1279_vm10, %v1283_v6, %v8833_v0 }
 0x9b8   :  { %1451 = vrot.lane.b32.xlu1 %v8915_v7, %s8260_s4 }
 0x9c1   :  { %v1207_v48 = vpop.permute.xlu0 %1206 }
 0x9c2   :  { %v1209_v29 = vmul.f32 %v7843_v8, %v1207_v48  ;;  %v8038_v8 = vld [vmem:[#allocation10 + $0x10] ss:$8 sps:$4 sm:$0xff]   ;;  %v1371_v48 = vcombine.high %v8574_v62, %v8574_v62 }
 0x9c4   :  { %v8920_v42 = vsel %vm1279_vm10, %v1209_v29, %v8838_v26  ;;  %v1286_v5 = vsel %vm1279_vm10, %v1209_v29, 0.0  ;;  %v8037_v26 = vld [vmem:[#allocation10 + $0x14] ss:$8 sps:$4 sm:$0xff]  }
 0x9c5   :  { %v1294_v18 = vrot.slane %v1286_v5, %v8496_v35  ;;  %v1390_v59 = vpack.c.bf16 %v8920_v42, %v8920_v42  ;;  %v1385_v5 = vrot.slane %v1371_v48, %v8496_v35 }
 0x9c7   :  { %v1295_v16 = vcombine.high %v1294_v18, %v1294_v18  ;;  %7411 = vmatmul.mubr.msk.bf16.vlgmr.msra.gmra.mrb[8].mxu1 %vm336_vm6, %v1390_v59  ;;  %v8927_v0 = vrot.slane %v1294_v18, %v8496_v35  ;;  %v1344_v18 = vcombine.high %v8571_v61, %v8571_v61 }
 0x9c8   :  { %1781 = vmatpush1.bf16.msra.mxu1 %v8929_v19  ;;  %1812 = vmatprep.mubr.bf16.mxu1 %v10502_v56 }
 0x9c9   :  { %1782 = vmatprep.subr.bf16.mxu1 %v8037_v26  ;;  %1312 = vst.msk [vmem:[#allocation3 + $0x3] sm:$0x1] %vm516_vm7, %v8927_v0  ;;  %v8936_v6 = vrot.slane %v1295_v16, %v8496_v35  ;;  %v1358_v29 = vrot.slane %v1344_v18, %v8496_v35 }
 0x9cb   :  { %1313 = vst.msk [vmem:[#allocation3 + $0xb] sm:$0x1] %vm516_vm7, %v8936_v6 }
 0x9cc   :  { %1783 = vmatpush1.bf16.msra.mxu1 %v8038_v8 }
 0x9cd   :  { %1784 = vmatprep.subr.bf16.mxu1 %v8450_v9  ;;  %v1389_v9 = vsel %vm8506_vm4, %v1358_v29, %v1385_v5 }
 0x9d0   :  { %1785 = vmatpush1.bf16.msra.mxu1 %v8452_v10 }
 0x9d1   :  { %1786 = vmatprep.subr.bf16.mxu1 %v8454_v11 }
 0x9d4   :  { %1787 = vmatpush1.bf16.msra.mxu1 %v8463_v12 }
 0xa9a   :  { %v1428_v59 = vpop.f32.mrb[8].mxu1 }
 0xa9b   :  { %v1435_v16 = vadd.f32 %v1428_v59, %v8599_v24  ;;  %v1430_v10 = vpop.f32.mrb[9].mxu1  ;;  %v1452_v24 = vpop.permute.xlu1 %1451 }
 0xa9c   :  { %v1436_v11 = vadd.f32 %v1430_v10, %v1389_v9  ;;  %v1432_v44 = vpop.f32.mrb[10].mxu1 }
 0xa9d   :  { %v1433_v12 = vpop.f32.mrb[11].mxu1  ;;  %v7412_v61 = vmul.f32 -1.442695, %v1435_v16 }
 0xa9e   :  { %7844 = vtanh.f32 %v1436_v11 }
 0xa9f   :  { %7846 = vpow2.f32 %v7412_v61 }
 0xaa8   :  { %v7845_v33 = vpop.eup %7844 }
 0xaa9   :  { %1456 = vrot.lane.b32.xlu0 %v7845_v33, %s8260_s4  ;;  %v7847_v62 = vpop.eup %7846  ;;  %v7413_v33 = vmul.f32 -1.442695, %v1436_v11 }
 0xaaa   :  { %v1443_v18 = vadd.f32 1.0, %v7847_v62 }
 0xaac   :  { %7848 = vrcp.f32 %v1443_v18 }
 0xab6   :  { %v7849_v48 = vpop.eup %7848 }
 0xab7   :  { %v1454_v29 = vmul.f32 %v7849_v48, %v1452_v24  ;;  %v8039_v24 = vld [vmem:[#allocation10 + $0x24] ss:$8 sps:$4 sm:$0xff]  }
 0xb1b   :  { %v1457_v27 = vpop.permute.xlu0 %1456 }
 0xb1c   :  { %v1459_v43 = vmul.f32 %v7849_v48, %v1457_v27  ;;  %v10503_v27 = vsel %vm8502_vm3, %v8904_v41, %v8901_v20 }
 0xb1d   :  { %vm1472_vm11 = vcmp.gt.f32.partialorder %v10503_v27, 0.0 }
 0xb1e   :  { %1461 = vrot.lane.b32.xlu0 %v1459_v43, %s8260_s4 }
 0xb90   :  { %v1462_v5 = vpop.permute.xlu0 %1461 }
 0xb91   :  { %v1464_v59 = vadd.f32 %v1462_v5, %v1454_v29  ;;  %v8040_v29 = vld [vmem:[#allocation10 + $0x20] ss:$8 sps:$4 sm:$0xff]   ;;  %v8041_v5 = vld [vmem:[#allocation10 + $0x34] ss:$8 sps:$4 sm:$0xff]  }
 0xb93   :  { %1475 = vrot.lane.b32.xlu0 %v1464_v59, %s8260_s4  ;;  %7850 = vtanh.f32 %v1464_v59 }
 0xb94   :  { %7852 = vpow2.f32 %v7413_v33 }
 0xb9d   :  { %v7851_v44 = vpop.eup %7850 }
 0xb9e   :  { %1467 = vrot.lane.b32.xlu1 %v7851_v44, %s8260_s4  ;;  %v7853_v16 = vpop.eup %7852 }
 0xb9f   :  { %v1444_v9 = vadd.f32 1.0, %v7853_v16 }
 0xba1   :  { %7854 = vrcp.f32 %v1444_v9 }
 0xbab   :  { %v7855_v12 = vpop.eup %7854 }
 0xc05   :  { %v1476_v10 = vpop.permute.xlu0 %1475 }
 0xc06   :  { %v8963_v43 = vsel %vm1472_vm11, %v1476_v10, %v8915_v7 }
 0xc07   :  { %1644 = vrot.lane.b32.xlu0 %v8963_v43, %s8260_s4 }
 0xc10   :  { %v1468_v61 = vpop.permute.xlu1 %1467 }
 0xc11   :  { %v1470_v11 = vmul.f32 %v7855_v12, %v1468_v61 }
 0xc13   :  { %v8968_v62 = vsel %vm1472_vm11, %v1470_v11, %v8920_v42  ;;  %v1479_v18 = vsel %vm1472_vm11, %v1470_v11, 0.0 }
 0xc14   :  { %v1487_v48 = vrot.slane %v1479_v18, %v8496_v35  ;;  %v1583_v20 = vpack.c.bf16 %v8968_v62, %v8968_v62 }
 0xc16   :  { %v1488_v41 = vcombine.high %v1487_v48, %v1487_v48  ;;  %7414 = vmatmul.mubr.msk.bf16.vlgmr.msra.gmra.mrb[12].mxu0 %vm336_vm6, %v1583_v20  ;;  %v8975_v7 = vrot.slane %v1487_v48, %v8496_v35 }
 0xc17   :  { %1974 = vmatpush1.bf16.msra.mxu0 %v8929_v19  ;;  %2005 = vmatprep.mubr.bf16.mxu0 %v10502_v56  ;;  %v8042_v19 = vld [vmem:[#allocation10 + $0x30] ss:$8 sps:$4 sm:$0xff]   ;;  %v1537_v56 = vcombine.high %v8577_v63, %v8577_v63 }
 0xc18   :  { %1975 = vmatprep.subr.bf16.mxu0 %v8037_v26  ;;  %1505 = vst.msk [vmem:[#allocation3 + $0x4] sm:$0x1] %vm516_vm7, %v8975_v7  ;;  %v8982_v42 = vrot.slane %v1488_v41, %v8496_v35  ;;  %v1564_v26 = vcombine.high %v8583_v4, %v8583_v4 }
 0xc19   :  { %v1551_v59 = vrot.slane %v1537_v56, %v8496_v35 }
 0xc1a   :  { %1506 = vst.msk [vmem:[#allocation3 + $0xc] sm:$0x1] %vm516_vm7, %v8982_v42  ;;  %v1578_v44 = vrot.slane %v1564_v26, %v8496_v35 }
 0xc1b   :  { %1976 = vmatpush1.bf16.msra.mxu0 %v8038_v8 }
 0xc1c   :  { %1977 = vmatprep.subr.bf16.mxu0 %v8039_v24  ;;  %v1582_v16 = vsel %vm8506_vm4, %v1551_v59, %v1578_v44  ;;  %v10504_v44 = vsel %vm8502_vm3, %v8822_v36, %v8819_v1 }
 0xc1d   :  { %vm1665_vm12 = vcmp.gt.f32.partialorder %v10504_v44, 0.0 }
 0xc1f   :  { %1978 = vmatpush1.bf16.msra.mxu0 %v8040_v29 }
 0xc20   :  { %1979 = vmatprep.subr.bf16.mxu0 %v8041_v5 }
 0xc23   :  { %1980 = vmatpush1.bf16.msra.mxu0 %v8042_v19 }
 0xce9   :  { %v1621_v33 = vpop.f32.mrb[12].mxu0 }
 0xcea   :  { %v1628_v8 = vadd.f32 %v1621_v33, %v8606_v32  ;;  %v1623_v9 = vpop.f32.mrb[13].mxu0  ;;  %v1645_v32 = vpop.permute.xlu0 %1644 }
 0xceb   :  { %v1629_v10 = vadd.f32 %v1623_v9, %v1582_v16  ;;  %v1625_v27 = vpop.f32.mrb[14].mxu0 }
 0xcec   :  { %v1626_v12 = vpop.f32.mrb[15].mxu0  ;;  %v7415_v63 = vmul.f32 -1.442695, %v1628_v8 }
 0xced   :  { %7856 = vtanh.f32 %v1629_v10  ;;  %v7416_v19 = vmul.f32 -1.442695, %v1629_v10 }
 0xcee   :  { %7858 = vpow2.f32 %v7415_v63 }
 0xcf7   :  { %v7857_v61 = vpop.eup %7856 }
 0xcf8   :  { %1649 = vrot.lane.b32.xlu1 %v7857_v61, %s8260_s4  ;;  %v7859_v4 = vpop.eup %7858 }
 0xcf9   :  { %v1636_v11 = vadd.f32 1.0, %v7859_v4 }
 0xcfb   :  { %7860 = vrcp.f32 %v1636_v11 }
 0xd05   :  { %v7861_v18 = vpop.eup %7860 }
 0xd06   :  { %v1647_v41 = vmul.f32 %v7861_v18, %v1645_v32 }
 0xd6a   :  { %v1650_v48 = vpop.permute.xlu1 %1649 }
 0xd6b   :  { %v1652_v20 = vmul.f32 %v7861_v18, %v1650_v48 }
 0xd6d   :  { %1654 = vrot.lane.b32.xlu1 %v1652_v20, %s8260_s4 }
 0xddf   :  { %v1655_v24 = vpop.permute.xlu1 %1654 }
 0xde0   :  { %v1657_v29 = vadd.f32 %v1655_v24, %v1647_v41 }
 0xde2   :  { %1668 = vrot.lane.b32.xlu1 %v1657_v29, %s8260_s4  ;;  %7862 = vtanh.f32 %v1657_v29 }
 0xde3   :  { %7864 = vpow2.f32 %v7416_v19 }
 0xdec   :  { %v7863_v5 = vpop.eup %7862 }
 0xded   :  { %1660 = vrot.lane.b32.xlu0 %v7863_v5, %s8260_s4  ;;  %v7865_v56 = vpop.eup %7864 }
 0xdee   :  { %v1637_v26 = vadd.f32 1.0, %v7865_v56 }
 0xdf0   :  { %7866 = vrcp.f32 %v1637_v26 }
 0xdfa   :  { %v7867_v8 = vpop.eup %7866 }
 0xe54   :  { %v1669_v59 = vpop.permute.xlu1 %1668 }
 0xe55   :  { %v1671_v33 = vsel %vm1665_vm12, %v1669_v59, %v8963_v43  ;;  %v1730_v43 = vcombine.high %v8602_v25, %v8602_v25 }
 0xe56   :  { %1837 = vrot.lane.b32.xlu1 %v1671_v33, %s8260_s4 }
 0xe57   :  { %v1744_v4 = vrot.slane %v1730_v43, %v8496_v35  ;;  %v10505_v43 = vsel %vm8502_vm3, %v8742_v3, %v8739_v60 }
 0xe58   :  { %vm1858_vm13 = vcmp.gt.f32.partialorder %v10505_v43, 0.0  ;;  %v8272_v43 = vmov 0.0  }
 0xe59   :  { %7572 = vmatprep.subr.bf16.mxu0 %v8272_v43  ;;  %7564 = vmatprep.subr.bf16.mxu1 %v8272_v43 }
 0xe5f   :  { %v1661_v16 = vpop.permute.xlu0 %1660 }
 0xe60   :  { %v1663_v9 = vmul.f32 %v7867_v8, %v1661_v16 }
 0xe62   :  { %v1666_v10 = vsel %vm1665_vm12, %v1663_v9, %v8968_v62  ;;  %v1672_v27 = vsel %vm1665_vm12, %v1663_v9, 0.0  ;;  %v1757_v62 = vcombine.high %v8613_v45, %v8613_v45 }
 0xe63   :  { %v1680_v12 = vrot.slane %v1672_v27, %v8496_v35  ;;  %v1776_v61 = vpack.c.bf16 %v1666_v10, %v1666_v10 }
 0xe64   :  { %v1771_v11 = vrot.slane %v1757_v62, %v8496_v35 }
 0xe65   :  { %v1681_v63 = vcombine.high %v1680_v12, %v1680_v12  ;;  %7417 = vmatmul.mubr.msk.bf16.vlgmr.msra.gmra.mrb[12].mxu1 %vm336_vm6, %v1776_v61  ;;  %v9010_v1 = vrot.slane %v1680_v12, %v8496_v35 }
 0xe66   :  { %v1775_v20 = vsel %vm8506_vm4, %v1744_v4, %v1771_v11  ;;  %7568 = vmatprep.mubr.msk.bf16.mxu1 %vm8273_vm14, %v8272_v43 }
 0xe67   :  { %1698 = vst.msk [vmem:[#allocation3 + $0x5] sm:$0x1] %vm516_vm7, %v9010_v1  ;;  %v9015_v36 = vrot.slane %v1681_v63, %v8496_v35 }
 0xe69   :  { %1699 = vst.msk [vmem:[#allocation3 + $0xd] sm:$0x1] %vm516_vm7, %v9015_v36 }
 0xf38   :  { %v1814_v18 = vpop.f32.mrb[12].mxu1 }
 0xf39   :  { %v1821_v48 = vadd.f32 %v1814_v18, %v8629_v52  ;;  %v1816_v32 = vpop.f32.mrb[13].mxu1  ;;  %v1838_v52 = vpop.permute.xlu1 %1837 }
 0xf3a   :  { %v1822_v41 = vadd.f32 %v1816_v32, %v1775_v20  ;;  %v1818_v24 = vpop.f32.mrb[14].mxu1 }
 0xf3b   :  { %v1819_v29 = vpop.f32.mrb[15].mxu1  ;;  %v7418_v25 = vmul.f32 -1.442695, %v1821_v48 }
 0xf3c   :  { %7868 = vtanh.f32 %v1822_v41  ;;  %v7419_v27 = vmul.f32 -1.442695, %v1822_v41 }
 0xf3d   :  { %7870 = vpow2.f32 %v7418_v25 }
 0xf46   :  { %v7869_v5 = vpop.eup %7868 }
 0xf47   :  { %1842 = vrot.lane.b32.xlu0 %v7869_v5, %s8260_s4  ;;  %v7871_v45 = vpop.eup %7870 }
 0xf48   :  { %v1829_v19 = vadd.f32 1.0, %v7871_v45 }
 0xf4a   :  { %7872 = vrcp.f32 %v1829_v19 }
 0xf54   :  { %v7873_v56 = vpop.eup %7872 }
 0xf55   :  { %v1840_v44 = vmul.f32 %v7873_v56, %v1838_v52 }
 0xfb9   :  { %v1843_v26 = vpop.permute.xlu0 %1842 }
 0xfba   :  { %v1845_v59 = vmul.f32 %v7873_v56, %v1843_v26 }
 0xfbc   :  { %1847 = vrot.lane.b32.xlu0 %v1845_v59, %s8260_s4 }
0x102e   :  { %v1848_v8 = vpop.permute.xlu0 %1847 }
0x102f   :  { %v1850_v16 = vadd.f32 %v1848_v8, %v1840_v44 }
0x1031   :  { %1861 = vrot.lane.b32.xlu0 %v1850_v16, %s8260_s4  ;;  %7874 = vtanh.f32 %v1850_v16 }
0x1032   :  { %7876 = vpow2.f32 %v7419_v27 }
0x103b   :  { %v7875_v9 = vpop.eup %7874 }
0x103c   :  { %1853 = vrot.lane.b32.xlu1 %v7875_v9, %s8260_s4  ;;  %v7877_v12 = vpop.eup %7876 }
0x103d   :  { %v1830_v61 = vadd.f32 1.0, %v7877_v12 }
0x103f   :  { %7878 = vrcp.f32 %v1830_v61 }
0x1049   :  { %v7879_v4 = vpop.eup %7878 }
0x10a3   :  { %v1862_v63 = vpop.permute.xlu0 %1861 }
0x10a4   :  { %v9037_v62 = vsel %vm1858_vm13, %v1862_v63, %v1671_v33  ;;  %v1923_v33 = vcombine.high %v8616_v46, %v8616_v46  ;;  %v9071_v63 = vld [vmem:[%s10476_s6] sm:$0xff]  }
0x10a5   :  { %2030 = vrot.lane.b32.xlu0 %v9037_v62, %s8260_s4 }
0x10a6   :  { %v1937_v29 = vrot.slane %v1923_v33, %v8496_v35 }
0x10ae   :  { %v1854_v11 = vpop.permute.xlu1 %1853 }
0x10af   :  { %v1856_v18 = vmul.f32 %v7879_v4, %v1854_v11  ;;  %v9079_v4 = vld [vmem:[%s10476_s6 + $0x8] sm:$0xff]   ;;  %v9086_v11 = vld [vmem:[%s10476_s6 + $0x10] sm:$0xff]  }
0x10b1   :  { %v9041_v48 = vsel %vm1858_vm13, %v1856_v18, %v1666_v10  ;;  %v1865_v20 = vsel %vm1858_vm13, %v1856_v18, 0.0  ;;  %v1950_v10 = vcombine.high %v8619_v47, %v8619_v47 }
0x10b2   :  { %v1873_v32 = vrot.slane %v1865_v20, %v8496_v35  ;;  %v1969_v41 = vpack.c.bf16 %v9041_v48, %v9041_v48 }
0x10b3   :  { %v1964_v5 = vrot.slane %v1950_v10, %v8496_v35 }
0x10b4   :  { %v1874_v24 = vcombine.high %v1873_v32, %v1873_v32  ;;  %7420 = vmatmul.mubr.msk.bf16.vlgmr.msra.gmra.mrb[16].mxu0 %vm336_vm6, %v1969_v41  ;;  %v9048_v60 = vrot.slane %v1873_v32, %v8496_v35 }
0x10b5   :  { %v1968_v19 = vsel %vm8506_vm4, %v1937_v29, %v1964_v5  ;;  %7573 = vmatpush3.bf16.msra.mxu0 %v9071_v63  ;;  %7580 = vmatprep.mubr.msk.bf16.mxu0 %vm8273_vm14, %v8272_v43  ;;  %v10506_v5 = vsel %vm8502_vm3, %v8662_v51, %v8659_v50  ;;  %vm2447_vm3 = vcmask 1041409   ;;  %vm2450_vm4 = vcmask 58368  }
0x10b6   :  { %1891 = vst.msk [vmem:[#allocation3 + $0x6] sm:$0x1] %vm516_vm7, %v9048_v60  ;;  %v9053_v3 = vrot.slane %v1874_v24, %v8496_v35  ;;  %7574 = vmatprep.subr.bf16.mxu0 %v8272_v43  ;;  %v9096_v24 = vld [vmem:[%s10476_s6 + $0x18] sm:$0xff]   ;;  %vm2051_vm15 = vcmp.gt.f32.partialorder %v10506_v5, 0.0 }
0x10b8   :  { %1892 = vst.msk [vmem:[#allocation3 + $0xe] sm:$0x1] %vm516_vm7, %v9053_v3 }
0x10b9   :  { %7575 = vmatpush3.bf16.msra.mxu0 %v9079_v4 }
0x10ba   :  { %7576 = vmatprep.subr.bf16.mxu0 %v8272_v43 }
0x10bd   :  { %7577 = vmatpush3.bf16.msra.mxu0 %v9086_v11 }
0x10be   :  { %7578 = vmatprep.subr.bf16.mxu0 %v8272_v43 }
0x10c1   :  { %7579 = vmatpush3.bf16.msra.mxu0 %v9096_v24 }
0x10c2   :  { %7604 = vmatprep.subr.bf16.mxu0 %v8272_v43 }
0x1117   :  { %v2031_v54 = vpop.permute.xlu0 %2030 }
0x1187   :  { %v2007_v25 = vpop.f32.mrb[16].mxu0 }
0x1188   :  { %v2014_v45 = vadd.f32 %v2007_v25, %v8633_v55  ;;  %v2009_v56 = vpop.f32.mrb[17].mxu0 }
0x1189   :  { %v2015_v26 = vadd.f32 %v2009_v56, %v1968_v19  ;;  %v2011_v59 = vpop.f32.mrb[18].mxu0 }
0x118a   :  { %v2012_v52 = vpop.f32.mrb[19].mxu0  ;;  %v7421_v46 = vmul.f32 -1.442695, %v2014_v45 }
0x118b   :  { %7880 = vtanh.f32 %v2015_v26  ;;  %v7422_v20 = vmul.f32 -1.442695, %v2015_v26 }
0x118c   :  { %7882 = vpow2.f32 %v7421_v46 }
0x1195   :  { %v7881_v44 = vpop.eup %7880 }
0x1196   :  { %2035 = vrot.lane.b32.xlu1 %v7881_v44, %s8260_s4  ;;  %v7883_v47 = vpop.eup %7882 }
0x1197   :  { %v2022_v8 = vadd.f32 1.0, %v7883_v47 }
0x1199   :  { %7884 = vrcp.f32 %v2022_v8 }
0x11a3   :  { %v7885_v16 = vpop.eup %7884 }
0x11a4   :  { %v2033_v55 = vmul.f32 %v7885_v16, %v2031_v54 }
0x1208   :  { %v2036_v9 = vpop.permute.xlu1 %2035 }
0x1209   :  { %v2038_v27 = vmul.f32 %v7885_v16, %v2036_v9 }
0x120b   :  { %2040 = vrot.lane.b32.xlu1 %v2038_v27, %s8260_s4 }
0x127d   :  { %v2041_v12 = vpop.permute.xlu1 %2040 }
0x127e   :  { %v2043_v61 = vadd.f32 %v2041_v12, %v2033_v55 }
0x1280   :  { %7886 = vtanh.f32 %v2043_v61 }
0x1281   :  { %7888 = vpow2.f32 %v7422_v20  ;;  %v522_v20 = vrot.slane %v8685_v34, %v8487_v15  ;;  %v1510_v34 = vrot.slane %v8975_v7, %v8487_v15 }
0x128a   :  { %v7887_v18 = vpop.eup %7886 }
0x128b   :  { %2046 = vrot.lane.b32.xlu0 %v7887_v18, %s8260_s4  ;;  %v7889_v32 = vpop.eup %7888 }
0x128c   :  { %v2023_v41 = vadd.f32 1.0, %v7889_v32  ;;  %v787_v32 = vrot.slane %v8765_v28, %v8487_v15  ;;  %v1703_v28 = vrot.slane %v9010_v1, %v8487_v15 }
0x128e   :  { %7890 = vrcp.f32 %v2023_v41  ;;  %v1052_v41 = vrot.slane %v8845_v21, %v8487_v15  ;;  %v1896_v21 = vrot.slane %v9048_v60, %v8487_v15 }
0x128f   :  { %2054 = vrot.lane.b32.xlu0 %v2043_v61, %s8260_s4 }
0x1298   :  { %v7891_v33 = vpop.eup %7890 }
0x12fd   :  { %v2047_v10 = vpop.permute.xlu0 %2046 }
0x12fe   :  { %v2049_v29 = vmul.f32 %v7891_v33, %v2047_v10  ;;  %v1317_v33 = vrot.slane %v8927_v0, %v8487_v15 }
0x1300   :  { %v2058_v25 = vsel %vm2051_vm15, %v2049_v29, 0.0  ;;  %v2052_v45 = vsel %vm2051_vm15, %v2049_v29, %v9041_v48 }
0x1301   :  { %v2066_v19 = vrot.slane %v2058_v25, %v8496_v35  ;;  %v2055_v56 = vpop.permute.xlu0 %2054  ;;  %2187 = vrot.lane.b32.xlu1 %v2052_v45, %s8274_s13 }
0x1302   :  { %v2057_v26 = vsel %vm2051_vm15, %v2055_v56, %v9037_v62  ;;  %v9128_v62 = vld [vmem:[%s10477_s7] ss:$0 sm:$0xff]  ;;  %v526_v56 = vrot.slane %v8693_v39, %v8487_v15 }
0x1303   :  { %v2067_v59 = vcombine.high %v2066_v19, %v2066_v19  ;;  %2273 = vrot.lane.b32.xlu0 %v2057_v26, %s8274_s13  ;;  %v2074_v53 = vrot.slane %v2066_v19, %v8496_v35 }
0x1305   :  { %2084 = vst.msk [vmem:[#allocation3 + $0x7] sm:$0x1] %vm516_vm7, %v2074_v53  ;;  %v9117_v50 = vrot.slane %v2067_v59, %v8496_v35  ;;  %v2089_v10 = vrot.slane %v2074_v53, %v8487_v15  ;;  %v791_v59 = vrot.slane %v8773_v13, %v8487_v15 }
0x1307   :  { %2085 = vst.msk [vmem:[#allocation3 + $0xf] sm:$0x1] %vm516_vm7, %v9117_v50 }
0x1373   :  { %v2188_v51 = vpop.permute.xlu1 %2187 }
0x1374   :  { %v2190_v48 = vsel %vm2108_vm0, 0.0, %v2188_v51  ;;  %v1056_v51 = vrot.slane %v8853_v40, %v8487_v15  ;;  %v7793_v40 = vld [vmem:[#allocation13 + $0x8] sm:$0xff]  }
0x1375   :  { %v2191_v52 = vpack.c.bf16 %v2190_v48, %v2190_v48  ;;  %v2274_v0 = vpop.permute.xlu0 %2273  ;;  %v1321_v48 = vrot.slane %v8936_v6, %v8487_v15  ;;  %v1900_v6 = vrot.slane %v9053_v3, %v8487_v15  ;;  %v9203_v3 = vld [vmem:[#allocation14 + $0x8] sm:$0xff]  }
0x1377   :  { %7581 = vmatmul.mubr.msk.bf16.vlgmr.msra.gmra.mrb[20].mxu0 %vm336_vm6, %v2191_v52  ;;  %v1514_v52 = vrot.slane %v8982_v42, %v8487_v15 }
0x1378   :  { %7608 = vmatprep.mubr.msk.bf16.mxu0 %vm8273_vm14, %v8272_v43 }
0x144a   :  { %v2259_v44 = vpop.f32.mrb[20].mxu0 }
0x144b   :  { %v2260_v46 = vadd.f32 %v9128_v62, %v2259_v44  ;;  %v7582_v47 = vpop.f32.mrb[21].mxu0  ;;  %v7792_v44 = vld [vmem:[#allocation13] sm:$0xff]  }
0x144c   :  { %v2262_v8 = vpop.f32.mrb[22].mxu0  ;;  %7565 = vmatpush3.bf16.msra.mxu1 %v7792_v44  ;;  %v2102_v47 = vld [vmem:[#allocation3] sm:$0xff] }
0x144d   :  { %7892 = vtanh.f32 %v2260_v46  ;;  %v7583_v16 = vpop.f32.mrb[23].mxu0  ;;  %v7432_v27 = vmul.f32 -1.442695, %v2260_v46  ;;  %v1707_v46 = vrot.slane %v9015_v36, %v8487_v15  ;;  %7566 = vmatprep.subr.bf16.mxu1 %v8272_v43  ;;  %v2093_v36 = vrot.slane %v9117_v50, %v8487_v15 }
0x144e   :  { %v9198_v16 = vld [vmem:[#allocation14] sm:$0xff]  }
0x144f   :  { %7894 = vpow2.f32 %v7432_v27  ;;  %7605 = vmatpush3.bf16.msra.mxu0 %v9198_v16 }
0x1450   :  { %7567 = vmatpush3.bf16.msra.mxu1 %v7793_v40  ;;  %7606 = vmatprep.subr.bf16.mxu0 %v8272_v43  ;;  %v9256_v40 = vld [vmem:[%s10480_s10] ss:$0 sm:$0xff] }
0x1451   :  { %7584 = vmatprep.subr.bf16.mxu1 %v8272_v43 }
0x1453   :  { %7607 = vmatpush3.bf16.msra.mxu0 %v9203_v3 }
0x1454   :  { %7612 = vmatprep.subr.bf16.mxu0 %v8272_v43 }
0x1457   :  { %v7893_v9 = vpop.eup %7892 }
0x1458   :  { %2278 = vrot.lane.b32.xlu1 %v7893_v9, %s8274_s13 }
0x1459   :  { %v7895_v54 = vpop.eup %7894 }
0x145a   :  { %v2268_v55 = vadd.f32 1.0, %v7895_v54 }
0x145c   :  { %7896 = vrcp.f32 %v2268_v55 }
0x1466   :  { %v9132_v12 = vpop.eup %7896 }
0x1467   :  { %v2276_v29 = vmul.f32 %v9132_v12, %v2274_v0 }
0x14ca   :  { %v2279_v61 = vpop.permute.xlu1 %2278 }
0x14cb   :  { %v2281_v18 = vmul.f32 %v9132_v12, %v2279_v61 }
0x14cd   :  { %2283 = vrot.lane.b32.xlu1 %v2281_v18, %s8274_s13 }
0x14d1   :  { %527 = vrot.lane.b32.xlu1 %v522_v20, %s8275_s17 }
0x14d5   :  { %792 = vrot.lane.b32.xlu1 %v787_v32, %s8275_s17 }
0x14d9   :  { %1057 = vrot.lane.b32.xlu1 %v1052_v41, %s8275_s17 }
0x14dd   :  { %1322 = vrot.lane.b32.xlu1 %v1317_v33, %s8275_s17  ;;  %v2103_v33 = vld [vmem:[#allocation3 + $0x8] sm:$0xff] }
0x14e1   :  { %1515 = vrot.lane.b32.xlu1 %v1510_v34, %s8275_s17 }
0x14e5   :  { %1708 = vrot.lane.b32.xlu1 %v1703_v28, %s8275_s17 }
0x14e9   :  { %1901 = vrot.lane.b32.xlu1 %v1896_v21, %s8275_s17 }
0x14ed   :  { %2094 = vrot.lane.b32.xlu1 %v2089_v10, %s8275_s17 }
0x153f   :  { %v2284_v7 = vpop.permute.xlu1 %2283 }
0x1540   :  { %v9160_v5 = vadd.f32 %v2284_v7, %v2276_v29 }
0x1542   :  { %7898 = vtanh.f32 %v9160_v5 }
0x1543   :  { %v528_v1 = vpop.permute.xlu1 %527 }
0x1544   :  { %533 = vst.msk [vmem:[#allocation4 + $0x7] sm:$0x1] %vm516_vm7, %v528_v1 }
0x1547   :  { %v793_v25 = vpop.permute.xlu1 %792 }
0x1548   :  { %798 = vst.msk [vmem:[#allocation4 + $0x6] sm:$0x1] %vm516_vm7, %v793_v25 }
0x154b   :  { %v1058_v60 = vpop.permute.xlu1 %1057 }
0x154c   :  { %v7899_v45 = vpop.eup %7898  ;;  %1063 = vst.msk [vmem:[#allocation4 + $0x5] sm:$0x1] %vm516_vm7, %v1058_v60 }
0x154d   :  { %2289 = vrot.lane.b32.xlu0 %v7899_v45, %s8274_s13 }
0x154f   :  { %v1323_v19 = vpop.permute.xlu1 %1322 }
0x1550   :  { %1328 = vst.msk [vmem:[#allocation4 + $0x4] sm:$0x1] %vm516_vm7, %v1323_v19 }
0x1551   :  { %529 = vrot.lane.b32.xlu0 %v526_v56, %s8275_s17 }
0x1553   :  { %v1516_v26 = vpop.permute.xlu1 %1515 }
0x1554   :  { %1521 = vst.msk [vmem:[#allocation4 + $0x3] sm:$0x1] %vm516_vm7, %v1516_v26 }
0x1555   :  { %794 = vrot.lane.b32.xlu0 %v791_v59, %s8275_s17 }
0x1557   :  { %v1709_v53 = vpop.permute.xlu1 %1708 }
0x1558   :  { %1714 = vst.msk [vmem:[#allocation4 + $0x2] sm:$0x1] %vm516_vm7, %v1709_v53 }
0x1559   :  { %1059 = vrot.lane.b32.xlu0 %v1056_v51, %s8275_s17 }
0x155b   :  { %v1902_v39 = vpop.permute.xlu1 %1901 }
0x155c   :  { %1907 = vst.msk [vmem:[#allocation4 + $0x1] sm:$0x1] %vm516_vm7, %v1902_v39 }
0x155d   :  { %1324 = vrot.lane.b32.xlu0 %v1321_v48, %s8275_s17 }
0x155f   :  { %v2095_v13 = vpop.permute.xlu1 %2094 }
0x1560   :  { %2100 = vst.msk [vmem:[#allocation4] sm:$0x1] %vm516_vm7, %v2095_v13 }
0x1561   :  { %1517 = vrot.lane.b32.xlu0 %v1514_v52, %s8275_s17 }
0x1565   :  { %1710 = vrot.lane.b32.xlu0 %v1707_v46, %s8275_s17 }
0x1567   :  { %v2104_v42 = vld [vmem:[#allocation4] sm:$0xff] }
0x1568   :  { %v2106_v8 = vadd.f32 %v2104_v42, %v2102_v47 }
0x1569   :  { %1903 = vrot.lane.b32.xlu0 %v1900_v6, %s8275_s17 }
0x156a   :  { %2109 = vst.msk [vmem:[#allocation3] sm:$0xff] %vm2108_vm0, %v2106_v8 }
0x156d   :  { %2096 = vrot.lane.b32.xlu0 %v2093_v36, %s8275_s17 }
0x15bf   :  { %v2290_v9 = vpop.permute.xlu0 %2289 }
0x15c0   :  { %v9208_v27 = vmul.f32 %v9132_v12, %v2290_v9  ;;  %v9265_v9 = vld [vmem:[%s10471_s1 + $0x1] sm:$0x1] }
0x15c2   :  { %v2293_v50 = vpack.c.bf16 %v9208_v27, %v9208_v27 }
0x15c3   :  { %v530_v54 = vpop.permute.xlu0 %529 }
0x15c4   :  { %534 = vst.msk [vmem:[#allocation4 + $0xf] sm:$0x1] %vm516_vm7, %v530_v54  ;;  %2295 = vrot.lane.b32.xlu1 %v2293_v50, %s8260_s4  ;;  %v9269_v50 = vmul.f32 %v9265_v9, %v8643_v31  ;;  %v9274_v54 = vld [vmem:[%s10471_s1] sm:$0x1] }
0x15c6   :  { %vm2408_vm1 = vcmp.gt.f32.partialorder %v9269_v50, 0.0  ;;  %vm2529_vm5 = vcmp.eq.f32.partialorder %v9269_v50, 0.0 }
0x15c7   :  { %v795_v55 = vpop.permute.xlu0 %794 }
0x15c8   :  { %799 = vst.msk [vmem:[#allocation4 + $0xe] sm:$0x1] %vm516_vm7, %v795_v55  ;;  %v9278_v55 = vmul.f32 %v9274_v54, %v8640_v22 }
0x15ca   :  { %vm2407_vm2 = vcmp.gt.f32.partialorder %v9278_v55, 0.0 }
0x15cb   :  { %v1060_v61 = vpop.permute.xlu0 %1059 }
0x15cc   :  { %1064 = vst.msk [vmem:[#allocation4 + $0xd] sm:$0x1] %vm516_vm7, %v1060_v61  ;;  %v8276_v61 = vmov -103.27893  }
0x15cd   :  { %v2409_v31 = vsel %vm2407_vm2, 0.0, %v8276_v61 }
0x15cf   :  { %v1325_v18 = vpop.permute.xlu0 %1324 }
0x15d0   :  { %1329 = vst.msk [vmem:[#allocation4 + $0xc] sm:$0x1] %vm516_vm7, %v1325_v18  ;;  %v2410_v18 = vsel %vm2408_vm1, 0.0, %v8276_v61 }
0x15d3   :  { %v1518_v20 = vpop.permute.xlu0 %1517 }
0x15d4   :  { %1522 = vst.msk [vmem:[#allocation4 + $0xb] sm:$0x1] %vm516_vm7, %v1518_v20  ;;  %v2420_v20 = vrot.slane %v2410_v18, %v8487_v15 }
0x15d7   :  { %v1711_v12 = vpop.permute.xlu0 %1710 }
0x15d8   :  { %1715 = vst.msk [vmem:[#allocation4 + $0xa] sm:$0x1] %vm516_vm7, %v1711_v12  ;;  %v2416_v12 = vrot.slane %v2409_v31, %v8487_v15 }
0x15db   :  { %v1904_v32 = vpop.permute.xlu0 %1903 }
0x15dc   :  { %1908 = vst.msk [vmem:[#allocation4 + $0x9] sm:$0x1] %vm516_vm7, %v1904_v32 }
0x15df   :  { %v2097_v41 = vpop.permute.xlu0 %2096 }
0x15e0   :  { %2101 = vst.msk [vmem:[#allocation4 + $0x8] sm:$0x1] %vm516_vm7, %v2097_v41  ;;  %vm2528_vm7 = vcmp.eq.f32.partialorder %v9278_v55, 0.0 }
0x15e7   :  { %v2105_v34 = vld [vmem:[#allocation4 + $0x8] sm:$0xff] }
0x15e8   :  { %v2107_v28 = vadd.f32 %v2105_v34, %v2103_v33 }
0x15ea   :  { %v2111_v21 = vpack.c.bf16 %v2107_v28, %v2106_v8  ;;  %2110 = vst.msk [vmem:[#allocation3 + $0x8] sm:$0xff] %vm2108_vm0, %v2107_v28 }
0x15ec   :  { %7569 = vmatmul.mubr.msk.bf16.vlgmr.msra.gmra.mrb[16].mxu1 %vm2108_vm0, %v2111_v21  ;;  %v10507_v21 = vlaneseq }
0x15ed   :  { %7585 = vmatpush3.bf16.msra.mxu1 %v9198_v16  ;;  %7588 = vmatprep.mubr.msk.bf16.mxu1 %vm8273_vm14, %v8272_v43 }
0x15ee   :  { %7586 = vmatprep.subr.bf16.mxu1 %v8272_v43 }
0x15f1   :  { %7587 = vmatpush3.bf16.msra.mxu1 %v9203_v3 }
0x15f2   :  { %7592 = vmatprep.subr.bf16.mxu1 %v8272_v43 }
0x1636   :  { %v2296_v10 = vpop.permute.xlu1 %2295 }
0x1637   :  { %7589 = vmatmul.mubr.msk.bf16.vlgmr.msra.gmra.mrb[20].mxu1 %vm2108_vm0, %v2296_v10  ;;  %v9287_v10 = vand.u32 127, %v10507_v21 }
0x1638   :  { %7593 = vmatpush3.bf16.msra.mxu1 %v9071_v63  ;;  %7600 = vmatprep.mubr.msk.bf16.mxu1 %vm8273_vm14, %v8272_v43 }
0x1639   :  { %7594 = vmatprep.subr.bf16.mxu1 %v8272_v43 }
0x163c   :  { %7595 = vmatpush3.bf16.msra.mxu1 %v9079_v4 }
0x163d   :  { %7596 = vmatprep.subr.bf16.mxu1 %v8272_v43 }
0x1640   :  { %7597 = vmatpush3.bf16.msra.mxu1 %v9086_v11 }
0x1641   :  { %7598 = vmatprep.subr.bf16.mxu1 %v8272_v43 }
0x1644   :  { %7599 = vmatpush3.bf16.msra.mxu1 %v9096_v24 }
0x1645   :  { %7624 = vmatprep.subr.bf16.mxu1 %v8272_v43 }
0x16bf   :  { %v2165_v0 = vpop.f32.mrb[16].mxu1 }
0x16c0   :  { %2172 = vst.msk [vmem:[#allocation4] sm:$0xff] %vm2108_vm0, %v2165_v0  ;;  %v7570_v29 = vpop.f32.mrb[17].mxu1  ;;  %v9291_v0 = vsub.s32 %v9287_v10, %v8484_v14 }
0x16c1   :  { %v2168_v7 = vpop.f32.mrb[18].mxu1 }
0x16c2   :  { %2173 = vst.msk [vmem:[#allocation4 + $0x8] sm:$0xff] %vm2108_vm0, %v2168_v7  ;;  %v7571_v1 = vpop.f32.mrb[19].mxu1 }
0x16c7   :  { %v9246_v39 = vld [vmem:[#allocation4] sm:$0xff] }
0x16c9   :  { %v9250_v52 = vld [vmem:[#allocation4 + $0x8] sm:$0xff] }
0x170a   :  { %v2346_v25 = vpop.f32.mrb[20].mxu1 }
0x170b   :  { %v2361_v60 = vrot.slane %v2346_v25, %v8496_v35  ;;  %v7590_v45 = vpop.f32.mrb[21].mxu1 }
0x170c   :  { %v2349_v19 = vpop.f32.mrb[22].mxu1 }
0x170d   :  { %v2362_v56 = vcombine.high %v2361_v60, %v2361_v60  ;;  %v2369_v26 = vrot.slane %v2361_v60, %v8496_v35  ;;  %v7591_v59 = vpop.f32.mrb[23].mxu1 }
0x170f   :  { %v2376_v53 = vrot.slane %v2362_v56, %v8496_v35  ;;  %v2380_v51 = vrot.slane %v2369_v26, %v8487_v15 }
0x1711   :  { %v2384_v48 = vrot.slane %v2376_v53, %v8487_v15  ;;  %v2387_v13 = vadd.f32 %v2380_v51, %v9246_v39 }
0x1713   :  { %v2388_v44 = vadd.f32 %v2384_v48, %v9250_v52  ;;  %7900 = vtanh.f32 %v2387_v13 }
0x1715   :  { %7902 = vtanh.f32 %v2388_v44 }
0x171d   :  { %v7901_v46 = vpop.eup %7900 }
0x171e   :  { %v2397_v6 = vmul.f32 %v7901_v46, %v9256_v40 }
0x171f   :  { %v7903_v47 = vpop.eup %7902 }
0x1720   :  { %v2399_v42 = vsel %vm2108_vm0, %v2397_v6, 0.0  ;;  %v2398_v8 = vmul.f32 %v7903_v47, %v9256_v40 }
0x1721   :  { %2400 = vadd.xlane.f32.xlu0 %v2399_v42 }
0x1722   :  { %v2402_v36 = vsel %vm2108_vm0, %v2398_v8, 0.0 }
0x1723   :  { %2403 = vadd.xlane.f32.xlu1 %v2402_v36 }
0x1734   :  { %2425 = vbcast.lane.b32.xlu1 %v2420_v20, 256 }
0x1737   :  { %2422 = vbcast.lane.b32.xlu0 %v2416_v12, 256 }
0x17ae   :  { %v2401_v32 = vpop.xlane.xlu0 %2400 }
0x17b0   :  { %v2404_v41 = vpop.xlane.xlu1 %2403 }
0x17b2   :  { %v2423_v33 = vpop.permute.xlu0 %2422 }
0x17b3   :  { %v2429_v22 = vadd.f32 %v2423_v33, %v2401_v32 }
0x17b4   :  { %v2426_v34 = vpop.permute.xlu1 %2425 }
0x17b5   :  { %v2430_v28 = vadd.f32 %v2426_v34, %v2404_v41  ;;  %2434 = vperm.xlu0 %7773, %v2429_v22  }
0x17b7   :  { %2437 = vperm.xlu1 %7774, %v2430_v28  }
0x1834   :  { %v2435_v29 = vpop.permute.xlu0 %2434 }
0x1835   :  { %v2442_v1 = vrot.slane %v2435_v29, %v9291_v0 }
0x1836   :  { %v2438_v7 = vpop.permute.xlu1 %2437 }
0x1837   :  { %v2446_v25 = vrot.slane %v2438_v7, %v9291_v0 }
0x1839   :  { %v2448_v60 = vsel %vm2447_vm3, %v2446_v25, %v2442_v1 }
0x183a   :  { %v2451_v45 = vsel %vm2450_vm4, %v2448_v60, -inf }
0x183b   :  { %2452 = vmax.xlane.f32.xlu1 %v2451_v45 }
0x18c8   :  { %v2453_v19 = vpop.xlane.xlu1 %2452 }
0x18c9   :  { %v2458_v56 = vrot.slane %v2453_v19, %v8487_v15  ;;  %v2462_v26 = vrot.slane %v2453_v19, %v8490_v17 }
0x18cb   :  { %v2465_v14 = vsub.f32 %v2429_v22, %v2458_v56  ;;  %v2466_v59 = vsub.f32 %v2430_v28, %v2462_v26 }
0x18cd   :  { %v2467_v53 = vmul.f32 1.442695, %v2465_v14  ;;  %v2469_v51 = vmul.f32 1.442695, %v2466_v59 }
0x18cf   :  { %7904 = vpow2.f32 %v2467_v53 }
0x18d0   :  { %7906 = vpow2.f32 %v2469_v51 }
0x18d9   :  { %v7905_v48 = vpop.eup %7904 }
0x18da   :  { %2474 = vperm.xlu0 %7773, %v7905_v48   ;;  %v7907_v13 = vpop.eup %7906 }
0x18de   :  { %2477 = vperm.xlu0 %7773, %v7907_v13  }
0x1959   :  { %v2475_v44 = vpop.permute.xlu0 %2474 }
0x195a   :  { %v2482_v6 = vrot.slane %v2475_v44, %v9291_v0 }
0x195d   :  { %v2478_v46 = vpop.permute.xlu0 %2477 }
0x195e   :  { %v2486_v47 = vrot.slane %v2478_v46, %v9291_v0 }
0x1960   :  { %v2487_v42 = vsel %vm2447_vm3, %v2486_v47, %v2482_v6 }
0x1961   :  { %v2489_v8 = vsel %vm2450_vm4, %v2487_v42, 0.0 }
0x1962   :  { %2490 = vadd.xlane.f32.xlu0 %v2489_v8 }
0x19ef   :  { %v2491_v36 = vpop.xlane.xlu0 %2490 }
0x19f0   :  { %7908 = vlog2.f32 %v2491_v36 }
0x19fa   :  { %v7909_v18 = vpop.eup %7908 }
0x19fb   :  { %v2493_v20 = vmul.f32 0.6931472, %v7909_v18 }
0x19fd   :  { %v2498_v31 = vrot.slane %v2493_v20, %v8487_v15  ;;  %v2502_v12 = vrot.slane %v2493_v20, %v8490_v17 }
0x19ff   :  { %v9305_v32 = vsub.f32 %v2465_v14, %v2498_v31  ;;  %v9307_v41 = vsub.f32 %v2466_v59, %v2502_v12 }
0x1a01   :  { %v2530_v33 = vcombine.high %v9305_v32, %v9305_v32  ;;  %v2537_v22 = vrot.slane %v9305_v32, %v8496_v35  ;;  %v2579_v34 = vcombine.high %v9307_v41, %v9307_v41  ;;  %v2586_v28 = vrot.slane %v9307_v41, %v8496_v35 }
0x1a03   :  { %v2544_v21 = vrot.slane %v2530_v33, %v8496_v35  ;;  %v2545_v29 = vcombine.high %v2537_v22, %v2537_v22  ;;  %v2593_v7 = vrot.slane %v2579_v34, %v8496_v35  ;;  %v2594_v1 = vcombine.high %v2586_v28, %v2586_v28 }
0x1a04   :  { %v2602_v60 = vrot.slane %v2586_v28, %v8496_v35  ;;  %v2553_v26 = vrot.slane %v2537_v22, %v8496_v35 }
0x1a05   :  { %v2595_v25 = vcombine.high %v2593_v7, %v2593_v7  ;;  %v2616_v45 = vrot.slane %v2594_v1, %v8496_v35  ;;  %v2546_v19 = vcombine.high %v2544_v21, %v2544_v21  ;;  %v2609_v56 = vrot.slane %v2593_v7, %v8496_v35 }
0x1a06   :  { %v2567_v14 = vrot.slane %v2545_v29, %v8496_v35  ;;  %v2560_v13 = vrot.slane %v2544_v21, %v8496_v35 }
0x1a07   :  { %v2623_v59 = vrot.slane %v2595_v25, %v8496_v35  ;;  %v2677_v53 = vcombine.low %v2602_v60, %v2616_v45  ;;  %v7439_v51 = vcombine.high %v2602_v60, %v2616_v45  ;;  %v2574_v48 = vrot.slane %v2546_v19, %v8496_v35 }
0x1a08   :  { %v2628_v44 = vcombine.low %v2553_v26, %v2567_v14  ;;  %v7437_v46 = vcombine.high %v2553_v26, %v2567_v14 }
0x1a09   :  { %v2679_v6 = vcombine.low %v2609_v56, %v2623_v59  ;;  %v7440_v47 = vcombine.high %v2609_v56, %v2623_v59  ;;  %v2687_v42 = vrot.slane %v2677_v53, %v8496_v35  ;;  %v2694_v8 = vrot.slane %v7439_v51, %v8496_v35 }
0x1a0a   :  { %v2630_v36 = vcombine.low %v2560_v13, %v2574_v48  ;;  %v7438_v18 = vcombine.high %v2560_v13, %v2574_v48  ;;  %v2638_v20 = vrot.slane %v2628_v44, %v8496_v35  ;;  %v2645_v31 = vrot.slane %v7437_v46, %v8496_v35 }
0x1a0b   :  { %v2701_v12 = vrot.slane %v2679_v6, %v8496_v35  ;;  %v2708_v33 = vrot.slane %v7440_v47, %v8496_v35  ;;  %v2709_v22 = vcombine.low %v2687_v42, %v2694_v8 }
0x1a0c   :  { %v2652_v34 = vrot.slane %v2630_v36, %v8496_v35  ;;  %v2659_v28 = vrot.slane %v7438_v18, %v8496_v35  ;;  %v2660_v21 = vcombine.low %v2638_v20, %v2645_v31  ;;  %v2812_v18 = vrot.slane %v9287_v10, %v8496_v35 }
0x1a0d   :  { %v2710_v29 = vcombine.low %v2701_v12, %v2708_v33  ;;  %v2717_v1 = vrot.slane %v2709_v22, %v8496_v35 }
0x1a0e   :  { %v2661_v7 = vcombine.low %v2652_v34, %v2659_v28  ;;  %v2668_v60 = vrot.slane %v2660_v21, %v8496_v35  ;;  %v2813_v20 = vcombine.high %v2812_v18, %v2812_v18  ;;  %v9353_v50 = vrot.slane %v2812_v18, %v8496_v35 }
0x1a0f   :  { %v2724_v25 = vrot.slane %v2710_v29, %v8496_v35 }
0x1a10   :  { %v2675_v45 = vrot.slane %v2661_v7, %v8496_v35  ;;  %v9356_v31 = vrot.slane %v2813_v20, %v8496_v35 }
0x1a11   :  { %v2725_v19 = vcombine.low %v2717_v1, %v2724_v25 }
0x1a12   :  { %v2676_v56 = vcombine.low %v2668_v60, %v2675_v45 }
0x1a13   :  { %2730 = vperm.xlu0 %7773, %v2725_v19  }
0x1a14   :  { %2727 = vperm.xlu1 %7774, %v2676_v56  }
0x1a92   :  { %v2731_v26 = vpop.permute.xlu0 %2730 }
0x1a93   :  { %v2739_v14 = vrot.slane %v2731_v26, %v9291_v0  ;;  %v2728_v59 = vpop.permute.xlu1 %2727 }
0x1a94   :  { %v2735_v53 = vrot.slane %v2728_v59, %v9291_v0 }
0x1a95   :  { %v2760_v51 = vrot.slane %v2739_v14, %v8496_v35 }
0x1a96   :  { %v2746_v48 = vrot.slane %v2735_v53, %v8496_v35 }
0x1a97   :  { %v2767_v13 = vrot.slane %v2760_v51, %v8496_v35 }
0x1a98   :  { %v2753_v44 = vrot.slane %v2746_v48, %v8496_v35 }
0x1a99   :  { %v2771_v46 = vsel %vm2529_vm5, -10000000.0, %v2767_v13 }
0x1a9a   :  { %v2770_v6 = vsel %vm2528_vm7, -10000000.0, %v2753_v44 }
0x1a9b   :  { %v2774_v47 = vcombine.low %v2770_v6, %v2771_v46 }
0x1a9d   :  { %v2781_v42 = vrot.slane %v2774_v47, %v8496_v35  ;;  %v9376_v47 = vld [vmem:[#allocation3] sm:$0xff] }
0x1a9f   :  { %v2788_v8 = vrot.slane %v2781_v42, %v8496_v35 }
0x1aa1   :  { %v2790_v36 = vsel %vm2450_vm4, %v2788_v8, -inf }
0x1aa2   :  { %2791 = vmax.xlane.f32.xlu1 %v2790_v36 }
0x1b2f   :  { %v2792_v55 = vpop.xlane.xlu1 %2791 }
0x1b30   :  { %v2797_v12 = vrot.slane %v2792_v55, %v8487_v15  ;;  %v2801_v33 = vrot.slane %v2792_v55, %v8490_v17 }
0x1b32   :  { %vm2804_vm8 = vcmp.eq.f32.partialorder %v2770_v6, %v2797_v12  ;;  %vm2805_vm9 = vcmp.eq.f32.partialorder %v2771_v46, %v2801_v33  ;;  %v9374_v6 = vld [vmem:[#allocation3 + $0x8] sm:$0xff] }
0x1b33   :  { %v2828_v22 = vsel %vm2804_vm8, %v9353_v50, 8  ;;  %v2829_v34 = vsel %vm2805_vm9, %v9356_v31, 8  ;;  %vm2860_vm8 = vcmp.eq.s32.totalorder %v9287_v10, 0  ;;  %vm3498_vm9 = vcmp.eq.s32.totalorder %v9287_v10, 1 }
0x1b34   :  { %v2830_v28 = vcombine.low %v2828_v22, %v2829_v34 }
0x1b36   :  { %v2837_v21 = vrot.slane %v2830_v28, %v8496_v35 }
0x1b38   :  { %v2844_v29 = vrot.slane %v2837_v21, %v8496_v35 }
0x1b3a   :  { %v2845_v7 = vsel %vm2450_vm4, %v2844_v29, 2147483647 }
0x1b3b   :  { %v2847_v1 = vshra.s32 %v2845_v7, 16  ;;  %v2846_v60 = vand.u32 65535, %v2845_v7 }
0x1b3d   :  { %v2849_v25 = vcvt.s32.f32 %v2847_v1  ;;  %v2848_v19 = vcvt.s32.f32 %v2846_v60 }
0x1b3f   :  { %2850 = vmin.xlane.f32.xlu0 %v2849_v25 }
0x1bcc   :  { %v2851_v45 = vpop.xlane.xlu0 %2850 }
0x1bcd   :  { %vm2852_vm10 = vcmp.eq.f32.partialorder %v2849_v25, %v2851_v45  ;;  %v2857_v26 = vcvt.f32.s32 %v2851_v45 }
0x1bce   :  { %v2853_v56 = vsel %vm2852_vm10, %v2848_v19, inf }
0x1bcf   :  { %2854 = vmin.xlane.f32.xlu1 %v2853_v56  ;;  %v2858_v59 = vshll.u32 %v2857_v26, 16 }
0x1c5c   :  { %v2855_v14 = vpop.xlane.xlu1 %2854 }
0x1c5d   :  { %v2856_v53 = vcvt.f32.s32 %v2855_v14 }
0x1c5f   :  { %v9365_v51 = vadd.s32 %v2858_v59, %v2856_v53 }
0x1c61   :  { %vm2862_vm11 = vcmp.eq.s32.totalorder %v9287_v10, %v9365_v51 }
0x1c62   :  { %v7441_v48 = vsel %vm2862_vm11, 1.0, %v8272_v43 }
0x1c63   :  { %v2875_v13 = vrot.slane %v7441_v48, %v8490_v17  ;;  %v2868_v44 = vrot.slane %v7441_v48, %v8487_v15 }
0x1c65   :  { %2877 = vbcast.lane.b32.xlu0 %v2875_v13, 256  ;;  %2870 = vbcast.lane.b32.xlu1 %v2868_v44, 256 }
0x1c69   :  { %2902 = vrot.lane.b32.xlu1 %v9208_v27, %s8275_s17 }
0x1cd7   :  { %v2878_v46 = vpop.permute.xlu0 %2877  ;;  %v2871_v42 = vpop.permute.xlu1 %2870 }
0x1cd8   :  { %v2882_v8 = vmul.f32 %v9374_v6, %v2878_v46  ;;  %v2881_v36 = vmul.f32 %v9376_v47, %v2871_v42 }
0x1cda   :  { %v2890_v18 = vsel %vm2108_vm0, %v2882_v8, 0.0  ;;  %v2883_v20 = vsel %vm2108_vm0, %v2881_v36, 0.0 }
0x1cdb   :  { %v2891_v55 = vrot.slane %v2890_v18, 4  ;;  %v2884_v12 = vrot.slane %v2883_v20, 4  ;;  %v2903_v60 = vpop.permute.xlu1 %2902 }
0x1cdd   :  { %v2892_v33 = vadd.f32 %v2891_v55, %v2890_v18  ;;  %v2885_v22 = vadd.f32 %v2884_v12, %v2883_v20 }
0x1cdf   :  { %v2893_v34 = vrot.slane %v2892_v33, 2  ;;  %v2886_v27 = vrot.slane %v2885_v22, 2 }
0x1ce1   :  { %v2894_v28 = vadd.f32 %v2893_v34, %v2892_v33  ;;  %v2887_v21 = vadd.f32 %v2886_v27, %v2885_v22 }
0x1ce3   :  { %v2895_v29 = vrot.slane %v2894_v28, 1  ;;  %v2888_v7 = vrot.slane %v2887_v21, 1 }
0x1ce5   :  { %v2889_v1 = vadd.f32 %v2888_v7, %v2887_v21  ;;  %v2896_v25 = vadd.f32 %v2895_v29, %v2894_v28 }
0x1ce7   :  { %v2899_v45 = vsel %vm2447_vm3, %v2896_v25, %v2889_v1 }
0x1ce8   :  { %v2905_v19 = vsel %vm2108_vm0, %v2899_v45, %v2903_v60 }
0x1ce9   :  { %v2906_v56 = vpack.c.bf16 %v2905_v19, %v2905_v19 }
0x1ceb   :  { %7601 = vmatmul.mubr.msk.bf16.vlgmr.msra.gmra.mrb[24].mxu1 %vm336_vm6, %v2906_v56 }
0x1cec   :  { %7625 = vmatpush3.bf16.msra.mxu1 %v9198_v16  ;;  %7628 = vmatprep.mubr.msk.bf16.mxu1 %vm8273_vm14, %v8272_v43 }
0x1ced   :  { %7626 = vmatprep.subr.bf16.mxu1 %v8272_v43 }
0x1cf0   :  { %7627 = vmatpush3.bf16.msra.mxu1 %v9203_v3 }
0x1cf1   :  { %7632 = vmatprep.subr.bf16.mxu1 %v8272_v43 }
0x1dbe   :  { %v2944_v26 = vpop.f32.mrb[24].mxu1 }
0x1dbf   :  { %v2945_v14 = vadd.f32 %v9128_v62, %v2944_v26  ;;  %v7602_v59 = vpop.f32.mrb[25].mxu1 }
0x1dc0   :  { %v2947_v53 = vpop.f32.mrb[26].mxu1 }
0x1dc1   :  { %7910 = vtanh.f32 %v2945_v14  ;;  %v7603_v48 = vpop.f32.mrb[27].mxu1  ;;  %v7443_v44 = vmul.f32 -1.442695, %v2945_v14  ;;  %v9428_v53 = vmul.f32 %v9265_v9, %v8724_v2 }
0x1dc2   :  { %v9433_v48 = vmul.f32 %v9274_v54, %v8720_v23 }
0x1dc3   :  { %7912 = vpow2.f32 %v7443_v44  ;;  %vm3071_vm12 = vcmp.gt.f32.partialorder %v9428_v53, 0.0  ;;  %vm3189_vm1 = vcmp.eq.f32.partialorder %v9428_v53, 0.0 }
0x1dc4   :  { %vm3070_vm13 = vcmp.gt.f32.partialorder %v9433_v48, 0.0  ;;  %vm3188_vm15 = vcmp.eq.f32.partialorder %v9433_v48, 0.0 }
0x1dcb   :  { %v7911_v13 = vpop.eup %7910 }
0x1dcc   :  { %2959 = vrot.lane.b32.xlu1 %v7911_v13, %s8274_s13  ;;  %v3073_v13 = vsel %vm3071_vm12, 0.0, %v8276_v61 }
0x1dcd   :  { %v7913_v46 = vpop.eup %7912  ;;  %v3083_v44 = vrot.slane %v3073_v13, %v8487_v15 }
0x1dce   :  { %v2953_v42 = vadd.f32 1.0, %v7913_v46  ;;  %v3072_v46 = vsel %vm3070_vm13, 0.0, %v8276_v61 }
0x1dd0   :  { %7914 = vrcp.f32 %v2953_v42  ;;  %v3079_v42 = vrot.slane %v3072_v46, %v8487_v15 }
0x1dda   :  { %v7915_v8 = vpop.eup %7914 }
0x1ddb   :  { %v2957_v20 = vmul.f32 %v7915_v8, %v9160_v5 }
0x1e3e   :  { %v2960_v36 = vpop.permute.xlu1 %2959 }
0x1e3f   :  { %v2962_v18 = vmul.f32 %v7915_v8, %v2960_v36 }
0x1e41   :  { %2964 = vrot.lane.b32.xlu0 %v2962_v18, %s8274_s13 }
0x1eb3   :  { %v2965_v62 = vpop.permute.xlu0 %2964 }
0x1eb4   :  { %v9395_v55 = vadd.f32 %v2965_v62, %v2957_v20 }
0x1eb6   :  { %7916 = vtanh.f32 %v9395_v55 }
0x1ec0   :  { %v7917_v12 = vpop.eup %7916 }
0x1ec1   :  { %2970 = vrot.lane.b32.xlu1 %v7917_v12, %s8274_s13 }
0x1f33   :  { %v2971_v33 = vpop.permute.xlu1 %2970 }
0x1f34   :  { %v9399_v22 = vmul.f32 %v7915_v8, %v2971_v33 }
0x1f36   :  { %v2974_v34 = vpack.c.bf16 %v9399_v22, %v9399_v22 }
0x1f38   :  { %2976 = vrot.lane.b32.xlu0 %v2974_v34, %s8260_s4 }
0x1faa   :  { %v2977_v27 = vpop.permute.xlu0 %2976 }
0x1fab   :  { %7609 = vmatmul.mubr.msk.bf16.vlgmr.msra.gmra.mrb[24].mxu0 %vm2108_vm0, %v2977_v27 }
0x1fac   :  { %7613 = vmatpush3.bf16.msra.mxu0 %v9071_v63  ;;  %7620 = vmatprep.mubr.msk.bf16.mxu0 %vm8273_vm14, %v8272_v43 }
0x1fad   :  { %7614 = vmatprep.subr.bf16.mxu0 %v8272_v43 }
0x1fb0   :  { %7615 = vmatpush3.bf16.msra.mxu0 %v9079_v4 }
0x1fb1   :  { %7616 = vmatprep.subr.bf16.mxu0 %v8272_v43 }
0x1fb4   :  { %7617 = vmatpush3.bf16.msra.mxu0 %v9086_v11 }
0x1fb5   :  { %7618 = vmatprep.subr.bf16.mxu0 %v8272_v43 }
0x1fb8   :  { %7619 = vmatpush3.bf16.msra.mxu0 %v9096_v24 }
0x1fb9   :  { %7644 = vmatprep.subr.bf16.mxu0 %v8272_v43 }
0x207e   :  { %v3015_v5 = vpop.f32.mrb[24].mxu0 }
0x207f   :  { %v3030_v63 = vrot.slane %v3015_v5, %v8496_v35  ;;  %v7610_v28 = vpop.f32.mrb[25].mxu0 }
0x2080   :  { %v3018_v21 = vpop.f32.mrb[26].mxu0 }
0x2081   :  { %v3031_v29 = vcombine.high %v3030_v63, %v3030_v63  ;;  %v3038_v7 = vrot.slane %v3030_v63, %v8496_v35  ;;  %v7611_v1 = vpop.f32.mrb[27].mxu0 }
0x2083   :  { %v3045_v4 = vrot.slane %v3031_v29, %v8496_v35  ;;  %v3049_v25 = vrot.slane %v3038_v7, %v8487_v15 }
0x2085   :  { %v3053_v11 = vrot.slane %v3045_v4, %v8487_v15  ;;  %v3056_v60 = vadd.f32 %v3049_v25, %v9246_v39 }
0x2087   :  { %v3057_v24 = vadd.f32 %v3053_v11, %v9250_v52  ;;  %7918 = vtanh.f32 %v3056_v60 }
0x2089   :  { %7920 = vtanh.f32 %v3057_v24 }
0x2091   :  { %v7919_v45 = vpop.eup %7918 }
0x2092   :  { %v3060_v19 = vmul.f32 %v7919_v45, %v9256_v40 }
0x2093   :  { %v7921_v56 = vpop.eup %7920 }
0x2094   :  { %v3062_v26 = vsel %vm2108_vm0, %v3060_v19, 0.0  ;;  %v3061_v14 = vmul.f32 %v7921_v56, %v9256_v40 }
0x2095   :  { %3063 = vadd.xlane.f32.xlu1 %v3062_v26 }
0x2096   :  { %v3065_v59 = vsel %vm2108_vm0, %v3061_v14, 0.0 }
0x2097   :  { %3066 = vadd.xlane.f32.xlu0 %v3065_v59 }
0x20a6   :  { %3088 = vbcast.lane.b32.xlu1 %v3083_v44, 256 }
0x20ad   :  { %3085 = vbcast.lane.b32.xlu0 %v3079_v42, 256 }
0x2122   :  { %v3064_v2 = vpop.xlane.xlu1 %3063 }
0x2124   :  { %v3067_v8 = vpop.xlane.xlu0 %3066 }
0x2126   :  { %v3089_v36 = vpop.permute.xlu1 %3088 }
0x2127   :  { %v3093_v18 = vadd.f32 %v3089_v36, %v3067_v8 }
0x2128   :  { %v3086_v20 = vpop.permute.xlu0 %3085 }
0x2129   :  { %v3092_v62 = vadd.f32 %v3086_v20, %v3064_v2  ;;  %3100 = vperm.xlu0 %7773, %v3093_v18  }
0x212b   :  { %3097 = vperm.xlu1 %7774, %v3092_v62  }
0x21a8   :  { %v3101_v23 = vpop.permute.xlu0 %3100 }
0x21a9   :  { %v3109_v33 = vrot.slane %v3101_v23, %v9291_v0 }
0x21aa   :  { %v3098_v12 = vpop.permute.xlu1 %3097 }
0x21ab   :  { %v3105_v34 = vrot.slane %v3098_v12, %v9291_v0 }
0x21ad   :  { %v3110_v27 = vsel %vm2447_vm3, %v3109_v33, %v3105_v34 }
0x21ae   :  { %v3112_v5 = vsel %vm2450_vm4, %v3110_v27, -inf }
0x21af   :  { %3113 = vmax.xlane.f32.xlu1 %v3112_v5 }
0x223c   :  { %v3114_v63 = vpop.xlane.xlu1 %3113 }
0x223d   :  { %v3119_v28 = vrot.slane %v3114_v63, %v8487_v15  ;;  %v3123_v21 = vrot.slane %v3114_v63, %v8490_v17 }
0x223f   :  { %v3126_v29 = vsub.f32 %v3092_v62, %v3119_v28  ;;  %v3127_v7 = vsub.f32 %v3093_v18, %v3123_v21 }
0x2241   :  { %v3128_v1 = vmul.f32 1.442695, %v3126_v29  ;;  %v3130_v4 = vmul.f32 1.442695, %v3127_v7 }
0x2243   :  { %7922 = vpow2.f32 %v3128_v1 }
0x2244   :  { %7924 = vpow2.f32 %v3130_v4 }
0x224d   :  { %v7923_v25 = vpop.eup %7922 }
0x224e   :  { %3135 = vperm.xlu0 %7773, %v7923_v25   ;;  %v7925_v11 = vpop.eup %7924 }
0x2252   :  { %3138 = vperm.xlu0 %7773, %v7925_v11  }
0x22cd   :  { %v3136_v60 = vpop.permute.xlu0 %3135 }
0x22ce   :  { %v3143_v45 = vrot.slane %v3136_v60, %v9291_v0 }
0x22d1   :  { %v3139_v24 = vpop.permute.xlu0 %3138 }
0x22d2   :  { %v3147_v19 = vrot.slane %v3139_v24, %v9291_v0 }
0x22d4   :  { %v3148_v56 = vsel %vm2447_vm3, %v3147_v19, %v3143_v45 }
0x22d5   :  { %v3150_v26 = vsel %vm2450_vm4, %v3148_v56, 0.0 }
0x22d6   :  { %3151 = vadd.xlane.f32.xlu0 %v3150_v26 }
0x2363   :  { %v3152_v14 = vpop.xlane.xlu0 %3151 }
0x2364   :  { %7926 = vlog2.f32 %v3152_v14 }
0x236e   :  { %v7927_v59 = vpop.eup %7926 }
0x236f   :  { %v3154_v13 = vmul.f32 0.6931472, %v7927_v59 }
0x2371   :  { %v3159_v44 = vrot.slane %v3154_v13, %v8487_v15  ;;  %v3163_v46 = vrot.slane %v3154_v13, %v8490_v17 }
0x2373   :  { %v9452_v42 = vsub.f32 %v3126_v29, %v3159_v44  ;;  %v9454_v2 = vsub.f32 %v3127_v7, %v3163_v46 }
0x2375   :  { %v3190_v8 = vcombine.high %v9452_v42, %v9452_v42  ;;  %v3197_v36 = vrot.slane %v9452_v42, %v8496_v35  ;;  %v3239_v18 = vcombine.high %v9454_v2, %v9454_v2  ;;  %v3246_v20 = vrot.slane %v9454_v2, %v8496_v35 }
0x2377   :  { %v3204_v62 = vrot.slane %v3190_v8, %v8496_v35  ;;  %v3205_v23 = vcombine.high %v3197_v36, %v3197_v36  ;;  %v3253_v12 = vrot.slane %v3239_v18, %v8496_v35  ;;  %v3254_v33 = vcombine.high %v3246_v20, %v3246_v20 }
0x2378   :  { %v3213_v27 = vrot.slane %v3197_v36, %v8496_v35  ;;  %v3262_v21 = vrot.slane %v3246_v20, %v8496_v35 }
0x2379   :  { %v3206_v34 = vcombine.high %v3204_v62, %v3204_v62  ;;  %v3227_v5 = vrot.slane %v3205_v23, %v8496_v35  ;;  %v3255_v63 = vcombine.high %v3253_v12, %v3253_v12  ;;  %v3220_v28 = vrot.slane %v3204_v62, %v8496_v35 }
0x237a   :  { %v3269_v29 = vrot.slane %v3253_v12, %v8496_v35  ;;  %v3276_v7 = vrot.slane %v3254_v33, %v8496_v35 }
0x237b   :  { %v3283_v1 = vrot.slane %v3255_v63, %v8496_v35  ;;  %v3234_v4 = vrot.slane %v3206_v34, %v8496_v35  ;;  %v3288_v25 = vcombine.low %v3213_v27, %v3227_v5  ;;  %v7445_v11 = vcombine.high %v3213_v27, %v3227_v5 }
0x237c   :  { %v3337_v60 = vcombine.low %v3262_v21, %v3276_v7  ;;  %v7447_v24 = vcombine.high %v3262_v21, %v3276_v7 }
0x237d   :  { %v3339_v45 = vcombine.low %v3269_v29, %v3283_v1  ;;  %v7448_v19 = vcombine.high %v3269_v29, %v3283_v1  ;;  %v3290_v56 = vcombine.low %v3220_v28, %v3234_v4  ;;  %v7446_v26 = vcombine.high %v3220_v28, %v3234_v4 }
0x237e   :  { %v3347_v14 = vrot.slane %v3337_v60, %v8496_v35  ;;  %v3354_v59 = vrot.slane %v7447_v24, %v8496_v35  ;;  %v3298_v13 = vrot.slane %v3288_v25, %v8496_v35  ;;  %v3305_v44 = vrot.slane %v7445_v11, %v8496_v35 }
0x237f   :  { %v3361_v46 = vrot.slane %v3339_v45, %v8496_v35  ;;  %v3368_v8 = vrot.slane %v7448_v19, %v8496_v35  ;;  %v3312_v36 = vrot.slane %v3290_v56, %v8496_v35  ;;  %v3319_v18 = vrot.slane %v7446_v26, %v8496_v35 }
0x2380   :  { %v3369_v20 = vcombine.low %v3347_v14, %v3354_v59  ;;  %v3320_v62 = vcombine.low %v3298_v13, %v3305_v44 }
0x2381   :  { %v3370_v23 = vcombine.low %v3361_v46, %v3368_v8  ;;  %v3321_v12 = vcombine.low %v3312_v36, %v3319_v18 }
0x2382   :  { %v3377_v33 = vrot.slane %v3369_v20, %v8496_v35  ;;  %v3328_v27 = vrot.slane %v3320_v62, %v8496_v35 }
0x2383   :  { %v3384_v34 = vrot.slane %v3370_v23, %v8496_v35  ;;  %v3335_v5 = vrot.slane %v3321_v12, %v8496_v35 }
0x2385   :  { %v3385_v63 = vcombine.low %v3377_v33, %v3384_v34  ;;  %v3336_v28 = vcombine.low %v3328_v27, %v3335_v5 }
0x2387   :  { %3390 = vperm.xlu0 %7773, %v3385_v63   ;;  %3387 = vperm.xlu1 %7774, %v3336_v28  }
0x2406   :  { %v3391_v21 = vpop.permute.xlu0 %3390  ;;  %v3388_v29 = vpop.permute.xlu1 %3387 }
0x2407   :  { %v3399_v7 = vrot.slane %v3391_v21, %v9291_v0  ;;  %v3395_v1 = vrot.slane %v3388_v29, %v9291_v0  ;;  %v2861_v29 = vsel %vm2860_vm8, %v9365_v51, 0 }
0x2409   :  { %v3420_v4 = vrot.slane %v3399_v7, %v8496_v35  ;;  %v3406_v25 = vrot.slane %v3395_v1, %v8496_v35 }
0x240b   :  { %v3427_v11 = vrot.slane %v3420_v4, %v8496_v35  ;;  %v3413_v60 = vrot.slane %v3406_v25, %v8496_v35 }
0x240d   :  { %v3431_v24 = vsel %vm3189_vm1, -10000000.0, %v3427_v11  ;;  %v3430_v45 = vsel %vm3188_vm15, -10000000.0, %v3413_v60 }
0x240e   :  { %v3434_v19 = vcombine.low %v3430_v45, %v3431_v24 }
0x2410   :  { %v3441_v56 = vrot.slane %v3434_v19, %v8496_v35 }
0x2412   :  { %v3448_v26 = vrot.slane %v3441_v56, %v8496_v35 }
0x2414   :  { %v3450_v14 = vsel %vm2450_vm4, %v3448_v26, -inf }
0x2415   :  { %3451 = vmax.xlane.f32.xlu1 %v3450_v14 }
0x24a2   :  { %v3452_v59 = vpop.xlane.xlu1 %3451 }
0x24a3   :  { %v3457_v13 = vrot.slane %v3452_v59, %v8487_v15  ;;  %v3461_v44 = vrot.slane %v3452_v59, %v8490_v17 }
0x24a5   :  { %vm3464_vm2 = vcmp.eq.f32.partialorder %v3430_v45, %v3457_v13  ;;  %vm3465_vm5 = vcmp.eq.f32.partialorder %v3431_v24, %v3461_v44 }
0x24a6   :  { %v3466_v48 = vsel %vm3464_vm2, %v9353_v50, 8  ;;  %v3467_v53 = vsel %vm3465_vm5, %v9356_v31, 8 }
0x24a7   :  { %v3468_v46 = vcombine.low %v3466_v48, %v3467_v53 }
0x24a9   :  { %v3475_v8 = vrot.slane %v3468_v46, %v8496_v35 }
0x24ab   :  { %v3482_v36 = vrot.slane %v3475_v8, %v8496_v35 }
0x24ad   :  { %v3483_v18 = vsel %vm2450_vm4, %v3482_v36, 2147483647 }
0x24ae   :  { %v3485_v20 = vshra.s32 %v3483_v18, 16  ;;  %v3484_v23 = vand.u32 65535, %v3483_v18 }
0x24b0   :  { %v3487_v62 = vcvt.s32.f32 %v3485_v20  ;;  %v3486_v33 = vcvt.s32.f32 %v3484_v23 }
0x24b2   :  { %3488 = vmin.xlane.f32.xlu0 %v3487_v62 }
0x253f   :  { %v3489_v12 = vpop.xlane.xlu0 %3488 }
0x2540   :  { %vm3490_vm7 = vcmp.eq.f32.partialorder %v3487_v62, %v3489_v12  ;;  %v3495_v27 = vcvt.f32.s32 %v3489_v12 }
0x2541   :  { %v3491_v34 = vsel %vm3490_vm7, %v3486_v33, inf  ;;  %v9531_v33 = vld [vmem:[%s10477_s7] ss:$0 sm:$0xff]  ;;  %vm4136_vm7 = vcmp.eq.s32.totalorder %v9287_v10, 2 }
0x2542   :  { %3492 = vmin.xlane.f32.xlu1 %v3491_v34  ;;  %v3496_v63 = vshll.u32 %v3495_v27, 16 }
0x25cf   :  { %v3493_v5 = vpop.xlane.xlu1 %3492 }
0x25d0   :  { %v3494_v28 = vcvt.f32.s32 %v3493_v5 }
0x25d2   :  { %v3497_v21 = vadd.s32 %v3496_v63, %v3494_v28 }
0x25d4   :  { %v9507_v7 = vsel %vm3498_vm9, %v3497_v21, %v2861_v29  ;;  %vm3500_vm10 = vcmp.eq.s32.totalorder %v9287_v10, %v3497_v21 }
0x25d5   :  { %v7449_v1 = vsel %vm3500_vm10, 1.0, %v8272_v43 }
0x25d6   :  { %v3513_v4 = vrot.slane %v7449_v1, %v8490_v17  ;;  %v3506_v25 = vrot.slane %v7449_v1, %v8487_v15 }
0x25d8   :  { %3515 = vbcast.lane.b32.xlu0 %v3513_v4, 256  ;;  %3508 = vbcast.lane.b32.xlu1 %v3506_v25, 256 }
0x25dc   :  { %3540 = vrot.lane.b32.xlu1 %v9399_v22, %s8275_s17 }
0x264a   :  { %v3516_v11 = vpop.permute.xlu0 %3515  ;;  %v3509_v60 = vpop.permute.xlu1 %3508 }
0x264b   :  { %v3520_v24 = vmul.f32 %v3516_v11, %v9374_v6  ;;  %v3519_v51 = vmul.f32 %v3509_v60, %v9376_v47 }
0x264d   :  { %v3528_v45 = vsel %vm2108_vm0, %v3520_v24, 0.0  ;;  %v3521_v19 = vsel %vm2108_vm0, %v3519_v51, 0.0 }
0x264e   :  { %v3529_v56 = vrot.slane %v3528_v45, 4  ;;  %v3522_v26 = vrot.slane %v3521_v19, 4  ;;  %v3541_v20 = vpop.permute.xlu1 %3540 }
0x2650   :  { %v3530_v14 = vadd.f32 %v3529_v56, %v3528_v45  ;;  %v3523_v59 = vadd.f32 %v3522_v26, %v3521_v19  ;;  %v9559_v26 = vld [vmem:[%s10476_s6 + $0x8] sm:$0xff]  }
0x2652   :  { %v3531_v13 = vrot.slane %v3530_v14, 2  ;;  %v3524_v44 = vrot.slane %v3523_v59, 2 }
0x2654   :  { %v3532_v48 = vadd.f32 %v3531_v13, %v3530_v14  ;;  %v3525_v53 = vadd.f32 %v3524_v44, %v3523_v59  ;;  %v9566_v14 = vld [vmem:[%s10476_s6 + $0x10] sm:$0xff]   ;;  %v9573_v59 = vld [vmem:[%s10476_s6 + $0x18] sm:$0xff]  }
0x2656   :  { %v3533_v46 = vrot.slane %v3532_v48, 1  ;;  %v3526_v22 = vrot.slane %v3525_v53, 1 }
0x2658   :  { %v3527_v8 = vadd.f32 %v3526_v22, %v3525_v53  ;;  %v3534_v36 = vadd.f32 %v3533_v46, %v3532_v48 }
0x265a   :  { %v3537_v18 = vsel %vm2447_vm3, %v3534_v36, %v3527_v8 }
0x265b   :  { %v3543_v62 = vsel %vm2108_vm0, %v3537_v18, %v3541_v20 }
0x265c   :  { %v3544_v23 = vpack.c.bf16 %v3543_v62, %v3543_v62 }
0x265e   :  { %7621 = vmatmul.mubr.msk.bf16.vlgmr.msra.gmra.mrb[28].mxu0 %vm336_vm6, %v3544_v23 }
0x265f   :  { %7645 = vmatpush3.bf16.msra.mxu0 %v9198_v16  ;;  %7648 = vmatprep.mubr.msk.bf16.mxu0 %vm8273_vm14, %v8272_v43 }
0x2660   :  { %7646 = vmatprep.subr.bf16.mxu0 %v8272_v43 }
0x2663   :  { %7647 = vmatpush3.bf16.msra.mxu0 %v9203_v3 }
0x2664   :  { %7652 = vmatprep.subr.bf16.mxu0 %v8272_v43 }
0x2731   :  { %v3582_v12 = vpop.f32.mrb[28].mxu0 }
0x2732   :  { %v3583_v34 = vadd.f32 %v9531_v33, %v3582_v12  ;;  %v7622_v27 = vpop.f32.mrb[29].mxu0 }
0x2733   :  { %v3585_v5 = vpop.f32.mrb[30].mxu0 }
0x2734   :  { %7928 = vtanh.f32 %v3583_v34  ;;  %v7623_v16 = vpop.f32.mrb[31].mxu0  ;;  %v7451_v28 = vmul.f32 -1.442695, %v3583_v34 }
0x2736   :  { %7930 = vpow2.f32 %v7451_v28  ;;  %v9590_v28 = vmul.f32 %v9265_v9, %v8812_v30 }
0x2738   :  { %vm3709_vm11 = vcmp.gt.f32.partialorder %v9590_v28, 0.0  ;;  %vm3827_vm15 = vcmp.eq.f32.partialorder %v9590_v28, 0.0 }
0x273e   :  { %v7929_v63 = vpop.eup %7928 }
0x273f   :  { %3597 = vrot.lane.b32.xlu1 %v7929_v63, %s8274_s13 }
0x2740   :  { %v7931_v3 = vpop.eup %7930 }
0x2741   :  { %v3591_v21 = vadd.f32 1.0, %v7931_v3 }
0x2743   :  { %7932 = vrcp.f32 %v3591_v21 }
0x274d   :  { %v7933_v29 = vpop.eup %7932 }
0x274e   :  { %v3595_v25 = vmul.f32 %v7933_v29, %v9395_v55  ;;  %v9550_v55 = vld [vmem:[%s10476_s6] sm:$0xff]  }
0x27b1   :  { %v3598_v1 = vpop.permute.xlu1 %3597 }
0x27b2   :  { %v3600_v4 = vmul.f32 %v7933_v29, %v3598_v1 }
0x27b4   :  { %3602 = vrot.lane.b32.xlu0 %v3600_v4, %s8274_s13 }
0x2826   :  { %v3603_v11 = vpop.permute.xlu0 %3602 }
0x2827   :  { %v9537_v60 = vadd.f32 %v3603_v11, %v3595_v25 }
0x2829   :  { %7934 = vtanh.f32 %v9537_v60 }
0x2833   :  { %v7935_v24 = vpop.eup %7934 }
0x2834   :  { %3608 = vrot.lane.b32.xlu1 %v7935_v24, %s8274_s13 }
0x28a6   :  { %v3609_v51 = vpop.permute.xlu1 %3608 }
0x28a7   :  { %v9541_v45 = vmul.f32 %v7933_v29, %v3609_v51 }
0x28a9   :  { %v3612_v19 = vpack.c.bf16 %v9541_v45, %v9541_v45 }
0x28ab   :  { %3614 = vrot.lane.b32.xlu0 %v3612_v19, %s8260_s4 }
0x291d   :  { %v3615_v56 = vpop.permute.xlu0 %3614 }
0x291e   :  { %7629 = vmatmul.mubr.msk.bf16.vlgmr.msra.gmra.mrb[28].mxu1 %vm2108_vm0, %v3615_v56 }
0x291f   :  { %7633 = vmatpush3.bf16.msra.mxu1 %v9550_v55  ;;  %7640 = vmatprep.mubr.msk.bf16.mxu1 %vm8273_vm14, %v8272_v43 }
0x2920   :  { %7634 = vmatprep.subr.bf16.mxu1 %v8272_v43 }
0x2923   :  { %7635 = vmatpush3.bf16.msra.mxu1 %v9559_v26 }
0x2924   :  { %7636 = vmatprep.subr.bf16.mxu1 %v8272_v43 }
0x2927   :  { %7637 = vmatpush3.bf16.msra.mxu1 %v9566_v14 }
0x2928   :  { %7638 = vmatprep.subr.bf16.mxu1 %v8272_v43 }
0x292b   :  { %7639 = vmatpush3.bf16.msra.mxu1 %v9573_v59 }
0x292c   :  { %7664 = vmatprep.subr.bf16.mxu1 %v8272_v43 }
0x29f1   :  { %v3653_v13 = vpop.f32.mrb[28].mxu1 }
0x29f2   :  { %v3668_v44 = vrot.slane %v3653_v13, %v8496_v35  ;;  %v7630_v48 = vpop.f32.mrb[29].mxu1 }
0x29f3   :  { %v3656_v53 = vpop.f32.mrb[30].mxu1 }
0x29f4   :  { %v3669_v46 = vcombine.high %v3668_v44, %v3668_v44  ;;  %v3676_v22 = vrot.slane %v3668_v44, %v8496_v35  ;;  %v7631_v8 = vpop.f32.mrb[31].mxu1 }
0x29f6   :  { %v3683_v36 = vrot.slane %v3669_v46, %v8496_v35  ;;  %v3687_v18 = vrot.slane %v3676_v22, %v8487_v15 }
0x29f8   :  { %v3691_v20 = vrot.slane %v3683_v36, %v8487_v15  ;;  %v3694_v62 = vadd.f32 %v3687_v18, %v9246_v39  ;;  %v9595_v39 = vmul.f32 %v9274_v54, %v8807_v57 }
0x29fa   :  { %v3695_v23 = vadd.f32 %v3691_v20, %v9250_v52  ;;  %7936 = vtanh.f32 %v3694_v62  ;;  %v3711_v52 = vsel %vm3709_vm11, 0.0, %v8276_v61  ;;  %vm3708_vm12 = vcmp.gt.f32.partialorder %v9595_v39, 0.0 }
0x29fb   :  { %v3721_v3 = vrot.slane %v3711_v52, %v8487_v15  ;;  %vm3826_vm13 = vcmp.eq.f32.partialorder %v9595_v39, 0.0 }
0x29fc   :  { %7938 = vtanh.f32 %v3695_v23 }
0x2a04   :  { %v7937_v12 = vpop.eup %7936 }
0x2a05   :  { %v3698_v34 = vmul.f32 %v7937_v12, %v9256_v40 }
0x2a06   :  { %v7939_v27 = vpop.eup %7938 }
0x2a07   :  { %v3700_v5 = vsel %vm2108_vm0, %v3698_v34, 0.0  ;;  %v3699_v16 = vmul.f32 %v7939_v27, %v9256_v40  ;;  %v3710_v40 = vsel %vm3708_vm12, 0.0, %v8276_v61 }
0x2a08   :  { %3701 = vadd.xlane.f32.xlu1 %v3700_v5  ;;  %v3717_v21 = vrot.slane %v3710_v40, %v8487_v15 }
0x2a09   :  { %v3703_v63 = vsel %vm2108_vm0, %v3699_v16, 0.0 }
0x2a0a   :  { %3704 = vadd.xlane.f32.xlu0 %v3703_v63 }
0x2a19   :  { %3726 = vbcast.lane.b32.xlu1 %v3721_v3, 256 }
0x2a20   :  { %3723 = vbcast.lane.b32.xlu0 %v3717_v21, 256 }
0x2a95   :  { %v3702_v30 = vpop.xlane.xlu1 %3701 }
0x2a97   :  { %v3705_v9 = vpop.xlane.xlu0 %3704 }
0x2a99   :  { %v3727_v29 = vpop.permute.xlu1 %3726 }
0x2a9a   :  { %v3731_v1 = vadd.f32 %v3727_v29, %v3705_v9 }
0x2a9b   :  { %v3724_v4 = vpop.permute.xlu0 %3723 }
0x2a9c   :  { %v3730_v25 = vadd.f32 %v3724_v4, %v3702_v30  ;;  %3738 = vperm.xlu0 %7773, %v3731_v1  }
0x2a9e   :  { %3735 = vperm.xlu1 %7774, %v3730_v25  }
0x2b1b   :  { %v3739_v57 = vpop.permute.xlu0 %3738 }
0x2b1c   :  { %v3747_v11 = vrot.slane %v3739_v57, %v9291_v0 }
0x2b1d   :  { %v3736_v54 = vpop.permute.xlu1 %3735 }
0x2b1e   :  { %v3743_v24 = vrot.slane %v3736_v54, %v9291_v0 }
0x2b20   :  { %v3748_v51 = vsel %vm2447_vm3, %v3747_v11, %v3743_v24 }
0x2b21   :  { %v3750_v19 = vsel %vm2450_vm4, %v3748_v51, -inf }
0x2b22   :  { %3751 = vmax.xlane.f32.xlu1 %v3750_v19 }
0x2baf   :  { %v3752_v56 = vpop.xlane.xlu1 %3751 }
0x2bb0   :  { %v3757_v13 = vrot.slane %v3752_v56, %v8487_v15  ;;  %v3761_v44 = vrot.slane %v3752_v56, %v8490_v17 }
0x2bb2   :  { %v3764_v48 = vsub.f32 %v3730_v25, %v3757_v13  ;;  %v3765_v53 = vsub.f32 %v3731_v1, %v3761_v44 }
0x2bb4   :  { %v3766_v46 = vmul.f32 1.442695, %v3764_v48  ;;  %v3768_v22 = vmul.f32 1.442695, %v3765_v53 }
0x2bb6   :  { %7940 = vpow2.f32 %v3766_v46 }
0x2bb7   :  { %7942 = vpow2.f32 %v3768_v22 }
0x2bc0   :  { %v7941_v8 = vpop.eup %7940 }
0x2bc1   :  { %3773 = vperm.xlu0 %7773, %v7941_v8   ;;  %v7943_v36 = vpop.eup %7942 }
0x2bc5   :  { %3776 = vperm.xlu0 %7773, %v7943_v36  }
0x2c40   :  { %v3774_v18 = vpop.permute.xlu0 %3773 }
0x2c41   :  { %v3781_v62 = vrot.slane %v3774_v18, %v9291_v0 }
0x2c44   :  { %v3777_v20 = vpop.permute.xlu0 %3776 }
0x2c45   :  { %v3785_v23 = vrot.slane %v3777_v20, %v9291_v0 }
0x2c47   :  { %v3786_v12 = vsel %vm2447_vm3, %v3785_v23, %v3781_v62 }
0x2c48   :  { %v3788_v34 = vsel %vm2450_vm4, %v3786_v12, 0.0 }
0x2c49   :  { %3789 = vadd.xlane.f32.xlu0 %v3788_v34 }
0x2cd6   :  { %v3790_v27 = vpop.xlane.xlu0 %3789 }
0x2cd7   :  { %7944 = vlog2.f32 %v3790_v27 }
0x2ce1   :  { %v7945_v5 = vpop.eup %7944 }
0x2ce2   :  { %v3792_v16 = vmul.f32 0.6931472, %v7945_v5 }
0x2ce4   :  { %v3797_v63 = vrot.slane %v3792_v16, %v8487_v15  ;;  %v3801_v52 = vrot.slane %v3792_v16, %v8490_v17 }
0x2ce6   :  { %v9614_v3 = vsub.f32 %v3764_v48, %v3797_v63  ;;  %v9616_v40 = vsub.f32 %v3765_v53, %v3801_v52 }
0x2ce8   :  { %v3828_v21 = vcombine.high %v9614_v3, %v9614_v3  ;;  %v3835_v30 = vrot.slane %v9614_v3, %v8496_v35  ;;  %v3877_v9 = vcombine.high %v9616_v40, %v9616_v40  ;;  %v3884_v29 = vrot.slane %v9616_v40, %v8496_v35 }
0x2cea   :  { %v3842_v1 = vrot.slane %v3828_v21, %v8496_v35  ;;  %v3843_v4 = vcombine.high %v3835_v30, %v3835_v30  ;;  %v3891_v25 = vrot.slane %v3877_v9, %v8496_v35  ;;  %v3892_v57 = vcombine.high %v3884_v29, %v3884_v29 }
0x2ceb   :  { %v3851_v11 = vrot.slane %v3835_v30, %v8496_v35  ;;  %v3900_v56 = vrot.slane %v3884_v29, %v8496_v35 }
0x2cec   :  { %v3844_v54 = vcombine.high %v3842_v1, %v3842_v1  ;;  %v3865_v24 = vrot.slane %v3843_v4, %v8496_v35  ;;  %v3893_v51 = vcombine.high %v3891_v25, %v3891_v25  ;;  %v3858_v19 = vrot.slane %v3842_v1, %v8496_v35 }
0x2ced   :  { %v3907_v13 = vrot.slane %v3891_v25, %v8496_v35  ;;  %v3914_v44 = vrot.slane %v3892_v57, %v8496_v35 }
0x2cee   :  { %v3921_v48 = vrot.slane %v3893_v51, %v8496_v35  ;;  %v3872_v53 = vrot.slane %v3844_v54, %v8496_v35  ;;  %v3926_v46 = vcombine.low %v3851_v11, %v3865_v24  ;;  %v7453_v22 = vcombine.high %v3851_v11, %v3865_v24 }
0x2cef   :  { %v3975_v8 = vcombine.low %v3900_v56, %v3914_v44  ;;  %v7455_v36 = vcombine.high %v3900_v56, %v3914_v44 }
0x2cf0   :  { %v3977_v18 = vcombine.low %v3907_v13, %v3921_v48  ;;  %v7456_v20 = vcombine.high %v3907_v13, %v3921_v48  ;;  %v3928_v62 = vcombine.low %v3858_v19, %v3872_v53  ;;  %v7454_v23 = vcombine.high %v3858_v19, %v3872_v53 }
0x2cf1   :  { %v3985_v12 = vrot.slane %v3975_v8, %v8496_v35  ;;  %v3992_v34 = vrot.slane %v7455_v36, %v8496_v35  ;;  %v3936_v27 = vrot.slane %v3926_v46, %v8496_v35  ;;  %v3943_v5 = vrot.slane %v7453_v22, %v8496_v35 }
0x2cf2   :  { %v3999_v16 = vrot.slane %v3977_v18, %v8496_v35  ;;  %v4006_v63 = vrot.slane %v7456_v20, %v8496_v35  ;;  %v3950_v52 = vrot.slane %v3928_v62, %v8496_v35  ;;  %v3957_v21 = vrot.slane %v7454_v23, %v8496_v35 }
0x2cf3   :  { %v4007_v30 = vcombine.low %v3985_v12, %v3992_v34  ;;  %v3958_v9 = vcombine.low %v3936_v27, %v3943_v5 }
0x2cf4   :  { %v4008_v29 = vcombine.low %v3999_v16, %v4006_v63  ;;  %v3959_v1 = vcombine.low %v3950_v52, %v3957_v21 }
0x2cf5   :  { %v4015_v4 = vrot.slane %v4007_v30, %v8496_v35  ;;  %v3966_v57 = vrot.slane %v3958_v9, %v8496_v35 }
0x2cf6   :  { %v4022_v25 = vrot.slane %v4008_v29, %v8496_v35  ;;  %v3973_v54 = vrot.slane %v3959_v1, %v8496_v35 }
0x2cf8   :  { %v4023_v11 = vcombine.low %v4015_v4, %v4022_v25  ;;  %v3974_v24 = vcombine.low %v3966_v57, %v3973_v54 }
0x2cfa   :  { %4028 = vperm.xlu0 %7773, %v4023_v11   ;;  %4025 = vperm.xlu1 %7774, %v3974_v24  }
0x2d79   :  { %v4029_v51 = vpop.permute.xlu0 %4028  ;;  %v4026_v19 = vpop.permute.xlu1 %4025 }
0x2d7a   :  { %v4037_v56 = vrot.slane %v4029_v51, %v9291_v0  ;;  %v4033_v13 = vrot.slane %v4026_v19, %v9291_v0 }
0x2d7c   :  { %v4058_v44 = vrot.slane %v4037_v56, %v8496_v35  ;;  %v4044_v48 = vrot.slane %v4033_v13, %v8496_v35 }
0x2d7e   :  { %v4065_v53 = vrot.slane %v4058_v44, %v8496_v35  ;;  %v4051_v46 = vrot.slane %v4044_v48, %v8496_v35 }
0x2d80   :  { %v4069_v22 = vsel %vm3827_vm15, -10000000.0, %v4065_v53  ;;  %v4068_v8 = vsel %vm3826_vm13, -10000000.0, %v4051_v46 }
0x2d81   :  { %v4072_v36 = vcombine.low %v4068_v8, %v4069_v22 }
0x2d83   :  { %v4079_v18 = vrot.slane %v4072_v36, %v8496_v35 }
0x2d85   :  { %v4086_v20 = vrot.slane %v4079_v18, %v8496_v35 }
0x2d87   :  { %v4088_v62 = vsel %vm2450_vm4, %v4086_v20, -inf }
0x2d88   :  { %4089 = vmax.xlane.f32.xlu1 %v4088_v62 }
0x2e15   :  { %v4090_v23 = vpop.xlane.xlu1 %4089 }
0x2e16   :  { %v4095_v12 = vrot.slane %v4090_v23, %v8487_v15  ;;  %v4099_v34 = vrot.slane %v4090_v23, %v8490_v17 }
0x2e18   :  { %vm4102_vm1 = vcmp.eq.f32.partialorder %v4068_v8, %v4095_v12  ;;  %vm4103_vm2 = vcmp.eq.f32.partialorder %v4069_v22, %v4099_v34 }
0x2e19   :  { %v4104_v39 = vsel %vm4102_vm1, %v9353_v50, 8  ;;  %v4105_v28 = vsel %vm4103_vm2, %v9356_v31, 8  ;;  %vm4774_vm2 = vcmp.eq.s32.totalorder %v9287_v10, 3 }
0x2e1a   :  { %v4106_v27 = vcombine.low %v4104_v39, %v4105_v28 }
0x2e1c   :  { %v4113_v5 = vrot.slane %v4106_v27, %v8496_v35 }
0x2e1e   :  { %v4120_v16 = vrot.slane %v4113_v5, %v8496_v35 }
0x2e20   :  { %v4121_v63 = vsel %vm2450_vm4, %v4120_v16, 2147483647  ;;  %v9683_v16 = vld [vmem:[#allocation14] sm:$0xff]  }
0x2e21   :  { %v4123_v52 = vshra.s32 %v4121_v63, 16  ;;  %v4122_v30 = vand.u32 65535, %v4121_v63  ;;  %v9689_v63 = vld [vmem:[#allocation14 + $0x8] sm:$0xff]  }
0x2e23   :  { %v4125_v21 = vcvt.s32.f32 %v4123_v52  ;;  %v4124_v29 = vcvt.s32.f32 %v4122_v30 }
0x2e25   :  { %4126 = vmin.xlane.f32.xlu0 %v4125_v21 }
0x2eb2   :  { %v4127_v9 = vpop.xlane.xlu0 %4126 }
0x2eb3   :  { %vm4128_vm5 = vcmp.eq.f32.partialorder %v4125_v21, %v4127_v9  ;;  %v4133_v4 = vcvt.f32.s32 %v4127_v9 }
0x2eb4   :  { %v4129_v1 = vsel %vm4128_vm5, %v4124_v29, inf }
0x2eb5   :  { %4130 = vmin.xlane.f32.xlu1 %v4129_v1  ;;  %v4134_v57 = vshll.u32 %v4133_v4, 16 }
0x2f42   :  { %v4131_v25 = vpop.xlane.xlu1 %4130 }
0x2f43   :  { %v4132_v54 = vcvt.f32.s32 %v4131_v25 }
0x2f45   :  { %v4135_v11 = vadd.s32 %v4134_v57, %v4132_v54 }
0x2f47   :  { %v9668_v24 = vsel %vm4136_vm7, %v4135_v11, %v9507_v7  ;;  %vm4138_vm8 = vcmp.eq.s32.totalorder %v9287_v10, %v4135_v11 }
0x2f48   :  { %v7457_v51 = vsel %vm4138_vm8, 1.0, %v8272_v43 }
0x2f49   :  { %v4151_v19 = vrot.slane %v7457_v51, %v8490_v17  ;;  %v4144_v56 = vrot.slane %v7457_v51, %v8487_v15 }
0x2f4b   :  { %4153 = vbcast.lane.b32.xlu0 %v4151_v19, 256  ;;  %4146 = vbcast.lane.b32.xlu1 %v4144_v56, 256 }
0x2f4f   :  { %4178 = vrot.lane.b32.xlu1 %v9541_v45, %s8275_s17 }
0x2fbd   :  { %v4154_v13 = vpop.permute.xlu0 %4153  ;;  %v4147_v44 = vpop.permute.xlu1 %4146 }
0x2fbe   :  { %v4158_v48 = vmul.f32 %v4154_v13, %v9374_v6  ;;  %v4157_v7 = vmul.f32 %v4147_v44, %v9376_v47 }
0x2fc0   :  { %v4166_v53 = vsel %vm2108_vm0, %v4158_v48, 0.0  ;;  %v4159_v46 = vsel %vm2108_vm0, %v4157_v7, 0.0 }
0x2fc1   :  { %v4167_v22 = vrot.slane %v4166_v53, 4  ;;  %v4160_v8 = vrot.slane %v4159_v46, 4  ;;  %v4179_v27 = vpop.permute.xlu1 %4178 }
0x2fc3   :  { %v4168_v36 = vadd.f32 %v4167_v22, %v4166_v53  ;;  %v4161_v18 = vadd.f32 %v4160_v8, %v4159_v46 }
0x2fc5   :  { %v4169_v20 = vrot.slane %v4168_v36, 2  ;;  %v4162_v62 = vrot.slane %v4161_v18, 2 }
0x2fc7   :  { %v4170_v23 = vadd.f32 %v4169_v20, %v4168_v36  ;;  %v4163_v12 = vadd.f32 %v4162_v62, %v4161_v18 }
0x2fc9   :  { %v4171_v34 = vrot.slane %v4170_v23, 1  ;;  %v4164_v45 = vrot.slane %v4163_v12, 1 }
0x2fcb   :  { %v4165_v39 = vadd.f32 %v4164_v45, %v4163_v12  ;;  %v4172_v28 = vadd.f32 %v4171_v34, %v4170_v23  ;;  %v9721_v34 = vld [vmem:[#allocation4] sm:$0xff] }
0x2fcd   :  { %v4175_v6 = vsel %vm2447_vm3, %v4172_v28, %v4165_v39  ;;  %v9725_v28 = vld [vmem:[#allocation4 + $0x8] sm:$0xff] }
0x2fce   :  { %v4181_v47 = vsel %vm2108_vm0, %v4175_v6, %v4179_v27 }
0x2fcf   :  { %v4182_v5 = vpack.c.bf16 %v4181_v47, %v4181_v47  ;;  %v9731_v47 = vld [vmem:[%s10480_s10] ss:$0 sm:$0xff] }
0x2fd1   :  { %7641 = vmatmul.mubr.msk.bf16.vlgmr.msra.gmra.mrb[32].mxu1 %vm336_vm6, %v4182_v5 }
0x2fd2   :  { %7665 = vmatpush3.bf16.msra.mxu1 %v9683_v16  ;;  %7668 = vmatprep.mubr.msk.bf16.mxu1 %vm8273_vm14, %v8272_v43 }
0x2fd3   :  { %7666 = vmatprep.subr.bf16.mxu1 %v8272_v43 }
0x2fd6   :  { %7667 = vmatpush3.bf16.msra.mxu1 %v9689_v63 }
0x2fd7   :  { %7672 = vmatprep.subr.bf16.mxu1 %v8272_v43 }
0x30a4   :  { %v4220_v52 = vpop.f32.mrb[32].mxu1 }
0x30a5   :  { %v4221_v21 = vadd.f32 %v9531_v33, %v4220_v52  ;;  %v7642_v30 = vpop.f32.mrb[33].mxu1 }
0x30a6   :  { %v4223_v9 = vpop.f32.mrb[34].mxu1 }
0x30a7   :  { %7946 = vtanh.f32 %v4221_v21  ;;  %v7643_v29 = vpop.f32.mrb[35].mxu1  ;;  %v7459_v4 = vmul.f32 -1.442695, %v4221_v21 }
0x30a8   :  { %v9740_v29 = vld [vmem:[%s10471_s1 + $0x1] sm:$0x1] }
0x30a9   :  { %7948 = vpow2.f32 %v7459_v4  ;;  %v9750_v4 = vld [vmem:[%s10471_s1] sm:$0x1] }
0x30b1   :  { %v7947_v1 = vpop.eup %7946 }
0x30b2   :  { %4235 = vrot.lane.b32.xlu1 %v7947_v1, %s8274_s13  ;;  %v9744_v1 = vmul.f32 %v9740_v29, %v8894_v38 }
0x30b3   :  { %v7949_v25 = vpop.eup %7948 }
0x30b4   :  { %v4229_v57 = vadd.f32 1.0, %v7949_v25  ;;  %vm4347_vm9 = vcmp.gt.f32.partialorder %v9744_v1, 0.0  ;;  %v9754_v25 = vmul.f32 %v9750_v4, %v8889_v49  ;;  %vm4465_vm12 = vcmp.eq.f32.partialorder %v9744_v1, 0.0 }
0x30b6   :  { %7950 = vrcp.f32 %v4229_v57  ;;  %v4349_v57 = vsel %vm4347_vm9, 0.0, %v8276_v61  ;;  %vm4346_vm10 = vcmp.gt.f32.partialorder %v9754_v25, 0.0  ;;  %vm4464_vm11 = vcmp.eq.f32.partialorder %v9754_v25, 0.0 }
0x30b7   :  { %v4348_v38 = vsel %vm4346_vm10, 0.0, %v8276_v61 }
0x30c0   :  { %v7951_v54 = vpop.eup %7950 }
0x30c1   :  { %v4233_v19 = vmul.f32 %v7951_v54, %v9537_v60 }
0x3124   :  { %v4236_v11 = vpop.permute.xlu1 %4235 }
0x3125   :  { %v4238_v51 = vmul.f32 %v7951_v54, %v4236_v11  ;;  %v4355_v11 = vrot.slane %v4348_v38, %v8487_v15 }
0x3127   :  { %4240 = vrot.lane.b32.xlu0 %v4238_v51, %s8274_s13 }
0x3199   :  { %v4241_v56 = vpop.permute.xlu0 %4240 }
0x319a   :  { %v9697_v13 = vadd.f32 %v4241_v56, %v4233_v19 }
0x319c   :  { %7952 = vtanh.f32 %v9697_v13 }
0x31a6   :  { %v7953_v44 = vpop.eup %7952 }
0x31a7   :  { %4246 = vrot.lane.b32.xlu1 %v7953_v44, %s8274_s13 }
0x3219   :  { %v4247_v48 = vpop.permute.xlu1 %4246 }
0x321a   :  { %v9701_v7 = vmul.f32 %v7951_v54, %v4247_v48  ;;  %v4359_v54 = vrot.slane %v4349_v57, %v8487_v15 }
0x321c   :  { %v4250_v53 = vpack.c.bf16 %v9701_v7, %v9701_v7 }
0x321e   :  { %4252 = vrot.lane.b32.xlu0 %v4250_v53, %s8260_s4 }
0x3290   :  { %v4253_v46 = vpop.permute.xlu0 %4252 }
0x3291   :  { %7649 = vmatmul.mubr.msk.bf16.vlgmr.msra.gmra.mrb[32].mxu0 %vm2108_vm0, %v4253_v46 }
0x3292   :  { %7653 = vmatpush3.bf16.msra.mxu0 %v9550_v55  ;;  %7660 = vmatprep.mubr.msk.bf16.mxu0 %vm8273_vm14, %v8272_v43 }
0x3293   :  { %7654 = vmatprep.subr.bf16.mxu0 %v8272_v43 }
0x3296   :  { %7655 = vmatpush3.bf16.msra.mxu0 %v9559_v26 }
0x3297   :  { %7656 = vmatprep.subr.bf16.mxu0 %v8272_v43 }
0x329a   :  { %7657 = vmatpush3.bf16.msra.mxu0 %v9566_v14 }
0x329b   :  { %7658 = vmatprep.subr.bf16.mxu0 %v8272_v43 }
0x329e   :  { %7659 = vmatpush3.bf16.msra.mxu0 %v9573_v59 }
0x329f   :  { %7684 = vmatprep.subr.bf16.mxu0 %v8272_v43 }
0x3364   :  { %v4291_v60 = vpop.f32.mrb[32].mxu0 }
0x3365   :  { %v4306_v22 = vrot.slane %v4291_v60, %v8496_v35  ;;  %v7650_v8 = vpop.f32.mrb[33].mxu0 }
0x3366   :  { %v4294_v36 = vpop.f32.mrb[34].mxu0 }
0x3367   :  { %v4307_v18 = vcombine.high %v4306_v22, %v4306_v22  ;;  %v4314_v20 = vrot.slane %v4306_v22, %v8496_v35  ;;  %v7651_v62 = vpop.f32.mrb[35].mxu0 }
0x3369   :  { %v4321_v23 = vrot.slane %v4307_v18, %v8496_v35  ;;  %v4325_v12 = vrot.slane %v4314_v20, %v8487_v15 }
0x336b   :  { %v4329_v45 = vrot.slane %v4321_v23, %v8487_v15  ;;  %v4332_v39 = vadd.f32 %v4325_v12, %v9721_v34 }
0x336d   :  { %v4333_v6 = vadd.f32 %v4329_v45, %v9725_v28  ;;  %7954 = vtanh.f32 %v4332_v39 }
0x336f   :  { %7956 = vtanh.f32 %v4333_v6 }
0x3377   :  { %v7955_v27 = vpop.eup %7954 }
0x3378   :  { %v4336_v5 = vmul.f32 %v9731_v47, %v7955_v27 }
0x3379   :  { %v7957_v52 = vpop.eup %7956 }
0x337a   :  { %v4338_v21 = vsel %vm2108_vm0, %v4336_v5, 0.0  ;;  %v4337_v30 = vmul.f32 %v9731_v47, %v7957_v52 }
0x337b   :  { %4339 = vadd.xlane.f32.xlu1 %v4338_v21 }
0x337c   :  { %v4341_v9 = vsel %vm2108_vm0, %v4337_v30, 0.0 }
0x337d   :  { %4342 = vadd.xlane.f32.xlu0 %v4341_v9 }
0x338c   :  { %4364 = vbcast.lane.b32.xlu1 %v4359_v54, 256 }
0x3393   :  { %4361 = vbcast.lane.b32.xlu0 %v4355_v11, 256 }
0x3408   :  { %v4340_v51 = vpop.xlane.xlu1 %4339 }
0x340a   :  { %v4343_v19 = vpop.xlane.xlu0 %4342 }
0x340c   :  { %v4365_v56 = vpop.permute.xlu1 %4364 }
0x340d   :  { %v4369_v44 = vadd.f32 %v4365_v56, %v4343_v19 }
0x340e   :  { %v4362_v48 = vpop.permute.xlu0 %4361 }
0x340f   :  { %v4368_v53 = vadd.f32 %v4362_v48, %v4340_v51  ;;  %4376 = vperm.xlu0 %7773, %v4369_v44  }
0x3411   :  { %4373 = vperm.xlu1 %7774, %v4368_v53  }
0x348e   :  { %v4377_v49 = vpop.permute.xlu0 %4376 }
0x348f   :  { %v4385_v60 = vrot.slane %v4377_v49, %v9291_v0 }
0x3490   :  { %v4374_v46 = vpop.permute.xlu1 %4373 }
0x3491   :  { %v4381_v22 = vrot.slane %v4374_v46, %v9291_v0 }
0x3493   :  { %v4386_v8 = vsel %vm2447_vm3, %v4385_v60, %v4381_v22 }
0x3494   :  { %v4388_v36 = vsel %vm2450_vm4, %v4386_v8, -inf }
0x3495   :  { %4389 = vmax.xlane.f32.xlu1 %v4388_v36 }
0x3522   :  { %v4390_v18 = vpop.xlane.xlu1 %4389 }
0x3523   :  { %v4395_v20 = vrot.slane %v4390_v18, %v8487_v15  ;;  %v4399_v62 = vrot.slane %v4390_v18, %v8490_v17 }
0x3525   :  { %v4402_v23 = vsub.f32 %v4368_v53, %v4395_v20  ;;  %v4403_v12 = vsub.f32 %v4369_v44, %v4399_v62 }
0x3527   :  { %v4404_v45 = vmul.f32 1.442695, %v4402_v23  ;;  %v4406_v39 = vmul.f32 1.442695, %v4403_v12 }
0x3529   :  { %7958 = vpow2.f32 %v4404_v45 }
0x352a   :  { %7960 = vpow2.f32 %v4406_v39 }
0x3533   :  { %v7959_v6 = vpop.eup %7958 }
0x3534   :  { %4411 = vperm.xlu0 %7773, %v7959_v6   ;;  %v7961_v27 = vpop.eup %7960 }
0x3538   :  { %4414 = vperm.xlu0 %7773, %v7961_v27  }
0x35b3   :  { %v4412_v5 = vpop.permute.xlu0 %4411 }
0x35b4   :  { %v4419_v21 = vrot.slane %v4412_v5, %v9291_v0 }
0x35b7   :  { %v4415_v52 = vpop.permute.xlu0 %4414 }
0x35b8   :  { %v4423_v30 = vrot.slane %v4415_v52, %v9291_v0 }
0x35ba   :  { %v4424_v9 = vsel %vm2447_vm3, %v4423_v30, %v4419_v21 }
0x35bb   :  { %v4426_v57 = vsel %vm2450_vm4, %v4424_v9, 0.0 }
0x35bc   :  { %4427 = vadd.xlane.f32.xlu0 %v4426_v57 }
0x3649   :  { %v4428_v54 = vpop.xlane.xlu0 %4427 }
0x364a   :  { %7962 = vlog2.f32 %v4428_v54 }
0x3654   :  { %v7963_v38 = vpop.eup %7962 }
0x3655   :  { %v4430_v11 = vmul.f32 0.6931472, %v7963_v38 }
0x3657   :  { %v4435_v51 = vrot.slane %v4430_v11, %v8487_v15  ;;  %v4439_v19 = vrot.slane %v4430_v11, %v8490_v17 }
0x3659   :  { %v9773_v56 = vsub.f32 %v4402_v23, %v4435_v51  ;;  %v9775_v44 = vsub.f32 %v4403_v12, %v4439_v19 }
0x365b   :  { %v4466_v48 = vcombine.high %v9773_v56, %v9773_v56  ;;  %v4473_v53 = vrot.slane %v9773_v56, %v8496_v35  ;;  %v4515_v49 = vcombine.high %v9775_v44, %v9775_v44  ;;  %v4522_v46 = vrot.slane %v9775_v44, %v8496_v35 }
0x365d   :  { %v4480_v60 = vrot.slane %v4466_v48, %v8496_v35  ;;  %v4481_v22 = vcombine.high %v4473_v53, %v4473_v53  ;;  %v4529_v8 = vrot.slane %v4515_v49, %v8496_v35  ;;  %v4530_v36 = vcombine.high %v4522_v46, %v4522_v46 }
0x365e   :  { %v4489_v20 = vrot.slane %v4473_v53, %v8496_v35  ;;  %v4538_v45 = vrot.slane %v4522_v46, %v8496_v35 }
0x365f   :  { %v4482_v18 = vcombine.high %v4480_v60, %v4480_v60  ;;  %v4503_v62 = vrot.slane %v4481_v22, %v8496_v35  ;;  %v4531_v23 = vcombine.high %v4529_v8, %v4529_v8  ;;  %v4496_v12 = vrot.slane %v4480_v60, %v8496_v35 }
0x3660   :  { %v4545_v39 = vrot.slane %v4529_v8, %v8496_v35  ;;  %v4552_v6 = vrot.slane %v4530_v36, %v8496_v35 }
0x3661   :  { %v4559_v27 = vrot.slane %v4531_v23, %v8496_v35  ;;  %v4510_v5 = vrot.slane %v4482_v18, %v8496_v35  ;;  %v4564_v52 = vcombine.low %v4489_v20, %v4503_v62  ;;  %v7461_v21 = vcombine.high %v4489_v20, %v4503_v62 }
0x3662   :  { %v4613_v30 = vcombine.low %v4538_v45, %v4552_v6  ;;  %v7463_v9 = vcombine.high %v4538_v45, %v4552_v6 }
0x3663   :  { %v4615_v57 = vcombine.low %v4545_v39, %v4559_v27  ;;  %v7464_v54 = vcombine.high %v4545_v39, %v4559_v27  ;;  %v4566_v38 = vcombine.low %v4496_v12, %v4510_v5  ;;  %v7462_v11 = vcombine.high %v4496_v12, %v4510_v5 }
0x3664   :  { %v4623_v51 = vrot.slane %v4613_v30, %v8496_v35  ;;  %v4630_v19 = vrot.slane %v7463_v9, %v8496_v35  ;;  %v4574_v48 = vrot.slane %v4564_v52, %v8496_v35  ;;  %v4581_v53 = vrot.slane %v7461_v21, %v8496_v35 }
0x3665   :  { %v4637_v49 = vrot.slane %v4615_v57, %v8496_v35  ;;  %v4644_v46 = vrot.slane %v7464_v54, %v8496_v35  ;;  %v4588_v60 = vrot.slane %v4566_v38, %v8496_v35  ;;  %v4595_v22 = vrot.slane %v7462_v11, %v8496_v35 }
0x3666   :  { %v4645_v8 = vcombine.low %v4623_v51, %v4630_v19  ;;  %v4596_v36 = vcombine.low %v4574_v48, %v4581_v53 }
0x3667   :  { %v4646_v18 = vcombine.low %v4637_v49, %v4644_v46  ;;  %v4597_v20 = vcombine.low %v4588_v60, %v4595_v22 }
0x3668   :  { %v4653_v62 = vrot.slane %v4645_v8, %v8496_v35  ;;  %v4604_v12 = vrot.slane %v4596_v36, %v8496_v35 }
0x3669   :  { %v4660_v23 = vrot.slane %v4646_v18, %v8496_v35  ;;  %v4611_v45 = vrot.slane %v4597_v20, %v8496_v35 }
0x366b   :  { %v4661_v39 = vcombine.low %v4653_v62, %v4660_v23  ;;  %v4612_v6 = vcombine.low %v4604_v12, %v4611_v45 }
0x366d   :  { %4666 = vperm.xlu0 %7773, %v4661_v39   ;;  %4663 = vperm.xlu1 %7774, %v4612_v6  }
0x36ec   :  { %v4667_v27 = vpop.permute.xlu0 %4666  ;;  %v4664_v5 = vpop.permute.xlu1 %4663 }
0x36ed   :  { %v4675_v52 = vrot.slane %v4667_v27, %v9291_v0  ;;  %v4671_v21 = vrot.slane %v4664_v5, %v9291_v0 }
0x36ef   :  { %v4696_v30 = vrot.slane %v4675_v52, %v8496_v35  ;;  %v4682_v9 = vrot.slane %v4671_v21, %v8496_v35 }
0x36f1   :  { %v4703_v57 = vrot.slane %v4696_v30, %v8496_v35  ;;  %v4689_v54 = vrot.slane %v4682_v9, %v8496_v35 }
0x36f3   :  { %v4707_v38 = vsel %vm4465_vm12, -10000000.0, %v4703_v57  ;;  %v4706_v11 = vsel %vm4464_vm11, -10000000.0, %v4689_v54 }
0x36f4   :  { %v4710_v51 = vcombine.low %v4706_v11, %v4707_v38 }
0x36f6   :  { %v4717_v19 = vrot.slane %v4710_v51, %v8496_v35  ;;  %v9837_v51 = vld [vmem:[#allocation3] sm:$0xff] }
0x36f8   :  { %v4724_v48 = vrot.slane %v4717_v19, %v8496_v35 }
0x36fa   :  { %v4726_v53 = vsel %vm2450_vm4, %v4724_v48, -inf }
0x36fb   :  { %4727 = vmax.xlane.f32.xlu1 %v4726_v53 }
0x3788   :  { %v4728_v49 = vpop.xlane.xlu1 %4727 }
0x3789   :  { %v4733_v46 = vrot.slane %v4728_v49, %v8487_v15  ;;  %v4737_v60 = vrot.slane %v4728_v49, %v8490_v17 }
0x378b   :  { %vm4740_vm13 = vcmp.eq.f32.partialorder %v4706_v11, %v4733_v46  ;;  %vm4741_vm15 = vcmp.eq.f32.partialorder %v4707_v38, %v4737_v60  ;;  %v9835_v38 = vld [vmem:[#allocation3 + $0x8] sm:$0xff] }
0x378c   :  { %v4742_v25 = vsel %vm4740_vm13, %v9353_v50, 8  ;;  %v4743_v1 = vsel %vm4741_vm15, %v9356_v31, 8  ;;  %vm5412_vm15 = vcmp.eq.s32.totalorder %v9287_v10, 4 }
0x378d   :  { %v4744_v22 = vcombine.low %v4742_v25, %v4743_v1 }
0x378f   :  { %v4751_v8 = vrot.slane %v4744_v22, %v8496_v35 }
0x3791   :  { %v4758_v36 = vrot.slane %v4751_v8, %v8496_v35 }
0x3793   :  { %v4759_v18 = vsel %vm2450_vm4, %v4758_v36, 2147483647 }
0x3794   :  { %v4761_v20 = vshra.s32 %v4759_v18, 16  ;;  %v4760_v23 = vand.u32 65535, %v4759_v18 }
0x3796   :  { %v4763_v62 = vcvt.s32.f32 %v4761_v20  ;;  %v4762_v45 = vcvt.s32.f32 %v4760_v23 }
0x3798   :  { %4764 = vmin.xlane.f32.xlu0 %v4763_v62 }
0x3825   :  { %v4765_v12 = vpop.xlane.xlu0 %4764 }
0x3826   :  { %vm4766_vm1 = vcmp.eq.f32.partialorder %v4763_v62, %v4765_v12  ;;  %v4771_v6 = vcvt.f32.s32 %v4765_v12 }
0x3827   :  { %v4767_v39 = vsel %vm4766_vm1, %v4762_v45, inf }
0x3828   :  { %4768 = vmin.xlane.f32.xlu1 %v4767_v39  ;;  %v4772_v5 = vshll.u32 %v4771_v6, 16 }
0x38b5   :  { %v4769_v27 = vpop.xlane.xlu1 %4768 }
0x38b6   :  { %v4770_v52 = vcvt.f32.s32 %v4769_v27 }
0x38b8   :  { %v4773_v21 = vadd.s32 %v4772_v5, %v4770_v52 }
0x38ba   :  { %v9827_v30 = vsel %vm4774_vm2, %v4773_v21, %v9668_v24  ;;  %vm4776_vm5 = vcmp.eq.s32.totalorder %v9287_v10, %v4773_v21 }
0x38bb   :  { %v7465_v9 = vsel %vm4776_vm5, 1.0, %v8272_v43 }
0x38bc   :  { %v4789_v57 = vrot.slane %v7465_v9, %v8490_v17  ;;  %v4782_v54 = vrot.slane %v7465_v9, %v8487_v15 }
0x38be   :  { %4791 = vbcast.lane.b32.xlu0 %v4789_v57, 256  ;;  %4784 = vbcast.lane.b32.xlu1 %v4782_v54, 256 }
0x38c2   :  { %4816 = vrot.lane.b32.xlu1 %v9701_v7, %s8275_s17 }
0x3930   :  { %v4792_v11 = vpop.permute.xlu0 %4791  ;;  %v4785_v24 = vpop.permute.xlu1 %4784 }
0x3931   :  { %v4796_v19 = vmul.f32 %v9835_v38, %v4792_v11  ;;  %v4795_v48 = vmul.f32 %v9837_v51, %v4785_v24 }
0x3933   :  { %v4804_v53 = vsel %vm2108_vm0, %v4796_v19, 0.0  ;;  %v4797_v49 = vsel %vm2108_vm0, %v4795_v48, 0.0 }
0x3934   :  { %v4805_v46 = vrot.slane %v4804_v53, 4  ;;  %v4798_v60 = vrot.slane %v4797_v49, 4  ;;  %v4817_v45 = vpop.permute.xlu1 %4816 }
0x3936   :  { %v4806_v25 = vadd.f32 %v4805_v46, %v4804_v53  ;;  %v4799_v1 = vadd.f32 %v4798_v60, %v4797_v49 }
0x3938   :  { %v4807_v22 = vrot.slane %v4806_v25, 2  ;;  %v4800_v7 = vrot.slane %v4799_v1, 2 }
0x393a   :  { %v4808_v8 = vadd.f32 %v4807_v22, %v4806_v25  ;;  %v4801_v36 = vadd.f32 %v4800_v7, %v4799_v1 }
0x393c   :  { %v4809_v18 = vrot.slane %v4808_v8, 1  ;;  %v4802_v20 = vrot.slane %v4801_v36, 1 }
0x393e   :  { %v4803_v62 = vadd.f32 %v4802_v20, %v4801_v36  ;;  %v4810_v23 = vadd.f32 %v4809_v18, %v4808_v8 }
0x3940   :  { %v4813_v12 = vsel %vm2447_vm3, %v4810_v23, %v4803_v62 }
0x3941   :  { %v4819_v39 = vsel %vm2108_vm0, %v4813_v12, %v4817_v45 }
0x3942   :  { %v4820_v6 = vpack.c.bf16 %v4819_v39, %v4819_v39 }
0x3944   :  { %7661 = vmatmul.mubr.msk.bf16.vlgmr.msra.gmra.mrb[36].mxu0 %vm336_vm6, %v4820_v6 }
0x3945   :  { %7685 = vmatpush3.bf16.msra.mxu0 %v9683_v16  ;;  %7688 = vmatprep.mubr.msk.bf16.mxu0 %vm8273_vm14, %v8272_v43 }
0x3946   :  { %7686 = vmatprep.subr.bf16.mxu0 %v8272_v43 }
0x3949   :  { %7687 = vmatpush3.bf16.msra.mxu0 %v9689_v63 }
0x394a   :  { %7692 = vmatprep.subr.bf16.mxu0 %v8272_v43 }
0x3a17   :  { %v4858_v27 = vpop.f32.mrb[36].mxu0 }
0x3a18   :  { %v4859_v5 = vadd.f32 %v9531_v33, %v4858_v27  ;;  %v7662_v52 = vpop.f32.mrb[37].mxu0 }
0x3a19   :  { %v4861_v21 = vpop.f32.mrb[38].mxu0 }
0x3a1a   :  { %7964 = vtanh.f32 %v4859_v5  ;;  %v7663_v9 = vpop.f32.mrb[39].mxu0  ;;  %v7467_v54 = vmul.f32 -1.442695, %v4859_v5  ;;  %v9889_v21 = vmul.f32 %v9740_v29, %v8885_v58 }
0x3a1b   :  { %v9894_v9 = vmul.f32 %v9750_v4, %v8882_v37 }
0x3a1c   :  { %7966 = vpow2.f32 %v7467_v54  ;;  %vm4985_vm7 = vcmp.gt.f32.partialorder %v9889_v21, 0.0  ;;  %vm5103_vm10 = vcmp.eq.f32.partialorder %v9889_v21, 0.0 }
0x3a1d   :  { %vm4984_vm8 = vcmp.gt.f32.partialorder %v9894_v9, 0.0  ;;  %vm5102_vm9 = vcmp.eq.f32.partialorder %v9894_v9, 0.0 }
0x3a24   :  { %v7965_v57 = vpop.eup %7964 }
0x3a25   :  { %4873 = vrot.lane.b32.xlu1 %v7965_v57, %s8274_s13  ;;  %v4987_v57 = vsel %vm4985_vm7, 0.0, %v8276_v61 }
0x3a26   :  { %v7967_v11 = vpop.eup %7966  ;;  %v4997_v54 = vrot.slane %v4987_v57, %v8487_v15 }
0x3a27   :  { %v4867_v24 = vadd.f32 1.0, %v7967_v11  ;;  %v4986_v11 = vsel %vm4984_vm8, 0.0, %v8276_v61 }
0x3a29   :  { %7968 = vrcp.f32 %v4867_v24  ;;  %v4993_v24 = vrot.slane %v4986_v11, %v8487_v15 }
0x3a33   :  { %v7969_v19 = vpop.eup %7968 }
0x3a34   :  { %v4871_v49 = vmul.f32 %v7969_v19, %v9697_v13 }
0x3a97   :  { %v4874_v48 = vpop.permute.xlu1 %4873 }
0x3a98   :  { %v4876_v53 = vmul.f32 %v7969_v19, %v4874_v48 }
0x3a9a   :  { %4878 = vrot.lane.b32.xlu0 %v4876_v53, %s8274_s13 }
0x3b0c   :  { %v4879_v33 = vpop.permute.xlu0 %4878 }
0x3b0d   :  { %v9856_v46 = vadd.f32 %v4879_v33, %v4871_v49 }
0x3b0f   :  { %7970 = vtanh.f32 %v9856_v46 }
0x3b19   :  { %v7971_v60 = vpop.eup %7970 }
0x3b1a   :  { %4884 = vrot.lane.b32.xlu1 %v7971_v60, %s8274_s13 }
0x3b8c   :  { %v4885_v25 = vpop.permute.xlu1 %4884 }
0x3b8d   :  { %v9860_v1 = vmul.f32 %v7969_v19, %v4885_v25 }
0x3b8f   :  { %v4888_v22 = vpack.c.bf16 %v9860_v1, %v9860_v1 }
0x3b91   :  { %4890 = vrot.lane.b32.xlu0 %v4888_v22, %s8260_s4 }
0x3c03   :  { %v4891_v7 = vpop.permute.xlu0 %4890 }
0x3c04   :  { %7669 = vmatmul.mubr.msk.bf16.vlgmr.msra.gmra.mrb[36].mxu1 %vm2108_vm0, %v4891_v7 }
0x3c05   :  { %7673 = vmatpush3.bf16.msra.mxu1 %v9550_v55  ;;  %7680 = vmatprep.mubr.msk.bf16.mxu1 %vm8273_vm14, %v8272_v43 }
0x3c06   :  { %7674 = vmatprep.subr.bf16.mxu1 %v8272_v43 }
0x3c09   :  { %7675 = vmatpush3.bf16.msra.mxu1 %v9559_v26 }
0x3c0a   :  { %7676 = vmatprep.subr.bf16.mxu1 %v8272_v43 }
0x3c0d   :  { %7677 = vmatpush3.bf16.msra.mxu1 %v9566_v14 }
0x3c0e   :  { %7678 = vmatprep.subr.bf16.mxu1 %v8272_v43 }
0x3c11   :  { %7679 = vmatpush3.bf16.msra.mxu1 %v9573_v59 }
0x3c12   :  { %7704 = vmatprep.subr.bf16.mxu1 %v8272_v43 }
0x3cd7   :  { %v4929_v13 = vpop.f32.mrb[36].mxu1 }
0x3cd8   :  { %v4944_v55 = vrot.slane %v4929_v13, %v8496_v35  ;;  %v7670_v8 = vpop.f32.mrb[37].mxu1 }
0x3cd9   :  { %v4932_v36 = vpop.f32.mrb[38].mxu1 }
0x3cda   :  { %v4945_v18 = vcombine.high %v4944_v55, %v4944_v55  ;;  %v4952_v20 = vrot.slane %v4944_v55, %v8496_v35  ;;  %v7671_v62 = vpop.f32.mrb[39].mxu1 }
0x3cdc   :  { %v4959_v26 = vrot.slane %v4945_v18, %v8496_v35  ;;  %v4963_v23 = vrot.slane %v4952_v20, %v8487_v15 }
0x3cde   :  { %v4967_v14 = vrot.slane %v4959_v26, %v8487_v15  ;;  %v4970_v12 = vadd.f32 %v4963_v23, %v9721_v34 }
0x3ce0   :  { %v4971_v59 = vadd.f32 %v4967_v14, %v9725_v28  ;;  %7972 = vtanh.f32 %v4970_v12 }
0x3ce2   :  { %7974 = vtanh.f32 %v4971_v59 }
0x3cea   :  { %v7973_v45 = vpop.eup %7972 }
0x3ceb   :  { %v4974_v39 = vmul.f32 %v9731_v47, %v7973_v45 }
0x3cec   :  { %v7975_v6 = vpop.eup %7974 }
0x3ced   :  { %v4976_v27 = vsel %vm2108_vm0, %v4974_v39, 0.0  ;;  %v4975_v5 = vmul.f32 %v9731_v47, %v7975_v6 }
0x3cee   :  { %4977 = vadd.xlane.f32.xlu1 %v4976_v27 }
0x3cef   :  { %v4979_v52 = vsel %vm2108_vm0, %v4975_v5, 0.0 }
0x3cf0   :  { %4980 = vadd.xlane.f32.xlu0 %v4979_v52 }
0x3cff   :  { %5002 = vbcast.lane.b32.xlu1 %v4997_v54, 256 }
0x3d06   :  { %4999 = vbcast.lane.b32.xlu0 %v4993_v24, 256 }
0x3d7b   :  { %v4978_v58 = vpop.xlane.xlu1 %4977 }
0x3d7d   :  { %v4981_v19 = vpop.xlane.xlu0 %4980 }
0x3d7f   :  { %v5003_v48 = vpop.permute.xlu1 %5002 }
0x3d80   :  { %v5007_v53 = vadd.f32 %v5003_v48, %v4981_v19 }
0x3d81   :  { %v5000_v49 = vpop.permute.xlu0 %4999 }
0x3d82   :  { %v5006_v33 = vadd.f32 %v5000_v49, %v4978_v58  ;;  %5014 = vperm.xlu0 %7773, %v5007_v53  }
0x3d84   :  { %5011 = vperm.xlu1 %7774, %v5006_v33  }
0x3e01   :  { %v5015_v37 = vpop.permute.xlu0 %5014 }
0x3e02   :  { %v5023_v25 = vrot.slane %v5015_v37, %v9291_v0 }
0x3e03   :  { %v5012_v60 = vpop.permute.xlu1 %5011 }
0x3e04   :  { %v5019_v22 = vrot.slane %v5012_v60, %v9291_v0 }
0x3e06   :  { %v5024_v7 = vsel %vm2447_vm3, %v5023_v25, %v5019_v22 }
0x3e07   :  { %v5026_v13 = vsel %vm2450_vm4, %v5024_v7, -inf }
0x3e08   :  { %5027 = vmax.xlane.f32.xlu1 %v5026_v13 }
0x3e95   :  { %v5028_v55 = vpop.xlane.xlu1 %5027 }
0x3e96   :  { %v5033_v8 = vrot.slane %v5028_v55, %v8487_v15  ;;  %v5037_v36 = vrot.slane %v5028_v55, %v8490_v17 }
0x3e98   :  { %v5040_v18 = vsub.f32 %v5006_v33, %v5033_v8  ;;  %v5041_v20 = vsub.f32 %v5007_v53, %v5037_v36 }
0x3e9a   :  { %v5042_v62 = vmul.f32 1.442695, %v5040_v18  ;;  %v5044_v26 = vmul.f32 1.442695, %v5041_v20 }
0x3e9c   :  { %7976 = vpow2.f32 %v5042_v62 }
0x3e9d   :  { %7978 = vpow2.f32 %v5044_v26 }
0x3ea6   :  { %v7977_v23 = vpop.eup %7976 }
0x3ea7   :  { %5049 = vperm.xlu0 %7773, %v7977_v23   ;;  %v7979_v14 = vpop.eup %7978 }
0x3eab   :  { %5052 = vperm.xlu0 %7773, %v7979_v14  }
0x3f26   :  { %v5050_v12 = vpop.permute.xlu0 %5049 }
0x3f27   :  { %v5057_v45 = vrot.slane %v5050_v12, %v9291_v0 }
0x3f2a   :  { %v5053_v59 = vpop.permute.xlu0 %5052 }
0x3f2b   :  { %v5061_v39 = vrot.slane %v5053_v59, %v9291_v0 }
0x3f2d   :  { %v5062_v6 = vsel %vm2447_vm3, %v5061_v39, %v5057_v45 }
0x3f2e   :  { %v5064_v27 = vsel %vm2450_vm4, %v5062_v6, 0.0 }
0x3f2f   :  { %5065 = vadd.xlane.f32.xlu0 %v5064_v27 }
0x3fbc   :  { %v5066_v5 = vpop.xlane.xlu0 %5065 }
0x3fbd   :  { %7980 = vlog2.f32 %v5066_v5 }
0x3fc7   :  { %v7981_v52 = vpop.eup %7980 }
0x3fc8   :  { %v5068_v57 = vmul.f32 0.6931472, %v7981_v52 }
0x3fca   :  { %v5073_v54 = vrot.slane %v5068_v57, %v8487_v15  ;;  %v5077_v11 = vrot.slane %v5068_v57, %v8490_v17 }
0x3fcc   :  { %v9913_v24 = vsub.f32 %v5040_v18, %v5073_v54  ;;  %v9915_v58 = vsub.f32 %v5041_v20, %v5077_v11 }
0x3fce   :  { %v5104_v19 = vcombine.high %v9913_v24, %v9913_v24  ;;  %v5111_v48 = vrot.slane %v9913_v24, %v8496_v35  ;;  %v5153_v53 = vcombine.high %v9915_v58, %v9915_v58  ;;  %v5160_v49 = vrot.slane %v9915_v58, %v8496_v35 }
0x3fd0   :  { %v5118_v33 = vrot.slane %v5104_v19, %v8496_v35  ;;  %v5119_v37 = vcombine.high %v5111_v48, %v5111_v48  ;;  %v5167_v60 = vrot.slane %v5153_v53, %v8496_v35  ;;  %v5168_v25 = vcombine.high %v5160_v49, %v5160_v49 }
0x3fd1   :  { %v5127_v7 = vrot.slane %v5111_v48, %v8496_v35  ;;  %v5176_v36 = vrot.slane %v5160_v49, %v8496_v35 }
0x3fd2   :  { %v5120_v22 = vcombine.high %v5118_v33, %v5118_v33  ;;  %v5141_v13 = vrot.slane %v5119_v37, %v8496_v35  ;;  %v5169_v55 = vcombine.high %v5167_v60, %v5167_v60  ;;  %v5134_v8 = vrot.slane %v5118_v33, %v8496_v35 }
0x3fd3   :  { %v5183_v18 = vrot.slane %v5167_v60, %v8496_v35  ;;  %v5190_v20 = vrot.slane %v5168_v25, %v8496_v35 }
0x3fd4   :  { %v5197_v62 = vrot.slane %v5169_v55, %v8496_v35  ;;  %v5148_v26 = vrot.slane %v5120_v22, %v8496_v35  ;;  %v5202_v23 = vcombine.low %v5127_v7, %v5141_v13  ;;  %v7469_v14 = vcombine.high %v5127_v7, %v5141_v13 }
0x3fd5   :  { %v5251_v12 = vcombine.low %v5176_v36, %v5190_v20  ;;  %v7471_v59 = vcombine.high %v5176_v36, %v5190_v20 }
0x3fd6   :  { %v5253_v45 = vcombine.low %v5183_v18, %v5197_v62  ;;  %v7472_v39 = vcombine.high %v5183_v18, %v5197_v62  ;;  %v5204_v6 = vcombine.low %v5134_v8, %v5148_v26  ;;  %v7470_v27 = vcombine.high %v5134_v8, %v5148_v26 }
0x3fd7   :  { %v5261_v5 = vrot.slane %v5251_v12, %v8496_v35  ;;  %v5268_v52 = vrot.slane %v7471_v59, %v8496_v35  ;;  %v5212_v57 = vrot.slane %v5202_v23, %v8496_v35  ;;  %v5219_v54 = vrot.slane %v7469_v14, %v8496_v35 }
0x3fd8   :  { %v5275_v11 = vrot.slane %v5253_v45, %v8496_v35  ;;  %v5282_v19 = vrot.slane %v7472_v39, %v8496_v35  ;;  %v5226_v48 = vrot.slane %v5204_v6, %v8496_v35  ;;  %v5233_v53 = vrot.slane %v7470_v27, %v8496_v35 }
0x3fd9   :  { %v5283_v49 = vcombine.low %v5261_v5, %v5268_v52  ;;  %v5234_v33 = vcombine.low %v5212_v57, %v5219_v54 }
0x3fda   :  { %v5284_v37 = vcombine.low %v5275_v11, %v5282_v19  ;;  %v5235_v60 = vcombine.low %v5226_v48, %v5233_v53 }
0x3fdb   :  { %v5291_v25 = vrot.slane %v5283_v49, %v8496_v35  ;;  %v5242_v7 = vrot.slane %v5234_v33, %v8496_v35 }
0x3fdc   :  { %v5298_v22 = vrot.slane %v5284_v37, %v8496_v35  ;;  %v5249_v13 = vrot.slane %v5235_v60, %v8496_v35 }
0x3fde   :  { %v5299_v55 = vcombine.low %v5291_v25, %v5298_v22  ;;  %v5250_v8 = vcombine.low %v5242_v7, %v5249_v13 }
0x3fe0   :  { %5304 = vperm.xlu0 %7773, %v5299_v55   ;;  %5301 = vperm.xlu1 %7774, %v5250_v8  }
0x405f   :  { %v5305_v36 = vpop.permute.xlu0 %5304  ;;  %v5302_v18 = vpop.permute.xlu1 %5301 }
0x4060   :  { %v5313_v20 = vrot.slane %v5305_v36, %v9291_v0  ;;  %v5309_v62 = vrot.slane %v5302_v18, %v9291_v0 }
0x4062   :  { %v5334_v26 = vrot.slane %v5313_v20, %v8496_v35  ;;  %v5320_v23 = vrot.slane %v5309_v62, %v8496_v35 }
0x4064   :  { %v5341_v14 = vrot.slane %v5334_v26, %v8496_v35  ;;  %v5327_v12 = vrot.slane %v5320_v23, %v8496_v35 }
0x4066   :  { %v5345_v59 = vsel %vm5103_vm10, -10000000.0, %v5341_v14  ;;  %v5344_v45 = vsel %vm5102_vm9, -10000000.0, %v5327_v12 }
0x4067   :  { %v5348_v39 = vcombine.low %v5344_v45, %v5345_v59 }
0x4069   :  { %v5355_v6 = vrot.slane %v5348_v39, %v8496_v35 }
0x406b   :  { %v5362_v27 = vrot.slane %v5355_v6, %v8496_v35 }
0x406d   :  { %v5364_v5 = vsel %vm2450_vm4, %v5362_v27, -inf }
0x406e   :  { %5365 = vmax.xlane.f32.xlu1 %v5364_v5 }
0x40fb   :  { %v5366_v52 = vpop.xlane.xlu1 %5365 }
0x40fc   :  { %v5371_v57 = vrot.slane %v5366_v52, %v8487_v15  ;;  %v5375_v54 = vrot.slane %v5366_v52, %v8490_v17 }
0x40fe   :  { %vm5378_vm11 = vcmp.eq.f32.partialorder %v5344_v45, %v5371_v57  ;;  %vm5379_vm12 = vcmp.eq.f32.partialorder %v5345_v59, %v5375_v54 }
0x40ff   :  { %v5380_v9 = vsel %vm5378_vm11, %v9353_v50, 8  ;;  %v5381_v21 = vsel %vm5379_vm12, %v9356_v31, 8  ;;  %vm6050_vm12 = vcmp.eq.s32.totalorder %v9287_v10, 5 }
0x4100   :  { %v5382_v11 = vcombine.low %v5380_v9, %v5381_v21 }
0x4102   :  { %v5389_v19 = vrot.slane %v5382_v11, %v8496_v35 }
0x4104   :  { %v5396_v48 = vrot.slane %v5389_v19, %v8496_v35 }
0x4106   :  { %v5397_v53 = vsel %vm2450_vm4, %v5396_v48, 2147483647 }
0x4107   :  { %v5399_v49 = vshra.s32 %v5397_v53, 16  ;;  %v5398_v37 = vand.u32 65535, %v5397_v53 }
0x4109   :  { %v5401_v33 = vcvt.s32.f32 %v5399_v49  ;;  %v5400_v25 = vcvt.s32.f32 %v5398_v37 }
0x410b   :  { %5402 = vmin.xlane.f32.xlu0 %v5401_v33 }
0x4198   :  { %v5403_v60 = vpop.xlane.xlu0 %5402 }
0x4199   :  { %vm5404_vm13 = vcmp.eq.f32.partialorder %v5401_v33, %v5403_v60  ;;  %v5409_v7 = vcvt.f32.s32 %v5403_v60  ;;  %v9991_v60 = vld [vmem:[%s10477_s7] ss:$0 sm:$0xff] }
0x419a   :  { %v5405_v22 = vsel %vm5404_vm13, %v5400_v25, inf }
0x419b   :  { %5406 = vmin.xlane.f32.xlu1 %v5405_v22  ;;  %v5410_v55 = vshll.u32 %v5409_v7, 16 }
0x4228   :  { %v5407_v13 = vpop.xlane.xlu1 %5406 }
0x4229   :  { %v5408_v8 = vcvt.f32.s32 %v5407_v13 }
0x422b   :  { %v5411_v36 = vadd.s32 %v5410_v55, %v5408_v8 }
0x422d   :  { %v9967_v18 = vsel %vm5412_vm15, %v5411_v36, %v9827_v30  ;;  %vm5414_vm1 = vcmp.eq.s32.totalorder %v9287_v10, %v5411_v36 }
0x422e   :  { %v7473_v20 = vsel %vm5414_vm1, 1.0, %v8272_v43 }
0x422f   :  { %v5427_v62 = vrot.slane %v7473_v20, %v8490_v17  ;;  %v5420_v26 = vrot.slane %v7473_v20, %v8487_v15 }
0x4231   :  { %5429 = vbcast.lane.b32.xlu0 %v5427_v62, 256  ;;  %5422 = vbcast.lane.b32.xlu1 %v5420_v26, 256 }
0x4235   :  { %5454 = vrot.lane.b32.xlu1 %v9860_v1, %s8275_s17 }
0x42a3   :  { %v5430_v23 = vpop.permute.xlu0 %5429  ;;  %v5423_v14 = vpop.permute.xlu1 %5422 }
0x42a4   :  { %v5434_v12 = vmul.f32 %v5430_v23, %v9835_v38  ;;  %v5433_v30 = vmul.f32 %v5423_v14, %v9837_v51 }
0x42a6   :  { %v5442_v59 = vsel %vm2108_vm0, %v5434_v12, 0.0  ;;  %v5435_v45 = vsel %vm2108_vm0, %v5433_v30, 0.0 }
0x42a7   :  { %v5443_v39 = vrot.slane %v5442_v59, 4  ;;  %v5436_v6 = vrot.slane %v5435_v45, 4  ;;  %v5455_v53 = vpop.permute.xlu1 %5454 }
0x42a9   :  { %v5444_v27 = vadd.f32 %v5443_v39, %v5442_v59  ;;  %v5437_v5 = vadd.f32 %v5436_v6, %v5435_v45  ;;  %v10019_v6 = vld [vmem:[%s10476_s6 + $0x8] sm:$0xff]  }
0x42ab   :  { %v5445_v52 = vrot.slane %v5444_v27, 2  ;;  %v5438_v57 = vrot.slane %v5437_v5, 2 }
0x42ad   :  { %v5446_v54 = vadd.f32 %v5445_v52, %v5444_v27  ;;  %v5439_v9 = vadd.f32 %v5438_v57, %v5437_v5  ;;  %v10026_v27 = vld [vmem:[%s10476_s6 + $0x10] sm:$0xff]   ;;  %v10033_v5 = vld [vmem:[%s10476_s6 + $0x18] sm:$0xff]  }
0x42af   :  { %v5447_v21 = vrot.slane %v5446_v54, 1  ;;  %v5440_v1 = vrot.slane %v5439_v9, 1 }
0x42b1   :  { %v5448_v11 = vadd.f32 %v5447_v21, %v5446_v54  ;;  %v5441_v19 = vadd.f32 %v5440_v1, %v5439_v9 }
0x42b3   :  { %v5451_v48 = vsel %vm2447_vm3, %v5448_v11, %v5441_v19 }
0x42b4   :  { %v5457_v49 = vsel %vm2108_vm0, %v5451_v48, %v5455_v53 }
0x42b5   :  { %v5458_v33 = vpack.c.bf16 %v5457_v49, %v5457_v49 }
0x42b7   :  { %7681 = vmatmul.mubr.msk.bf16.vlgmr.msra.gmra.mrb[40].mxu1 %vm336_vm6, %v5458_v33 }
0x42b8   :  { %7705 = vmatpush3.bf16.msra.mxu1 %v9683_v16  ;;  %7708 = vmatprep.mubr.msk.bf16.mxu1 %vm8273_vm14, %v8272_v43 }
0x42b9   :  { %7706 = vmatprep.subr.bf16.mxu1 %v8272_v43 }
0x42bc   :  { %7707 = vmatpush3.bf16.msra.mxu1 %v9689_v63 }
0x42bd   :  { %7712 = vmatprep.subr.bf16.mxu1 %v8272_v43 }
0x438a   :  { %v5496_v37 = vpop.f32.mrb[40].mxu1 }
0x438b   :  { %v5497_v25 = vadd.f32 %v9991_v60, %v5496_v37  ;;  %v7682_v22 = vpop.f32.mrb[41].mxu1 }
0x438c   :  { %v5499_v7 = vpop.f32.mrb[42].mxu1 }
0x438d   :  { %7982 = vtanh.f32 %v5497_v25  ;;  %v7683_v16 = vpop.f32.mrb[43].mxu1  ;;  %v7475_v55 = vmul.f32 -1.442695, %v5497_v25 }
0x438f   :  { %7984 = vpow2.f32 %v7475_v55  ;;  %v10508_v55 = vld [vmem:[#allocation30_spill] sm:$0xff] }
0x4397   :  { %v7983_v13 = vpop.eup %7982 }
0x4398   :  { %5511 = vrot.lane.b32.xlu1 %v7983_v13, %s8274_s13 }
0x4399   :  { %v7985_v63 = vpop.eup %7984 }
0x439a   :  { %v5505_v8 = vadd.f32 1.0, %v7985_v63  ;;  %v10050_v63 = vmul.f32 %v9740_v29, %v10508_v55 }
0x439c   :  { %7986 = vrcp.f32 %v5505_v8  ;;  %vm5623_vm2 = vcmp.gt.f32.partialorder %v10050_v63, 0.0  ;;  %vm5741_vm8 = vcmp.eq.f32.partialorder %v10050_v63, 0.0 }
0x439d   :  { %v5625_v8 = vsel %vm5623_vm2, 0.0, %v8276_v61 }
0x43a6   :  { %v7987_v36 = vpop.eup %7986 }
0x43a7   :  { %v5509_v26 = vmul.f32 %v7987_v36, %v9856_v46  ;;  %v10010_v46 = vld [vmem:[%s10476_s6] sm:$0xff]  }
0x440a   :  { %v5512_v20 = vpop.permute.xlu1 %5511 }
0x440b   :  { %v5514_v62 = vmul.f32 %v7987_v36, %v5512_v20 }
0x440d   :  { %5516 = vrot.lane.b32.xlu0 %v5514_v62, %s8274_s13 }
0x447f   :  { %v5517_v23 = vpop.permute.xlu0 %5516 }
0x4480   :  { %v9997_v14 = vadd.f32 %v5517_v23, %v5509_v26 }
0x4482   :  { %7988 = vtanh.f32 %v9997_v14 }
0x448c   :  { %v7989_v12 = vpop.eup %7988 }
0x448d   :  { %5522 = vrot.lane.b32.xlu1 %v7989_v12, %s8274_s13 }
0x44ff   :  { %v5523_v30 = vpop.permute.xlu1 %5522 }
0x4500   :  { %v10001_v59 = vmul.f32 %v7987_v36, %v5523_v30  ;;  %v5635_v36 = vrot.slane %v5625_v8, %v8487_v15 }
0x4502   :  { %v5526_v45 = vpack.c.bf16 %v10001_v59, %v10001_v59 }
0x4504   :  { %5528 = vrot.lane.b32.xlu0 %v5526_v45, %s8260_s4 }
0x4576   :  { %v5529_v39 = vpop.permute.xlu0 %5528 }
0x4577   :  { %7689 = vmatmul.mubr.msk.bf16.vlgmr.msra.gmra.mrb[40].mxu0 %vm2108_vm0, %v5529_v39 }
0x4578   :  { %7693 = vmatpush3.bf16.msra.mxu0 %v10010_v46  ;;  %7700 = vmatprep.mubr.msk.bf16.mxu0 %vm8273_vm14, %v8272_v43 }
0x4579   :  { %7694 = vmatprep.subr.bf16.mxu0 %v8272_v43 }
0x457c   :  { %7695 = vmatpush3.bf16.msra.mxu0 %v10019_v6 }
0x457d   :  { %7696 = vmatprep.subr.bf16.mxu0 %v8272_v43 }
0x4580   :  { %7697 = vmatpush3.bf16.msra.mxu0 %v10026_v27 }
0x4581   :  { %7698 = vmatprep.subr.bf16.mxu0 %v8272_v43 }
0x4584   :  { %7699 = vmatpush3.bf16.msra.mxu0 %v10033_v5 }
0x4585   :  { %7724 = vmatprep.subr.bf16.mxu0 %v8272_v43 }
0x464a   :  { %v5567_v52 = vpop.f32.mrb[40].mxu0 }
0x464b   :  { %v5582_v57 = vrot.slane %v5567_v52, %v8496_v35  ;;  %v7690_v54 = vpop.f32.mrb[41].mxu0 }
0x464c   :  { %v5570_v9 = vpop.f32.mrb[42].mxu0 }
0x464d   :  { %v5583_v21 = vcombine.high %v5582_v57, %v5582_v57  ;;  %v5590_v1 = vrot.slane %v5582_v57, %v8496_v35  ;;  %v7691_v11 = vpop.f32.mrb[43].mxu0 }
0x464f   :  { %v5597_v19 = vrot.slane %v5583_v21, %v8496_v35  ;;  %v5601_v48 = vrot.slane %v5590_v1, %v8487_v15 }
0x4651   :  { %v5605_v53 = vrot.slane %v5597_v19, %v8487_v15  ;;  %v5608_v49 = vadd.f32 %v5601_v48, %v9721_v34  ;;  %v10509_v34 = vld [vmem:[#allocation29_spill] sm:$0xff] }
0x4653   :  { %v5609_v33 = vadd.f32 %v5605_v53, %v9725_v28  ;;  %7990 = vtanh.f32 %v5608_v49  ;;  %v10055_v28 = vmul.f32 %v9750_v4, %v10509_v34 }
0x4655   :  { %7992 = vtanh.f32 %v5609_v33  ;;  %vm5622_vm5 = vcmp.gt.f32.partialorder %v10055_v28, 0.0  ;;  %vm5740_vm7 = vcmp.eq.f32.partialorder %v10055_v28, 0.0 }
0x465d   :  { %v7991_v37 = vpop.eup %7990 }
0x465e   :  { %v5612_v25 = vmul.f32 %v9731_v47, %v7991_v37 }
0x465f   :  { %v7993_v22 = vpop.eup %7992 }
0x4660   :  { %v5614_v7 = vsel %vm2108_vm0, %v5612_v25, 0.0  ;;  %v5613_v16 = vmul.f32 %v9731_v47, %v7993_v22  ;;  %v5624_v47 = vsel %vm5622_vm5, 0.0, %v8276_v61 }
0x4661   :  { %5615 = vadd.xlane.f32.xlu1 %v5614_v7  ;;  %v5631_v20 = vrot.slane %v5624_v47, %v8487_v15 }
0x4662   :  { %v5617_v13 = vsel %vm2108_vm0, %v5613_v16, 0.0 }
0x4663   :  { %5618 = vadd.xlane.f32.xlu0 %v5617_v13 }
0x4672   :  { %5640 = vbcast.lane.b32.xlu1 %v5635_v36, 256 }
0x4679   :  { %5637 = vbcast.lane.b32.xlu0 %v5631_v20, 256 }
0x46ee   :  { %v5616_v29 = vpop.xlane.xlu1 %5615 }
0x46f0   :  { %v5619_v62 = vpop.xlane.xlu0 %5618 }
0x46f2   :  { %v5641_v26 = vpop.permute.xlu1 %5640 }
0x46f3   :  { %v5645_v23 = vadd.f32 %v5641_v26, %v5619_v62 }
0x46f4   :  { %v5638_v12 = vpop.permute.xlu0 %5637 }
0x46f5   :  { %v5644_v30 = vadd.f32 %v5638_v12, %v5616_v29  ;;  %5652 = vperm.xlu0 %7773, %v5645_v23  }
0x46f7   :  { %5649 = vperm.xlu1 %7774, %v5644_v30  }
0x4774   :  { %v5653_v4 = vpop.permute.xlu0 %5652 }
0x4775   :  { %v5661_v39 = vrot.slane %v5653_v4, %v9291_v0 }
0x4776   :  { %v5650_v45 = vpop.permute.xlu1 %5649 }
0x4777   :  { %v5657_v52 = vrot.slane %v5650_v45, %v9291_v0 }
0x4779   :  { %v5662_v57 = vsel %vm2447_vm3, %v5661_v39, %v5657_v52 }
0x477a   :  { %v5664_v54 = vsel %vm2450_vm4, %v5662_v57, -inf }
0x477b   :  { %5665 = vmax.xlane.f32.xlu1 %v5664_v54 }
0x4808   :  { %v5666_v9 = vpop.xlane.xlu1 %5665 }
0x4809   :  { %v5671_v21 = vrot.slane %v5666_v9, %v8487_v15  ;;  %v5675_v1 = vrot.slane %v5666_v9, %v8490_v17 }
0x480b   :  { %v5678_v11 = vsub.f32 %v5644_v30, %v5671_v21  ;;  %v5679_v19 = vsub.f32 %v5645_v23, %v5675_v1 }
0x480d   :  { %v5680_v48 = vmul.f32 1.442695, %v5678_v11  ;;  %v5682_v53 = vmul.f32 1.442695, %v5679_v19 }
0x480f   :  { %7994 = vpow2.f32 %v5680_v48 }
0x4810   :  { %7996 = vpow2.f32 %v5682_v53 }
0x4819   :  { %v7995_v49 = vpop.eup %7994 }
0x481a   :  { %5687 = vperm.xlu0 %7773, %v7995_v49   ;;  %v7997_v33 = vpop.eup %7996 }
0x481e   :  { %5690 = vperm.xlu0 %7773, %v7997_v33  }
0x4899   :  { %v5688_v37 = vpop.permute.xlu0 %5687 }
0x489a   :  { %v5695_v22 = vrot.slane %v5688_v37, %v9291_v0 }
0x489d   :  { %v5691_v25 = vpop.permute.xlu0 %5690 }
0x489e   :  { %v5699_v7 = vrot.slane %v5691_v25, %v9291_v0 }
0x48a0   :  { %v5700_v16 = vsel %vm2447_vm3, %v5699_v7, %v5695_v22 }
0x48a1   :  { %v5702_v13 = vsel %vm2450_vm4, %v5700_v16, 0.0 }
0x48a2   :  { %5703 = vadd.xlane.f32.xlu0 %v5702_v13 }
0x492f   :  { %v5704_v55 = vpop.xlane.xlu0 %5703 }
0x4930   :  { %7998 = vlog2.f32 %v5704_v55 }
0x493a   :  { %v7999_v34 = vpop.eup %7998 }
0x493b   :  { %v5706_v8 = vmul.f32 0.6931472, %v7999_v34 }
0x493d   :  { %v5711_v36 = vrot.slane %v5706_v8, %v8487_v15  ;;  %v5715_v47 = vrot.slane %v5706_v8, %v8490_v17 }
0x493f   :  { %v10074_v20 = vsub.f32 %v5678_v11, %v5711_v36  ;;  %v10076_v29 = vsub.f32 %v5679_v19, %v5715_v47 }
0x4941   :  { %v5742_v62 = vcombine.high %v10074_v20, %v10074_v20  ;;  %v5749_v26 = vrot.slane %v10074_v20, %v8496_v35  ;;  %v5791_v23 = vcombine.high %v10076_v29, %v10076_v29  ;;  %v5798_v12 = vrot.slane %v10076_v29, %v8496_v35 }
0x4943   :  { %v5756_v30 = vrot.slane %v5742_v62, %v8496_v35  ;;  %v5757_v4 = vcombine.high %v5749_v26, %v5749_v26  ;;  %v5805_v45 = vrot.slane %v5791_v23, %v8496_v35  ;;  %v5806_v39 = vcombine.high %v5798_v12, %v5798_v12 }
0x4944   :  { %v5765_v57 = vrot.slane %v5749_v26, %v8496_v35  ;;  %v5814_v1 = vrot.slane %v5798_v12, %v8496_v35 }
0x4945   :  { %v5758_v52 = vcombine.high %v5756_v30, %v5756_v30  ;;  %v5779_v54 = vrot.slane %v5757_v4, %v8496_v35  ;;  %v5807_v9 = vcombine.high %v5805_v45, %v5805_v45  ;;  %v5772_v21 = vrot.slane %v5756_v30, %v8496_v35 }
0x4946   :  { %v5821_v11 = vrot.slane %v5805_v45, %v8496_v35  ;;  %v5828_v19 = vrot.slane %v5806_v39, %v8496_v35 }
0x4947   :  { %v5835_v48 = vrot.slane %v5807_v9, %v8496_v35  ;;  %v5786_v53 = vrot.slane %v5758_v52, %v8496_v35  ;;  %v5840_v49 = vcombine.low %v5765_v57, %v5779_v54  ;;  %v7477_v33 = vcombine.high %v5765_v57, %v5779_v54 }
0x4948   :  { %v5889_v37 = vcombine.low %v5814_v1, %v5828_v19  ;;  %v7479_v25 = vcombine.high %v5814_v1, %v5828_v19 }
0x4949   :  { %v5891_v22 = vcombine.low %v5821_v11, %v5835_v48  ;;  %v7480_v7 = vcombine.high %v5821_v11, %v5835_v48  ;;  %v5842_v16 = vcombine.low %v5772_v21, %v5786_v53  ;;  %v7478_v13 = vcombine.high %v5772_v21, %v5786_v53 }
0x494a   :  { %v5899_v55 = vrot.slane %v5889_v37, %v8496_v35  ;;  %v5906_v34 = vrot.slane %v7479_v25, %v8496_v35  ;;  %v5850_v8 = vrot.slane %v5840_v49, %v8496_v35  ;;  %v5857_v36 = vrot.slane %v7477_v33, %v8496_v35 }
0x494b   :  { %v5913_v47 = vrot.slane %v5891_v22, %v8496_v35  ;;  %v5920_v62 = vrot.slane %v7480_v7, %v8496_v35  ;;  %v5864_v26 = vrot.slane %v5842_v16, %v8496_v35  ;;  %v5871_v23 = vrot.slane %v7478_v13, %v8496_v35 }
0x494c   :  { %v5921_v12 = vcombine.low %v5899_v55, %v5906_v34  ;;  %v5872_v30 = vcombine.low %v5850_v8, %v5857_v36 }
0x494d   :  { %v5922_v4 = vcombine.low %v5913_v47, %v5920_v62  ;;  %v5873_v45 = vcombine.low %v5864_v26, %v5871_v23 }
0x494e   :  { %v5929_v39 = vrot.slane %v5921_v12, %v8496_v35  ;;  %v5880_v57 = vrot.slane %v5872_v30, %v8496_v35 }
0x494f   :  { %v5936_v52 = vrot.slane %v5922_v4, %v8496_v35  ;;  %v5887_v54 = vrot.slane %v5873_v45, %v8496_v35 }
0x4951   :  { %v5937_v9 = vcombine.low %v5929_v39, %v5936_v52  ;;  %v5888_v21 = vcombine.low %v5880_v57, %v5887_v54 }
0x4953   :  { %5942 = vperm.xlu0 %7773, %v5937_v9   ;;  %5939 = vperm.xlu1 %7774, %v5888_v21  }
0x49d2   :  { %v5943_v1 = vpop.permute.xlu0 %5942  ;;  %v5940_v11 = vpop.permute.xlu1 %5939 }
0x49d3   :  { %v5951_v19 = vrot.slane %v5943_v1, %v9291_v0  ;;  %v5947_v48 = vrot.slane %v5940_v11, %v9291_v0 }
0x49d5   :  { %v5972_v53 = vrot.slane %v5951_v19, %v8496_v35  ;;  %v5958_v49 = vrot.slane %v5947_v48, %v8496_v35 }
0x49d7   :  { %v5979_v33 = vrot.slane %v5972_v53, %v8496_v35  ;;  %v5965_v37 = vrot.slane %v5958_v49, %v8496_v35 }
0x49d9   :  { %v5983_v25 = vsel %vm5741_vm8, -10000000.0, %v5979_v33  ;;  %v5982_v22 = vsel %vm5740_vm7, -10000000.0, %v5965_v37 }
0x49da   :  { %v5986_v7 = vcombine.low %v5982_v22, %v5983_v25 }
0x49dc   :  { %v5993_v16 = vrot.slane %v5986_v7, %v8496_v35 }
0x49de   :  { %v6000_v13 = vrot.slane %v5993_v16, %v8496_v35 }
0x49e0   :  { %v6002_v55 = vsel %vm2450_vm4, %v6000_v13, -inf }
0x49e1   :  { %6003 = vmax.xlane.f32.xlu1 %v6002_v55 }
0x4a6e   :  { %v6004_v34 = vpop.xlane.xlu1 %6003 }
0x4a6f   :  { %v6009_v8 = vrot.slane %v6004_v34, %v8487_v15  ;;  %v6013_v36 = vrot.slane %v6004_v34, %v8490_v17 }
0x4a71   :  { %vm6016_vm9 = vcmp.eq.f32.partialorder %v5982_v22, %v6009_v8  ;;  %vm6017_vm10 = vcmp.eq.f32.partialorder %v5983_v25, %v6013_v36 }
0x4a72   :  { %v6018_v28 = vsel %vm6016_vm9, %v9353_v50, 8  ;;  %v6019_v63 = vsel %vm6017_vm10, %v9356_v31, 8  ;;  %vm6688_vm9 = vcmp.eq.s32.totalorder %v9287_v10, 6 }
0x4a73   :  { %v6020_v47 = vcombine.low %v6018_v28, %v6019_v63 }
0x4a75   :  { %v6027_v62 = vrot.slane %v6020_v47, %v8496_v35 }
0x4a77   :  { %v6034_v26 = vrot.slane %v6027_v62, %v8496_v35 }
0x4a79   :  { %v6035_v23 = vsel %vm2450_vm4, %v6034_v26, 2147483647 }
0x4a7a   :  { %v6037_v12 = vshra.s32 %v6035_v23, 16  ;;  %v6036_v4 = vand.u32 65535, %v6035_v23 }
0x4a7c   :  { %v6039_v30 = vcvt.s32.f32 %v6037_v12  ;;  %v6038_v39 = vcvt.s32.f32 %v6036_v4  ;;  %v8060_v12 = vld [vmem:[#allocation14] sm:$0xff]  }
0x4a7e   :  { %6040 = vmin.xlane.f32.xlu0 %v6039_v30 }
0x4b0b   :  { %v6041_v45 = vpop.xlane.xlu0 %6040 }
0x4b0c   :  { %vm6042_vm11 = vcmp.eq.f32.partialorder %v6039_v30, %v6041_v45  ;;  %v6047_v57 = vcvt.f32.s32 %v6041_v45  ;;  %v8061_v30 = vld [vmem:[#allocation14 + $0x8] sm:$0xff]  }
0x4b0d   :  { %v6043_v52 = vsel %vm6042_vm11, %v6038_v39, inf }
0x4b0e   :  { %6044 = vmin.xlane.f32.xlu1 %v6043_v52  ;;  %v6048_v9 = vshll.u32 %v6047_v57, 16 }
0x4b9b   :  { %v6045_v54 = vpop.xlane.xlu1 %6044 }
0x4b9c   :  { %v6046_v21 = vcvt.f32.s32 %v6045_v54 }
0x4b9e   :  { %v6049_v1 = vadd.s32 %v6048_v9, %v6046_v21 }
0x4ba0   :  { %v10128_v11 = vsel %vm6050_vm12, %v6049_v1, %v9967_v18  ;;  %vm6052_vm13 = vcmp.eq.s32.totalorder %v9287_v10, %v6049_v1 }
0x4ba1   :  { %v7481_v19 = vsel %vm6052_vm13, 1.0, %v8272_v43 }
0x4ba2   :  { %v6065_v48 = vrot.slane %v7481_v19, %v8490_v17  ;;  %v6058_v53 = vrot.slane %v7481_v19, %v8487_v15 }
0x4ba4   :  { %6067 = vbcast.lane.b32.xlu0 %v6065_v48, 256  ;;  %6060 = vbcast.lane.b32.xlu1 %v6058_v53, 256 }
0x4ba8   :  { %6092 = vrot.lane.b32.xlu1 %v10001_v59, %s8275_s17 }
0x4c16   :  { %v6068_v49 = vpop.permute.xlu0 %6067  ;;  %v6061_v33 = vpop.permute.xlu1 %6060 }
0x4c17   :  { %v6072_v37 = vmul.f32 %v6068_v49, %v9835_v38  ;;  %v6071_v18 = vmul.f32 %v6061_v33, %v9837_v51 }
0x4c19   :  { %v6080_v25 = vsel %vm2108_vm0, %v6072_v37, 0.0  ;;  %v6073_v22 = vsel %vm2108_vm0, %v6071_v18, 0.0 }
0x4c1a   :  { %v6081_v7 = vrot.slane %v6080_v25, 4  ;;  %v6074_v16 = vrot.slane %v6073_v22, 4  ;;  %v6093_v26 = vpop.permute.xlu1 %6092 }
0x4c1c   :  { %v6082_v13 = vadd.f32 %v6081_v7, %v6080_v25  ;;  %v6075_v55 = vadd.f32 %v6074_v16, %v6073_v22 }
0x4c1e   :  { %v6083_v34 = vrot.slane %v6082_v13, 2  ;;  %v6076_v8 = vrot.slane %v6075_v55, 2 }
0x4c20   :  { %v6084_v36 = vadd.f32 %v6083_v34, %v6082_v13  ;;  %v6077_v28 = vadd.f32 %v6076_v8, %v6075_v55 }
0x4c22   :  { %v6085_v63 = vrot.slane %v6084_v36, 1  ;;  %v6078_v59 = vrot.slane %v6077_v28, 1 }
0x4c24   :  { %v6086_v47 = vadd.f32 %v6085_v63, %v6084_v36  ;;  %v6079_v62 = vadd.f32 %v6078_v59, %v6077_v28  ;;  %v10173_v63 = vld [vmem:[#allocation4] sm:$0xff] }
0x4c26   :  { %v6089_v38 = vsel %vm2447_vm3, %v6086_v47, %v6079_v62 }
0x4c27   :  { %v6095_v51 = vsel %vm2108_vm0, %v6089_v38, %v6093_v26  ;;  %v10183_v38 = vld [vmem:[%s10480_s10] ss:$0 sm:$0xff] }
0x4c28   :  { %v6096_v23 = vpack.c.bf16 %v6095_v51, %v6095_v51 }
0x4c2a   :  { %7701 = vmatmul.mubr.msk.bf16.vlgmr.msra.gmra.mrb[44].mxu0 %vm336_vm6, %v6096_v23 }
0x4c2b   :  { %7725 = vmatpush3.bf16.msra.mxu0 %v8060_v12  ;;  %7728 = vmatprep.mubr.msk.bf16.mxu0 %vm8273_vm14, %v8272_v43 }
0x4c2c   :  { %7726 = vmatprep.subr.bf16.mxu0 %v8272_v43 }
0x4c2f   :  { %7727 = vmatpush3.bf16.msra.mxu0 %v8061_v30 }
0x4cfd   :  { %v6134_v4 = vpop.f32.mrb[44].mxu0 }
0x4cfe   :  { %v6135_v45 = vadd.f32 %v9991_v60, %v6134_v4  ;;  %v7702_v39 = vpop.f32.mrb[45].mxu0  ;;  %v10192_v4 = vld [vmem:[%s10471_s1 + $0x1] sm:$0x1] }
0x4cff   :  { %v6137_v52 = vpop.f32.mrb[46].mxu0 }
0x4d00   :  { %8000 = vtanh.f32 %v6135_v45  ;;  %v7703_v57 = vpop.f32.mrb[47].mxu0  ;;  %v7483_v9 = vmul.f32 -1.442695, %v6135_v45  ;;  %v10510_v45 = vld [vmem:[#allocation27_spill] sm:$0xff]  ;;  %v10202_v52 = vld [vmem:[%s10471_s1] sm:$0x1] }
0x4d01   :  { %v10196_v39 = vmul.f32 %v10192_v4, %v10510_v45  ;;  %v10511_v57 = vld [vmem:[#allocation28_spill] sm:$0xff]  ;;  %s8277_s1 = smov [#allocation16]  }
0x4d02   :  { %8002 = vpow2.f32 %v7483_v9 }
0x4d03   :  { %vm6379_vm1 = vcmp.eq.f32.partialorder %v10196_v39, 0.0 }
0x4d0a   :  { %v8001_v54 = vpop.eup %8000 }
0x4d0b   :  { %6149 = vrot.lane.b32.xlu1 %v8001_v54, %s8274_s13  ;;  %v10206_v54 = vmul.f32 %v10202_v52, %v10511_v57 }
0x4d0c   :  { %v8003_v21 = vpop.eup %8002 }
0x4d0d   :  { %v6143_v1 = vadd.f32 1.0, %v8003_v21  ;;  %vm6260_vm15 = vcmp.gt.f32.partialorder %v10206_v54, 0.0  ;;  %vm6378_vm2 = vcmp.eq.f32.partialorder %v10206_v54, 0.0 }
0x4d0f   :  { %8004 = vrcp.f32 %v6143_v1  ;;  %v6262_v1 = vsel %vm6260_vm15, 0.0, %v8276_v61  ;;  %vm7326_vm15 = vcmp.eq.s32.totalorder %v9287_v10, 7 }
0x4d19   :  { %v8005_v19 = vpop.eup %8004 }
0x4d1a   :  { %v6147_v49 = vmul.f32 %v8005_v19, %v9997_v14 }
0x4d7d   :  { %v6150_v48 = vpop.permute.xlu1 %6149 }
0x4d7e   :  { %v6152_v53 = vmul.f32 %v8005_v19, %v6150_v48 }
0x4d80   :  { %6154 = vrot.lane.b32.xlu0 %v6152_v53, %s8274_s13 }
0x4df2   :  { %v6155_v33 = vpop.permute.xlu0 %6154 }
0x4df3   :  { %v10150_v37 = vadd.f32 %v6155_v33, %v6147_v49 }
0x4df5   :  { %8006 = vtanh.f32 %v10150_v37 }
0x4dff   :  { %v8007_v18 = vpop.eup %8006 }
0x4e00   :  { %6160 = vrot.lane.b32.xlu1 %v8007_v18, %s8274_s13 }
0x4e72   :  { %v6161_v25 = vpop.permute.xlu1 %6160 }
0x4e73   :  { %v10154_v22 = vmul.f32 %v8005_v19, %v6161_v25  ;;  %v6269_v19 = vrot.slane %v6262_v1, %v8487_v15 }
0x4e75   :  { %v6164_v7 = vpack.c.bf16 %v10154_v22, %v10154_v22 }
0x4e77   :  { %6166 = vrot.lane.b32.xlu0 %v6164_v7, %s8260_s4 }
0x4ee9   :  { %v6167_v16 = vpop.permute.xlu0 %6166 }
0x4eea   :  { %7709 = vmatmul.mubr.msk.bf16.vlgmr.msra.gmra.mrb[44].mxu1 %vm2108_vm0, %v6167_v16 }
0x4eeb   :  { %7713 = vmatpush3.bf16.msra.mxu1 %v10010_v46  ;;  %7720 = vmatprep.mubr.msk.bf16.mxu1 %vm8273_vm14, %v8272_v43  ;;  %vm6261_vm14 = vcmp.gt.f32.partialorder %v10196_v39, 0.0 }
0x4eec   :  { %7714 = vmatprep.subr.bf16.mxu1 %v8272_v43  ;;  %v6263_v9 = vsel %vm6261_vm14, 0.0, %v8276_v61  ;;  %vm2525_vm14 = vcmask 57344  }
0x4eed   :  { %v6273_v21 = vrot.slane %v6263_v9, %v8487_v15 }
0x4eef   :  { %7715 = vmatpush3.bf16.msra.mxu1 %v10019_v6 }
0x4ef0   :  { %7716 = vmatprep.subr.bf16.mxu1 %v8272_v43 }
0x4ef3   :  { %7717 = vmatpush3.bf16.msra.mxu1 %v10026_v27 }
0x4ef4   :  { %7718 = vmatprep.subr.bf16.mxu1 %v8272_v43 }
0x4ef7   :  { %7719 = vmatpush3.bf16.msra.mxu1 %v10033_v5  ;;  %v10177_v5 = vld [vmem:[#allocation4 + $0x8] sm:$0xff] }
0x4fbd   :  { %v6205_v14 = vpop.f32.mrb[44].mxu1 }
0x4fbe   :  { %v6220_v13 = vrot.slane %v6205_v14, %v8496_v35  ;;  %v7710_v55 = vpop.f32.mrb[45].mxu1 }
0x4fbf   :  { %v6208_v46 = vpop.f32.mrb[46].mxu1 }
0x4fc0   :  { %v6221_v34 = vcombine.high %v6220_v13, %v6220_v13  ;;  %v6228_v8 = vrot.slane %v6220_v13, %v8496_v35  ;;  %v7711_v36 = vpop.f32.mrb[47].mxu1 }
0x4fc2   :  { %v6235_v28 = vrot.slane %v6221_v34, %v8496_v35  ;;  %v6239_v6 = vrot.slane %v6228_v8, %v8487_v15 }
0x4fc4   :  { %v6243_v27 = vrot.slane %v6235_v28, %v8487_v15  ;;  %v6246_v59 = vadd.f32 %v6239_v6, %v10173_v63 }
0x4fc6   :  { %v6247_v47 = vadd.f32 %v6243_v27, %v10177_v5  ;;  %8008 = vtanh.f32 %v6246_v59 }
0x4fc8   :  { %8010 = vtanh.f32 %v6247_v47 }
0x4fd0   :  { %v8009_v62 = vpop.eup %8008 }
0x4fd1   :  { %v6250_v26 = vmul.f32 %v10183_v38, %v8009_v62 }
0x4fd2   :  { %v8011_v51 = vpop.eup %8010 }
0x4fd3   :  { %v6252_v23 = vsel %vm2108_vm0, %v6250_v26, 0.0  ;;  %v6251_v12 = vmul.f32 %v10183_v38, %v8011_v51 }
0x4fd4   :  { %6253 = vadd.xlane.f32.xlu1 %v6252_v23 }
0x4fd5   :  { %v6255_v30 = vsel %vm2108_vm0, %v6251_v12, 0.0 }
0x4fd6   :  { %6256 = vadd.xlane.f32.xlu0 %v6255_v30 }
0x4fe5   :  { %6278 = vbcast.lane.b32.xlu1 %v6273_v21, 256 }
0x4fec   :  { %6275 = vbcast.lane.b32.xlu0 %v6269_v19, 256 }
0x5061   :  { %v6254_v48 = vpop.xlane.xlu1 %6253 }
0x5063   :  { %v6257_v53 = vpop.xlane.xlu0 %6256 }
0x5065   :  { %v6279_v49 = vpop.permute.xlu1 %6278 }
0x5066   :  { %v6283_v33 = vadd.f32 %v6279_v49, %v6257_v53 }
0x5067   :  { %v6276_v18 = vpop.permute.xlu0 %6275 }
0x5068   :  { %v6282_v25 = vadd.f32 %v6276_v18, %v6254_v48  ;;  %6290 = vperm.xlu0 %7773, %v6283_v33  }
0x506a   :  { %6287 = vperm.xlu1 %7774, %v6282_v25  }
0x50e7   :  { %v6291_v7 = vpop.permute.xlu0 %6290 }
0x50e8   :  { %v6299_v14 = vrot.slane %v6291_v7, %v9291_v0 }
0x50e9   :  { %v6288_v16 = vpop.permute.xlu1 %6287 }
0x50ea   :  { %v6295_v13 = vrot.slane %v6288_v16, %v9291_v0 }
0x50ec   :  { %v6300_v55 = vsel %vm2447_vm3, %v6299_v14, %v6295_v13 }
0x50ed   :  { %v6302_v46 = vsel %vm2450_vm4, %v6300_v55, -inf }
0x50ee   :  { %6303 = vmax.xlane.f32.xlu1 %v6302_v46 }
0x517b   :  { %v6304_v34 = vpop.xlane.xlu1 %6303 }
0x517c   :  { %v6309_v8 = vrot.slane %v6304_v34, %v8487_v15  ;;  %v6313_v36 = vrot.slane %v6304_v34, %v8490_v17 }
0x517e   :  { %v6316_v28 = vsub.f32 %v6282_v25, %v6309_v8  ;;  %v6317_v6 = vsub.f32 %v6283_v33, %v6313_v36 }
0x5180   :  { %v6318_v27 = vmul.f32 1.442695, %v6316_v28  ;;  %v6320_v59 = vmul.f32 1.442695, %v6317_v6 }
0x5182   :  { %8012 = vpow2.f32 %v6318_v27 }
0x5183   :  { %8014 = vpow2.f32 %v6320_v59 }
0x518c   :  { %v8013_v47 = vpop.eup %8012 }
0x518d   :  { %6325 = vperm.xlu0 %7773, %v8013_v47   ;;  %v8015_v62 = vpop.eup %8014 }
0x5191   :  { %6328 = vperm.xlu0 %7773, %v8015_v62  }
0x520c   :  { %v6326_v26 = vpop.permute.xlu0 %6325 }
0x520d   :  { %v6333_v23 = vrot.slane %v6326_v26, %v9291_v0 }
0x5210   :  { %v6329_v51 = vpop.permute.xlu0 %6328 }
0x5211   :  { %v6337_v12 = vrot.slane %v6329_v51, %v9291_v0 }
0x5213   :  { %v6338_v30 = vsel %vm2447_vm3, %v6337_v12, %v6333_v23 }
0x5214   :  { %v6340_v45 = vsel %vm2450_vm4, %v6338_v30, 0.0 }
0x5215   :  { %6341 = vadd.xlane.f32.xlu0 %v6340_v45 }
0x52a2   :  { %v6342_v57 = vpop.xlane.xlu0 %6341 }
0x52a3   :  { %8016 = vlog2.f32 %v6342_v57 }
0x52ad   :  { %v8017_v9 = vpop.eup %8016 }
0x52ae   :  { %v6344_v21 = vmul.f32 0.6931472, %v8017_v9 }
0x52b0   :  { %v6349_v1 = vrot.slane %v6344_v21, %v8487_v15  ;;  %v6353_v19 = vrot.slane %v6344_v21, %v8490_v17 }
0x52b2   :  { %v10225_v48 = vsub.f32 %v6316_v28, %v6349_v1  ;;  %v10227_v53 = vsub.f32 %v6317_v6, %v6353_v19 }
0x52b4   :  { %v6380_v49 = vcombine.high %v10225_v48, %v10225_v48  ;;  %v6387_v33 = vrot.slane %v10225_v48, %v8496_v35  ;;  %v6429_v18 = vcombine.high %v10227_v53, %v10227_v53  ;;  %v6436_v25 = vrot.slane %v10227_v53, %v8496_v35 }
0x52b6   :  { %v6394_v7 = vrot.slane %v6380_v49, %v8496_v35  ;;  %v6395_v16 = vcombine.high %v6387_v33, %v6387_v33  ;;  %v6443_v14 = vrot.slane %v6429_v18, %v8496_v35  ;;  %v6444_v13 = vcombine.high %v6436_v25, %v6436_v25 }
0x52b7   :  { %v6403_v46 = vrot.slane %v6387_v33, %v8496_v35  ;;  %v6452_v28 = vrot.slane %v6436_v25, %v8496_v35 }
0x52b8   :  { %v6396_v55 = vcombine.high %v6394_v7, %v6394_v7  ;;  %v6417_v34 = vrot.slane %v6395_v16, %v8496_v35  ;;  %v6445_v8 = vcombine.high %v6443_v14, %v6443_v14  ;;  %v6410_v36 = vrot.slane %v6394_v7, %v8496_v35 }
0x52b9   :  { %v6459_v6 = vrot.slane %v6443_v14, %v8496_v35  ;;  %v6466_v27 = vrot.slane %v6444_v13, %v8496_v35 }
0x52ba   :  { %v6473_v59 = vrot.slane %v6445_v8, %v8496_v35  ;;  %v6424_v47 = vrot.slane %v6396_v55, %v8496_v35  ;;  %v6478_v62 = vcombine.low %v6403_v46, %v6417_v34  ;;  %v7485_v26 = vcombine.high %v6403_v46, %v6417_v34 }
0x52bb   :  { %v6527_v51 = vcombine.low %v6452_v28, %v6466_v27  ;;  %v7487_v23 = vcombine.high %v6452_v28, %v6466_v27 }
0x52bc   :  { %v6529_v12 = vcombine.low %v6459_v6, %v6473_v59  ;;  %v7488_v30 = vcombine.high %v6459_v6, %v6473_v59  ;;  %v6480_v45 = vcombine.low %v6410_v36, %v6424_v47  ;;  %v7486_v57 = vcombine.high %v6410_v36, %v6424_v47 }
0x52bd   :  { %v6537_v9 = vrot.slane %v6527_v51, %v8496_v35  ;;  %v6544_v21 = vrot.slane %v7487_v23, %v8496_v35  ;;  %v6488_v1 = vrot.slane %v6478_v62, %v8496_v35  ;;  %v6495_v19 = vrot.slane %v7485_v26, %v8496_v35 }
0x52be   :  { %v6551_v49 = vrot.slane %v6529_v12, %v8496_v35  ;;  %v6558_v33 = vrot.slane %v7488_v30, %v8496_v35  ;;  %v6502_v18 = vrot.slane %v6480_v45, %v8496_v35  ;;  %v6509_v25 = vrot.slane %v7486_v57, %v8496_v35 }
0x52bf   :  { %v6559_v7 = vcombine.low %v6537_v9, %v6544_v21  ;;  %v6510_v16 = vcombine.low %v6488_v1, %v6495_v19 }
0x52c0   :  { %v6560_v14 = vcombine.low %v6551_v49, %v6558_v33  ;;  %v6511_v13 = vcombine.low %v6502_v18, %v6509_v25 }
0x52c1   :  { %v6567_v55 = vrot.slane %v6559_v7, %v8496_v35  ;;  %v6518_v34 = vrot.slane %v6510_v16, %v8496_v35 }
0x52c2   :  { %v6574_v46 = vrot.slane %v6560_v14, %v8496_v35  ;;  %v6525_v8 = vrot.slane %v6511_v13, %v8496_v35 }
0x52c4   :  { %v6575_v36 = vcombine.low %v6567_v55, %v6574_v46  ;;  %v6526_v28 = vcombine.low %v6518_v34, %v6525_v8 }
0x52c6   :  { %6580 = vperm.xlu0 %7773, %v6575_v36   ;;  %6577 = vperm.xlu1 %7774, %v6526_v28  }
0x5345   :  { %v6581_v6 = vpop.permute.xlu0 %6580  ;;  %v6578_v27 = vpop.permute.xlu1 %6577 }
0x5346   :  { %v6589_v59 = vrot.slane %v6581_v6, %v9291_v0  ;;  %v6585_v47 = vrot.slane %v6578_v27, %v9291_v0 }
0x5348   :  { %v6610_v62 = vrot.slane %v6589_v59, %v8496_v35  ;;  %v6596_v26 = vrot.slane %v6585_v47, %v8496_v35 }
0x534a   :  { %v6617_v51 = vrot.slane %v6610_v62, %v8496_v35  ;;  %v6603_v23 = vrot.slane %v6596_v26, %v8496_v35 }
0x534c   :  { %v6621_v12 = vsel %vm6379_vm1, -10000000.0, %v6617_v51  ;;  %v6620_v30 = vsel %vm6378_vm2, -10000000.0, %v6603_v23  ;;  %v6708_v51 = vld [vmem:[#allocation3 + $0x8] sm:$0xff] }
0x534d   :  { %v6624_v45 = vcombine.low %v6620_v30, %v6621_v12 }
0x534f   :  { %v6631_v57 = vrot.slane %v6624_v45, %v8496_v35 }
0x5351   :  { %v6638_v9 = vrot.slane %v6631_v57, %v8496_v35 }
0x5353   :  { %v6640_v21 = vsel %vm2450_vm4, %v6638_v9, -inf }
0x5354   :  { %6641 = vmax.xlane.f32.xlu1 %v6640_v21 }
0x53e1   :  { %v6642_v1 = vpop.xlane.xlu1 %6641 }
0x53e2   :  { %v6647_v19 = vrot.slane %v6642_v1, %v8487_v15  ;;  %v6651_v49 = vrot.slane %v6642_v1, %v8490_v17 }
0x53e4   :  { %vm6654_vm5 = vcmp.eq.f32.partialorder %v6620_v30, %v6647_v19  ;;  %vm6655_vm7 = vcmp.eq.f32.partialorder %v6621_v12, %v6651_v49  ;;  %v6707_v12 = vld [vmem:[#allocation3] sm:$0xff] }
0x53e5   :  { %v6656_v39 = vsel %vm6654_vm5, %v9353_v50, 8  ;;  %v6657_v54 = vsel %vm6655_vm7, %v9356_v31, 8 }
0x53e6   :  { %v6658_v33 = vcombine.low %v6656_v39, %v6657_v54 }
0x53e8   :  { %v6665_v18 = vrot.slane %v6658_v33, %v8496_v35 }
0x53ea   :  { %v6672_v25 = vrot.slane %v6665_v18, %v8496_v35 }
0x53ec   :  { %v6673_v7 = vsel %vm2450_vm4, %v6672_v25, 2147483647 }
0x53ed   :  { %v6675_v16 = vshra.s32 %v6673_v7, 16  ;;  %v6674_v13 = vand.u32 65535, %v6673_v7 }
0x53ef   :  { %v6677_v14 = vcvt.s32.f32 %v6675_v16  ;;  %v6676_v46 = vcvt.s32.f32 %v6674_v13 }
0x53f1   :  { %6678 = vmin.xlane.f32.xlu0 %v6677_v14 }
0x547e   :  { %v6679_v55 = vpop.xlane.xlu0 %6678 }
0x547f   :  { %vm6680_vm8 = vcmp.eq.f32.partialorder %v6677_v14, %v6679_v55  ;;  %v6685_v8 = vcvt.f32.s32 %v6679_v55 }
0x5480   :  { %v6681_v34 = vsel %vm6680_vm8, %v6676_v46, inf }
0x5481   :  { %6682 = vmin.xlane.f32.xlu1 %v6681_v34  ;;  %v6686_v28 = vshll.u32 %v6685_v8, 16 }
0x550e   :  { %v6683_v36 = vpop.xlane.xlu1 %6682 }
0x550f   :  { %v6684_v6 = vcvt.f32.s32 %v6683_v36 }
0x5511   :  { %v6687_v27 = vadd.s32 %v6686_v28, %v6684_v6 }
0x5513   :  { %v10279_v59 = vsel %vm6688_vm9, %v6687_v27, %v10128_v11  ;;  %vm6690_vm10 = vcmp.eq.s32.totalorder %v9287_v10, %v6687_v27 }
0x5514   :  { %v7489_v47 = vsel %vm6690_vm10, 1.0, %v8272_v43 }
0x5515   :  { %v6703_v62 = vrot.slane %v7489_v47, %v8490_v17  ;;  %v6696_v26 = vrot.slane %v7489_v47, %v8487_v15 }
0x5517   :  { %6705 = vbcast.lane.b32.xlu0 %v6703_v62, 256  ;;  %6698 = vbcast.lane.b32.xlu1 %v6696_v26, 256 }
0x551b   :  { %6730 = vrot.lane.b32.xlu1 %v10154_v22, %s8275_s17 }
0x5589   :  { %v6706_v23 = vpop.permute.xlu0 %6705  ;;  %v6699_v30 = vpop.permute.xlu1 %6698 }
0x558a   :  { %v6710_v45 = vmul.f32 %v6708_v51, %v6706_v23  ;;  %v6709_v11 = vmul.f32 %v6707_v12, %v6699_v30 }
0x558c   :  { %v6718_v57 = vsel %vm2108_vm0, %v6710_v45, 0.0  ;;  %v6711_v9 = vsel %vm2108_vm0, %v6709_v11, 0.0 }
0x558d   :  { %v6719_v43 = vrot.slane %v6718_v57, 4  ;;  %v6712_v21 = vrot.slane %v6711_v9, 4  ;;  %v6731_v14 = vpop.permute.xlu1 %6730 }
0x558f   :  { %v6720_v1 = vadd.f32 %v6719_v43, %v6718_v57  ;;  %v6713_v19 = vadd.f32 %v6712_v21, %v6711_v9 }
0x5591   :  { %v6721_v49 = vrot.slane %v6720_v1, 2  ;;  %v6714_v39 = vrot.slane %v6713_v19, 2 }
0x5593   :  { %v6722_v54 = vadd.f32 %v6721_v49, %v6720_v1  ;;  %v6715_v33 = vadd.f32 %v6714_v39, %v6713_v19 }
0x5595   :  { %v6723_v18 = vrot.slane %v6722_v54, 1  ;;  %v6716_v22 = vrot.slane %v6715_v33, 1 }
0x5597   :  { %v6724_v25 = vadd.f32 %v6723_v18, %v6722_v54  ;;  %v6717_v7 = vadd.f32 %v6716_v22, %v6715_v33 }
0x5599   :  { %v6727_v16 = vsel %vm2447_vm3, %v6724_v25, %v6717_v7 }
0x559a   :  { %v6733_v13 = vsel %vm2108_vm0, %v6727_v16, %v6731_v14 }
0x559b   :  { %v6734_v55 = vpack.c.bf16 %v6733_v13, %v6733_v13 }
0x559d   :  { %7721 = vmatmul.mubr.msk.bf16.vlgmr.msra.gmra.mrb[48].mxu1 %vm336_vm6, %v6734_v55 }
0x5670   :  { %v6772_v46 = vpop.f32.mrb[48].mxu1 }
0x5671   :  { %v6773_v34 = vadd.f32 %v9991_v60, %v6772_v46  ;;  %v7722_v8 = vpop.f32.mrb[49].mxu1 }
0x5672   :  { %v6775_v36 = vpop.f32.mrb[50].mxu1  ;;  %v10512_v8 = vld [vmem:[#allocation25_spill] sm:$0xff] }
0x5673   :  { %8018 = vtanh.f32 %v6773_v34  ;;  %v7723_v28 = vpop.f32.mrb[51].mxu1  ;;  %v7491_v27 = vmul.f32 -1.442695, %v6773_v34  ;;  %v10312_v36 = vmul.f32 %v10192_v4, %v10512_v8 }
0x5675   :  { %8020 = vpow2.f32 %v7491_v27  ;;  %vm6899_vm6 = vcmp.gt.f32.partialorder %v10312_v36, 0.0 }
0x5676   :  { %v6901_v28 = vsel %vm6899_vm6, 0.0, %v8276_v61 }
0x567d   :  { %v8019_v6 = vpop.eup %8018 }
0x567e   :  { %6787 = vrot.lane.b32.xlu1 %v8019_v6, %s8274_s13  ;;  %v6911_v6 = vrot.slane %v6901_v28, %v8487_v15 }
0x567f   :  { %v8021_v47 = vpop.eup %8020 }
0x5680   :  { %v6781_v62 = vadd.f32 1.0, %v8021_v47 }
0x5682   :  { %8022 = vrcp.f32 %v6781_v62 }
0x568c   :  { %v8023_v26 = vpop.eup %8022 }
0x568d   :  { %v6785_v12 = vmul.f32 %v8023_v26, %v10150_v37 }
0x56f0   :  { %v6788_v51 = vpop.permute.xlu1 %6787 }
0x56f1   :  { %v6790_v23 = vmul.f32 %v8023_v26, %v6788_v51 }
0x56f3   :  { %6792 = vrot.lane.b32.xlu0 %v6790_v23, %s8274_s13 }
0x5765   :  { %v6793_v60 = vpop.permute.xlu0 %6792 }
0x5766   :  { %v6795_v30 = vadd.f32 %v6793_v60, %v6785_v12 }
0x5768   :  { %8024 = vtanh.f32 %v6795_v30 }
0x5772   :  { %v8025_v45 = vpop.eup %8024 }
0x5773   :  { %6798 = vrot.lane.b32.xlu1 %v8025_v45, %s8274_s13  ;;  %s8278_s13 = smov [#allocation17]  }
0x5774   :  { %s7369_s17 = sshll.u32 %s8278_s13, 4  ;;  %s7370_s17 = int_to_ptr.vmem [resolvable:$true] %s7369_s17 }
0x57e5   :  { %v6799_v11 = vpop.permute.xlu1 %6798 }
0x57e6   :  { %v6801_v57 = vmul.f32 %v8023_v26, %v6799_v11 }
0x57e8   :  { %v6802_v9 = vpack.c.bf16 %v6801_v57, %v6801_v57 }
0x57ea   :  { %6804 = vrot.lane.b32.xlu0 %v6802_v9, %s8260_s4  ;;  %s7357_s4 = sshll.u32 %s8277_s1, 4  ;;  %s7358_s4 = int_to_ptr.vmem [resolvable:$true] %s7357_s4 }
0x57eb   :  { %s8197_s22 = scalar_lea.vmem %s7358_s4, 256  ;;  %p8202_p7 = scmp.lt.s32.totalorder %s7358_s4, %s7358_s4 }
0x57ec   :  { %p8198_p6 = scmp.ne.s32.totalorder %s7358_s4, %s8197_s22  ;;  %p8203_p8 = scmp.lt.s32.totalorder %s8197_s22, %s8197_s22 }
0x57ee   :  { %p8204_p9 = por %p8203_p8, %p8202_p7 }
0x57f0   :  { %p8205_p10 = pnand %p8204_p9, %p8198_p6 }
0x585c   :  { %v6805_v43 = vpop.permute.xlu0 %6804 }
0x585d   :  { %7729 = vmatmul.mubr.msk.bf16.vlgmr.msra.gmra.mrb[48].mxu0 %vm2108_vm0, %v6805_v43 }
0x5930   :  { %v6843_v21 = vpop.f32.mrb[48].mxu0 }
0x5931   :  { %v6858_v1 = vrot.slane %v6843_v21, %v8496_v35  ;;  %v7730_v19 = vpop.f32.mrb[49].mxu0 }
0x5932   :  { %v6846_v49 = vpop.f32.mrb[50].mxu0 }
0x5933   :  { %v6859_v37 = vcombine.high %v6858_v1, %v6858_v1  ;;  %v6866_v39 = vrot.slane %v6858_v1, %v8496_v35  ;;  %v7731_v54 = vpop.f32.mrb[51].mxu0 }
0x5935   :  { %v6873_v33 = vrot.slane %v6859_v37, %v8496_v35  ;;  %v6877_v18 = vrot.slane %v6866_v39, %v8487_v15 }
0x5937   :  { %v6881_v22 = vrot.slane %v6873_v33, %v8487_v15  ;;  %v6884_v25 = vadd.f32 %v6877_v18, %v10173_v63  ;;  %v10513_v63 = vld [vmem:[#allocation26_spill] sm:$0xff] }
0x5939   :  { %v6885_v7 = vadd.f32 %v6881_v22, %v10177_v5  ;;  %8026 = vtanh.f32 %v6884_v25  ;;  %v10317_v5 = vmul.f32 %v10202_v52, %v10513_v63 }
0x593b   :  { %8028 = vtanh.f32 %v6885_v7  ;;  %vm6898_vm11 = vcmp.gt.f32.partialorder %v10317_v5, 0.0 }
0x5943   :  { %v8027_v16 = vpop.eup %8026 }
0x5944   :  { %v6888_v14 = vmul.f32 %v10183_v38, %v8027_v16 }
0x5945   :  { %v8029_v13 = vpop.eup %8028 }
0x5946   :  { %v6890_v55 = vsel %vm2108_vm0, %v6888_v14, 0.0  ;;  %v6889_v46 = vmul.f32 %v10183_v38, %v8029_v13  ;;  %v6900_v38 = vsel %vm6898_vm11, 0.0, %v8276_v61 }
0x5947   :  { %6891 = vadd.xlane.f32.xlu1 %v6890_v55  ;;  %v6907_v27 = vrot.slane %v6900_v38, %v8487_v15 }
0x5948   :  { %v6893_v34 = vsel %vm2108_vm0, %v6889_v46, 0.0  ;;  %vm7016_vm0 = vcmp.eq.f32.partialorder %v10317_v5, 0.0 }
0x5949   :  { %6894 = vadd.xlane.f32.xlu0 %v6893_v34 }
0x5958   :  { %6916 = vbcast.lane.b32.xlu1 %v6911_v6, 256 }
0x595f   :  { %6913 = vbcast.lane.b32.xlu0 %v6907_v27, 256 }
0x59d4   :  { %v6892_v4 = vpop.xlane.xlu1 %6891 }
0x59d6   :  { %v6895_v47 = vpop.xlane.xlu0 %6894 }
0x59d8   :  { %v6917_v62 = vpop.permute.xlu1 %6916 }
0x59d9   :  { %v6921_v26 = vadd.f32 %v6917_v62, %v6895_v47 }
0x59da   :  { %v6914_v51 = vpop.permute.xlu0 %6913 }
0x59db   :  { %v6920_v23 = vadd.f32 %v6914_v51, %v6892_v4  ;;  %6928 = vperm.xlu0 %7773, %v6921_v26  }
0x59dd   :  { %6925 = vperm.xlu1 %7774, %v6920_v23  }
0x5a5a   :  { %v6929_v52 = vpop.permute.xlu0 %6928 }
0x5a5b   :  { %v6937_v60 = vrot.slane %v6929_v52, %v9291_v0 }
0x5a5c   :  { %v6926_v12 = vpop.permute.xlu1 %6925 }
0x5a5d   :  { %v6933_v30 = vrot.slane %v6926_v12, %v9291_v0 }
0x5a5f   :  { %v6938_v45 = vsel %vm2447_vm3, %v6937_v60, %v6933_v30 }
0x5a60   :  { %v6940_v61 = vsel %vm2450_vm4, %v6938_v45, -inf }
0x5a61   :  { %6941 = vmax.xlane.f32.xlu1 %v6940_v61 }
0x5aee   :  { %v6942_v11 = vpop.xlane.xlu1 %6941 }
0x5aef   :  { %v6947_v57 = vrot.slane %v6942_v11, %v8487_v15  ;;  %v6951_v9 = vrot.slane %v6942_v11, %v8490_v17 }
0x5af1   :  { %v6954_v43 = vsub.f32 %v6920_v23, %v6947_v57  ;;  %v6955_v21 = vsub.f32 %v6921_v26, %v6951_v9 }
0x5af3   :  { %v6956_v1 = vmul.f32 1.442695, %v6954_v43  ;;  %v6958_v19 = vmul.f32 1.442695, %v6955_v21 }
0x5af5   :  { %8030 = vpow2.f32 %v6956_v1 }
0x5af6   :  { %8032 = vpow2.f32 %v6958_v19 }
0x5aff   :  { %v8031_v49 = vpop.eup %8030 }
0x5b00   :  { %6963 = vperm.xlu0 %7773, %v8031_v49   ;;  %v8033_v37 = vpop.eup %8032 }
0x5b04   :  { %6966 = vperm.xlu0 %7773, %v8033_v37  }
0x5b7f   :  { %v6964_v39 = vpop.permute.xlu0 %6963 }
0x5b80   :  { %v6971_v33 = vrot.slane %v6964_v39, %v9291_v0 }
0x5b83   :  { %v6967_v54 = vpop.permute.xlu0 %6966 }
0x5b84   :  { %v6975_v18 = vrot.slane %v6967_v54, %v9291_v0 }
0x5b86   :  { %v6976_v22 = vsel %vm2447_vm3, %v6975_v18, %v6971_v33  ;;  %vm7017_vm3 = vcmp.eq.f32.partialorder %v10312_v36, 0.0 }
0x5b87   :  { %v6978_v25 = vsel %vm2450_vm4, %v6976_v22, 0.0 }
0x5b88   :  { %6979 = vadd.xlane.f32.xlu0 %v6978_v25 }
0x5c15   :  { %v6980_v7 = vpop.xlane.xlu0 %6979 }
0x5c16   :  { %8034 = vlog2.f32 %v6980_v7 }
0x5c20   :  { %v8035_v16 = vpop.eup %8034 }
0x5c21   :  { %v6982_v14 = vmul.f32 0.6931472, %v8035_v16 }
0x5c23   :  { %v6987_v13 = vrot.slane %v6982_v14, %v8487_v15  ;;  %v6991_v55 = vrot.slane %v6982_v14, %v8490_v17 }
0x5c25   :  { %v10336_v46 = vsub.f32 %v6954_v43, %v6987_v13  ;;  %v10338_v34 = vsub.f32 %v6955_v21, %v6991_v55 }
0x5c27   :  { %v7018_v8 = vcombine.high %v10336_v46, %v10336_v46  ;;  %v7025_v63 = vrot.slane %v10336_v46, %v8496_v35  ;;  %v7067_v28 = vcombine.high %v10338_v34, %v10338_v34  ;;  %v7074_v6 = vrot.slane %v10338_v34, %v8496_v35 }
0x5c29   :  { %v7032_v38 = vrot.slane %v7018_v8, %v8496_v35  ;;  %v7033_v27 = vcombine.high %v7025_v63, %v7025_v63  ;;  %v7081_v4 = vrot.slane %v7067_v28, %v8496_v35  ;;  %v7082_v47 = vcombine.high %v7074_v6, %v7074_v6 }
0x5c2a   :  { %v7041_v26 = vrot.slane %v7025_v63, %v8496_v35  ;;  %v7090_v12 = vrot.slane %v7074_v6, %v8496_v35 }
0x5c2b   :  { %v7034_v62 = vcombine.high %v7032_v38, %v7032_v38  ;;  %v7055_v51 = vrot.slane %v7033_v27, %v8496_v35  ;;  %v7083_v23 = vcombine.high %v7081_v4, %v7081_v4  ;;  %v7048_v52 = vrot.slane %v7032_v38, %v8496_v35 }
0x5c2c   :  { %v7097_v60 = vrot.slane %v7081_v4, %v8496_v35  ;;  %v7104_v30 = vrot.slane %v7082_v47, %v8496_v35 }
0x5c2d   :  { %v7111_v45 = vrot.slane %v7083_v23, %v8496_v35  ;;  %v7062_v61 = vrot.slane %v7034_v62, %v8496_v35  ;;  %v7116_v11 = vcombine.low %v7041_v26, %v7055_v51  ;;  %v7493_v57 = vcombine.high %v7041_v26, %v7055_v51 }
0x5c2e   :  { %v7165_v9 = vcombine.low %v7090_v12, %v7104_v30  ;;  %v7495_v43 = vcombine.high %v7090_v12, %v7104_v30 }
0x5c2f   :  { %v7167_v21 = vcombine.low %v7097_v60, %v7111_v45  ;;  %v7496_v1 = vcombine.high %v7097_v60, %v7111_v45  ;;  %v7118_v19 = vcombine.low %v7048_v52, %v7062_v61  ;;  %v7494_v49 = vcombine.high %v7048_v52, %v7062_v61 }
0x5c30   :  { %v7175_v37 = vrot.slane %v7165_v9, %v8496_v35  ;;  %v7182_v39 = vrot.slane %v7495_v43, %v8496_v35  ;;  %v7126_v54 = vrot.slane %v7116_v11, %v8496_v35  ;;  %v7133_v33 = vrot.slane %v7493_v57, %v8496_v35 }
0x5c31   :  { %v7189_v18 = vrot.slane %v7167_v21, %v8496_v35  ;;  %v7196_v22 = vrot.slane %v7496_v1, %v8496_v35  ;;  %v7140_v25 = vrot.slane %v7118_v19, %v8496_v35  ;;  %v7147_v7 = vrot.slane %v7494_v49, %v8496_v35 }
0x5c32   :  { %v7197_v16 = vcombine.low %v7175_v37, %v7182_v39  ;;  %v7148_v14 = vcombine.low %v7126_v54, %v7133_v33 }
0x5c33   :  { %v7198_v13 = vcombine.low %v7189_v18, %v7196_v22  ;;  %v7149_v55 = vcombine.low %v7140_v25, %v7147_v7 }
0x5c34   :  { %v7205_v8 = vrot.slane %v7197_v16, %v8496_v35  ;;  %v7156_v28 = vrot.slane %v7148_v14, %v8496_v35 }
0x5c35   :  { %v7212_v63 = vrot.slane %v7198_v13, %v8496_v35  ;;  %v7163_v6 = vrot.slane %v7149_v55, %v8496_v35 }
0x5c37   :  { %v7213_v38 = vcombine.low %v7205_v8, %v7212_v63  ;;  %v7164_v27 = vcombine.low %v7156_v28, %v7163_v6 }
0x5c39   :  { %7218 = vperm.xlu0 %7773, %v7213_v38   ;;  %7215 = vperm.xlu1 %7774, %v7164_v27  }
0x5cb8   :  { %v7219_v4 = vpop.permute.xlu0 %7218  ;;  %v7216_v47 = vpop.permute.xlu1 %7215 }
0x5cb9   :  { %v7227_v62 = vrot.slane %v7219_v4, %v9291_v0  ;;  %v7223_v26 = vrot.slane %v7216_v47, %v9291_v0 }
0x5cbb   :  { %v7248_v51 = vrot.slane %v7227_v62, %v8496_v35  ;;  %v7234_v23 = vrot.slane %v7223_v26, %v8496_v35 }
0x5cbd   :  { %v7255_v52 = vrot.slane %v7248_v51, %v8496_v35  ;;  %v7241_v12 = vrot.slane %v7234_v23, %v8496_v35 }
0x5cbf   :  { %v7259_v60 = vsel %vm7017_vm3, -10000000.0, %v7255_v52  ;;  %v7258_v30 = vsel %vm7016_vm0, -10000000.0, %v7241_v12 }
0x5cc0   :  { %v7262_v45 = vcombine.low %v7258_v30, %v7259_v60 }
0x5cc2   :  { %v7269_v61 = vrot.slane %v7262_v45, %v8496_v35 }
0x5cc4   :  { %v7276_v11 = vrot.slane %v7269_v61, %v8496_v35 }
0x5cc6   :  { %v7278_v57 = vsel %vm2450_vm4, %v7276_v11, -inf }
0x5cc7   :  { %7279 = vmax.xlane.f32.xlu1 %v7278_v57 }
0x5cd8   :  { %2510 = vperm.xlu1 %7774, %v9305_v32  }
0x5cdc   :  { %3171 = vperm.xlu1 %7774, %v9452_v42  }
0x5ce0   :  { %3174 = vperm.xlu1 %7774, %v9454_v2  }
0x5ce4   :  { %3812 = vperm.xlu1 %7774, %v9616_v40  }
0x5ce8   :  { %4450 = vperm.xlu1 %7774, %v9775_v44  }
0x5cec   :  { %5088 = vperm.xlu1 %7774, %v9915_v58  }
0x5cf0   :  { %5726 = vperm.xlu1 %7774, %v10076_v29  }
0x5cf4   :  { %6364 = vperm.xlu1 %7774, %v10227_v53  }
0x5d54   :  { %v7280_v36 = vpop.xlane.xlu1 %7279 }
0x5d55   :  { %v7285_v5 = vrot.slane %v7280_v36, %v8487_v15  ;;  %v7289_v9 = vrot.slane %v7280_v36, %v8490_v17 }
0x5d57   :  { %vm7292_vm12 = vcmp.eq.f32.partialorder %v7258_v30, %v7285_v5  ;;  %vm7293_vm13 = vcmp.eq.f32.partialorder %v7259_v60, %v7289_v9 }
0x5d58   :  { %v7294_v32 = vsel %vm7292_vm12, %v9353_v50, 8  ;;  %v7295_v42 = vsel %vm7293_vm13, %v9356_v31, 8  ;;  %v2511_v2 = vpop.permute.xlu1 %2510 }
0x5d59   :  { %v7296_v40 = vcombine.low %v7294_v32, %v7295_v42  ;;  %v2518_v44 = vrot.slane %v2511_v2, %v9291_v0 }
0x5d5b   :  { %v7303_v58 = vrot.slane %v7296_v40, %v8496_v35  ;;  %2526 = vst.msk [vmem:[#allocation16] sm:$0x1] %vm2525_vm14, %v2518_v44 }
0x5d5c   :  { %v3172_v29 = vpop.permute.xlu1 %3171 }
0x5d5d   :  { %v3179_v15 = vrot.slane %v3172_v29, %v9291_v0  ;;  %v7310_v17 = vrot.slane %v7303_v58, %v8496_v35 }
0x5d5f   :  { %3186 = vst.msk [vmem:[#allocation16 + $0x1] sm:$0x1] %vm2525_vm14, %v3179_v15  ;;  %v7311_v50 = vsel %vm2450_vm4, %v7310_v17, 2147483647 }
0x5d60   :  { %v3175_v53 = vpop.permute.xlu1 %3174  ;;  %v7313_v31 = vshra.s32 %v7311_v50, 16  ;;  %v7312_v7 = vand.u32 65535, %v7311_v50 }
0x5d61   :  { %v3183_v43 = vrot.slane %v3175_v53, %v9291_v0 }
0x5d62   :  { %v7315_v21 = vcvt.s32.f32 %v7313_v31  ;;  %v7314_v14 = vcvt.s32.f32 %v7312_v7 }
0x5d63   :  { %3187 = vst.msk [vmem:[#allocation16 + $0x9] sm:$0x1] %vm2525_vm14, %v3183_v43 }
0x5d64   :  { %7316 = vmin.xlane.f32.xlu0 %v7315_v21  ;;  %v3813_v1 = vpop.permute.xlu1 %3812 }
0x5d65   :  { %v3821_v19 = vrot.slane %v3813_v1, %v9291_v0 }
0x5d67   :  { %3825 = vst.msk [vmem:[#allocation16 + $0xa] sm:$0x1] %vm2525_vm14, %v3821_v19 }
0x5d68   :  { %v4451_v49 = vpop.permute.xlu1 %4450 }
0x5d69   :  { %v4459_v37 = vrot.slane %v4451_v49, %v9291_v0 }
0x5d6b   :  { %4463 = vst.msk [vmem:[#allocation16 + $0xb] sm:$0x1] %vm2525_vm14, %v4459_v37 }
0x5d6c   :  { %v5089_v39 = vpop.permute.xlu1 %5088 }
0x5d6d   :  { %v5097_v54 = vrot.slane %v5089_v39, %v9291_v0 }
0x5d6f   :  { %5101 = vst.msk [vmem:[#allocation16 + $0xc] sm:$0x1] %vm2525_vm14, %v5097_v54 }
0x5d70   :  { %v5727_v33 = vpop.permute.xlu1 %5726 }
0x5d71   :  { %v5735_v18 = vrot.slane %v5727_v33, %v9291_v0 }
0x5d73   :  { %5739 = vst.msk [vmem:[#allocation16 + $0xd] sm:$0x1] %vm2525_vm14, %v5735_v18 }
0x5d74   :  { %v6365_v22 = vpop.permute.xlu1 %6364 }
0x5d75   :  { %v6373_v25 = vrot.slane %v6365_v22, %v9291_v0 }
0x5d77   :  { %6377 = vst.msk [vmem:[#allocation16 + $0xe] sm:$0x1] %vm2525_vm14, %v6373_v25 }
0x5d7a   :  { %2513 = vperm.xlu0 %7773, %v9307_v41  }
0x5d7e   :  { %3809 = vperm.xlu0 %7773, %v9614_v3  }
0x5d82   :  { %4447 = vperm.xlu0 %7773, %v9773_v56  }
0x5d86   :  { %5085 = vperm.xlu0 %7773, %v9913_v24  }
0x5d8a   :  { %5723 = vperm.xlu0 %7773, %v10074_v20  }
0x5d8e   :  { %6361 = vperm.xlu0 %7773, %v10225_v48  }
0x5d92   :  { %6999 = vperm.xlu0 %7773, %v10336_v46  }
0x5df1   :  { %v7317_v16 = vpop.xlane.xlu0 %7316 }
0x5df2   :  { %vm7318_vm4 = vcmp.eq.f32.partialorder %v7315_v21, %v7317_v16 }
0x5df3   :  { %v7319_v13 = vsel %vm7318_vm4, %v7314_v14, inf }
0x5df4   :  { %7320 = vmin.xlane.f32.xlu1 %v7319_v13 }
0x5df9   :  { %v2514_v55 = vpop.permute.xlu0 %2513 }
0x5dfa   :  { %v2522_v41 = vrot.slane %v2514_v55, %v9291_v0 }
0x5dfc   :  { %2527 = vst.msk [vmem:[#allocation16 + $0x8] sm:$0x1] %vm2525_vm14, %v2522_v41 }
0x5dfd   :  { %v3810_v3 = vpop.permute.xlu0 %3809 }
0x5dfe   :  { %v3817_v56 = vrot.slane %v3810_v3, %v9291_v0 }
0x5e00   :  { %3824 = vst.msk [vmem:[#allocation16 + $0x2] sm:$0x1] %vm2525_vm14, %v3817_v56 }
0x5e01   :  { %v4448_v24 = vpop.permute.xlu0 %4447 }
0x5e02   :  { %v4455_v20 = vrot.slane %v4448_v24, %v9291_v0 }
0x5e04   :  { %4462 = vst.msk [vmem:[#allocation16 + $0x3] sm:$0x1] %vm2525_vm14, %v4455_v20 }
0x5e05   :  { %v5086_v48 = vpop.permute.xlu0 %5085  ;;  %7002 = vperm.xlu1 %7774, %v10338_v34   ;;  %v7323_v34 = vcvt.f32.s32 %v7317_v16 }
0x5e06   :  { %v5093_v46 = vrot.slane %v5086_v48, %v9291_v0 }
0x5e07   :  { %v7324_v47 = vshll.u32 %v7323_v34, 16 }
0x5e08   :  { %5100 = vst.msk [vmem:[#allocation16 + $0x4] sm:$0x1] %vm2525_vm14, %v5093_v46 }
0x5e09   :  { %v5724_v8 = vpop.permute.xlu0 %5723 }
0x5e0a   :  { %v5731_v63 = vrot.slane %v5724_v8, %v9291_v0 }
0x5e0c   :  { %5738 = vst.msk [vmem:[#allocation16 + $0x5] sm:$0x1] %vm2525_vm14, %v5731_v63 }
0x5e0d   :  { %v6362_v28 = vpop.permute.xlu0 %6361 }
0x5e0e   :  { %v6369_v6 = vrot.slane %v6362_v28, %v9291_v0 }
0x5e10   :  { %6376 = vst.msk [vmem:[#allocation16 + $0x6] sm:$0x1] %vm2525_vm14, %v6369_v6 }
0x5e11   :  { %v7000_v38 = vpop.permute.xlu0 %6999 }
0x5e12   :  { %v7007_v27 = vrot.slane %v7000_v38, %v9291_v0 }
0x5e14   :  { %7014 = vst.msk [vmem:[#allocation16 + $0x7] sm:$0x1] %vm2525_vm14, %v7007_v27 }
0x5e81   :  { %v7321_v4 = vpop.xlane.xlu1 %7320 }
0x5e82   :  { %v7322_v62 = vcvt.f32.s32 %v7321_v4 }
0x5e84   :  { %v7325_v26 = vadd.s32 %v7324_v47, %v7322_v62 }
0x5e85   :  { %v7003_v51 = vpop.permute.xlu1 %7002 }
0x5e86   :  { %v7327_v23 = vsel %vm7326_vm15, %v7325_v26, %v10279_v59  ;;  %v7011_v52 = vrot.slane %v7003_v51, %v9291_v0 }
0x5e87   :  { %v7334_v12 = vrot.slane %v7327_v23, %v8496_v35 }
0x5e88   :  { %7015 = vst.msk [vmem:[#allocation16 + $0xf] sm:$0x1] %vm2525_vm14, %v7011_v52 }
0x5e89   :  { %v7335_v60 = vcombine.high %v7334_v12, %v7334_v12  ;;  %v7342_v30 = vrot.slane %v7334_v12, %v8496_v35 }
0x5e8a   :  { %8208 = shalt.err (!%p8205_p10)
}
0x5e8b   :  { %s8209_s14 = scalar_lea.hbm %s10481_s11, 256 }
0x5e8c   :  { %p8210_p11 = scmp.ne.s32.totalorder %s10481_s11, %s8209_s14  ;;  %p8213_p12 = scmp.lt.u32.totalorder %s8209_s14, %s10481_s11 }
0x5e8e   :  { %p8215_p13 = pnand %p8213_p12, %p8210_p11 }
0x5e90   :  { %8218 = shalt.err (!%p8215_p13)
}
0x5e91   :  { %7363 = dma.vmem_to_hbm [thread:$0]  %s7358_s4, 256, %s10481_s11, [#allocation7], %s8257_s2, %s8257_s2, %s8258_s28   ;;  %v7349_v10 = vrot.slane %v7335_v60, %v8496_v35  ;;  %7350 = vst.msk [vmem:[#allocation17] sm:$0x1] %vm2525_vm14, %v7342_v30 }
0x5e92   :  { %s8219_s9 = scalar_lea.vmem %s7370_s17, 32  ;;  %p8224_p1 = scmp.lt.s32.totalorder %s7370_s17, %s7370_s17 }
0x5e93   :  { %7351 = vst.msk [vmem:[#allocation17 + $0x1] sm:$0x1] %vm2525_vm14, %v7349_v10  ;;  %p8220_p0 = scmp.ne.s32.totalorder %s7370_s17, %s8219_s9  ;;  %p8225_p2 = scmp.lt.s32.totalorder %s8219_s9, %s8219_s9 }
0x5e95   :  { %p8226_p3 = por %p8225_p2, %p8224_p1 }
0x5e97   :  { %p8227_p4 = pnand %p8226_p3, %p8220_p0 }
0x5e99   :  { %8230 = shalt.err (!%p8227_p4)
}
0x5e9a   :  { %s8231_s24 = scalar_lea.hbm %s10482_s12, 32 }
0x5e9b   :  { %p8232_p5 = scmp.ne.s32.totalorder %s10482_s12, %s8231_s24  ;;  %p8235_p6 = scmp.lt.u32.totalorder %s8231_s24, %s10482_s12 }
0x5e9d   :  { %p8237_p7 = pnand %p8235_p6, %p8232_p5 }
0x5e9f   :  { %8240 = shalt.err (!%p8237_p7)
}
0x5ea0   :  { %s8279_s21 = smov 16   ;;  %s8280_s23 = smov 1  }
0x5ea1   :  { %7375 = dma.vmem_to_hbm [thread:$0]  %s7370_s17, 32, %s10482_s12, [#allocation18], %s8279_s21, %s8279_s21, %s8280_s23  }
0x5ea2   :  { %8249 = dma.done.wait [#allocation7], 256  }
0x5ea3   :  { %8250 = vsyncadd [#allocation7], 4294967040 }
0x5ea4   :  { %8251 = dma.done.wait [#allocation18], 32  }
0x5ea5   :  { %8252 = vsyncadd [#allocation18], 4294967264 }
0x5ea6   :  { %7382 = vsyncpa [#allocation6], 1 }
0x5ea7   :  { %7383 = vsyncpa [#allocation9], 1 }
0x5ea8   :  { %7384 = vsyncpa [#allocation12], 1 }
0x5ea9   :  { %7385 = vsyncpa [#allocation15], 1 }
0x5eaa   :  { %7386 = vsyncpa [#allocation7], 1 }
0x5eab   :  { %7387 = vsyncpa [#allocation18], 1 }

</bundles_post_ra>
